<compile_context>
chip_gen: v7x
topology: tpu7x:2x2x1
jax: 0.10.0
libtpu: 0.0.40
codegen_flags: <defaults>
</compile_context>

<pallas_src>
import jax
import jax.numpy as jnp
from jax.experimental import pallas as pl
from jax.experimental.pallas import tpu as pltpu

# ---------------- config (cait_xxs24_384 architecture, small synthetic sizes) ----
B = 2            # batch
C = 3            # input channels
IMG = 32         # image size
PATCH = 8        # patch size (stride = kernel = PATCH)
NPATCH = (IMG // PATCH) ** 2   # 16 patch tokens
D = 64           # embed dim
H = 4            # attention heads
DH = D // H      # head dim
HID = 4 * D      # mlp hidden (mlp_ratio=4)
DEPTH = 2        # talking-heads self-attn blocks (24 in real model)
DEPTH_TOKEN = 2  # class-attention blocks (2 in real model)
EPS = 1e-6       # CaiT LayerNorm eps
SCALE = DH ** -0.5
CPP = C * PATCH * PATCH

MM_DT = jnp.bfloat16   # MXU operand dtype (f32 accumulation). Set jnp.float32 for
                       # bit-closer agreement with the f32 PyTorch reference.
SLAB_W = 256           # lane width of both parameter slabs (>= widest matrix: HID)
NEG_INF = -1e9


# ================================ kernel helpers =================================

def _ln(x, g, b):
    """LayerNorm over the last (lane) axis; x:(M,D), g/b:(1,D), f32 math."""
    mu = jnp.mean(x, axis=-1, keepdims=True)
    xc = x - mu
    var = jnp.mean(xc * xc, axis=-1, keepdims=True)
    return xc * jax.lax.rsqrt(var + EPS) * g + b


def _mm(a, b):
    """a @ b with bf16 MXU operands and f32 accumulation."""
    return jnp.dot(a.astype(MM_DT), b.astype(MM_DT),
                   preferred_element_type=jnp.float32)


def _mmT(a, b):
    """a @ b.T (contract last axes), bf16 operands, f32 accumulation."""
    return jax.lax.dot_general(a.astype(MM_DT), b.astype(MM_DT),
                               (((1,), (1,)), ((), ())),
                               preferred_element_type=jnp.float32)


def _softmax_rows(s):
    m = jnp.max(s, axis=-1, keepdims=True)
    e = jnp.exp(s - m)
    return e * pl.reciprocal(jnp.sum(e, axis=-1, keepdims=True), approx=True)


# ================================ parameter slabs ================================

class _Slab:
    """Packs many 2-D parameters into one (rows, SLAB_W) slab.

    Row offsets are static Python ints; each entry is row-aligned so every static
    in-kernel slice starts on a sublane-tile boundary (8 rows f32 / 16 rows bf16).
    """

    def __init__(self, row_align):
        self.row_align = row_align
        self.parts = []
        self.layout = {}          # name -> (row_offset, rows, cols)
        self.rows = 0

    def add(self, name, arr):
        arr = jnp.asarray(arr, jnp.float32)
        assert arr.ndim == 2 and arr.shape[1] <= SLAB_W, (name, arr.shape)
        r, c = arr.shape
        rp = -(-r // self.row_align) * self.row_align
        self.layout[name] = (self.rows, r, c)
        self.parts.append(jnp.pad(arr, ((0, rp - r), (0, SLAB_W - c))))
        self.rows += rp

    def finalize(self, dtype):
        return jnp.concatenate(self.parts, axis=0).astype(dtype)


# ================================ forward wrapper ================================

def forward(params, x_nchw):
    """Cait_fusev2.forward: returns (feat (B,NPATCH,D), cls_token (B,D))."""
    Bb = x_nchw.shape[0]
    p = PATCH
    N = NPATCH
    # stride-p patch-embed conv == per-patch flatten (C, ph, pw order); matmul in-kernel
    xb = x_nchw.reshape(Bb, C, IMG // p, p, IMG // p, p)
    xb = xb.transpose(0, 2, 4, 1, 3, 5).reshape(Bb * N, CPP).astype(jnp.float32)

    eye_n = jnp.eye(N, dtype=jnp.float32)
    eye_b = jnp.eye(Bb, dtype=jnp.float32)

    # ---- pack everything into two slabs: bf16 matmul weights + f32 vectors/consts --
    mats = _Slab(row_align=16)    # bf16 sublane tile is (16, 128)
    vecs = _Slab(row_align=8)

    # fold SCALE into the q columns of qkv / q projections (constant weight transform)
    qscale = jnp.concatenate([jnp.full((D,), SCALE, jnp.float32),
                              jnp.ones((2 * D,), jnp.float32)])

    mats.add('patch_w', params['patch_w'])
    vecs.add('patch_b', params['patch_b'].reshape(1, D))
    vecs.add('pos', jnp.tile(params['pos_embed'].reshape(N, D), (Bb, 1)))
    vecs.add('cls', jnp.tile(params['cls_token'].reshape(1, D), (Bb, 1)))
    # block-diag head mask: row h*N+i keeps lanes [h*DH, (h+1)*DH)
    vecs.add('head_mask', jnp.kron(jnp.eye(H, dtype=jnp.float32),
                                   jnp.ones((N, DH), jnp.float32)))
    # additive cross-batch mask for class-attention scores over stacked patch keys
    vecs.add('batch_bias', (1.0 - jnp.repeat(eye_b, N, axis=1)) * NEG_INF)

    for i, bp in enumerate(params['blocks']):
        pre = f'sa{i}_'
        vecs.add(pre + 'n1_g', bp['n1_g'].reshape(1, D))
        vecs.add(pre + 'n1_b', bp['n1_b'].reshape(1, D))
        mats.add(pre + 'qkv_w', bp['qkv_w'] * qscale[None, :])
        vecs.add(pre + 'qkv_b', (bp['qkv_b'] * qscale).reshape(1, 3 * D))
        # talking-heads mixing as kron(I_B, pl_w, I_N): one MXU matmul covers every
        # (batch, head).  proj_l bias is dropped (exact: softmax shift invariance).
        # TODO(synk): at real CaiT sizes (N=576) these kron matrices don't fit VMEM;
        # switch to an (H,H) mix over (H, N*N)-reshaped scores when scaling up.
        mats.add(pre + 'mix_l', jnp.kron(eye_b, jnp.kron(bp['pl_w'], eye_n)))
        mats.add(pre + 'mix_w', jnp.kron(eye_b, jnp.kron(bp['pw_w'], eye_n)))
        vecs.add(pre + 'mix_w_b',
                 jnp.tile(jnp.repeat(bp['pw_b'], N), Bb).reshape(Bb * H * N, 1))
        mats.add(pre + 'proj_w', bp['proj_w'])
        vecs.add(pre + 'proj_b', bp['proj_b'].reshape(1, D))
        vecs.add(pre + 'gamma1', bp['gamma1'].reshape(1, D))
        vecs.add(pre + 'n2_g', bp['n2_g'].reshape(1, D))
        vecs.add(pre + 'n2_b', bp['n2_b'].reshape(1, D))
        mats.add(pre + 'fc1_w', bp['fc1_w'])
        vecs.add(pre + 'fc1_b', bp['fc1_b'].reshape(1, HID))
        mats.add(pre + 'fc2_w', bp['fc2_w'])
        vecs.add(pre + 'fc2_b', bp['fc2_b'].reshape(1, D))
        vecs.add(pre + 'gamma2', bp['gamma2'].reshape(1, D))

    for i, bp in enumerate(params['blocks_token_only']):
        pre = f'ca{i}_'
        vecs.add(pre + 'n1_g', bp['n1_g'].reshape(1, D))
        vecs.add(pre + 'n1_b', bp['n1_b'].reshape(1, D))
        mats.add(pre + 'q_w', bp['q_w'] * SCALE)
        vecs.add(pre + 'q_b', (bp['q_b'] * SCALE).reshape(1, D))
        # patch tokens only ever need K/V -> single (D, 2D) projection (q cols dropped)
        mats.add(pre + 'kv_w', jnp.concatenate([bp['k_w'], bp['v_w']], axis=1))
        vecs.add(pre + 'kv_b', jnp.concatenate([bp['k_b'], bp['v_b']]).reshape(1, 2 * D))
        mats.add(pre + 'proj_w', bp['proj_w'])
        vecs.add(pre + 'proj_b', bp['proj_b'].reshape(1, D))
        vecs.add(pre + 'gamma1', bp['gamma1'].reshape(1, D))
        vecs.add(pre + 'n2_g', bp['n2_g'].reshape(1, D))
        vecs.add(pre + 'n2_b', bp['n2_b'].reshape(1, D))
        mats.add(pre + 'fc1_w', bp['fc1_w'])
        vecs.add(pre + 'fc1_b', bp['fc1_b'].reshape(1, HID))
        mats.add(pre + 'fc2_w', bp['fc2_w'])
        vecs.add(pre + 'fc2_b', bp['fc2_b'].reshape(1, D))
        vecs.add(pre + 'gamma2', bp['gamma2'].reshape(1, D))

    vecs.add('norm_g', params['norm_g'].reshape(1, D))
    vecs.add('norm_b', params['norm_b'].reshape(1, D))

    w_mat = mats.finalize(MM_DT)         # matmul weights (bf16 MXU operands)
    w_vec = vecs.finalize(jnp.float32)   # biases / LN params / masks stay f32
    LM, LV = mats.layout, vecs.layout

    # --------------------------------- kernel -----------------------------------
    # TODO(synk): for real DEPTH=24, stream per-block weight slices with lax.fori_loop
    # (or a grid axis) instead of Python-unrolling the block loops.
    def kernel(xp_ref, wm_ref, wv_ref, feat_ref, cls_ref):
        def M(name):
            off, r, c = LM[name]
            return wm_ref[off:off + r, 0:c]

        def V(name):
            off, r, c = LV[name]
            return wv_ref[off:off + r, 0:c]

        # ---- patch embed + positional embedding (pos_drop == identity in eval) ----
        x = _mm(xp_ref[...], M('patch_w')) + V('patch_b') + V('pos')    # (B*N, D)
        cls = V('cls')                                                  # (B, D)
        head_mask = V('head_mask')                                      # (H*N, D)

        # ---- talking-heads self-attention blocks (batch stacked along sublanes) ---
        for li in range(DEPTH):
            pre = f'sa{li}_'
            h1 = _ln(x, V(pre + 'n1_g'), V(pre + 'n1_b'))
            qkv = _mm(h1, M(pre + 'qkv_w')) + V(pre + 'qkv_b')          # (B*N, 3D)

            # all heads' q@k^T for one batch in ONE matmul via block-diag q
            sc = []
            for b in range(Bb):
                qb = qkv[b * N:(b + 1) * N, 0:D]          # pre-scaled by SCALE
                kb = qkv[b * N:(b + 1) * N, D:2 * D]
                q_bd = jnp.concatenate([qb] * H, axis=0) * head_mask    # (H*N, D)
                sc.append(_mmT(q_bd, kb))                               # (H*N, N)
            s_all = jnp.concatenate(sc, axis=0)                         # (B*H*N, N)

            mixed = _mm(M(pre + 'mix_l'), s_all)                        # head mix (pre)
            probs = _softmax_rows(mixed)
            mixed2 = _mm(M(pre + 'mix_w'), probs) + V(pre + 'mix_w_b')  # head mix (post)

            # per-head attn@v, heads lane-concat, batches sublane-concat, ONE projection
            rows = []
            for b in range(Bb):
                heads = []
                for h in range(H):
                    r0 = (b * H + h) * N
                    vh = qkv[b * N:(b + 1) * N, 2 * D + h * DH:2 * D + (h + 1) * DH]
                    heads.append(_mm(mixed2[r0:r0 + N, :], vh))         # (N, DH)
                rows.append(jnp.concatenate(heads, axis=-1))            # (N, D)
            attn = jnp.concatenate(rows, axis=0)                        # (B*N, D)
            x = x + V(pre + 'gamma1') * (_mm(attn, M(pre + 'proj_w')) + V(pre + 'proj_b'))

            h2 = _ln(x, V(pre + 'n2_g'), V(pre + 'n2_b'))
            m = _mm(h2, M(pre + 'fc1_w')) + V(pre + 'fc1_b')
            # TODO(synk): PyTorch nn.GELU is erf-exact; tanh approximation used in-kernel.
            m = jax.nn.gelu(m, approximate=True)
            m = _mm(m, M(pre + 'fc2_w')) + V(pre + 'fc2_b')
            x = x + V(pre + 'gamma2') * m

        # ---- class-attention blocks (update cls only; keys = [cls; patches]) ------
        batch_bias = V('batch_bias')                                    # (B, B*N)
        for li in range(DEPTH_TOKEN):
            pre = f'ca{li}_'
            # LN is per-row, so LN([cls; x]) == [LN(cls); LN(x)] -- no physical concat.
            un_c = _ln(cls, V(pre + 'n1_g'), V(pre + 'n1_b'))           # (B, D)
            un_x = _ln(x, V(pre + 'n1_g'), V(pre + 'n1_b'))             # (B*N, D)
            q_c = _mm(un_c, M(pre + 'q_w')) + V(pre + 'q_b')            # (B, D)
            kv_c = _mm(un_c, M(pre + 'kv_w')) + V(pre + 'kv_b')         # (B, 2D)
            kv_x = _mm(un_x, M(pre + 'kv_w')) + V(pre + 'kv_b')         # (B*N, 2D)

            heads = []
            for h in range(H):
                lo, hi = h * DH, (h + 1) * DH
                qh = q_c[:, lo:hi]                                      # (B, DH)
                kc, vc = kv_c[:, lo:hi], kv_c[:, D + lo:D + hi]         # (B, DH)
                kx, vx = kv_x[:, lo:hi], kv_x[:, D + lo:D + hi]         # (B*N, DH)
                # 2-segment softmax over keys = [cls, patches]; cross-batch patch keys
                # are suppressed by the additive -inf mask (exact).
                s0 = jnp.sum(qh * kc, axis=-1, keepdims=True)           # (B, 1)
                s1 = _mmT(qh, kx) + batch_bias                          # (B, B*N)
                mmax = jnp.maximum(s0, jnp.max(s1, axis=-1, keepdims=True))
                e0 = jnp.exp(s0 - mmax)
                e1 = jnp.exp(s1 - mmax)
                inv = pl.reciprocal(e0 + jnp.sum(e1, axis=-1, keepdims=True),
                                    approx=True)
                heads.append((e0 * vc + _mm(e1, vx)) * inv)             # (B, DH)
            av = jnp.concatenate(heads, axis=-1)                        # (B, D)
            cls = cls + V(pre + 'gamma1') * (_mm(av, M(pre + 'proj_w')) + V(pre + 'proj_b'))

            h2 = _ln(cls, V(pre + 'n2_g'), V(pre + 'n2_b'))
            m = _mm(h2, M(pre + 'fc1_w')) + V(pre + 'fc1_b')
            m = jax.nn.gelu(m, approximate=True)
            m = _mm(m, M(pre + 'fc2_w')) + V(pre + 'fc2_b')
            cls = cls + V(pre + 'gamma2') * m

        # ---- final norm of the (logical) concat [cls; x] (LN is per-row) ----------
        feat_ref[...] = _ln(x, V('norm_g'), V('norm_b'))
        cls_ref[...] = _ln(cls, V('norm_g'), V('norm_b'))

    feat, cls = pl.pallas_call(
        kernel,
        out_shape=(jax.ShapeDtypeStruct((Bb * N, D), jnp.float32),
                   jax.ShapeDtypeStruct((Bb, D), jnp.float32)),
        grid=(1,),
        in_specs=[pl.BlockSpec((Bb * N, CPP), lambda i: (0, 0)),
                  pl.BlockSpec(w_mat.shape, lambda i: (0, 0)),
                  pl.BlockSpec(w_vec.shape, lambda i: (0, 0))],
        out_specs=(pl.BlockSpec((Bb * N, D), lambda i: (0, 0)),
                   pl.BlockSpec((Bb, D), lambda i: (0, 0))),
        compiler_params=pltpu.CompilerParams(
            dimension_semantics=("arbitrary",),
            vmem_limit_bytes=32 * 1024 * 1024),
    )(xb, w_mat, w_vec)
    return feat.reshape(Bb, N, D), cls


# ============================ deterministic parameters ===========================

def init_params(key):
    keys = iter(jax.random.split(key, 256))

    def nrm(shape, s=0.02):
        return (s * jax.random.normal(next(keys), shape)).astype(jnp.float32)

    def zeros(shape):
        return jnp.zeros(shape, jnp.float32)

    def ones(shape):
        return jnp.ones(shape, jnp.float32)

    params = {
        'patch_w': nrm((C * PATCH * PATCH, D)),
        'patch_b': zeros((D,)),
        'pos_embed': nrm((1, NPATCH, D)),
        'cls_token': nrm((1, 1, D)),
        'norm_g': ones((D,)),
        'norm_b': zeros((D,)),
        'blocks': [],
        'blocks_token_only': [],
    }
    for _ in range(DEPTH):
        params['blocks'].append({
            'n1_g': ones((D,)), 'n1_b': zeros((D,)),
            'qkv_w': nrm((D, 3 * D)), 'qkv_b': zeros((3 * D,)),
            'pl_w': nrm((H, H), 0.2), 'pl_b': zeros((H,)),
            'pw_w': nrm((H, H), 0.2), 'pw_b': zeros((H,)),
            'proj_w': nrm((D, D)), 'proj_b': zeros((D,)),
            'gamma1': jnp.full((D,), 1e-5, jnp.float32),
            'n2_g': ones((D,)), 'n2_b': zeros((D,)),
            'fc1_w': nrm((D, HID)), 'fc1_b': zeros((HID,)),
            'fc2_w': nrm((HID, D)), 'fc2_b': zeros((D,)),
            'gamma2': jnp.full((D,), 1e-5, jnp.float32),
        })
    for _ in range(DEPTH_TOKEN):
        params['blocks_token_only'].append({
            'n1_g': ones((D,)), 'n1_b': zeros((D,)),
            'q_w': nrm((D, D)), 'q_b': zeros((D,)),
            'k_w': nrm((D, D)), 'k_b': zeros((D,)),
            'v_w': nrm((D, D)), 'v_b': zeros((D,)),
            'proj_w': nrm((D, D)), 'proj_b': zeros((D,)),
            'gamma1': jnp.full((D,), 1e-5, jnp.float32),
            'n2_g': ones((D,)), 'n2_b': zeros((D,)),
            'fc1_w': nrm((D, HID)), 'fc1_b': zeros((HID,)),
            'fc2_w': nrm((HID, D)), 'fc2_b': zeros((D,)),
            'gamma2': jnp.full((D,), 1e-5, jnp.float32),
        })
    return params


# ===================================== main ======================================

if __name__ == "__main__":
    key = jax.random.PRNGKey(0)
    pkey, xkey = jax.random.split(key)
    params = init_params(pkey)
    x = jax.random.normal(xkey, (B, C, IMG, IMG), dtype=jnp.float32)

    feat, cls_token = jax.jit(forward)(params, x)
    jax.block_until_ready((feat, cls_token))

    assert feat.shape == (B, NPATCH, D), feat.shape
    assert cls_token.shape == (B, D), cls_token.shape
    assert jnp.all(jnp.isfinite(feat)) and jnp.all(jnp.isfinite(cls_token))
    print("KERNEL_OK")
</pallas_src>

<mosaic_0001>
module attributes {stable_mosaic.version = 11 : i64} {
  func.func @kernel(%arg0: i32, %arg1: memref<32x192xf32, #tpu.memory_space<vmem>>, %arg2: memref<2624x256xbf16, #tpu.memory_space<vmem>>, %arg3: memref<728x256xf32, #tpu.memory_space<vmem>>, %arg4: memref<32x64xf32, #tpu.memory_space<vmem>>, %arg5: memref<2x64xf32, #tpu.memory_space<vmem>>) attributes {dimension_semantics = [#tpu.dimension_semantics<arbitrary>], iteration_bounds = array<i64: 1>, scalar_prefetch = 0 : i64, scratch_operands = 0 : i64, tpu.core_type = #tpu.core_type<tc>, window_params = [{pipeline_mode = #tpu.pipeline_mode<synchronous>, transform_indices = @transform_0, window_bounds = array<i64: 32, 192>}, {pipeline_mode = #tpu.pipeline_mode<synchronous>, transform_indices = @transform_1, window_bounds = array<i64: 2624, 256>}, {pipeline_mode = #tpu.pipeline_mode<synchronous>, transform_indices = @transform_2, window_bounds = array<i64: 728, 256>}, {pipeline_mode = #tpu.pipeline_mode<synchronous>, transform_indices = @transform_3, window_bounds = array<i64: 32, 64>}, {pipeline_mode = #tpu.pipeline_mode<synchronous>, transform_indices = @transform_4, window_bounds = array<i64: 2, 64>}]} {
    %c0 = arith.constant 0 : index
    %c0_0 = arith.constant 0 : index
    %0 = vector.load %arg1[%c0, %c0_0] : memref<32x192xf32, #tpu.memory_space<vmem>>, vector<32x192xf32>
    %c0_1 = arith.constant 0 : index
    %c0_2 = arith.constant 0 : index
    %1 = vector.load %arg2[%c0_1, %c0_2] : memref<2624x256xbf16, #tpu.memory_space<vmem>>, vector<192x64xbf16>
    %2 = arith.truncf %0 : vector<32x192xf32> to vector<32x192xbf16>
    %cst = arith.constant dense<0.000000e+00> : vector<32x64xf32>
    %3 = tpu.matmul %2, %1, %cst {dimension_numbers = #tpu.dot_dimension_numbers<[1], [0], [0], [1], [0, 0, 1, 1], [], []>} : vector<32x192xbf16>, vector<192x64xbf16>, vector<32x64xf32> -> vector<32x64xf32>
    %c0_3 = arith.constant 0 : index
    %c0_4 = arith.constant 0 : index
    %4 = vector.load %arg3[%c0_3, %c0_4] : memref<728x256xf32, #tpu.memory_space<vmem>>, vector<1x64xf32>
    %5 = vector.broadcast %4 : vector<1x64xf32> to vector<32x64xf32>
    %6 = arith.addf %3, %5 : vector<32x64xf32>
    %c8 = arith.constant 8 : index
    %c0_5 = arith.constant 0 : index
    %7 = vector.load %arg3[%c8, %c0_5] : memref<728x256xf32, #tpu.memory_space<vmem>>, vector<32x64xf32>
    %8 = arith.addf %6, %7 : vector<32x64xf32>
    %c40 = arith.constant 40 : index
    %c0_6 = arith.constant 0 : index
    %9 = vector.load %arg3[%c40, %c0_6] : memref<728x256xf32, #tpu.memory_space<vmem>>, vector<2x64xf32>
    %c48 = arith.constant 48 : index
    %c0_7 = arith.constant 0 : index
    %10 = vector.load %arg3[%c48, %c0_7] : memref<728x256xf32, #tpu.memory_space<vmem>>, vector<64x64xf32>
    %c120 = arith.constant 120 : index
    %c0_8 = arith.constant 0 : index
    %11 = vector.load %arg3[%c120, %c0_8] : memref<728x256xf32, #tpu.memory_space<vmem>>, vector<1x64xf32>
    %c128 = arith.constant 128 : index
    %c0_9 = arith.constant 0 : index
    %12 = vector.load %arg3[%c128, %c0_9] : memref<728x256xf32, #tpu.memory_space<vmem>>, vector<1x64xf32>
    %cst_10 = arith.constant dense<0.000000e+00> : vector<32xf32>
    %13 = vector.multi_reduction <add>, %8, %cst_10 [1] : vector<32x64xf32> to vector<32xf32>
    %14 = vector.shape_cast %13 : vector<32xf32> to vector<32x1xf32>
    %cst_11 = arith.constant 6.400000e+01 : f32
    %15 = vector.broadcast %cst_11 : f32 to vector<32x1xf32>
    %16 = arith.divf %14, %15 : vector<32x1xf32>
    %17 = vector.broadcast %16 : vector<32x1xf32> to vector<32x64xf32>
    %18 = arith.subf %8, %17 : vector<32x64xf32>
    %19 = arith.mulf %18, %18 : vector<32x64xf32>
    %cst_12 = arith.constant dense<0.000000e+00> : vector<32xf32>
    %20 = vector.multi_reduction <add>, %19, %cst_12 [1] : vector<32x64xf32> to vector<32xf32>
    %21 = vector.shape_cast %20 : vector<32xf32> to vector<32x1xf32>
    %cst_13 = arith.constant 6.400000e+01 : f32
    %22 = vector.broadcast %cst_13 : f32 to vector<32x1xf32>
    %23 = arith.divf %21, %22 : vector<32x1xf32>
    %cst_14 = arith.constant 9.99999997E-7 : f32
    %24 = vector.broadcast %cst_14 : f32 to vector<32x1xf32>
    %25 = arith.addf %23, %24 : vector<32x1xf32>
    %26 = math.rsqrt %25 : vector<32x1xf32>
    %27 = vector.broadcast %26 : vector<32x1xf32> to vector<32x64xf32>
    %28 = arith.mulf %18, %27 : vector<32x64xf32>
    %29 = vector.broadcast %11 : vector<1x64xf32> to vector<32x64xf32>
    %30 = arith.mulf %28, %29 : vector<32x64xf32>
    %31 = vector.broadcast %12 : vector<1x64xf32> to vector<32x64xf32>
    %32 = arith.addf %30, %31 : vector<32x64xf32>
    %c192 = arith.constant 192 : index
    %c0_15 = arith.constant 0 : index
    %33 = vector.load %arg2[%c192, %c0_15] : memref<2624x256xbf16, #tpu.memory_space<vmem>>, vector<64x192xbf16>
    %34 = arith.truncf %32 : vector<32x64xf32> to vector<32x64xbf16>
    %cst_16 = arith.constant dense<0.000000e+00> : vector<32x192xf32>
    %35 = tpu.matmul %34, %33, %cst_16 {dimension_numbers = #tpu.dot_dimension_numbers<[1], [0], [0], [1], [0, 0, 1, 1], [], []>} : vector<32x64xbf16>, vector<64x192xbf16>, vector<32x192xf32> -> vector<32x192xf32>
    %c136 = arith.constant 136 : index
    %c0_17 = arith.constant 0 : index
    %36 = vector.load %arg3[%c136, %c0_17] : memref<728x256xf32, #tpu.memory_space<vmem>>, vector<1x192xf32>
    %37 = vector.broadcast %36 : vector<1x192xf32> to vector<32x192xf32>
    %38 = arith.addf %35, %37 : vector<32x192xf32>
    %39 = vector.extract_strided_slice %38 {offsets = [0, 0], sizes = [16, 64], strides = [1, 1]} : vector<32x192xf32> to vector<16x64xf32>
    %40 = vector.extract_strided_slice %38 {offsets = [0, 64], sizes = [16, 64], strides = [1, 1]} : vector<32x192xf32> to vector<16x64xf32>
    %41 = tpu.concatenate %39, %39, %39, %39 in 0 : vector<16x64xf32>, vector<16x64xf32>, vector<16x64xf32>, vector<16x64xf32> -> vector<64x64xf32>
    %42 = arith.mulf %41, %10 : vector<64x64xf32>
    %43 = arith.truncf %42 : vector<64x64xf32> to vector<64x64xbf16>
    %44 = arith.truncf %40 : vector<16x64xf32> to vector<16x64xbf16>
    %cst_18 = arith.constant dense<0.000000e+00> : vector<64x16xf32>
    %45 = tpu.matmul %43, %44, %cst_18 {dimension_numbers = #tpu.dot_dimension_numbers<[1], [1], [0], [0], [0, 0, 1, 0], [], []>} : vector<64x64xbf16>, vector<16x64xbf16>, vector<64x16xf32> -> vector<64x16xf32>
    %46 = vector.extract_strided_slice %38 {offsets = [16, 0], sizes = [16, 64], strides = [1, 1]} : vector<32x192xf32> to vector<16x64xf32>
    %47 = vector.extract_strided_slice %38 {offsets = [16, 64], sizes = [16, 64], strides = [1, 1]} : vector<32x192xf32> to vector<16x64xf32>
    %48 = tpu.concatenate %46, %46, %46, %46 in 0 : vector<16x64xf32>, vector<16x64xf32>, vector<16x64xf32>, vector<16x64xf32> -> vector<64x64xf32>
    %49 = arith.mulf %48, %10 : vector<64x64xf32>
    %50 = arith.truncf %49 : vector<64x64xf32> to vector<64x64xbf16>
    %51 = arith.truncf %47 : vector<16x64xf32> to vector<16x64xbf16>
    %cst_19 = arith.constant dense<0.000000e+00> : vector<64x16xf32>
    %52 = tpu.matmul %50, %51, %cst_19 {dimension_numbers = #tpu.dot_dimension_numbers<[1], [1], [0], [0], [0, 0, 1, 0], [], []>} : vector<64x64xbf16>, vector<16x64xbf16>, vector<64x16xf32> -> vector<64x16xf32>
    %53 = tpu.concatenate %45, %52 in 0 : vector<64x16xf32>, vector<64x16xf32> -> vector<128x16xf32>
    %c256 = arith.constant 256 : index
    %c0_20 = arith.constant 0 : index
    %54 = vector.load %arg2[%c256, %c0_20] : memref<2624x256xbf16, #tpu.memory_space<vmem>>, vector<128x128xbf16>
    %55 = arith.truncf %53 : vector<128x16xf32> to vector<128x16xbf16>
    %cst_21 = arith.constant dense<0.000000e+00> : vector<128x16xf32>
    %56 = tpu.matmul %54, %55, %cst_21 {dimension_numbers = #tpu.dot_dimension_numbers<[1], [0], [0], [1], [0, 0, 1, 1], [], []>} : vector<128x128xbf16>, vector<128x16xbf16>, vector<128x16xf32> -> vector<128x16xf32>
    %cst_22 = arith.constant dense<0xFF800000> : vector<128xf32>
    %57 = vector.multi_reduction <maximumf>, %56, %cst_22 [1] : vector<128x16xf32> to vector<128xf32>
    %58 = vector.shape_cast %57 : vector<128xf32> to vector<128x1xf32>
    %59 = vector.broadcast %58 : vector<128x1xf32> to vector<128x16xf32>
    %60 = arith.subf %56, %59 : vector<128x16xf32>
    %61 = math.exp %60 : vector<128x16xf32>
    %cst_23 = arith.constant dense<0.000000e+00> : vector<128xf32>
    %62 = vector.multi_reduction <add>, %61, %cst_23 [1] : vector<128x16xf32> to vector<128xf32>
    %63 = vector.shape_cast %62 : vector<128xf32> to vector<128x1xf32>
    %64 = tpu.reciprocal %63 {approx = true} : vector<128x1xf32> -> vector<128x1xf32>
    %65 = vector.broadcast %64 : vector<128x1xf32> to vector<128x16xf32>
    %66 = arith.mulf %61, %65 : vector<128x16xf32>
    %c384 = arith.constant 384 : index
    %c0_24 = arith.constant 0 : index
    %67 = vector.load %arg2[%c384, %c0_24] : memref<2624x256xbf16, #tpu.memory_space<vmem>>, vector<128x128xbf16>
    %68 = arith.truncf %66 : vector<128x16xf32> to vector<128x16xbf16>
    %cst_25 = arith.constant dense<0.000000e+00> : vector<128x16xf32>
    %69 = tpu.matmul %67, %68, %cst_25 {dimension_numbers = #tpu.dot_dimension_numbers<[1], [0], [0], [1], [0, 0, 1, 1], [], []>} : vector<128x128xbf16>, vector<128x16xbf16>, vector<128x16xf32> -> vector<128x16xf32>
    %c144 = arith.constant 144 : index
    %c0_26 = arith.constant 0 : index
    %70 = vector.load %arg3[%c144, %c0_26] : memref<728x256xf32, #tpu.memory_space<vmem>>, vector<128x1xf32>
    %71 = vector.broadcast %70 : vector<128x1xf32> to vector<128x16xf32>
    %72 = arith.addf %69, %71 : vector<128x16xf32>
    %73 = vector.extract_strided_slice %38 {offsets = [0, 128], sizes = [16, 16], strides = [1, 1]} : vector<32x192xf32> to vector<16x16xf32>
    %74 = vector.extract_strided_slice %72 {offsets = [0, 0], sizes = [16, 16], strides = [1, 1]} : vector<128x16xf32> to vector<16x16xf32>
    %75 = arith.truncf %74 : vector<16x16xf32> to vector<16x16xbf16>
    %76 = arith.truncf %73 : vector<16x16xf32> to vector<16x16xbf16>
    %cst_27 = arith.constant dense<0.000000e+00> : vector<16x16xf32>
    %77 = tpu.matmul %75, %76, %cst_27 {dimension_numbers = #tpu.dot_dimension_numbers<[1], [0], [0], [1], [0, 0, 1, 1], [], []>} : vector<16x16xbf16>, vector<16x16xbf16>, vector<16x16xf32> -> vector<16x16xf32>
    %78 = vector.extract_strided_slice %38 {offsets = [0, 144], sizes = [16, 16], strides = [1, 1]} : vector<32x192xf32> to vector<16x16xf32>
    %79 = vector.extract_strided_slice %72 {offsets = [16, 0], sizes = [16, 16], strides = [1, 1]} : vector<128x16xf32> to vector<16x16xf32>
    %80 = arith.truncf %79 : vector<16x16xf32> to vector<16x16xbf16>
    %81 = arith.truncf %78 : vector<16x16xf32> to vector<16x16xbf16>
    %cst_28 = arith.constant dense<0.000000e+00> : vector<16x16xf32>
    %82 = tpu.matmul %80, %81, %cst_28 {dimension_numbers = #tpu.dot_dimension_numbers<[1], [0], [0], [1], [0, 0, 1, 1], [], []>} : vector<16x16xbf16>, vector<16x16xbf16>, vector<16x16xf32> -> vector<16x16xf32>
    %83 = vector.extract_strided_slice %38 {offsets = [0, 160], sizes = [16, 16], strides = [1, 1]} : vector<32x192xf32> to vector<16x16xf32>
    %84 = vector.extract_strided_slice %72 {offsets = [32, 0], sizes = [16, 16], strides = [1, 1]} : vector<128x16xf32> to vector<16x16xf32>
    %85 = arith.truncf %84 : vector<16x16xf32> to vector<16x16xbf16>
    %86 = arith.truncf %83 : vector<16x16xf32> to vector<16x16xbf16>
    %cst_29 = arith.constant dense<0.000000e+00> : vector<16x16xf32>
    %87 = tpu.matmul %85, %86, %cst_29 {dimension_numbers = #tpu.dot_dimension_numbers<[1], [0], [0], [1], [0, 0, 1, 1], [], []>} : vector<16x16xbf16>, vector<16x16xbf16>, vector<16x16xf32> -> vector<16x16xf32>
    %88 = vector.extract_strided_slice %38 {offsets = [0, 176], sizes = [16, 16], strides = [1, 1]} : vector<32x192xf32> to vector<16x16xf32>
    %89 = vector.extract_strided_slice %72 {offsets = [48, 0], sizes = [16, 16], strides = [1, 1]} : vector<128x16xf32> to vector<16x16xf32>
    %90 = arith.truncf %89 : vector<16x16xf32> to vector<16x16xbf16>
    %91 = arith.truncf %88 : vector<16x16xf32> to vector<16x16xbf16>
    %cst_30 = arith.constant dense<0.000000e+00> : vector<16x16xf32>
    %92 = tpu.matmul %90, %91, %cst_30 {dimension_numbers = #tpu.dot_dimension_numbers<[1], [0], [0], [1], [0, 0, 1, 1], [], []>} : vector<16x16xbf16>, vector<16x16xbf16>, vector<16x16xf32> -> vector<16x16xf32>
    %93 = tpu.concatenate %77, %82, %87, %92 in 1 : vector<16x16xf32>, vector<16x16xf32>, vector<16x16xf32>, vector<16x16xf32> -> vector<16x64xf32>
    %94 = vector.extract_strided_slice %38 {offsets = [16, 128], sizes = [16, 16], strides = [1, 1]} : vector<32x192xf32> to vector<16x16xf32>
    %95 = vector.extract_strided_slice %72 {offsets = [64, 0], sizes = [16, 16], strides = [1, 1]} : vector<128x16xf32> to vector<16x16xf32>
    %96 = arith.truncf %95 : vector<16x16xf32> to vector<16x16xbf16>
    %97 = arith.truncf %94 : vector<16x16xf32> to vector<16x16xbf16>
    %cst_31 = arith.constant dense<0.000000e+00> : vector<16x16xf32>
    %98 = tpu.matmul %96, %97, %cst_31 {dimension_numbers = #tpu.dot_dimension_numbers<[1], [0], [0], [1], [0, 0, 1, 1], [], []>} : vector<16x16xbf16>, vector<16x16xbf16>, vector<16x16xf32> -> vector<16x16xf32>
    %99 = vector.extract_strided_slice %38 {offsets = [16, 144], sizes = [16, 16], strides = [1, 1]} : vector<32x192xf32> to vector<16x16xf32>
    %100 = vector.extract_strided_slice %72 {offsets = [80, 0], sizes = [16, 16], strides = [1, 1]} : vector<128x16xf32> to vector<16x16xf32>
    %101 = arith.truncf %100 : vector<16x16xf32> to vector<16x16xbf16>
    %102 = arith.truncf %99 : vector<16x16xf32> to vector<16x16xbf16>
    %cst_32 = arith.constant dense<0.000000e+00> : vector<16x16xf32>
    %103 = tpu.matmul %101, %102, %cst_32 {dimension_numbers = #tpu.dot_dimension_numbers<[1], [0], [0], [1], [0, 0, 1, 1], [], []>} : vector<16x16xbf16>, vector<16x16xbf16>, vector<16x16xf32> -> vector<16x16xf32>
    %104 = vector.extract_strided_slice %38 {offsets = [16, 160], sizes = [16, 16], strides = [1, 1]} : vector<32x192xf32> to vector<16x16xf32>
    %105 = vector.extract_strided_slice %72 {offsets = [96, 0], sizes = [16, 16], strides = [1, 1]} : vector<128x16xf32> to vector<16x16xf32>
    %106 = arith.truncf %105 : vector<16x16xf32> to vector<16x16xbf16>
    %107 = arith.truncf %104 : vector<16x16xf32> to vector<16x16xbf16>
    %cst_33 = arith.constant dense<0.000000e+00> : vector<16x16xf32>
    %108 = tpu.matmul %106, %107, %cst_33 {dimension_numbers = #tpu.dot_dimension_numbers<[1], [0], [0], [1], [0, 0, 1, 1], [], []>} : vector<16x16xbf16>, vector<16x16xbf16>, vector<16x16xf32> -> vector<16x16xf32>
    %109 = vector.extract_strided_slice %38 {offsets = [16, 176], sizes = [16, 16], strides = [1, 1]} : vector<32x192xf32> to vector<16x16xf32>
    %110 = vector.extract_strided_slice %72 {offsets = [112, 0], sizes = [16, 16], strides = [1, 1]} : vector<128x16xf32> to vector<16x16xf32>
    %111 = arith.truncf %110 : vector<16x16xf32> to vector<16x16xbf16>
    %112 = arith.truncf %109 : vector<16x16xf32> to vector<16x16xbf16>
    %cst_34 = arith.constant dense<0.000000e+00> : vector<16x16xf32>
    %113 = tpu.matmul %111, %112, %cst_34 {dimension_numbers = #tpu.dot_dimension_numbers<[1], [0], [0], [1], [0, 0, 1, 1], [], []>} : vector<16x16xbf16>, vector<16x16xbf16>, vector<16x16xf32> -> vector<16x16xf32>
    %114 = tpu.concatenate %98, %103, %108, %113 in 1 : vector<16x16xf32>, vector<16x16xf32>, vector<16x16xf32>, vector<16x16xf32> -> vector<16x64xf32>
    %115 = tpu.concatenate %93, %114 in 0 : vector<16x64xf32>, vector<16x64xf32> -> vector<32x64xf32>
    %c280 = arith.constant 280 : index
    %c0_35 = arith.constant 0 : index
    %116 = vector.load %arg3[%c280, %c0_35] : memref<728x256xf32, #tpu.memory_space<vmem>>, vector<1x64xf32>
    %c512 = arith.constant 512 : index
    %c0_36 = arith.constant 0 : index
    %117 = vector.load %arg2[%c512, %c0_36] : memref<2624x256xbf16, #tpu.memory_space<vmem>>, vector<64x64xbf16>
    %118 = arith.truncf %115 : vector<32x64xf32> to vector<32x64xbf16>
    %cst_37 = arith.constant dense<0.000000e+00> : vector<32x64xf32>
    %119 = tpu.matmul %118, %117, %cst_37 {dimension_numbers = #tpu.dot_dimension_numbers<[1], [0], [0], [1], [0, 0, 1, 1], [], []>} : vector<32x64xbf16>, vector<64x64xbf16>, vector<32x64xf32> -> vector<32x64xf32>
    %c272 = arith.constant 272 : index
    %c0_38 = arith.constant 0 : index
    %120 = vector.load %arg3[%c272, %c0_38] : memref<728x256xf32, #tpu.memory_space<vmem>>, vector<1x64xf32>
    %121 = vector.broadcast %120 : vector<1x64xf32> to vector<32x64xf32>
    %122 = arith.addf %119, %121 : vector<32x64xf32>
    %123 = vector.broadcast %116 : vector<1x64xf32> to vector<32x64xf32>
    %124 = arith.mulf %123, %122 : vector<32x64xf32>
    %125 = arith.addf %8, %124 : vector<32x64xf32>
    %c288 = arith.constant 288 : index
    %c0_39 = arith.constant 0 : index
    %126 = vector.load %arg3[%c288, %c0_39] : memref<728x256xf32, #tpu.memory_space<vmem>>, vector<1x64xf32>
    %c296 = arith.constant 296 : index
    %c0_40 = arith.constant 0 : index
    %127 = vector.load %arg3[%c296, %c0_40] : memref<728x256xf32, #tpu.memory_space<vmem>>, vector<1x64xf32>
    %cst_41 = arith.constant dense<0.000000e+00> : vector<32xf32>
    %128 = vector.multi_reduction <add>, %125, %cst_41 [1] : vector<32x64xf32> to vector<32xf32>
    %129 = vector.shape_cast %128 : vector<32xf32> to vector<32x1xf32>
    %cst_42 = arith.constant 6.400000e+01 : f32
    %130 = vector.broadcast %cst_42 : f32 to vector<32x1xf32>
    %131 = arith.divf %129, %130 : vector<32x1xf32>
    %132 = vector.broadcast %131 : vector<32x1xf32> to vector<32x64xf32>
    %133 = arith.subf %125, %132 : vector<32x64xf32>
    %134 = arith.mulf %133, %133 : vector<32x64xf32>
    %cst_43 = arith.constant dense<0.000000e+00> : vector<32xf32>
    %135 = vector.multi_reduction <add>, %134, %cst_43 [1] : vector<32x64xf32> to vector<32xf32>
    %136 = vector.shape_cast %135 : vector<32xf32> to vector<32x1xf32>
    %cst_44 = arith.constant 6.400000e+01 : f32
    %137 = vector.broadcast %cst_44 : f32 to vector<32x1xf32>
    %138 = arith.divf %136, %137 : vector<32x1xf32>
    %cst_45 = arith.constant 9.99999997E-7 : f32
    %139 = vector.broadcast %cst_45 : f32 to vector<32x1xf32>
    %140 = arith.addf %138, %139 : vector<32x1xf32>
    %141 = math.rsqrt %140 : vector<32x1xf32>
    %142 = vector.broadcast %141 : vector<32x1xf32> to vector<32x64xf32>
    %143 = arith.mulf %133, %142 : vector<32x64xf32>
    %144 = vector.broadcast %126 : vector<1x64xf32> to vector<32x64xf32>
    %145 = arith.mulf %143, %144 : vector<32x64xf32>
    %146 = vector.broadcast %127 : vector<1x64xf32> to vector<32x64xf32>
    %147 = arith.addf %145, %146 : vector<32x64xf32>
    %c576 = arith.constant 576 : index
    %c0_46 = arith.constant 0 : index
    %148 = vector.load %arg2[%c576, %c0_46] : memref<2624x256xbf16, #tpu.memory_space<vmem>>, vector<64x256xbf16>
    %149 = arith.truncf %147 : vector<32x64xf32> to vector<32x64xbf16>
    %cst_47 = arith.constant dense<0.000000e+00> : vector<32x256xf32>
    %150 = tpu.matmul %149, %148, %cst_47 {dimension_numbers = #tpu.dot_dimension_numbers<[1], [0], [0], [1], [0, 0, 1, 1], [], []>} : vector<32x64xbf16>, vector<64x256xbf16>, vector<32x256xf32> -> vector<32x256xf32>
    %c304 = arith.constant 304 : index
    %c0_48 = arith.constant 0 : index
    %151 = vector.load %arg3[%c304, %c0_48] : memref<728x256xf32, #tpu.memory_space<vmem>>, vector<1x256xf32>
    %152 = vector.broadcast %151 : vector<1x256xf32> to vector<32x256xf32>
    %153 = arith.addf %150, %152 : vector<32x256xf32>
    %154 = arith.mulf %153, %153 : vector<32x256xf32>
    %155 = arith.mulf %153, %154 : vector<32x256xf32>
    %cst_49 = arith.constant 4.471500e-02 : f32
    %156 = vector.broadcast %cst_49 : f32 to vector<32x256xf32>
    %157 = arith.mulf %156, %155 : vector<32x256xf32>
    %158 = arith.addf %153, %157 : vector<32x256xf32>
    %cst_50 = arith.constant 0.797884583 : f32
    %159 = vector.broadcast %cst_50 : f32 to vector<32x256xf32>
    %160 = arith.mulf %159, %158 : vector<32x256xf32>
    %161 = math.tanh %160 : vector<32x256xf32>
    %cst_51 = arith.constant 1.000000e+00 : f32
    %162 = vector.broadcast %cst_51 : f32 to vector<32x256xf32>
    %163 = arith.addf %162, %161 : vector<32x256xf32>
    %cst_52 = arith.constant 5.000000e-01 : f32
    %164 = vector.broadcast %cst_52 : f32 to vector<32x256xf32>
    %165 = arith.mulf %164, %163 : vector<32x256xf32>
    %166 = arith.mulf %153, %165 : vector<32x256xf32>
    %c640 = arith.constant 640 : index
    %c0_53 = arith.constant 0 : index
    %167 = vector.load %arg2[%c640, %c0_53] : memref<2624x256xbf16, #tpu.memory_space<vmem>>, vector<256x64xbf16>
    %168 = arith.truncf %166 : vector<32x256xf32> to vector<32x256xbf16>
    %cst_54 = arith.constant dense<0.000000e+00> : vector<32x64xf32>
    %169 = tpu.matmul %168, %167, %cst_54 {dimension_numbers = #tpu.dot_dimension_numbers<[1], [0], [0], [1], [0, 0, 1, 1], [], []>} : vector<32x256xbf16>, vector<256x64xbf16>, vector<32x64xf32> -> vector<32x64xf32>
    %c312 = arith.constant 312 : index
    %c0_55 = arith.constant 0 : index
    %170 = vector.load %arg3[%c312, %c0_55] : memref<728x256xf32, #tpu.memory_space<vmem>>, vector<1x64xf32>
    %171 = vector.broadcast %170 : vector<1x64xf32> to vector<32x64xf32>
    %172 = arith.addf %169, %171 : vector<32x64xf32>
    %c320 = arith.constant 320 : index
    %c0_56 = arith.constant 0 : index
    %173 = vector.load %arg3[%c320, %c0_56] : memref<728x256xf32, #tpu.memory_space<vmem>>, vector<1x64xf32>
    %174 = vector.broadcast %173 : vector<1x64xf32> to vector<32x64xf32>
    %175 = arith.mulf %174, %172 : vector<32x64xf32>
    %176 = arith.addf %125, %175 : vector<32x64xf32>
    %c328 = arith.constant 328 : index
    %c0_57 = arith.constant 0 : index
    %177 = vector.load %arg3[%c328, %c0_57] : memref<728x256xf32, #tpu.memory_space<vmem>>, vector<1x64xf32>
    %c336 = arith.constant 336 : index
    %c0_58 = arith.constant 0 : index
    %178 = vector.load %arg3[%c336, %c0_58] : memref<728x256xf32, #tpu.memory_space<vmem>>, vector<1x64xf32>
    %cst_59 = arith.constant dense<0.000000e+00> : vector<32xf32>
    %179 = vector.multi_reduction <add>, %176, %cst_59 [1] : vector<32x64xf32> to vector<32xf32>
    %180 = vector.shape_cast %179 : vector<32xf32> to vector<32x1xf32>
    %cst_60 = arith.constant 6.400000e+01 : f32
    %181 = vector.broadcast %cst_60 : f32 to vector<32x1xf32>
    %182 = arith.divf %180, %181 : vector<32x1xf32>
    %183 = vector.broadcast %182 : vector<32x1xf32> to vector<32x64xf32>
    %184 = arith.subf %176, %183 : vector<32x64xf32>
    %185 = arith.mulf %184, %184 : vector<32x64xf32>
    %cst_61 = arith.constant dense<0.000000e+00> : vector<32xf32>
    %186 = vector.multi_reduction <add>, %185, %cst_61 [1] : vector<32x64xf32> to vector<32xf32>
    %187 = vector.shape_cast %186 : vector<32xf32> to vector<32x1xf32>
    %cst_62 = arith.constant 6.400000e+01 : f32
    %188 = vector.broadcast %cst_62 : f32 to vector<32x1xf32>
    %189 = arith.divf %187, %188 : vector<32x1xf32>
    %cst_63 = arith.constant 9.99999997E-7 : f32
    %190 = vector.broadcast %cst_63 : f32 to vector<32x1xf32>
    %191 = arith.addf %189, %190 : vector<32x1xf32>
    %192 = math.rsqrt %191 : vector<32x1xf32>
    %193 = vector.broadcast %192 : vector<32x1xf32> to vector<32x64xf32>
    %194 = arith.mulf %184, %193 : vector<32x64xf32>
    %195 = vector.broadcast %177 : vector<1x64xf32> to vector<32x64xf32>
    %196 = arith.mulf %194, %195 : vector<32x64xf32>
    %197 = vector.broadcast %178 : vector<1x64xf32> to vector<32x64xf32>
    %198 = arith.addf %196, %197 : vector<32x64xf32>
    %c896 = arith.constant 896 : index
    %c0_64 = arith.constant 0 : index
    %199 = vector.load %arg2[%c896, %c0_64] : memref<2624x256xbf16, #tpu.memory_space<vmem>>, vector<64x192xbf16>
    %200 = arith.truncf %198 : vector<32x64xf32> to vector<32x64xbf16>
    %cst_65 = arith.constant dense<0.000000e+00> : vector<32x192xf32>
    %201 = tpu.matmul %200, %199, %cst_65 {dimension_numbers = #tpu.dot_dimension_numbers<[1], [0], [0], [1], [0, 0, 1, 1], [], []>} : vector<32x64xbf16>, vector<64x192xbf16>, vector<32x192xf32> -> vector<32x192xf32>
    %c344 = arith.constant 344 : index
    %c0_66 = arith.constant 0 : index
    %202 = vector.load %arg3[%c344, %c0_66] : memref<728x256xf32, #tpu.memory_space<vmem>>, vector<1x192xf32>
    %203 = vector.broadcast %202 : vector<1x192xf32> to vector<32x192xf32>
    %204 = arith.addf %201, %203 : vector<32x192xf32>
    %205 = vector.extract_strided_slice %204 {offsets = [0, 0], sizes = [16, 64], strides = [1, 1]} : vector<32x192xf32> to vector<16x64xf32>
    %206 = vector.extract_strided_slice %204 {offsets = [0, 64], sizes = [16, 64], strides = [1, 1]} : vector<32x192xf32> to vector<16x64xf32>
    %207 = tpu.concatenate %205, %205, %205, %205 in 0 : vector<16x64xf32>, vector<16x64xf32>, vector<16x64xf32>, vector<16x64xf32> -> vector<64x64xf32>
    %208 = arith.mulf %207, %10 : vector<64x64xf32>
    %209 = arith.truncf %208 : vector<64x64xf32> to vector<64x64xbf16>
    %210 = arith.truncf %206 : vector<16x64xf32> to vector<16x64xbf16>
    %cst_67 = arith.constant dense<0.000000e+00> : vector<64x16xf32>
    %211 = tpu.matmul %209, %210, %cst_67 {dimension_numbers = #tpu.dot_dimension_numbers<[1], [1], [0], [0], [0, 0, 1, 0], [], []>} : vector<64x64xbf16>, vector<16x64xbf16>, vector<64x16xf32> -> vector<64x16xf32>
    %212 = vector.extract_strided_slice %204 {offsets = [16, 0], sizes = [16, 64], strides = [1, 1]} : vector<32x192xf32> to vector<16x64xf32>
    %213 = vector.extract_strided_slice %204 {offsets = [16, 64], sizes = [16, 64], strides = [1, 1]} : vector<32x192xf32> to vector<16x64xf32>
    %214 = tpu.concatenate %212, %212, %212, %212 in 0 : vector<16x64xf32>, vector<16x64xf32>, vector<16x64xf32>, vector<16x64xf32> -> vector<64x64xf32>
    %215 = arith.mulf %214, %10 : vector<64x64xf32>
    %216 = arith.truncf %215 : vector<64x64xf32> to vector<64x64xbf16>
    %217 = arith.truncf %213 : vector<16x64xf32> to vector<16x64xbf16>
    %cst_68 = arith.constant dense<0.000000e+00> : vector<64x16xf32>
    %218 = tpu.matmul %216, %217, %cst_68 {dimension_numbers = #tpu.dot_dimension_numbers<[1], [1], [0], [0], [0, 0, 1, 0], [], []>} : vector<64x64xbf16>, vector<16x64xbf16>, vector<64x16xf32> -> vector<64x16xf32>
    %219 = tpu.concatenate %211, %218 in 0 : vector<64x16xf32>, vector<64x16xf32> -> vector<128x16xf32>
    %c960 = arith.constant 960 : index
    %c0_69 = arith.constant 0 : index
    %220 = vector.load %arg2[%c960, %c0_69] : memref<2624x256xbf16, #tpu.memory_space<vmem>>, vector<128x128xbf16>
    %221 = arith.truncf %219 : vector<128x16xf32> to vector<128x16xbf16>
    %cst_70 = arith.constant dense<0.000000e+00> : vector<128x16xf32>
    %222 = tpu.matmul %220, %221, %cst_70 {dimension_numbers = #tpu.dot_dimension_numbers<[1], [0], [0], [1], [0, 0, 1, 1], [], []>} : vector<128x128xbf16>, vector<128x16xbf16>, vector<128x16xf32> -> vector<128x16xf32>
    %cst_71 = arith.constant dense<0xFF800000> : vector<128xf32>
    %223 = vector.multi_reduction <maximumf>, %222, %cst_71 [1] : vector<128x16xf32> to vector<128xf32>
    %224 = vector.shape_cast %223 : vector<128xf32> to vector<128x1xf32>
    %225 = vector.broadcast %224 : vector<128x1xf32> to vector<128x16xf32>
    %226 = arith.subf %222, %225 : vector<128x16xf32>
    %227 = math.exp %226 : vector<128x16xf32>
    %cst_72 = arith.constant dense<0.000000e+00> : vector<128xf32>
    %228 = vector.multi_reduction <add>, %227, %cst_72 [1] : vector<128x16xf32> to vector<128xf32>
    %229 = vector.shape_cast %228 : vector<128xf32> to vector<128x1xf32>
    %230 = tpu.reciprocal %229 {approx = true} : vector<128x1xf32> -> vector<128x1xf32>
    %231 = vector.broadcast %230 : vector<128x1xf32> to vector<128x16xf32>
    %232 = arith.mulf %227, %231 : vector<128x16xf32>
    %c1088 = arith.constant 1088 : index
    %c0_73 = arith.constant 0 : index
    %233 = vector.load %arg2[%c1088, %c0_73] : memref<2624x256xbf16, #tpu.memory_space<vmem>>, vector<128x128xbf16>
    %234 = arith.truncf %232 : vector<128x16xf32> to vector<128x16xbf16>
    %cst_74 = arith.constant dense<0.000000e+00> : vector<128x16xf32>
    %235 = tpu.matmul %233, %234, %cst_74 {dimension_numbers = #tpu.dot_dimension_numbers<[1], [0], [0], [1], [0, 0, 1, 1], [], []>} : vector<128x128xbf16>, vector<128x16xbf16>, vector<128x16xf32> -> vector<128x16xf32>
    %c352 = arith.constant 352 : index
    %c0_75 = arith.constant 0 : index
    %236 = vector.load %arg3[%c352, %c0_75] : memref<728x256xf32, #tpu.memory_space<vmem>>, vector<128x1xf32>
    %237 = vector.broadcast %236 : vector<128x1xf32> to vector<128x16xf32>
    %238 = arith.addf %235, %237 : vector<128x16xf32>
    %239 = vector.extract_strided_slice %204 {offsets = [0, 128], sizes = [16, 16], strides = [1, 1]} : vector<32x192xf32> to vector<16x16xf32>
    %240 = vector.extract_strided_slice %238 {offsets = [0, 0], sizes = [16, 16], strides = [1, 1]} : vector<128x16xf32> to vector<16x16xf32>
    %241 = arith.truncf %240 : vector<16x16xf32> to vector<16x16xbf16>
    %242 = arith.truncf %239 : vector<16x16xf32> to vector<16x16xbf16>
    %cst_76 = arith.constant dense<0.000000e+00> : vector<16x16xf32>
    %243 = tpu.matmul %241, %242, %cst_76 {dimension_numbers = #tpu.dot_dimension_numbers<[1], [0], [0], [1], [0, 0, 1, 1], [], []>} : vector<16x16xbf16>, vector<16x16xbf16>, vector<16x16xf32> -> vector<16x16xf32>
    %244 = vector.extract_strided_slice %204 {offsets = [0, 144], sizes = [16, 16], strides = [1, 1]} : vector<32x192xf32> to vector<16x16xf32>
    %245 = vector.extract_strided_slice %238 {offsets = [16, 0], sizes = [16, 16], strides = [1, 1]} : vector<128x16xf32> to vector<16x16xf32>
    %246 = arith.truncf %245 : vector<16x16xf32> to vector<16x16xbf16>
    %247 = arith.truncf %244 : vector<16x16xf32> to vector<16x16xbf16>
    %cst_77 = arith.constant dense<0.000000e+00> : vector<16x16xf32>
    %248 = tpu.matmul %246, %247, %cst_77 {dimension_numbers = #tpu.dot_dimension_numbers<[1], [0], [0], [1], [0, 0, 1, 1], [], []>} : vector<16x16xbf16>, vector<16x16xbf16>, vector<16x16xf32> -> vector<16x16xf32>
    %249 = vector.extract_strided_slice %204 {offsets = [0, 160], sizes = [16, 16], strides = [1, 1]} : vector<32x192xf32> to vector<16x16xf32>
    %250 = vector.extract_strided_slice %238 {offsets = [32, 0], sizes = [16, 16], strides = [1, 1]} : vector<128x16xf32> to vector<16x16xf32>
    %251 = arith.truncf %250 : vector<16x16xf32> to vector<16x16xbf16>
    %252 = arith.truncf %249 : vector<16x16xf32> to vector<16x16xbf16>
    %cst_78 = arith.constant dense<0.000000e+00> : vector<16x16xf32>
    %253 = tpu.matmul %251, %252, %cst_78 {dimension_numbers = #tpu.dot_dimension_numbers<[1], [0], [0], [1], [0, 0, 1, 1], [], []>} : vector<16x16xbf16>, vector<16x16xbf16>, vector<16x16xf32> -> vector<16x16xf32>
    %254 = vector.extract_strided_slice %204 {offsets = [0, 176], sizes = [16, 16], strides = [1, 1]} : vector<32x192xf32> to vector<16x16xf32>
    %255 = vector.extract_strided_slice %238 {offsets = [48, 0], sizes = [16, 16], strides = [1, 1]} : vector<128x16xf32> to vector<16x16xf32>
    %256 = arith.truncf %255 : vector<16x16xf32> to vector<16x16xbf16>
    %257 = arith.truncf %254 : vector<16x16xf32> to vector<16x16xbf16>
    %cst_79 = arith.constant dense<0.000000e+00> : vector<16x16xf32>
    %258 = tpu.matmul %256, %257, %cst_79 {dimension_numbers = #tpu.dot_dimension_numbers<[1], [0], [0], [1], [0, 0, 1, 1], [], []>} : vector<16x16xbf16>, vector<16x16xbf16>, vector<16x16xf32> -> vector<16x16xf32>
    %259 = tpu.concatenate %243, %248, %253, %258 in 1 : vector<16x16xf32>, vector<16x16xf32>, vector<16x16xf32>, vector<16x16xf32> -> vector<16x64xf32>
    %260 = vector.extract_strided_slice %204 {offsets = [16, 128], sizes = [16, 16], strides = [1, 1]} : vector<32x192xf32> to vector<16x16xf32>
    %261 = vector.extract_strided_slice %238 {offsets = [64, 0], sizes = [16, 16], strides = [1, 1]} : vector<128x16xf32> to vector<16x16xf32>
    %262 = arith.truncf %261 : vector<16x16xf32> to vector<16x16xbf16>
    %263 = arith.truncf %260 : vector<16x16xf32> to vector<16x16xbf16>
    %cst_80 = arith.constant dense<0.000000e+00> : vector<16x16xf32>
    %264 = tpu.matmul %262, %263, %cst_80 {dimension_numbers = #tpu.dot_dimension_numbers<[1], [0], [0], [1], [0, 0, 1, 1], [], []>} : vector<16x16xbf16>, vector<16x16xbf16>, vector<16x16xf32> -> vector<16x16xf32>
    %265 = vector.extract_strided_slice %204 {offsets = [16, 144], sizes = [16, 16], strides = [1, 1]} : vector<32x192xf32> to vector<16x16xf32>
    %266 = vector.extract_strided_slice %238 {offsets = [80, 0], sizes = [16, 16], strides = [1, 1]} : vector<128x16xf32> to vector<16x16xf32>
    %267 = arith.truncf %266 : vector<16x16xf32> to vector<16x16xbf16>
    %268 = arith.truncf %265 : vector<16x16xf32> to vector<16x16xbf16>
    %cst_81 = arith.constant dense<0.000000e+00> : vector<16x16xf32>
    %269 = tpu.matmul %267, %268, %cst_81 {dimension_numbers = #tpu.dot_dimension_numbers<[1], [0], [0], [1], [0, 0, 1, 1], [], []>} : vector<16x16xbf16>, vector<16x16xbf16>, vector<16x16xf32> -> vector<16x16xf32>
    %270 = vector.extract_strided_slice %204 {offsets = [16, 160], sizes = [16, 16], strides = [1, 1]} : vector<32x192xf32> to vector<16x16xf32>
    %271 = vector.extract_strided_slice %238 {offsets = [96, 0], sizes = [16, 16], strides = [1, 1]} : vector<128x16xf32> to vector<16x16xf32>
    %272 = arith.truncf %271 : vector<16x16xf32> to vector<16x16xbf16>
    %273 = arith.truncf %270 : vector<16x16xf32> to vector<16x16xbf16>
    %cst_82 = arith.constant dense<0.000000e+00> : vector<16x16xf32>
    %274 = tpu.matmul %272, %273, %cst_82 {dimension_numbers = #tpu.dot_dimension_numbers<[1], [0], [0], [1], [0, 0, 1, 1], [], []>} : vector<16x16xbf16>, vector<16x16xbf16>, vector<16x16xf32> -> vector<16x16xf32>
    %275 = vector.extract_strided_slice %204 {offsets = [16, 176], sizes = [16, 16], strides = [1, 1]} : vector<32x192xf32> to vector<16x16xf32>
    %276 = vector.extract_strided_slice %238 {offsets = [112, 0], sizes = [16, 16], strides = [1, 1]} : vector<128x16xf32> to vector<16x16xf32>
    %277 = arith.truncf %276 : vector<16x16xf32> to vector<16x16xbf16>
    %278 = arith.truncf %275 : vector<16x16xf32> to vector<16x16xbf16>
    %cst_83 = arith.constant dense<0.000000e+00> : vector<16x16xf32>
    %279 = tpu.matmul %277, %278, %cst_83 {dimension_numbers = #tpu.dot_dimension_numbers<[1], [0], [0], [1], [0, 0, 1, 1], [], []>} : vector<16x16xbf16>, vector<16x16xbf16>, vector<16x16xf32> -> vector<16x16xf32>
    %280 = tpu.concatenate %264, %269, %274, %279 in 1 : vector<16x16xf32>, vector<16x16xf32>, vector<16x16xf32>, vector<16x16xf32> -> vector<16x64xf32>
    %281 = tpu.concatenate %259, %280 in 0 : vector<16x64xf32>, vector<16x64xf32> -> vector<32x64xf32>
    %c488 = arith.constant 488 : index
    %c0_84 = arith.constant 0 : index
    %282 = vector.load %arg3[%c488, %c0_84] : memref<728x256xf32, #tpu.memory_space<vmem>>, vector<1x64xf32>
    %c1216 = arith.constant 1216 : index
    %c0_85 = arith.constant 0 : index
    %283 = vector.load %arg2[%c1216, %c0_85] : memref<2624x256xbf16, #tpu.memory_space<vmem>>, vector<64x64xbf16>
    %284 = arith.truncf %281 : vector<32x64xf32> to vector<32x64xbf16>
    %cst_86 = arith.constant dense<0.000000e+00> : vector<32x64xf32>
    %285 = tpu.matmul %284, %283, %cst_86 {dimension_numbers = #tpu.dot_dimension_numbers<[1], [0], [0], [1], [0, 0, 1, 1], [], []>} : vector<32x64xbf16>, vector<64x64xbf16>, vector<32x64xf32> -> vector<32x64xf32>
    %c480 = arith.constant 480 : index
    %c0_87 = arith.constant 0 : index
    %286 = vector.load %arg3[%c480, %c0_87] : memref<728x256xf32, #tpu.memory_space<vmem>>, vector<1x64xf32>
    %287 = vector.broadcast %286 : vector<1x64xf32> to vector<32x64xf32>
    %288 = arith.addf %285, %287 : vector<32x64xf32>
    %289 = vector.broadcast %282 : vector<1x64xf32> to vector<32x64xf32>
    %290 = arith.mulf %289, %288 : vector<32x64xf32>
    %291 = arith.addf %176, %290 : vector<32x64xf32>
    %c496 = arith.constant 496 : index
    %c0_88 = arith.constant 0 : index
    %292 = vector.load %arg3[%c496, %c0_88] : memref<728x256xf32, #tpu.memory_space<vmem>>, vector<1x64xf32>
    %c504 = arith.constant 504 : index
    %c0_89 = arith.constant 0 : index
    %293 = vector.load %arg3[%c504, %c0_89] : memref<728x256xf32, #tpu.memory_space<vmem>>, vector<1x64xf32>
    %cst_90 = arith.constant dense<0.000000e+00> : vector<32xf32>
    %294 = vector.multi_reduction <add>, %291, %cst_90 [1] : vector<32x64xf32> to vector<32xf32>
    %295 = vector.shape_cast %294 : vector<32xf32> to vector<32x1xf32>
    %cst_91 = arith.constant 6.400000e+01 : f32
    %296 = vector.broadcast %cst_91 : f32 to vector<32x1xf32>
    %297 = arith.divf %295, %296 : vector<32x1xf32>
    %298 = vector.broadcast %297 : vector<32x1xf32> to vector<32x64xf32>
    %299 = arith.subf %291, %298 : vector<32x64xf32>
    %300 = arith.mulf %299, %299 : vector<32x64xf32>
    %cst_92 = arith.constant dense<0.000000e+00> : vector<32xf32>
    %301 = vector.multi_reduction <add>, %300, %cst_92 [1] : vector<32x64xf32> to vector<32xf32>
    %302 = vector.shape_cast %301 : vector<32xf32> to vector<32x1xf32>
    %cst_93 = arith.constant 6.400000e+01 : f32
    %303 = vector.broadcast %cst_93 : f32 to vector<32x1xf32>
    %304 = arith.divf %302, %303 : vector<32x1xf32>
    %cst_94 = arith.constant 9.99999997E-7 : f32
    %305 = vector.broadcast %cst_94 : f32 to vector<32x1xf32>
    %306 = arith.addf %304, %305 : vector<32x1xf32>
    %307 = math.rsqrt %306 : vector<32x1xf32>
    %308 = vector.broadcast %307 : vector<32x1xf32> to vector<32x64xf32>
    %309 = arith.mulf %299, %308 : vector<32x64xf32>
    %310 = vector.broadcast %292 : vector<1x64xf32> to vector<32x64xf32>
    %311 = arith.mulf %309, %310 : vector<32x64xf32>
    %312 = vector.broadcast %293 : vector<1x64xf32> to vector<32x64xf32>
    %313 = arith.addf %311, %312 : vector<32x64xf32>
    %c1280 = arith.constant 1280 : index
    %c0_95 = arith.constant 0 : index
    %314 = vector.load %arg2[%c1280, %c0_95] : memref<2624x256xbf16, #tpu.memory_space<vmem>>, vector<64x256xbf16>
    %315 = arith.truncf %313 : vector<32x64xf32> to vector<32x64xbf16>
    %cst_96 = arith.constant dense<0.000000e+00> : vector<32x256xf32>
    %316 = tpu.matmul %315, %314, %cst_96 {dimension_numbers = #tpu.dot_dimension_numbers<[1], [0], [0], [1], [0, 0, 1, 1], [], []>} : vector<32x64xbf16>, vector<64x256xbf16>, vector<32x256xf32> -> vector<32x256xf32>
    %c512_97 = arith.constant 512 : index
    %c0_98 = arith.constant 0 : index
    %317 = vector.load %arg3[%c512_97, %c0_98] : memref<728x256xf32, #tpu.memory_space<vmem>>, vector<1x256xf32>
    %318 = vector.broadcast %317 : vector<1x256xf32> to vector<32x256xf32>
    %319 = arith.addf %316, %318 : vector<32x256xf32>
    %320 = arith.mulf %319, %319 : vector<32x256xf32>
    %321 = arith.mulf %319, %320 : vector<32x256xf32>
    %cst_99 = arith.constant 4.471500e-02 : f32
    %322 = vector.broadcast %cst_99 : f32 to vector<32x256xf32>
    %323 = arith.mulf %322, %321 : vector<32x256xf32>
    %324 = arith.addf %319, %323 : vector<32x256xf32>
    %cst_100 = arith.constant 0.797884583 : f32
    %325 = vector.broadcast %cst_100 : f32 to vector<32x256xf32>
    %326 = arith.mulf %325, %324 : vector<32x256xf32>
    %327 = math.tanh %326 : vector<32x256xf32>
    %cst_101 = arith.constant 1.000000e+00 : f32
    %328 = vector.broadcast %cst_101 : f32 to vector<32x256xf32>
    %329 = arith.addf %328, %327 : vector<32x256xf32>
    %cst_102 = arith.constant 5.000000e-01 : f32
    %330 = vector.broadcast %cst_102 : f32 to vector<32x256xf32>
    %331 = arith.mulf %330, %329 : vector<32x256xf32>
    %332 = arith.mulf %319, %331 : vector<32x256xf32>
    %c1344 = arith.constant 1344 : index
    %c0_103 = arith.constant 0 : index
    %333 = vector.load %arg2[%c1344, %c0_103] : memref<2624x256xbf16, #tpu.memory_space<vmem>>, vector<256x64xbf16>
    %334 = arith.truncf %332 : vector<32x256xf32> to vector<32x256xbf16>
    %cst_104 = arith.constant dense<0.000000e+00> : vector<32x64xf32>
    %335 = tpu.matmul %334, %333, %cst_104 {dimension_numbers = #tpu.dot_dimension_numbers<[1], [0], [0], [1], [0, 0, 1, 1], [], []>} : vector<32x256xbf16>, vector<256x64xbf16>, vector<32x64xf32> -> vector<32x64xf32>
    %c520 = arith.constant 520 : index
    %c0_105 = arith.constant 0 : index
    %336 = vector.load %arg3[%c520, %c0_105] : memref<728x256xf32, #tpu.memory_space<vmem>>, vector<1x64xf32>
    %337 = vector.broadcast %336 : vector<1x64xf32> to vector<32x64xf32>
    %338 = arith.addf %335, %337 : vector<32x64xf32>
    %c528 = arith.constant 528 : index
    %c0_106 = arith.constant 0 : index
    %339 = vector.load %arg3[%c528, %c0_106] : memref<728x256xf32, #tpu.memory_space<vmem>>, vector<1x64xf32>
    %340 = vector.broadcast %339 : vector<1x64xf32> to vector<32x64xf32>
    %341 = arith.mulf %340, %338 : vector<32x64xf32>
    %342 = arith.addf %291, %341 : vector<32x64xf32>
    %c112 = arith.constant 112 : index
    %c0_107 = arith.constant 0 : index
    %343 = vector.load %arg3[%c112, %c0_107] : memref<728x256xf32, #tpu.memory_space<vmem>>, vector<2x32xf32>
    %c536 = arith.constant 536 : index
    %c0_108 = arith.constant 0 : index
    %344 = vector.load %arg3[%c536, %c0_108] : memref<728x256xf32, #tpu.memory_space<vmem>>, vector<1x64xf32>
    %c544 = arith.constant 544 : index
    %c0_109 = arith.constant 0 : index
    %345 = vector.load %arg3[%c544, %c0_109] : memref<728x256xf32, #tpu.memory_space<vmem>>, vector<1x64xf32>
    %cst_110 = arith.constant dense<0.000000e+00> : vector<2xf32>
    %346 = vector.multi_reduction <add>, %9, %cst_110 [1] : vector<2x64xf32> to vector<2xf32>
    %347 = vector.shape_cast %346 : vector<2xf32> to vector<2x1xf32>
    %cst_111 = arith.constant 6.400000e+01 : f32
    %348 = vector.broadcast %cst_111 : f32 to vector<2x1xf32>
    %349 = arith.divf %347, %348 : vector<2x1xf32>
    %350 = vector.broadcast %349 : vector<2x1xf32> to vector<2x64xf32>
    %351 = arith.subf %9, %350 : vector<2x64xf32>
    %352 = arith.mulf %351, %351 : vector<2x64xf32>
    %cst_112 = arith.constant dense<0.000000e+00> : vector<2xf32>
    %353 = vector.multi_reduction <add>, %352, %cst_112 [1] : vector<2x64xf32> to vector<2xf32>
    %354 = vector.shape_cast %353 : vector<2xf32> to vector<2x1xf32>
    %cst_113 = arith.constant 6.400000e+01 : f32
    %355 = vector.broadcast %cst_113 : f32 to vector<2x1xf32>
    %356 = arith.divf %354, %355 : vector<2x1xf32>
    %cst_114 = arith.constant 9.99999997E-7 : f32
    %357 = vector.broadcast %cst_114 : f32 to vector<2x1xf32>
    %358 = arith.addf %356, %357 : vector<2x1xf32>
    %359 = math.rsqrt %358 : vector<2x1xf32>
    %360 = vector.broadcast %359 : vector<2x1xf32> to vector<2x64xf32>
    %361 = arith.mulf %351, %360 : vector<2x64xf32>
    %362 = vector.broadcast %344 : vector<1x64xf32> to vector<2x64xf32>
    %363 = arith.mulf %361, %362 : vector<2x64xf32>
    %364 = vector.broadcast %345 : vector<1x64xf32> to vector<2x64xf32>
    %365 = arith.addf %363, %364 : vector<2x64xf32>
    %c536_115 = arith.constant 536 : index
    %c0_116 = arith.constant 0 : index
    %366 = vector.load %arg3[%c536_115, %c0_116] : memref<728x256xf32, #tpu.memory_space<vmem>>, vector<1x64xf32>
    %c544_117 = arith.constant 544 : index
    %c0_118 = arith.constant 0 : index
    %367 = vector.load %arg3[%c544_117, %c0_118] : memref<728x256xf32, #tpu.memory_space<vmem>>, vector<1x64xf32>
    %cst_119 = arith.constant dense<0.000000e+00> : vector<32xf32>
    %368 = vector.multi_reduction <add>, %342, %cst_119 [1] : vector<32x64xf32> to vector<32xf32>
    %369 = vector.shape_cast %368 : vector<32xf32> to vector<32x1xf32>
    %cst_120 = arith.constant 6.400000e+01 : f32
    %370 = vector.broadcast %cst_120 : f32 to vector<32x1xf32>
    %371 = arith.divf %369, %370 : vector<32x1xf32>
    %372 = vector.broadcast %371 : vector<32x1xf32> to vector<32x64xf32>
    %373 = arith.subf %342, %372 : vector<32x64xf32>
    %374 = arith.mulf %373, %373 : vector<32x64xf32>
    %cst_121 = arith.constant dense<0.000000e+00> : vector<32xf32>
    %375 = vector.multi_reduction <add>, %374, %cst_121 [1] : vector<32x64xf32> to vector<32xf32>
    %376 = vector.shape_cast %375 : vector<32xf32> to vector<32x1xf32>
    %cst_122 = arith.constant 6.400000e+01 : f32
    %377 = vector.broadcast %cst_122 : f32 to vector<32x1xf32>
    %378 = arith.divf %376, %377 : vector<32x1xf32>
    %cst_123 = arith.constant 9.99999997E-7 : f32
    %379 = vector.broadcast %cst_123 : f32 to vector<32x1xf32>
    %380 = arith.addf %378, %379 : vector<32x1xf32>
    %381 = math.rsqrt %380 : vector<32x1xf32>
    %382 = vector.broadcast %381 : vector<32x1xf32> to vector<32x64xf32>
    %383 = arith.mulf %373, %382 : vector<32x64xf32>
    %384 = vector.broadcast %366 : vector<1x64xf32> to vector<32x64xf32>
    %385 = arith.mulf %383, %384 : vector<32x64xf32>
    %386 = vector.broadcast %367 : vector<1x64xf32> to vector<32x64xf32>
    %387 = arith.addf %385, %386 : vector<32x64xf32>
    %c1600 = arith.constant 1600 : index
    %c0_124 = arith.constant 0 : index
    %388 = vector.load %arg2[%c1600, %c0_124] : memref<2624x256xbf16, #tpu.memory_space<vmem>>, vector<64x64xbf16>
    %389 = arith.truncf %365 : vector<2x64xf32> to vector<2x64xbf16>
    %cst_125 = arith.constant dense<0.000000e+00> : vector<2x64xf32>
    %390 = tpu.matmul %389, %388, %cst_125 {dimension_numbers = #tpu.dot_dimension_numbers<[1], [0], [0], [1], [0, 0, 1, 1], [], []>} : vector<2x64xbf16>, vector<64x64xbf16>, vector<2x64xf32> -> vector<2x64xf32>
    %c552 = arith.constant 552 : index
    %c0_126 = arith.constant 0 : index
    %391 = vector.load %arg3[%c552, %c0_126] : memref<728x256xf32, #tpu.memory_space<vmem>>, vector<1x64xf32>
    %392 = vector.broadcast %391 : vector<1x64xf32> to vector<2x64xf32>
    %393 = arith.addf %390, %392 : vector<2x64xf32>
    %c1664 = arith.constant 1664 : index
    %c0_127 = arith.constant 0 : index
    %394 = vector.load %arg2[%c1664, %c0_127] : memref<2624x256xbf16, #tpu.memory_space<vmem>>, vector<64x128xbf16>
    %395 = arith.truncf %365 : vector<2x64xf32> to vector<2x64xbf16>
    %cst_128 = arith.constant dense<0.000000e+00> : vector<2x128xf32>
    %396 = tpu.matmul %395, %394, %cst_128 {dimension_numbers = #tpu.dot_dimension_numbers<[1], [0], [0], [1], [0, 0, 1, 1], [], []>} : vector<2x64xbf16>, vector<64x128xbf16>, vector<2x128xf32> -> vector<2x128xf32>
    %c560 = arith.constant 560 : index
    %c0_129 = arith.constant 0 : index
    %397 = vector.load %arg3[%c560, %c0_129] : memref<728x256xf32, #tpu.memory_space<vmem>>, vector<1x128xf32>
    %398 = vector.broadcast %397 : vector<1x128xf32> to vector<2x128xf32>
    %399 = arith.addf %396, %398 : vector<2x128xf32>
    %c1664_130 = arith.constant 1664 : index
    %c0_131 = arith.constant 0 : index
    %400 = vector.load %arg2[%c1664_130, %c0_131] : memref<2624x256xbf16, #tpu.memory_space<vmem>>, vector<64x128xbf16>
    %401 = arith.truncf %387 : vector<32x64xf32> to vector<32x64xbf16>
    %cst_132 = arith.constant dense<0.000000e+00> : vector<32x128xf32>
    %402 = tpu.matmul %401, %400, %cst_132 {dimension_numbers = #tpu.dot_dimension_numbers<[1], [0], [0], [1], [0, 0, 1, 1], [], []>} : vector<32x64xbf16>, vector<64x128xbf16>, vector<32x128xf32> -> vector<32x128xf32>
    %c560_133 = arith.constant 560 : index
    %c0_134 = arith.constant 0 : index
    %403 = vector.load %arg3[%c560_133, %c0_134] : memref<728x256xf32, #tpu.memory_space<vmem>>, vector<1x128xf32>
    %404 = vector.broadcast %403 : vector<1x128xf32> to vector<32x128xf32>
    %405 = arith.addf %402, %404 : vector<32x128xf32>
    %406 = vector.extract_strided_slice %393 {offsets = [0, 0], sizes = [2, 16], strides = [1, 1]} : vector<2x64xf32> to vector<2x16xf32>
    %407 = vector.extract_strided_slice %399 {offsets = [0, 0], sizes = [2, 16], strides = [1, 1]} : vector<2x128xf32> to vector<2x16xf32>
    %408 = vector.extract_strided_slice %399 {offsets = [0, 64], sizes = [2, 16], strides = [1, 1]} : vector<2x128xf32> to vector<2x16xf32>
    %409 = vector.extract_strided_slice %405 {offsets = [0, 0], sizes = [32, 16], strides = [1, 1]} : vector<32x128xf32> to vector<32x16xf32>
    %410 = vector.extract_strided_slice %405 {offsets = [0, 64], sizes = [32, 16], strides = [1, 1]} : vector<32x128xf32> to vector<32x16xf32>
    %411 = arith.mulf %406, %407 : vector<2x16xf32>
    %cst_135 = arith.constant dense<0.000000e+00> : vector<2xf32>
    %412 = vector.multi_reduction <add>, %411, %cst_135 [1] : vector<2x16xf32> to vector<2xf32>
    %413 = vector.shape_cast %412 : vector<2xf32> to vector<2x1xf32>
    %414 = arith.truncf %406 : vector<2x16xf32> to vector<2x16xbf16>
    %415 = arith.truncf %409 : vector<32x16xf32> to vector<32x16xbf16>
    %cst_136 = arith.constant dense<0.000000e+00> : vector<2x32xf32>
    %416 = tpu.matmul %414, %415, %cst_136 {dimension_numbers = #tpu.dot_dimension_numbers<[1], [1], [0], [0], [0, 0, 1, 0], [], []>} : vector<2x16xbf16>, vector<32x16xbf16>, vector<2x32xf32> -> vector<2x32xf32>
    %417 = arith.addf %416, %343 : vector<2x32xf32>
    %cst_137 = arith.constant dense<0xFF800000> : vector<2xf32>
    %418 = vector.multi_reduction <maximumf>, %417, %cst_137 [1] : vector<2x32xf32> to vector<2xf32>
    %419 = vector.shape_cast %418 : vector<2xf32> to vector<2x1xf32>
    %420 = arith.maximumf %413, %419 : vector<2x1xf32>
    %421 = arith.subf %413, %420 : vector<2x1xf32>
    %422 = math.exp %421 : vector<2x1xf32>
    %423 = vector.broadcast %420 : vector<2x1xf32> to vector<2x32xf32>
    %424 = arith.subf %417, %423 : vector<2x32xf32>
    %425 = math.exp %424 : vector<2x32xf32>
    %cst_138 = arith.constant dense<0.000000e+00> : vector<2xf32>
    %426 = vector.multi_reduction <add>, %425, %cst_138 [1] : vector<2x32xf32> to vector<2xf32>
    %427 = vector.shape_cast %426 : vector<2xf32> to vector<2x1xf32>
    %428 = arith.addf %422, %427 : vector<2x1xf32>
    %429 = tpu.reciprocal %428 {approx = true} : vector<2x1xf32> -> vector<2x1xf32>
    %430 = vector.broadcast %422 : vector<2x1xf32> to vector<2x16xf32>
    %431 = arith.mulf %430, %408 : vector<2x16xf32>
    %432 = arith.truncf %425 : vector<2x32xf32> to vector<2x32xbf16>
    %433 = arith.truncf %410 : vector<32x16xf32> to vector<32x16xbf16>
    %cst_139 = arith.constant dense<0.000000e+00> : vector<2x16xf32>
    %434 = tpu.matmul %432, %433, %cst_139 {dimension_numbers = #tpu.dot_dimension_numbers<[1], [0], [0], [1], [0, 0, 1, 1], [], []>} : vector<2x32xbf16>, vector<32x16xbf16>, vector<2x16xf32> -> vector<2x16xf32>
    %435 = arith.addf %431, %434 : vector<2x16xf32>
    %436 = vector.broadcast %429 : vector<2x1xf32> to vector<2x16xf32>
    %437 = arith.mulf %435, %436 : vector<2x16xf32>
    %438 = vector.extract_strided_slice %393 {offsets = [0, 16], sizes = [2, 16], strides = [1, 1]} : vector<2x64xf32> to vector<2x16xf32>
    %439 = vector.extract_strided_slice %399 {offsets = [0, 16], sizes = [2, 16], strides = [1, 1]} : vector<2x128xf32> to vector<2x16xf32>
    %440 = vector.extract_strided_slice %399 {offsets = [0, 80], sizes = [2, 16], strides = [1, 1]} : vector<2x128xf32> to vector<2x16xf32>
    %441 = vector.extract_strided_slice %405 {offsets = [0, 16], sizes = [32, 16], strides = [1, 1]} : vector<32x128xf32> to vector<32x16xf32>
    %442 = vector.extract_strided_slice %405 {offsets = [0, 80], sizes = [32, 16], strides = [1, 1]} : vector<32x128xf32> to vector<32x16xf32>
    %443 = arith.mulf %438, %439 : vector<2x16xf32>
    %cst_140 = arith.constant dense<0.000000e+00> : vector<2xf32>
    %444 = vector.multi_reduction <add>, %443, %cst_140 [1] : vector<2x16xf32> to vector<2xf32>
    %445 = vector.shape_cast %444 : vector<2xf32> to vector<2x1xf32>
    %446 = arith.truncf %438 : vector<2x16xf32> to vector<2x16xbf16>
    %447 = arith.truncf %441 : vector<32x16xf32> to vector<32x16xbf16>
    %cst_141 = arith.constant dense<0.000000e+00> : vector<2x32xf32>
    %448 = tpu.matmul %446, %447, %cst_141 {dimension_numbers = #tpu.dot_dimension_numbers<[1], [1], [0], [0], [0, 0, 1, 0], [], []>} : vector<2x16xbf16>, vector<32x16xbf16>, vector<2x32xf32> -> vector<2x32xf32>
    %449 = arith.addf %448, %343 : vector<2x32xf32>
    %cst_142 = arith.constant dense<0xFF800000> : vector<2xf32>
    %450 = vector.multi_reduction <maximumf>, %449, %cst_142 [1] : vector<2x32xf32> to vector<2xf32>
    %451 = vector.shape_cast %450 : vector<2xf32> to vector<2x1xf32>
    %452 = arith.maximumf %445, %451 : vector<2x1xf32>
    %453 = arith.subf %445, %452 : vector<2x1xf32>
    %454 = math.exp %453 : vector<2x1xf32>
    %455 = vector.broadcast %452 : vector<2x1xf32> to vector<2x32xf32>
    %456 = arith.subf %449, %455 : vector<2x32xf32>
    %457 = math.exp %456 : vector<2x32xf32>
    %cst_143 = arith.constant dense<0.000000e+00> : vector<2xf32>
    %458 = vector.multi_reduction <add>, %457, %cst_143 [1] : vector<2x32xf32> to vector<2xf32>
    %459 = vector.shape_cast %458 : vector<2xf32> to vector<2x1xf32>
    %460 = arith.addf %454, %459 : vector<2x1xf32>
    %461 = tpu.reciprocal %460 {approx = true} : vector<2x1xf32> -> vector<2x1xf32>
    %462 = vector.broadcast %454 : vector<2x1xf32> to vector<2x16xf32>
    %463 = arith.mulf %462, %440 : vector<2x16xf32>
    %464 = arith.truncf %457 : vector<2x32xf32> to vector<2x32xbf16>
    %465 = arith.truncf %442 : vector<32x16xf32> to vector<32x16xbf16>
    %cst_144 = arith.constant dense<0.000000e+00> : vector<2x16xf32>
    %466 = tpu.matmul %464, %465, %cst_144 {dimension_numbers = #tpu.dot_dimension_numbers<[1], [0], [0], [1], [0, 0, 1, 1], [], []>} : vector<2x32xbf16>, vector<32x16xbf16>, vector<2x16xf32> -> vector<2x16xf32>
    %467 = arith.addf %463, %466 : vector<2x16xf32>
    %468 = vector.broadcast %461 : vector<2x1xf32> to vector<2x16xf32>
    %469 = arith.mulf %467, %468 : vector<2x16xf32>
    %470 = vector.extract_strided_slice %393 {offsets = [0, 32], sizes = [2, 16], strides = [1, 1]} : vector<2x64xf32> to vector<2x16xf32>
    %471 = vector.extract_strided_slice %399 {offsets = [0, 32], sizes = [2, 16], strides = [1, 1]} : vector<2x128xf32> to vector<2x16xf32>
    %472 = vector.extract_strided_slice %399 {offsets = [0, 96], sizes = [2, 16], strides = [1, 1]} : vector<2x128xf32> to vector<2x16xf32>
    %473 = vector.extract_strided_slice %405 {offsets = [0, 32], sizes = [32, 16], strides = [1, 1]} : vector<32x128xf32> to vector<32x16xf32>
    %474 = vector.extract_strided_slice %405 {offsets = [0, 96], sizes = [32, 16], strides = [1, 1]} : vector<32x128xf32> to vector<32x16xf32>
    %475 = arith.mulf %470, %471 : vector<2x16xf32>
    %cst_145 = arith.constant dense<0.000000e+00> : vector<2xf32>
    %476 = vector.multi_reduction <add>, %475, %cst_145 [1] : vector<2x16xf32> to vector<2xf32>
    %477 = vector.shape_cast %476 : vector<2xf32> to vector<2x1xf32>
    %478 = arith.truncf %470 : vector<2x16xf32> to vector<2x16xbf16>
    %479 = arith.truncf %473 : vector<32x16xf32> to vector<32x16xbf16>
    %cst_146 = arith.constant dense<0.000000e+00> : vector<2x32xf32>
    %480 = tpu.matmul %478, %479, %cst_146 {dimension_numbers = #tpu.dot_dimension_numbers<[1], [1], [0], [0], [0, 0, 1, 0], [], []>} : vector<2x16xbf16>, vector<32x16xbf16>, vector<2x32xf32> -> vector<2x32xf32>
    %481 = arith.addf %480, %343 : vector<2x32xf32>
    %cst_147 = arith.constant dense<0xFF800000> : vector<2xf32>
    %482 = vector.multi_reduction <maximumf>, %481, %cst_147 [1] : vector<2x32xf32> to vector<2xf32>
    %483 = vector.shape_cast %482 : vector<2xf32> to vector<2x1xf32>
    %484 = arith.maximumf %477, %483 : vector<2x1xf32>
    %485 = arith.subf %477, %484 : vector<2x1xf32>
    %486 = math.exp %485 : vector<2x1xf32>
    %487 = vector.broadcast %484 : vector<2x1xf32> to vector<2x32xf32>
    %488 = arith.subf %481, %487 : vector<2x32xf32>
    %489 = math.exp %488 : vector<2x32xf32>
    %cst_148 = arith.constant dense<0.000000e+00> : vector<2xf32>
    %490 = vector.multi_reduction <add>, %489, %cst_148 [1] : vector<2x32xf32> to vector<2xf32>
    %491 = vector.shape_cast %490 : vector<2xf32> to vector<2x1xf32>
    %492 = arith.addf %486, %491 : vector<2x1xf32>
    %493 = tpu.reciprocal %492 {approx = true} : vector<2x1xf32> -> vector<2x1xf32>
    %494 = vector.broadcast %486 : vector<2x1xf32> to vector<2x16xf32>
    %495 = arith.mulf %494, %472 : vector<2x16xf32>
    %496 = arith.truncf %489 : vector<2x32xf32> to vector<2x32xbf16>
    %497 = arith.truncf %474 : vector<32x16xf32> to vector<32x16xbf16>
    %cst_149 = arith.constant dense<0.000000e+00> : vector<2x16xf32>
    %498 = tpu.matmul %496, %497, %cst_149 {dimension_numbers = #tpu.dot_dimension_numbers<[1], [0], [0], [1], [0, 0, 1, 1], [], []>} : vector<2x32xbf16>, vector<32x16xbf16>, vector<2x16xf32> -> vector<2x16xf32>
    %499 = arith.addf %495, %498 : vector<2x16xf32>
    %500 = vector.broadcast %493 : vector<2x1xf32> to vector<2x16xf32>
    %501 = arith.mulf %499, %500 : vector<2x16xf32>
    %502 = vector.extract_strided_slice %393 {offsets = [0, 48], sizes = [2, 16], strides = [1, 1]} : vector<2x64xf32> to vector<2x16xf32>
    %503 = vector.extract_strided_slice %399 {offsets = [0, 48], sizes = [2, 16], strides = [1, 1]} : vector<2x128xf32> to vector<2x16xf32>
    %504 = vector.extract_strided_slice %399 {offsets = [0, 112], sizes = [2, 16], strides = [1, 1]} : vector<2x128xf32> to vector<2x16xf32>
    %505 = vector.extract_strided_slice %405 {offsets = [0, 48], sizes = [32, 16], strides = [1, 1]} : vector<32x128xf32> to vector<32x16xf32>
    %506 = vector.extract_strided_slice %405 {offsets = [0, 112], sizes = [32, 16], strides = [1, 1]} : vector<32x128xf32> to vector<32x16xf32>
    %507 = arith.mulf %502, %503 : vector<2x16xf32>
    %cst_150 = arith.constant dense<0.000000e+00> : vector<2xf32>
    %508 = vector.multi_reduction <add>, %507, %cst_150 [1] : vector<2x16xf32> to vector<2xf32>
    %509 = vector.shape_cast %508 : vector<2xf32> to vector<2x1xf32>
    %510 = arith.truncf %502 : vector<2x16xf32> to vector<2x16xbf16>
    %511 = arith.truncf %505 : vector<32x16xf32> to vector<32x16xbf16>
    %cst_151 = arith.constant dense<0.000000e+00> : vector<2x32xf32>
    %512 = tpu.matmul %510, %511, %cst_151 {dimension_numbers = #tpu.dot_dimension_numbers<[1], [1], [0], [0], [0, 0, 1, 0], [], []>} : vector<2x16xbf16>, vector<32x16xbf16>, vector<2x32xf32> -> vector<2x32xf32>
    %513 = arith.addf %512, %343 : vector<2x32xf32>
    %cst_152 = arith.constant dense<0xFF800000> : vector<2xf32>
    %514 = vector.multi_reduction <maximumf>, %513, %cst_152 [1] : vector<2x32xf32> to vector<2xf32>
    %515 = vector.shape_cast %514 : vector<2xf32> to vector<2x1xf32>
    %516 = arith.maximumf %509, %515 : vector<2x1xf32>
    %517 = arith.subf %509, %516 : vector<2x1xf32>
    %518 = math.exp %517 : vector<2x1xf32>
    %519 = vector.broadcast %516 : vector<2x1xf32> to vector<2x32xf32>
    %520 = arith.subf %513, %519 : vector<2x32xf32>
    %521 = math.exp %520 : vector<2x32xf32>
    %cst_153 = arith.constant dense<0.000000e+00> : vector<2xf32>
    %522 = vector.multi_reduction <add>, %521, %cst_153 [1] : vector<2x32xf32> to vector<2xf32>
    %523 = vector.shape_cast %522 : vector<2xf32> to vector<2x1xf32>
    %524 = arith.addf %518, %523 : vector<2x1xf32>
    %525 = tpu.reciprocal %524 {approx = true} : vector<2x1xf32> -> vector<2x1xf32>
    %526 = vector.broadcast %518 : vector<2x1xf32> to vector<2x16xf32>
    %527 = arith.mulf %526, %504 : vector<2x16xf32>
    %528 = arith.truncf %521 : vector<2x32xf32> to vector<2x32xbf16>
    %529 = arith.truncf %506 : vector<32x16xf32> to vector<32x16xbf16>
    %cst_154 = arith.constant dense<0.000000e+00> : vector<2x16xf32>
    %530 = tpu.matmul %528, %529, %cst_154 {dimension_numbers = #tpu.dot_dimension_numbers<[1], [0], [0], [1], [0, 0, 1, 1], [], []>} : vector<2x32xbf16>, vector<32x16xbf16>, vector<2x16xf32> -> vector<2x16xf32>
    %531 = arith.addf %527, %530 : vector<2x16xf32>
    %532 = vector.broadcast %525 : vector<2x1xf32> to vector<2x16xf32>
    %533 = arith.mulf %531, %532 : vector<2x16xf32>
    %534 = tpu.concatenate %437, %469, %501, %533 in 1 : vector<2x16xf32>, vector<2x16xf32>, vector<2x16xf32>, vector<2x16xf32> -> vector<2x64xf32>
    %c576_155 = arith.constant 576 : index
    %c0_156 = arith.constant 0 : index
    %535 = vector.load %arg3[%c576_155, %c0_156] : memref<728x256xf32, #tpu.memory_space<vmem>>, vector<1x64xf32>
    %c1728 = arith.constant 1728 : index
    %c0_157 = arith.constant 0 : index
    %536 = vector.load %arg2[%c1728, %c0_157] : memref<2624x256xbf16, #tpu.memory_space<vmem>>, vector<64x64xbf16>
    %537 = arith.truncf %534 : vector<2x64xf32> to vector<2x64xbf16>
    %cst_158 = arith.constant dense<0.000000e+00> : vector<2x64xf32>
    %538 = tpu.matmul %537, %536, %cst_158 {dimension_numbers = #tpu.dot_dimension_numbers<[1], [0], [0], [1], [0, 0, 1, 1], [], []>} : vector<2x64xbf16>, vector<64x64xbf16>, vector<2x64xf32> -> vector<2x64xf32>
    %c568 = arith.constant 568 : index
    %c0_159 = arith.constant 0 : index
    %539 = vector.load %arg3[%c568, %c0_159] : memref<728x256xf32, #tpu.memory_space<vmem>>, vector<1x64xf32>
    %540 = vector.broadcast %539 : vector<1x64xf32> to vector<2x64xf32>
    %541 = arith.addf %538, %540 : vector<2x64xf32>
    %542 = vector.broadcast %535 : vector<1x64xf32> to vector<2x64xf32>
    %543 = arith.mulf %542, %541 : vector<2x64xf32>
    %544 = arith.addf %9, %543 : vector<2x64xf32>
    %c584 = arith.constant 584 : index
    %c0_160 = arith.constant 0 : index
    %545 = vector.load %arg3[%c584, %c0_160] : memref<728x256xf32, #tpu.memory_space<vmem>>, vector<1x64xf32>
    %c592 = arith.constant 592 : index
    %c0_161 = arith.constant 0 : index
    %546 = vector.load %arg3[%c592, %c0_161] : memref<728x256xf32, #tpu.memory_space<vmem>>, vector<1x64xf32>
    %cst_162 = arith.constant dense<0.000000e+00> : vector<2xf32>
    %547 = vector.multi_reduction <add>, %544, %cst_162 [1] : vector<2x64xf32> to vector<2xf32>
    %548 = vector.shape_cast %547 : vector<2xf32> to vector<2x1xf32>
    %cst_163 = arith.constant 6.400000e+01 : f32
    %549 = vector.broadcast %cst_163 : f32 to vector<2x1xf32>
    %550 = arith.divf %548, %549 : vector<2x1xf32>
    %551 = vector.broadcast %550 : vector<2x1xf32> to vector<2x64xf32>
    %552 = arith.subf %544, %551 : vector<2x64xf32>
    %553 = arith.mulf %552, %552 : vector<2x64xf32>
    %cst_164 = arith.constant dense<0.000000e+00> : vector<2xf32>
    %554 = vector.multi_reduction <add>, %553, %cst_164 [1] : vector<2x64xf32> to vector<2xf32>
    %555 = vector.shape_cast %554 : vector<2xf32> to vector<2x1xf32>
    %cst_165 = arith.constant 6.400000e+01 : f32
    %556 = vector.broadcast %cst_165 : f32 to vector<2x1xf32>
    %557 = arith.divf %555, %556 : vector<2x1xf32>
    %cst_166 = arith.constant 9.99999997E-7 : f32
    %558 = vector.broadcast %cst_166 : f32 to vector<2x1xf32>
    %559 = arith.addf %557, %558 : vector<2x1xf32>
    %560 = math.rsqrt %559 : vector<2x1xf32>
    %561 = vector.broadcast %560 : vector<2x1xf32> to vector<2x64xf32>
    %562 = arith.mulf %552, %561 : vector<2x64xf32>
    %563 = vector.broadcast %545 : vector<1x64xf32> to vector<2x64xf32>
    %564 = arith.mulf %562, %563 : vector<2x64xf32>
    %565 = vector.broadcast %546 : vector<1x64xf32> to vector<2x64xf32>
    %566 = arith.addf %564, %565 : vector<2x64xf32>
    %c1792 = arith.constant 1792 : index
    %c0_167 = arith.constant 0 : index
    %567 = vector.load %arg2[%c1792, %c0_167] : memref<2624x256xbf16, #tpu.memory_space<vmem>>, vector<64x256xbf16>
    %568 = arith.truncf %566 : vector<2x64xf32> to vector<2x64xbf16>
    %cst_168 = arith.constant dense<0.000000e+00> : vector<2x256xf32>
    %569 = tpu.matmul %568, %567, %cst_168 {dimension_numbers = #tpu.dot_dimension_numbers<[1], [0], [0], [1], [0, 0, 1, 1], [], []>} : vector<2x64xbf16>, vector<64x256xbf16>, vector<2x256xf32> -> vector<2x256xf32>
    %c600 = arith.constant 600 : index
    %c0_169 = arith.constant 0 : index
    %570 = vector.load %arg3[%c600, %c0_169] : memref<728x256xf32, #tpu.memory_space<vmem>>, vector<1x256xf32>
    %571 = vector.broadcast %570 : vector<1x256xf32> to vector<2x256xf32>
    %572 = arith.addf %569, %571 : vector<2x256xf32>
    %573 = arith.mulf %572, %572 : vector<2x256xf32>
    %574 = arith.mulf %572, %573 : vector<2x256xf32>
    %cst_170 = arith.constant 4.471500e-02 : f32
    %575 = vector.broadcast %cst_170 : f32 to vector<2x256xf32>
    %576 = arith.mulf %575, %574 : vector<2x256xf32>
    %577 = arith.addf %572, %576 : vector<2x256xf32>
    %cst_171 = arith.constant 0.797884583 : f32
    %578 = vector.broadcast %cst_171 : f32 to vector<2x256xf32>
    %579 = arith.mulf %578, %577 : vector<2x256xf32>
    %580 = math.tanh %579 : vector<2x256xf32>
    %cst_172 = arith.constant 1.000000e+00 : f32
    %581 = vector.broadcast %cst_172 : f32 to vector<2x256xf32>
    %582 = arith.addf %581, %580 : vector<2x256xf32>
    %cst_173 = arith.constant 5.000000e-01 : f32
    %583 = vector.broadcast %cst_173 : f32 to vector<2x256xf32>
    %584 = arith.mulf %583, %582 : vector<2x256xf32>
    %585 = arith.mulf %572, %584 : vector<2x256xf32>
    %c1856 = arith.constant 1856 : index
    %c0_174 = arith.constant 0 : index
    %586 = vector.load %arg2[%c1856, %c0_174] : memref<2624x256xbf16, #tpu.memory_space<vmem>>, vector<256x64xbf16>
    %587 = arith.truncf %585 : vector<2x256xf32> to vector<2x256xbf16>
    %cst_175 = arith.constant dense<0.000000e+00> : vector<2x64xf32>
    %588 = tpu.matmul %587, %586, %cst_175 {dimension_numbers = #tpu.dot_dimension_numbers<[1], [0], [0], [1], [0, 0, 1, 1], [], []>} : vector<2x256xbf16>, vector<256x64xbf16>, vector<2x64xf32> -> vector<2x64xf32>
    %c608 = arith.constant 608 : index
    %c0_176 = arith.constant 0 : index
    %589 = vector.load %arg3[%c608, %c0_176] : memref<728x256xf32, #tpu.memory_space<vmem>>, vector<1x64xf32>
    %590 = vector.broadcast %589 : vector<1x64xf32> to vector<2x64xf32>
    %591 = arith.addf %588, %590 : vector<2x64xf32>
    %c616 = arith.constant 616 : index
    %c0_177 = arith.constant 0 : index
    %592 = vector.load %arg3[%c616, %c0_177] : memref<728x256xf32, #tpu.memory_space<vmem>>, vector<1x64xf32>
    %593 = vector.broadcast %592 : vector<1x64xf32> to vector<2x64xf32>
    %594 = arith.mulf %593, %591 : vector<2x64xf32>
    %595 = arith.addf %544, %594 : vector<2x64xf32>
    %c624 = arith.constant 624 : index
    %c0_178 = arith.constant 0 : index
    %596 = vector.load %arg3[%c624, %c0_178] : memref<728x256xf32, #tpu.memory_space<vmem>>, vector<1x64xf32>
    %c632 = arith.constant 632 : index
    %c0_179 = arith.constant 0 : index
    %597 = vector.load %arg3[%c632, %c0_179] : memref<728x256xf32, #tpu.memory_space<vmem>>, vector<1x64xf32>
    %cst_180 = arith.constant dense<0.000000e+00> : vector<2xf32>
    %598 = vector.multi_reduction <add>, %595, %cst_180 [1] : vector<2x64xf32> to vector<2xf32>
    %599 = vector.shape_cast %598 : vector<2xf32> to vector<2x1xf32>
    %cst_181 = arith.constant 6.400000e+01 : f32
    %600 = vector.broadcast %cst_181 : f32 to vector<2x1xf32>
    %601 = arith.divf %599, %600 : vector<2x1xf32>
    %602 = vector.broadcast %601 : vector<2x1xf32> to vector<2x64xf32>
    %603 = arith.subf %595, %602 : vector<2x64xf32>
    %604 = arith.mulf %603, %603 : vector<2x64xf32>
    %cst_182 = arith.constant dense<0.000000e+00> : vector<2xf32>
    %605 = vector.multi_reduction <add>, %604, %cst_182 [1] : vector<2x64xf32> to vector<2xf32>
    %606 = vector.shape_cast %605 : vector<2xf32> to vector<2x1xf32>
    %cst_183 = arith.constant 6.400000e+01 : f32
    %607 = vector.broadcast %cst_183 : f32 to vector<2x1xf32>
    %608 = arith.divf %606, %607 : vector<2x1xf32>
    %cst_184 = arith.constant 9.99999997E-7 : f32
    %609 = vector.broadcast %cst_184 : f32 to vector<2x1xf32>
    %610 = arith.addf %608, %609 : vector<2x1xf32>
    %611 = math.rsqrt %610 : vector<2x1xf32>
    %612 = vector.broadcast %611 : vector<2x1xf32> to vector<2x64xf32>
    %613 = arith.mulf %603, %612 : vector<2x64xf32>
    %614 = vector.broadcast %596 : vector<1x64xf32> to vector<2x64xf32>
    %615 = arith.mulf %613, %614 : vector<2x64xf32>
    %616 = vector.broadcast %597 : vector<1x64xf32> to vector<2x64xf32>
    %617 = arith.addf %615, %616 : vector<2x64xf32>
    %c624_185 = arith.constant 624 : index
    %c0_186 = arith.constant 0 : index
    %618 = vector.load %arg3[%c624_185, %c0_186] : memref<728x256xf32, #tpu.memory_space<vmem>>, vector<1x64xf32>
    %c632_187 = arith.constant 632 : index
    %c0_188 = arith.constant 0 : index
    %619 = vector.load %arg3[%c632_187, %c0_188] : memref<728x256xf32, #tpu.memory_space<vmem>>, vector<1x64xf32>
    %cst_189 = arith.constant dense<0.000000e+00> : vector<32xf32>
    %620 = vector.multi_reduction <add>, %342, %cst_189 [1] : vector<32x64xf32> to vector<32xf32>
    %621 = vector.shape_cast %620 : vector<32xf32> to vector<32x1xf32>
    %cst_190 = arith.constant 6.400000e+01 : f32
    %622 = vector.broadcast %cst_190 : f32 to vector<32x1xf32>
    %623 = arith.divf %621, %622 : vector<32x1xf32>
    %624 = vector.broadcast %623 : vector<32x1xf32> to vector<32x64xf32>
    %625 = arith.subf %342, %624 : vector<32x64xf32>
    %626 = arith.mulf %625, %625 : vector<32x64xf32>
    %cst_191 = arith.constant dense<0.000000e+00> : vector<32xf32>
    %627 = vector.multi_reduction <add>, %626, %cst_191 [1] : vector<32x64xf32> to vector<32xf32>
    %628 = vector.shape_cast %627 : vector<32xf32> to vector<32x1xf32>
    %cst_192 = arith.constant 6.400000e+01 : f32
    %629 = vector.broadcast %cst_192 : f32 to vector<32x1xf32>
    %630 = arith.divf %628, %629 : vector<32x1xf32>
    %cst_193 = arith.constant 9.99999997E-7 : f32
    %631 = vector.broadcast %cst_193 : f32 to vector<32x1xf32>
    %632 = arith.addf %630, %631 : vector<32x1xf32>
    %633 = math.rsqrt %632 : vector<32x1xf32>
    %634 = vector.broadcast %633 : vector<32x1xf32> to vector<32x64xf32>
    %635 = arith.mulf %625, %634 : vector<32x64xf32>
    %636 = vector.broadcast %618 : vector<1x64xf32> to vector<32x64xf32>
    %637 = arith.mulf %635, %636 : vector<32x64xf32>
    %638 = vector.broadcast %619 : vector<1x64xf32> to vector<32x64xf32>
    %639 = arith.addf %637, %638 : vector<32x64xf32>
    %c2112 = arith.constant 2112 : index
    %c0_194 = arith.constant 0 : index
    %640 = vector.load %arg2[%c2112, %c0_194] : memref<2624x256xbf16, #tpu.memory_space<vmem>>, vector<64x64xbf16>
    %641 = arith.truncf %617 : vector<2x64xf32> to vector<2x64xbf16>
    %cst_195 = arith.constant dense<0.000000e+00> : vector<2x64xf32>
    %642 = tpu.matmul %641, %640, %cst_195 {dimension_numbers = #tpu.dot_dimension_numbers<[1], [0], [0], [1], [0, 0, 1, 1], [], []>} : vector<2x64xbf16>, vector<64x64xbf16>, vector<2x64xf32> -> vector<2x64xf32>
    %c640_196 = arith.constant 640 : index
    %c0_197 = arith.constant 0 : index
    %643 = vector.load %arg3[%c640_196, %c0_197] : memref<728x256xf32, #tpu.memory_space<vmem>>, vector<1x64xf32>
    %644 = vector.broadcast %643 : vector<1x64xf32> to vector<2x64xf32>
    %645 = arith.addf %642, %644 : vector<2x64xf32>
    %c2176 = arith.constant 2176 : index
    %c0_198 = arith.constant 0 : index
    %646 = vector.load %arg2[%c2176, %c0_198] : memref<2624x256xbf16, #tpu.memory_space<vmem>>, vector<64x128xbf16>
    %647 = arith.truncf %617 : vector<2x64xf32> to vector<2x64xbf16>
    %cst_199 = arith.constant dense<0.000000e+00> : vector<2x128xf32>
    %648 = tpu.matmul %647, %646, %cst_199 {dimension_numbers = #tpu.dot_dimension_numbers<[1], [0], [0], [1], [0, 0, 1, 1], [], []>} : vector<2x64xbf16>, vector<64x128xbf16>, vector<2x128xf32> -> vector<2x128xf32>
    %c648 = arith.constant 648 : index
    %c0_200 = arith.constant 0 : index
    %649 = vector.load %arg3[%c648, %c0_200] : memref<728x256xf32, #tpu.memory_space<vmem>>, vector<1x128xf32>
    %650 = vector.broadcast %649 : vector<1x128xf32> to vector<2x128xf32>
    %651 = arith.addf %648, %650 : vector<2x128xf32>
    %c2176_201 = arith.constant 2176 : index
    %c0_202 = arith.constant 0 : index
    %652 = vector.load %arg2[%c2176_201, %c0_202] : memref<2624x256xbf16, #tpu.memory_space<vmem>>, vector<64x128xbf16>
    %653 = arith.truncf %639 : vector<32x64xf32> to vector<32x64xbf16>
    %cst_203 = arith.constant dense<0.000000e+00> : vector<32x128xf32>
    %654 = tpu.matmul %653, %652, %cst_203 {dimension_numbers = #tpu.dot_dimension_numbers<[1], [0], [0], [1], [0, 0, 1, 1], [], []>} : vector<32x64xbf16>, vector<64x128xbf16>, vector<32x128xf32> -> vector<32x128xf32>
    %c648_204 = arith.constant 648 : index
    %c0_205 = arith.constant 0 : index
    %655 = vector.load %arg3[%c648_204, %c0_205] : memref<728x256xf32, #tpu.memory_space<vmem>>, vector<1x128xf32>
    %656 = vector.broadcast %655 : vector<1x128xf32> to vector<32x128xf32>
    %657 = arith.addf %654, %656 : vector<32x128xf32>
    %658 = vector.extract_strided_slice %645 {offsets = [0, 0], sizes = [2, 16], strides = [1, 1]} : vector<2x64xf32> to vector<2x16xf32>
    %659 = vector.extract_strided_slice %651 {offsets = [0, 0], sizes = [2, 16], strides = [1, 1]} : vector<2x128xf32> to vector<2x16xf32>
    %660 = vector.extract_strided_slice %651 {offsets = [0, 64], sizes = [2, 16], strides = [1, 1]} : vector<2x128xf32> to vector<2x16xf32>
    %661 = vector.extract_strided_slice %657 {offsets = [0, 0], sizes = [32, 16], strides = [1, 1]} : vector<32x128xf32> to vector<32x16xf32>
    %662 = vector.extract_strided_slice %657 {offsets = [0, 64], sizes = [32, 16], strides = [1, 1]} : vector<32x128xf32> to vector<32x16xf32>
    %663 = arith.mulf %658, %659 : vector<2x16xf32>
    %cst_206 = arith.constant dense<0.000000e+00> : vector<2xf32>
    %664 = vector.multi_reduction <add>, %663, %cst_206 [1] : vector<2x16xf32> to vector<2xf32>
    %665 = vector.shape_cast %664 : vector<2xf32> to vector<2x1xf32>
    %666 = arith.truncf %658 : vector<2x16xf32> to vector<2x16xbf16>
    %667 = arith.truncf %661 : vector<32x16xf32> to vector<32x16xbf16>
    %cst_207 = arith.constant dense<0.000000e+00> : vector<2x32xf32>
    %668 = tpu.matmul %666, %667, %cst_207 {dimension_numbers = #tpu.dot_dimension_numbers<[1], [1], [0], [0], [0, 0, 1, 0], [], []>} : vector<2x16xbf16>, vector<32x16xbf16>, vector<2x32xf32> -> vector<2x32xf32>
    %669 = arith.addf %668, %343 : vector<2x32xf32>
    %cst_208 = arith.constant dense<0xFF800000> : vector<2xf32>
    %670 = vector.multi_reduction <maximumf>, %669, %cst_208 [1] : vector<2x32xf32> to vector<2xf32>
    %671 = vector.shape_cast %670 : vector<2xf32> to vector<2x1xf32>
    %672 = arith.maximumf %665, %671 : vector<2x1xf32>
    %673 = arith.subf %665, %672 : vector<2x1xf32>
    %674 = math.exp %673 : vector<2x1xf32>
    %675 = vector.broadcast %672 : vector<2x1xf32> to vector<2x32xf32>
    %676 = arith.subf %669, %675 : vector<2x32xf32>
    %677 = math.exp %676 : vector<2x32xf32>
    %cst_209 = arith.constant dense<0.000000e+00> : vector<2xf32>
    %678 = vector.multi_reduction <add>, %677, %cst_209 [1] : vector<2x32xf32> to vector<2xf32>
    %679 = vector.shape_cast %678 : vector<2xf32> to vector<2x1xf32>
    %680 = arith.addf %674, %679 : vector<2x1xf32>
    %681 = tpu.reciprocal %680 {approx = true} : vector<2x1xf32> -> vector<2x1xf32>
    %682 = vector.broadcast %674 : vector<2x1xf32> to vector<2x16xf32>
    %683 = arith.mulf %682, %660 : vector<2x16xf32>
    %684 = arith.truncf %677 : vector<2x32xf32> to vector<2x32xbf16>
    %685 = arith.truncf %662 : vector<32x16xf32> to vector<32x16xbf16>
    %cst_210 = arith.constant dense<0.000000e+00> : vector<2x16xf32>
    %686 = tpu.matmul %684, %685, %cst_210 {dimension_numbers = #tpu.dot_dimension_numbers<[1], [0], [0], [1], [0, 0, 1, 1], [], []>} : vector<2x32xbf16>, vector<32x16xbf16>, vector<2x16xf32> -> vector<2x16xf32>
    %687 = arith.addf %683, %686 : vector<2x16xf32>
    %688 = vector.broadcast %681 : vector<2x1xf32> to vector<2x16xf32>
    %689 = arith.mulf %687, %688 : vector<2x16xf32>
    %690 = vector.extract_strided_slice %645 {offsets = [0, 16], sizes = [2, 16], strides = [1, 1]} : vector<2x64xf32> to vector<2x16xf32>
    %691 = vector.extract_strided_slice %651 {offsets = [0, 16], sizes = [2, 16], strides = [1, 1]} : vector<2x128xf32> to vector<2x16xf32>
    %692 = vector.extract_strided_slice %651 {offsets = [0, 80], sizes = [2, 16], strides = [1, 1]} : vector<2x128xf32> to vector<2x16xf32>
    %693 = vector.extract_strided_slice %657 {offsets = [0, 16], sizes = [32, 16], strides = [1, 1]} : vector<32x128xf32> to vector<32x16xf32>
    %694 = vector.extract_strided_slice %657 {offsets = [0, 80], sizes = [32, 16], strides = [1, 1]} : vector<32x128xf32> to vector<32x16xf32>
    %695 = arith.mulf %690, %691 : vector<2x16xf32>
    %cst_211 = arith.constant dense<0.000000e+00> : vector<2xf32>
    %696 = vector.multi_reduction <add>, %695, %cst_211 [1] : vector<2x16xf32> to vector<2xf32>
    %697 = vector.shape_cast %696 : vector<2xf32> to vector<2x1xf32>
    %698 = arith.truncf %690 : vector<2x16xf32> to vector<2x16xbf16>
    %699 = arith.truncf %693 : vector<32x16xf32> to vector<32x16xbf16>
    %cst_212 = arith.constant dense<0.000000e+00> : vector<2x32xf32>
    %700 = tpu.matmul %698, %699, %cst_212 {dimension_numbers = #tpu.dot_dimension_numbers<[1], [1], [0], [0], [0, 0, 1, 0], [], []>} : vector<2x16xbf16>, vector<32x16xbf16>, vector<2x32xf32> -> vector<2x32xf32>
    %701 = arith.addf %700, %343 : vector<2x32xf32>
    %cst_213 = arith.constant dense<0xFF800000> : vector<2xf32>
    %702 = vector.multi_reduction <maximumf>, %701, %cst_213 [1] : vector<2x32xf32> to vector<2xf32>
    %703 = vector.shape_cast %702 : vector<2xf32> to vector<2x1xf32>
    %704 = arith.maximumf %697, %703 : vector<2x1xf32>
    %705 = arith.subf %697, %704 : vector<2x1xf32>
    %706 = math.exp %705 : vector<2x1xf32>
    %707 = vector.broadcast %704 : vector<2x1xf32> to vector<2x32xf32>
    %708 = arith.subf %701, %707 : vector<2x32xf32>
    %709 = math.exp %708 : vector<2x32xf32>
    %cst_214 = arith.constant dense<0.000000e+00> : vector<2xf32>
    %710 = vector.multi_reduction <add>, %709, %cst_214 [1] : vector<2x32xf32> to vector<2xf32>
    %711 = vector.shape_cast %710 : vector<2xf32> to vector<2x1xf32>
    %712 = arith.addf %706, %711 : vector<2x1xf32>
    %713 = tpu.reciprocal %712 {approx = true} : vector<2x1xf32> -> vector<2x1xf32>
    %714 = vector.broadcast %706 : vector<2x1xf32> to vector<2x16xf32>
    %715 = arith.mulf %714, %692 : vector<2x16xf32>
    %716 = arith.truncf %709 : vector<2x32xf32> to vector<2x32xbf16>
    %717 = arith.truncf %694 : vector<32x16xf32> to vector<32x16xbf16>
    %cst_215 = arith.constant dense<0.000000e+00> : vector<2x16xf32>
    %718 = tpu.matmul %716, %717, %cst_215 {dimension_numbers = #tpu.dot_dimension_numbers<[1], [0], [0], [1], [0, 0, 1, 1], [], []>} : vector<2x32xbf16>, vector<32x16xbf16>, vector<2x16xf32> -> vector<2x16xf32>
    %719 = arith.addf %715, %718 : vector<2x16xf32>
    %720 = vector.broadcast %713 : vector<2x1xf32> to vector<2x16xf32>
    %721 = arith.mulf %719, %720 : vector<2x16xf32>
    %722 = vector.extract_strided_slice %645 {offsets = [0, 32], sizes = [2, 16], strides = [1, 1]} : vector<2x64xf32> to vector<2x16xf32>
    %723 = vector.extract_strided_slice %651 {offsets = [0, 32], sizes = [2, 16], strides = [1, 1]} : vector<2x128xf32> to vector<2x16xf32>
    %724 = vector.extract_strided_slice %651 {offsets = [0, 96], sizes = [2, 16], strides = [1, 1]} : vector<2x128xf32> to vector<2x16xf32>
    %725 = vector.extract_strided_slice %657 {offsets = [0, 32], sizes = [32, 16], strides = [1, 1]} : vector<32x128xf32> to vector<32x16xf32>
    %726 = vector.extract_strided_slice %657 {offsets = [0, 96], sizes = [32, 16], strides = [1, 1]} : vector<32x128xf32> to vector<32x16xf32>
    %727 = arith.mulf %722, %723 : vector<2x16xf32>
    %cst_216 = arith.constant dense<0.000000e+00> : vector<2xf32>
    %728 = vector.multi_reduction <add>, %727, %cst_216 [1] : vector<2x16xf32> to vector<2xf32>
    %729 = vector.shape_cast %728 : vector<2xf32> to vector<2x1xf32>
    %730 = arith.truncf %722 : vector<2x16xf32> to vector<2x16xbf16>
    %731 = arith.truncf %725 : vector<32x16xf32> to vector<32x16xbf16>
    %cst_217 = arith.constant dense<0.000000e+00> : vector<2x32xf32>
    %732 = tpu.matmul %730, %731, %cst_217 {dimension_numbers = #tpu.dot_dimension_numbers<[1], [1], [0], [0], [0, 0, 1, 0], [], []>} : vector<2x16xbf16>, vector<32x16xbf16>, vector<2x32xf32> -> vector<2x32xf32>
    %733 = arith.addf %732, %343 : vector<2x32xf32>
    %cst_218 = arith.constant dense<0xFF800000> : vector<2xf32>
    %734 = vector.multi_reduction <maximumf>, %733, %cst_218 [1] : vector<2x32xf32> to vector<2xf32>
    %735 = vector.shape_cast %734 : vector<2xf32> to vector<2x1xf32>
    %736 = arith.maximumf %729, %735 : vector<2x1xf32>
    %737 = arith.subf %729, %736 : vector<2x1xf32>
    %738 = math.exp %737 : vector<2x1xf32>
    %739 = vector.broadcast %736 : vector<2x1xf32> to vector<2x32xf32>
    %740 = arith.subf %733, %739 : vector<2x32xf32>
    %741 = math.exp %740 : vector<2x32xf32>
    %cst_219 = arith.constant dense<0.000000e+00> : vector<2xf32>
    %742 = vector.multi_reduction <add>, %741, %cst_219 [1] : vector<2x32xf32> to vector<2xf32>
    %743 = vector.shape_cast %742 : vector<2xf32> to vector<2x1xf32>
    %744 = arith.addf %738, %743 : vector<2x1xf32>
    %745 = tpu.reciprocal %744 {approx = true} : vector<2x1xf32> -> vector<2x1xf32>
    %746 = vector.broadcast %738 : vector<2x1xf32> to vector<2x16xf32>
    %747 = arith.mulf %746, %724 : vector<2x16xf32>
    %748 = arith.truncf %741 : vector<2x32xf32> to vector<2x32xbf16>
    %749 = arith.truncf %726 : vector<32x16xf32> to vector<32x16xbf16>
    %cst_220 = arith.constant dense<0.000000e+00> : vector<2x16xf32>
    %750 = tpu.matmul %748, %749, %cst_220 {dimension_numbers = #tpu.dot_dimension_numbers<[1], [0], [0], [1], [0, 0, 1, 1], [], []>} : vector<2x32xbf16>, vector<32x16xbf16>, vector<2x16xf32> -> vector<2x16xf32>
    %751 = arith.addf %747, %750 : vector<2x16xf32>
    %752 = vector.broadcast %745 : vector<2x1xf32> to vector<2x16xf32>
    %753 = arith.mulf %751, %752 : vector<2x16xf32>
    %754 = vector.extract_strided_slice %645 {offsets = [0, 48], sizes = [2, 16], strides = [1, 1]} : vector<2x64xf32> to vector<2x16xf32>
    %755 = vector.extract_strided_slice %651 {offsets = [0, 48], sizes = [2, 16], strides = [1, 1]} : vector<2x128xf32> to vector<2x16xf32>
    %756 = vector.extract_strided_slice %651 {offsets = [0, 112], sizes = [2, 16], strides = [1, 1]} : vector<2x128xf32> to vector<2x16xf32>
    %757 = vector.extract_strided_slice %657 {offsets = [0, 48], sizes = [32, 16], strides = [1, 1]} : vector<32x128xf32> to vector<32x16xf32>
    %758 = vector.extract_strided_slice %657 {offsets = [0, 112], sizes = [32, 16], strides = [1, 1]} : vector<32x128xf32> to vector<32x16xf32>
    %759 = arith.mulf %754, %755 : vector<2x16xf32>
    %cst_221 = arith.constant dense<0.000000e+00> : vector<2xf32>
    %760 = vector.multi_reduction <add>, %759, %cst_221 [1] : vector<2x16xf32> to vector<2xf32>
    %761 = vector.shape_cast %760 : vector<2xf32> to vector<2x1xf32>
    %762 = arith.truncf %754 : vector<2x16xf32> to vector<2x16xbf16>
    %763 = arith.truncf %757 : vector<32x16xf32> to vector<32x16xbf16>
    %cst_222 = arith.constant dense<0.000000e+00> : vector<2x32xf32>
    %764 = tpu.matmul %762, %763, %cst_222 {dimension_numbers = #tpu.dot_dimension_numbers<[1], [1], [0], [0], [0, 0, 1, 0], [], []>} : vector<2x16xbf16>, vector<32x16xbf16>, vector<2x32xf32> -> vector<2x32xf32>
    %765 = arith.addf %764, %343 : vector<2x32xf32>
    %cst_223 = arith.constant dense<0xFF800000> : vector<2xf32>
    %766 = vector.multi_reduction <maximumf>, %765, %cst_223 [1] : vector<2x32xf32> to vector<2xf32>
    %767 = vector.shape_cast %766 : vector<2xf32> to vector<2x1xf32>
    %768 = arith.maximumf %761, %767 : vector<2x1xf32>
    %769 = arith.subf %761, %768 : vector<2x1xf32>
    %770 = math.exp %769 : vector<2x1xf32>
    %771 = vector.broadcast %768 : vector<2x1xf32> to vector<2x32xf32>
    %772 = arith.subf %765, %771 : vector<2x32xf32>
    %773 = math.exp %772 : vector<2x32xf32>
    %cst_224 = arith.constant dense<0.000000e+00> : vector<2xf32>
    %774 = vector.multi_reduction <add>, %773, %cst_224 [1] : vector<2x32xf32> to vector<2xf32>
    %775 = vector.shape_cast %774 : vector<2xf32> to vector<2x1xf32>
    %776 = arith.addf %770, %775 : vector<2x1xf32>
    %777 = tpu.reciprocal %776 {approx = true} : vector<2x1xf32> -> vector<2x1xf32>
    %778 = vector.broadcast %770 : vector<2x1xf32> to vector<2x16xf32>
    %779 = arith.mulf %778, %756 : vector<2x16xf32>
    %780 = arith.truncf %773 : vector<2x32xf32> to vector<2x32xbf16>
    %781 = arith.truncf %758 : vector<32x16xf32> to vector<32x16xbf16>
    %cst_225 = arith.constant dense<0.000000e+00> : vector<2x16xf32>
    %782 = tpu.matmul %780, %781, %cst_225 {dimension_numbers = #tpu.dot_dimension_numbers<[1], [0], [0], [1], [0, 0, 1, 1], [], []>} : vector<2x32xbf16>, vector<32x16xbf16>, vector<2x16xf32> -> vector<2x16xf32>
    %783 = arith.addf %779, %782 : vector<2x16xf32>
    %784 = vector.broadcast %777 : vector<2x1xf32> to vector<2x16xf32>
    %785 = arith.mulf %783, %784 : vector<2x16xf32>
    %786 = tpu.concatenate %689, %721, %753, %785 in 1 : vector<2x16xf32>, vector<2x16xf32>, vector<2x16xf32>, vector<2x16xf32> -> vector<2x64xf32>
    %c664 = arith.constant 664 : index
    %c0_226 = arith.constant 0 : index
    %787 = vector.load %arg3[%c664, %c0_226] : memref<728x256xf32, #tpu.memory_space<vmem>>, vector<1x64xf32>
    %c2240 = arith.constant 2240 : index
    %c0_227 = arith.constant 0 : index
    %788 = vector.load %arg2[%c2240, %c0_227] : memref<2624x256xbf16, #tpu.memory_space<vmem>>, vector<64x64xbf16>
    %789 = arith.truncf %786 : vector<2x64xf32> to vector<2x64xbf16>
    %cst_228 = arith.constant dense<0.000000e+00> : vector<2x64xf32>
    %790 = tpu.matmul %789, %788, %cst_228 {dimension_numbers = #tpu.dot_dimension_numbers<[1], [0], [0], [1], [0, 0, 1, 1], [], []>} : vector<2x64xbf16>, vector<64x64xbf16>, vector<2x64xf32> -> vector<2x64xf32>
    %c656 = arith.constant 656 : index
    %c0_229 = arith.constant 0 : index
    %791 = vector.load %arg3[%c656, %c0_229] : memref<728x256xf32, #tpu.memory_space<vmem>>, vector<1x64xf32>
    %792 = vector.broadcast %791 : vector<1x64xf32> to vector<2x64xf32>
    %793 = arith.addf %790, %792 : vector<2x64xf32>
    %794 = vector.broadcast %787 : vector<1x64xf32> to vector<2x64xf32>
    %795 = arith.mulf %794, %793 : vector<2x64xf32>
    %796 = arith.addf %595, %795 : vector<2x64xf32>
    %c672 = arith.constant 672 : index
    %c0_230 = arith.constant 0 : index
    %797 = vector.load %arg3[%c672, %c0_230] : memref<728x256xf32, #tpu.memory_space<vmem>>, vector<1x64xf32>
    %c680 = arith.constant 680 : index
    %c0_231 = arith.constant 0 : index
    %798 = vector.load %arg3[%c680, %c0_231] : memref<728x256xf32, #tpu.memory_space<vmem>>, vector<1x64xf32>
    %cst_232 = arith.constant dense<0.000000e+00> : vector<2xf32>
    %799 = vector.multi_reduction <add>, %796, %cst_232 [1] : vector<2x64xf32> to vector<2xf32>
    %800 = vector.shape_cast %799 : vector<2xf32> to vector<2x1xf32>
    %cst_233 = arith.constant 6.400000e+01 : f32
    %801 = vector.broadcast %cst_233 : f32 to vector<2x1xf32>
    %802 = arith.divf %800, %801 : vector<2x1xf32>
    %803 = vector.broadcast %802 : vector<2x1xf32> to vector<2x64xf32>
    %804 = arith.subf %796, %803 : vector<2x64xf32>
    %805 = arith.mulf %804, %804 : vector<2x64xf32>
    %cst_234 = arith.constant dense<0.000000e+00> : vector<2xf32>
    %806 = vector.multi_reduction <add>, %805, %cst_234 [1] : vector<2x64xf32> to vector<2xf32>
    %807 = vector.shape_cast %806 : vector<2xf32> to vector<2x1xf32>
    %cst_235 = arith.constant 6.400000e+01 : f32
    %808 = vector.broadcast %cst_235 : f32 to vector<2x1xf32>
    %809 = arith.divf %807, %808 : vector<2x1xf32>
    %cst_236 = arith.constant 9.99999997E-7 : f32
    %810 = vector.broadcast %cst_236 : f32 to vector<2x1xf32>
    %811 = arith.addf %809, %810 : vector<2x1xf32>
    %812 = math.rsqrt %811 : vector<2x1xf32>
    %813 = vector.broadcast %812 : vector<2x1xf32> to vector<2x64xf32>
    %814 = arith.mulf %804, %813 : vector<2x64xf32>
    %815 = vector.broadcast %797 : vector<1x64xf32> to vector<2x64xf32>
    %816 = arith.mulf %814, %815 : vector<2x64xf32>
    %817 = vector.broadcast %798 : vector<1x64xf32> to vector<2x64xf32>
    %818 = arith.addf %816, %817 : vector<2x64xf32>
    %c2304 = arith.constant 2304 : index
    %c0_237 = arith.constant 0 : index
    %819 = vector.load %arg2[%c2304, %c0_237] : memref<2624x256xbf16, #tpu.memory_space<vmem>>, vector<64x256xbf16>
    %820 = arith.truncf %818 : vector<2x64xf32> to vector<2x64xbf16>
    %cst_238 = arith.constant dense<0.000000e+00> : vector<2x256xf32>
    %821 = tpu.matmul %820, %819, %cst_238 {dimension_numbers = #tpu.dot_dimension_numbers<[1], [0], [0], [1], [0, 0, 1, 1], [], []>} : vector<2x64xbf16>, vector<64x256xbf16>, vector<2x256xf32> -> vector<2x256xf32>
    %c688 = arith.constant 688 : index
    %c0_239 = arith.constant 0 : index
    %822 = vector.load %arg3[%c688, %c0_239] : memref<728x256xf32, #tpu.memory_space<vmem>>, vector<1x256xf32>
    %823 = vector.broadcast %822 : vector<1x256xf32> to vector<2x256xf32>
    %824 = arith.addf %821, %823 : vector<2x256xf32>
    %825 = arith.mulf %824, %824 : vector<2x256xf32>
    %826 = arith.mulf %824, %825 : vector<2x256xf32>
    %cst_240 = arith.constant 4.471500e-02 : f32
    %827 = vector.broadcast %cst_240 : f32 to vector<2x256xf32>
    %828 = arith.mulf %827, %826 : vector<2x256xf32>
    %829 = arith.addf %824, %828 : vector<2x256xf32>
    %cst_241 = arith.constant 0.797884583 : f32
    %830 = vector.broadcast %cst_241 : f32 to vector<2x256xf32>
    %831 = arith.mulf %830, %829 : vector<2x256xf32>
    %832 = math.tanh %831 : vector<2x256xf32>
    %cst_242 = arith.constant 1.000000e+00 : f32
    %833 = vector.broadcast %cst_242 : f32 to vector<2x256xf32>
    %834 = arith.addf %833, %832 : vector<2x256xf32>
    %cst_243 = arith.constant 5.000000e-01 : f32
    %835 = vector.broadcast %cst_243 : f32 to vector<2x256xf32>
    %836 = arith.mulf %835, %834 : vector<2x256xf32>
    %837 = arith.mulf %824, %836 : vector<2x256xf32>
    %c2368 = arith.constant 2368 : index
    %c0_244 = arith.constant 0 : index
    %838 = vector.load %arg2[%c2368, %c0_244] : memref<2624x256xbf16, #tpu.memory_space<vmem>>, vector<256x64xbf16>
    %839 = arith.truncf %837 : vector<2x256xf32> to vector<2x256xbf16>
    %cst_245 = arith.constant dense<0.000000e+00> : vector<2x64xf32>
    %840 = tpu.matmul %839, %838, %cst_245 {dimension_numbers = #tpu.dot_dimension_numbers<[1], [0], [0], [1], [0, 0, 1, 1], [], []>} : vector<2x256xbf16>, vector<256x64xbf16>, vector<2x64xf32> -> vector<2x64xf32>
    %c696 = arith.constant 696 : index
    %c0_246 = arith.constant 0 : index
    %841 = vector.load %arg3[%c696, %c0_246] : memref<728x256xf32, #tpu.memory_space<vmem>>, vector<1x64xf32>
    %842 = vector.broadcast %841 : vector<1x64xf32> to vector<2x64xf32>
    %843 = arith.addf %840, %842 : vector<2x64xf32>
    %c704 = arith.constant 704 : index
    %c0_247 = arith.constant 0 : index
    %844 = vector.load %arg3[%c704, %c0_247] : memref<728x256xf32, #tpu.memory_space<vmem>>, vector<1x64xf32>
    %845 = vector.broadcast %844 : vector<1x64xf32> to vector<2x64xf32>
    %846 = arith.mulf %845, %843 : vector<2x64xf32>
    %847 = arith.addf %796, %846 : vector<2x64xf32>
    %c712 = arith.constant 712 : index
    %c0_248 = arith.constant 0 : index
    %848 = vector.load %arg3[%c712, %c0_248] : memref<728x256xf32, #tpu.memory_space<vmem>>, vector<1x64xf32>
    %c720 = arith.constant 720 : index
    %c0_249 = arith.constant 0 : index
    %849 = vector.load %arg3[%c720, %c0_249] : memref<728x256xf32, #tpu.memory_space<vmem>>, vector<1x64xf32>
    %cst_250 = arith.constant dense<0.000000e+00> : vector<32xf32>
    %850 = vector.multi_reduction <add>, %342, %cst_250 [1] : vector<32x64xf32> to vector<32xf32>
    %851 = vector.shape_cast %850 : vector<32xf32> to vector<32x1xf32>
    %cst_251 = arith.constant 6.400000e+01 : f32
    %852 = vector.broadcast %cst_251 : f32 to vector<32x1xf32>
    %853 = arith.divf %851, %852 : vector<32x1xf32>
    %854 = vector.broadcast %853 : vector<32x1xf32> to vector<32x64xf32>
    %855 = arith.subf %342, %854 : vector<32x64xf32>
    %856 = arith.mulf %855, %855 : vector<32x64xf32>
    %cst_252 = arith.constant dense<0.000000e+00> : vector<32xf32>
    %857 = vector.multi_reduction <add>, %856, %cst_252 [1] : vector<32x64xf32> to vector<32xf32>
    %858 = vector.shape_cast %857 : vector<32xf32> to vector<32x1xf32>
    %cst_253 = arith.constant 6.400000e+01 : f32
    %859 = vector.broadcast %cst_253 : f32 to vector<32x1xf32>
    %860 = arith.divf %858, %859 : vector<32x1xf32>
    %cst_254 = arith.constant 9.99999997E-7 : f32
    %861 = vector.broadcast %cst_254 : f32 to vector<32x1xf32>
    %862 = arith.addf %860, %861 : vector<32x1xf32>
    %863 = math.rsqrt %862 : vector<32x1xf32>
    %864 = vector.broadcast %863 : vector<32x1xf32> to vector<32x64xf32>
    %865 = arith.mulf %855, %864 : vector<32x64xf32>
    %866 = vector.broadcast %848 : vector<1x64xf32> to vector<32x64xf32>
    %867 = arith.mulf %865, %866 : vector<32x64xf32>
    %868 = vector.broadcast %849 : vector<1x64xf32> to vector<32x64xf32>
    %869 = arith.addf %867, %868 : vector<32x64xf32>
    %c0_255 = arith.constant 0 : index
    %c0_256 = arith.constant 0 : index
    %870 = vector.load %arg4[%c0_255, %c0_256] : memref<32x64xf32, #tpu.memory_space<vmem>>, vector<32x64xf32>
    tpu.vector_store %arg4[%c0_255, %c0_256], %869 {strides = array<i32>} : memref<32x64xf32, #tpu.memory_space<vmem>>, vector<32x64xf32>,
    %c712_257 = arith.constant 712 : index
    %c0_258 = arith.constant 0 : index
    %871 = vector.load %arg3[%c712_257, %c0_258] : memref<728x256xf32, #tpu.memory_space<vmem>>, vector<1x64xf32>
    %c720_259 = arith.constant 720 : index
    %c0_260 = arith.constant 0 : index
    %872 = vector.load %arg3[%c720_259, %c0_260] : memref<728x256xf32, #tpu.memory_space<vmem>>, vector<1x64xf32>
    %cst_261 = arith.constant dense<0.000000e+00> : vector<2xf32>
    %873 = vector.multi_reduction <add>, %847, %cst_261 [1] : vector<2x64xf32> to vector<2xf32>
    %874 = vector.shape_cast %873 : vector<2xf32> to vector<2x1xf32>
    %cst_262 = arith.constant 6.400000e+01 : f32
    %875 = vector.broadcast %cst_262 : f32 to vector<2x1xf32>
    %876 = arith.divf %874, %875 : vector<2x1xf32>
    %877 = vector.broadcast %876 : vector<2x1xf32> to vector<2x64xf32>
    %878 = arith.subf %847, %877 : vector<2x64xf32>
    %879 = arith.mulf %878, %878 : vector<2x64xf32>
    %cst_263 = arith.constant dense<0.000000e+00> : vector<2xf32>
    %880 = vector.multi_reduction <add>, %879, %cst_263 [1] : vector<2x64xf32> to vector<2xf32>
    %881 = vector.shape_cast %880 : vector<2xf32> to vector<2x1xf32>
    %cst_264 = arith.constant 6.400000e+01 : f32
    %882 = vector.broadcast %cst_264 : f32 to vector<2x1xf32>
    %883 = arith.divf %881, %882 : vector<2x1xf32>
    %cst_265 = arith.constant 9.99999997E-7 : f32
    %884 = vector.broadcast %cst_265 : f32 to vector<2x1xf32>
    %885 = arith.addf %883, %884 : vector<2x1xf32>
    %886 = math.rsqrt %885 : vector<2x1xf32>
    %887 = vector.broadcast %886 : vector<2x1xf32> to vector<2x64xf32>
    %888 = arith.mulf %878, %887 : vector<2x64xf32>
    %889 = vector.broadcast %871 : vector<1x64xf32> to vector<2x64xf32>
    %890 = arith.mulf %888, %889 : vector<2x64xf32>
    %891 = vector.broadcast %872 : vector<1x64xf32> to vector<2x64xf32>
    %892 = arith.addf %890, %891 : vector<2x64xf32>
    %c0_266 = arith.constant 0 : index
    %c0_267 = arith.constant 0 : index
    %893 = vector.load %arg5[%c0_266, %c0_267] : memref<2x64xf32, #tpu.memory_space<vmem>>, vector<2x64xf32>
    tpu.vector_store %arg5[%c0_266, %c0_267], %892 {strides = array<i32>} : memref<2x64xf32, #tpu.memory_space<vmem>>, vector<2x64xf32>,
    return
  }
  func.func @transform_0(%arg0: i32) -> (i32, i32) {
    %c0_i32 = arith.constant 0 : i32
    %c0_i32_0 = arith.constant 0 : i32
    %c0_i32_1 = arith.constant 0 : i32
    return %c0_i32, %c0_i32_0 : i32, i32
  }
  func.func @transform_1(%arg0: i32) -> (i32, i32) {
    %c0_i32 = arith.constant 0 : i32
    %c0_i32_0 = arith.constant 0 : i32
    %c0_i32_1 = arith.constant 0 : i32
    return %c0_i32, %c0_i32_0 : i32, i32
  }
  func.func @transform_2(%arg0: i32) -> (i32, i32) {
    %c0_i32 = arith.constant 0 : i32
    %c0_i32_0 = arith.constant 0 : i32
    %c0_i32_1 = arith.constant 0 : i32
    return %c0_i32, %c0_i32_0 : i32, i32
  }
  func.func @transform_3(%arg0: i32) -> (i32, i32) {
    %c0_i32 = arith.constant 0 : i32
    %c0_i32_0 = arith.constant 0 : i32
    %c0_i32_1 = arith.constant 0 : i32
    return %c0_i32, %c0_i32_0 : i32, i32
  }
  func.func @transform_4(%arg0: i32) -> (i32, i32) {
    %c0_i32 = arith.constant 0 : i32
    %c0_i32_0 = arith.constant 0 : i32
    %c0_i32_1 = arith.constant 0 : i32
    return %c0_i32, %c0_i32_0 : i32, i32
  }
}

</mosaic_0001>

<bundles_post_ra>
// kernel: tile.25
= control target key start
LH: loop header
LB: loop body
LE: loop exit
PB: predicated region body
PF: predicated region fallthrough
CT: control target
= control target key end

     0   :  { %vm7_vm0 = vcmask 130048   ;;  %s37_s8 = smov 16   ;;  %s38_s9 = smov 32   ;;  %vm13_vm1 = vcmask 523648   ;;  %vm19_vm2 = vcmask 392448   ;;  %vm25_vm3 = vcmask 261248   ;;  %s55_s0 = inlined_call_operand.vmem [shape: f32[4,16], index: 0, kind: input, shape index: {}]   ;;  %s56_s1 = inlined_call_operand.vmem [shape: f32[64], index: 1, kind: output, shape index: {}]  }
   0x1   :  { %v4_v0 = vld [vmem:[%s55_s0] sm:$0xf]  ;;  %s36_s0 = smov 48  }
   0x2   :  { %5 = vst [vmem:[#allocation1] sm:$0xf] %v4_v0 }
   0x9   :  { %v10_v1 = vld [vmem:[#allocation1 + $0x3] sm:$0x1]   ;;  %v22_v2 = vld [vmem:[#allocation1 + $0x1] sm:$0x1]   ;;  %v6_v3 = vld [vmem:[#allocation1] sm:$0x1]  }
   0xa   :  { %11 = vrot.lane.b32.xlu0 %v10_v1, %s36_s0  ;;  %23 = vrot.lane.b32.xlu1 %v22_v2, %s37_s8  ;;  %v16_v4 = vld [vmem:[#allocation1 + $0x2] sm:$0x1]   ;;  %8 = vst.msk [vmem:[#allocation0] sm:$0x1] %vm7_vm0, %v6_v3  }
   0xe   :  { %17 = vrot.lane.b32.xlu0 %v16_v4, %s38_s9 }
  0x7c   :  { %v12_v5 = vpop.permute.xlu0 %11   ;;  %v24_v6 = vpop.permute.xlu1 %23  }
  0x7d   :  { %14 = vst.msk [vmem:[#allocation0] sm:$0x1] %vm13_vm1, %v12_v5  }
  0x80   :  { %v18_v7 = vpop.permute.xlu0 %17  }
  0x81   :  { %20 = vst.msk [vmem:[#allocation0] sm:$0x1] %vm19_vm2, %v18_v7  }
  0x82   :  { %26 = vst.msk [vmem:[#allocation0] sm:$0x1] %vm25_vm3, %v24_v6  }
  0x89   :  { %v30_v8 = vld [vmem:[#allocation0] sm:$0x1] }
  0x8a   :  { %32 = vst [vmem:[%s56_s1] sm:$0x1] %v30_v8 }

// kernel: tile.26
= control target key start
LH: loop header
LB: loop body
LE: loop exit
PB: predicated region body
PF: predicated region fallthrough
CT: control target
= control target key end

     0   :  { %s22_s0 = inlined_call_operand.vmem [shape: f32[64], index: 0, kind: input, shape index: {}]   ;;  %s23_s1 = inlined_call_operand.vmem [shape: f32[2,64], index: 1, kind: output, shape index: {}]  }
   0x1   :  { %v4_v0 = vld [vmem:[%s22_s0] ss:$0 sm:$0xff] }
   0x2   :  { %5 = vst [vmem:[%s23_s1] sm:$0x3] %v4_v0 }

// kernel: tile.0
= control target key start
LH: loop header
LB: loop body
LE: loop exit
PB: predicated region body
PF: predicated region fallthrough
CT: control target
= control target key end

     0   :  { %s706_s8 = smov 125   ;;  %s707_s9 = smov 126   ;;  %vm7_vm0 = vcmask 7168   ;;  %s1293_s0 = inlined_call_operand.vmem [shape: f32[2,64], index: 0, kind: input, shape index: {}]   ;;  %s1294_s1 = inlined_call_operand.vmem [shape: f32[128,1], index: 1, kind: output, shape index: {}]  }
   0x1   :  { %v4_v0 = vld [vmem:[%s1293_s0] sm:$0x3]  ;;  %s705_s0 = smov 127   ;;  %s708_s10 = smov 124  }
   0x2   :  { %5 = vst [vmem:[#allocation0] sm:$0x3] %v4_v0  ;;  %s709_s11 = smov 123   ;;  %s710_s12 = smov 122  }
   0x3   :  { %s711_s13 = smov 121   ;;  %s712_s14 = smov 120  }
   0x4   :  { %s713_s15 = smov 119   ;;  %s714_s16 = smov 118  }
   0x5   :  { %s715_s17 = smov 117   ;;  %s716_s18 = smov 116  }
   0x6   :  { %s717_s19 = smov 115   ;;  %s718_s20 = smov 114  }
   0x7   :  { %s719_s21 = smov 113   ;;  %s720_s22 = smov 112  }
   0x8   :  { %s721_s23 = smov 111   ;;  %s722_s24 = smov 110  }
   0x9   :  { %v11_v1 = vld [vmem:[#allocation0] sm:$0x3]   ;;  %s723_s25 = smov 109   ;;  %s724_s26 = smov 108  }
   0xa   :  { %v27_v2 = vld [vmem:[#allocation0] sm:$0x3]   ;;  %12 = vrot.lane.b32.xlu0 %v11_v1, %s705_s0  ;;  %s725_s27 = smov 107   ;;  %s726_s28 = smov 106  }
   0xb   :  { %28 = vrot.lane.b32.xlu1 %v27_v2, %s706_s8  ;;  %v19_v3 = vld [vmem:[#allocation0] sm:$0x3]   ;;  %s727_s29 = smov 105   ;;  %s728_s30 = smov 104  }
   0xc   :  { %v35_v4 = vld [vmem:[#allocation0] sm:$0x3]   ;;  %s729_s2 = smov 103   ;;  %s730_s3 = smov 102  }
   0xd   :  { %v43_v5 = vld [vmem:[#allocation0] sm:$0x3]   ;;  %s731_s4 = smov 101   ;;  %s732_s5 = smov 100  }
   0xe   :  { %20 = vrot.lane.b32.xlu0 %v19_v3, %s707_s9  ;;  %v51_v6 = vld [vmem:[#allocation0] sm:$0x3]   ;;  %s733_s6 = smov 99   ;;  %s734_s7 = smov 98  }
   0xf   :  { %36 = vrot.lane.b32.xlu1 %v35_v4, %s708_s10  ;;  %v59_v7 = vld [vmem:[#allocation0] sm:$0x3]   ;;  %s735_s0 = smov 97   ;;  %s736_s8 = smov 96  }
  0x10   :  { %v67_v8 = vld [vmem:[#allocation0] sm:$0x3]   ;;  %s737_s9 = smov 95   ;;  %s738_s10 = smov 94  }
  0x11   :  { %v75_v9 = vld [vmem:[#allocation0] sm:$0x3]  }
  0x12   :  { %44 = vrot.lane.b32.xlu0 %v43_v5, %s709_s11  ;;  %v83_v10 = vld [vmem:[#allocation0] sm:$0x3]   ;;  %s739_s11 = smov 93  }
  0x13   :  { %52 = vrot.lane.b32.xlu1 %v51_v6, %s710_s12  ;;  %v91_v11 = vld [vmem:[#allocation0] sm:$0x3]   ;;  %s740_s12 = smov 92  }
  0x14   :  { %v99_v12 = vld [vmem:[#allocation0] sm:$0x3]  }
  0x15   :  { %v107_v13 = vld [vmem:[#allocation0] sm:$0x3]  }
  0x16   :  { %60 = vrot.lane.b32.xlu0 %v59_v7, %s711_s13  ;;  %v115_v14 = vld [vmem:[#allocation0] sm:$0x3]   ;;  %s741_s13 = smov 91  }
  0x17   :  { %68 = vrot.lane.b32.xlu1 %v67_v8, %s712_s14  ;;  %v123_v15 = vld [vmem:[#allocation0] sm:$0x3]   ;;  %s742_s14 = smov 90  }
  0x18   :  { %v131_v16 = vld [vmem:[#allocation0] sm:$0x3]  }
  0x19   :  { %v139_v17 = vld [vmem:[#allocation0] sm:$0x3]  }
  0x1a   :  { %76 = vrot.lane.b32.xlu0 %v75_v9, %s713_s15  ;;  %v147_v18 = vld [vmem:[#allocation0] sm:$0x3]   ;;  %s743_s15 = smov 89  }
  0x1b   :  { %84 = vrot.lane.b32.xlu1 %v83_v10, %s714_s16  ;;  %v155_v19 = vld [vmem:[#allocation0] sm:$0x3]   ;;  %s744_s16 = smov 88  }
  0x1c   :  { %v163_v20 = vld [vmem:[#allocation0] sm:$0x3]  }
  0x1d   :  { %v171_v21 = vld [vmem:[#allocation0] sm:$0x3]  }
  0x1e   :  { %92 = vrot.lane.b32.xlu0 %v91_v11, %s715_s17  ;;  %v179_v22 = vld [vmem:[#allocation0] sm:$0x3]   ;;  %s745_s17 = smov 87  }
  0x1f   :  { %100 = vrot.lane.b32.xlu1 %v99_v12, %s716_s18  ;;  %v187_v23 = vld [vmem:[#allocation0] sm:$0x3]   ;;  %s746_s18 = smov 86  }
  0x20   :  { %v195_v24 = vld [vmem:[#allocation0] sm:$0x3]  }
  0x21   :  { %v203_v25 = vld [vmem:[#allocation0] sm:$0x3]  }
  0x22   :  { %108 = vrot.lane.b32.xlu0 %v107_v13, %s717_s19  ;;  %v211_v26 = vld [vmem:[#allocation0] sm:$0x3]   ;;  %s747_s19 = smov 85  }
  0x23   :  { %116 = vrot.lane.b32.xlu1 %v115_v14, %s718_s20  ;;  %v219_v27 = vld [vmem:[#allocation0] sm:$0x3]   ;;  %s748_s20 = smov 84  }
  0x24   :  { %v227_v28 = vld [vmem:[#allocation0] sm:$0x3]  }
  0x25   :  { %v235_v29 = vld [vmem:[#allocation0] sm:$0x3]  }
  0x26   :  { %124 = vrot.lane.b32.xlu0 %v123_v15, %s719_s21  ;;  %v243_v30 = vld [vmem:[#allocation0] sm:$0x3]   ;;  %s749_s21 = smov 83  }
  0x27   :  { %132 = vrot.lane.b32.xlu1 %v131_v16, %s720_s22  ;;  %v251_v31 = vld [vmem:[#allocation0] sm:$0x3]   ;;  %s750_s22 = smov 82  }
  0x28   :  { %v259_v32 = vld [vmem:[#allocation0] sm:$0x3]  }
  0x29   :  { %v267_v33 = vld [vmem:[#allocation0] sm:$0x3]  }
  0x2a   :  { %140 = vrot.lane.b32.xlu0 %v139_v17, %s721_s23  ;;  %v275_v34 = vld [vmem:[#allocation0] sm:$0x3]   ;;  %s751_s23 = smov 81  }
  0x2b   :  { %148 = vrot.lane.b32.xlu1 %v147_v18, %s722_s24  ;;  %v283_v35 = vld [vmem:[#allocation0] sm:$0x3]   ;;  %s752_s24 = smov 80  }
  0x2c   :  { %v291_v36 = vld [vmem:[#allocation0] sm:$0x3]  }
  0x2d   :  { %v299_v37 = vld [vmem:[#allocation0] sm:$0x3]  }
  0x2e   :  { %156 = vrot.lane.b32.xlu0 %v155_v19, %s723_s25  ;;  %v307_v38 = vld [vmem:[#allocation0] sm:$0x3]   ;;  %s753_s25 = smov 79  }
  0x2f   :  { %164 = vrot.lane.b32.xlu1 %v163_v20, %s724_s26  ;;  %v315_v39 = vld [vmem:[#allocation0] sm:$0x3]   ;;  %s754_s26 = smov 78  }
  0x30   :  { %v323_v40 = vld [vmem:[#allocation0] sm:$0x3]  }
  0x31   :  { %v331_v41 = vld [vmem:[#allocation0] sm:$0x3]  }
  0x32   :  { %172 = vrot.lane.b32.xlu0 %v171_v21, %s725_s27  ;;  %v339_v42 = vld [vmem:[#allocation0] sm:$0x3]   ;;  %s755_s27 = smov 77  }
  0x33   :  { %180 = vrot.lane.b32.xlu1 %v179_v22, %s726_s28  ;;  %v347_v43 = vld [vmem:[#allocation0] sm:$0x3]   ;;  %s756_s28 = smov 76  }
  0x34   :  { %v355_v44 = vld [vmem:[#allocation0] sm:$0x3]  }
  0x35   :  { %v363_v45 = vld [vmem:[#allocation0] sm:$0x3]  }
  0x36   :  { %188 = vrot.lane.b32.xlu0 %v187_v23, %s727_s29  ;;  %v371_v46 = vld [vmem:[#allocation0] sm:$0x3]   ;;  %s757_s29 = smov 75  }
  0x37   :  { %196 = vrot.lane.b32.xlu1 %v195_v24, %s728_s30  ;;  %v379_v47 = vld [vmem:[#allocation0] sm:$0x3]   ;;  %s758_s30 = smov 74  }
  0x38   :  { %v387_v48 = vld [vmem:[#allocation0] sm:$0x3]  }
  0x39   :  { %v395_v49 = vld [vmem:[#allocation0] sm:$0x3]  }
  0x3a   :  { %204 = vrot.lane.b32.xlu0 %v203_v25, %s729_s2  ;;  %v403_v50 = vld [vmem:[#allocation0] sm:$0x3]   ;;  %s759_s2 = smov 73  }
  0x3b   :  { %212 = vrot.lane.b32.xlu1 %v211_v26, %s730_s3  ;;  %v411_v51 = vld [vmem:[#allocation0] sm:$0x3]   ;;  %s760_s3 = smov 72  }
  0x3c   :  { %v419_v52 = vld [vmem:[#allocation0] sm:$0x3]  }
  0x3d   :  { %v427_v53 = vld [vmem:[#allocation0] sm:$0x3]  }
  0x3e   :  { %220 = vrot.lane.b32.xlu0 %v219_v27, %s731_s4  ;;  %v435_v54 = vld [vmem:[#allocation0] sm:$0x3]  }
  0x3f   :  { %228 = vrot.lane.b32.xlu1 %v227_v28, %s732_s5  ;;  %v443_v55 = vld [vmem:[#allocation0] sm:$0x3]  }
  0x40   :  { %v451_v56 = vld [vmem:[#allocation0] sm:$0x3]  }
  0x41   :  { %v459_v57 = vld [vmem:[#allocation0] sm:$0x3]  }
  0x42   :  { %236 = vrot.lane.b32.xlu0 %v235_v29, %s733_s6  ;;  %v467_v58 = vld [vmem:[#allocation0] sm:$0x3]  }
  0x43   :  { %244 = vrot.lane.b32.xlu1 %v243_v30, %s734_s7  ;;  %v6_v59 = vld [vmem:[#allocation0] sm:$0x3]  }
  0x44   :  { %8 = vst.msk [vmem:[%s1294_s1] sm:$0x1] %vm7_vm0, %v6_v59   ;;  %515 = vst.msk [vmem:[%s1294_s1 + $0x3f] sm:$0x2] %vm7_vm0, %v6_v59   ;;  %v475_v60 = vld [vmem:[#allocation0] sm:$0x3]  }
  0x45   :  { %v483_v61 = vld [vmem:[#allocation0] sm:$0x3]  }
  0x46   :  { %252 = vrot.lane.b32.xlu0 %v251_v31, %s735_s0  ;;  %s761_s0 = smov 71   ;;  %v491_v0 = vld [vmem:[#allocation0] sm:$0x3]  }
  0x47   :  { %260 = vrot.lane.b32.xlu1 %v259_v32, %s736_s8  ;;  %s762_s8 = smov 70   ;;  %v499_v1 = vld [vmem:[#allocation0] sm:$0x3]  }
  0x48   :  { %v507_v4 = vld [vmem:[#allocation0] sm:$0x3]  }
  0x4a   :  { %268 = vrot.lane.b32.xlu0 %v267_v33, %s737_s9 }
  0x4b   :  { %276 = vrot.lane.b32.xlu1 %v275_v34, %s738_s10 }
  0x4e   :  { %284 = vrot.lane.b32.xlu0 %v283_v35, %s739_s11 }
  0x4f   :  { %292 = vrot.lane.b32.xlu1 %v291_v36, %s740_s12 }
  0x52   :  { %300 = vrot.lane.b32.xlu0 %v299_v37, %s741_s13 }
  0x53   :  { %308 = vrot.lane.b32.xlu1 %v307_v38, %s742_s14 }
  0x56   :  { %316 = vrot.lane.b32.xlu0 %v315_v39, %s743_s15 }
  0x57   :  { %324 = vrot.lane.b32.xlu1 %v323_v40, %s744_s16 }
  0x5a   :  { %332 = vrot.lane.b32.xlu0 %v331_v41, %s745_s17  ;;  %s763_s17 = smov 69  }
  0x5b   :  { %340 = vrot.lane.b32.xlu1 %v339_v42, %s746_s18  ;;  %s764_s18 = smov 68  }
  0x5e   :  { %348 = vrot.lane.b32.xlu0 %v347_v43, %s747_s19 }
  0x5f   :  { %356 = vrot.lane.b32.xlu1 %v355_v44, %s748_s20 }
  0x62   :  { %364 = vrot.lane.b32.xlu0 %v363_v45, %s749_s21 }
  0x63   :  { %372 = vrot.lane.b32.xlu1 %v371_v46, %s750_s22 }
  0x66   :  { %380 = vrot.lane.b32.xlu0 %v379_v47, %s751_s23 }
  0x67   :  { %388 = vrot.lane.b32.xlu1 %v387_v48, %s752_s24 }
  0x6a   :  { %396 = vrot.lane.b32.xlu0 %v395_v49, %s753_s25 }
  0x6b   :  { %404 = vrot.lane.b32.xlu1 %v403_v50, %s754_s26 }
  0x6e   :  { %412 = vrot.lane.b32.xlu0 %v411_v51, %s755_s27  ;;  %s765_s27 = smov 67  }
  0x6f   :  { %420 = vrot.lane.b32.xlu1 %v419_v52, %s756_s28  ;;  %s766_s28 = smov 66  }
  0x72   :  { %428 = vrot.lane.b32.xlu0 %v427_v53, %s757_s29 }
  0x73   :  { %436 = vrot.lane.b32.xlu1 %v435_v54, %s758_s30 }
  0x76   :  { %444 = vrot.lane.b32.xlu0 %v443_v55, %s759_s2 }
  0x77   :  { %452 = vrot.lane.b32.xlu1 %v451_v56, %s760_s3 }
  0x7a   :  { %460 = vrot.lane.b32.xlu0 %v459_v57, %s761_s0  ;;  %s767_s0 = smov 65  }
  0x7b   :  { %468 = vrot.lane.b32.xlu1 %v467_v58, %s762_s8 }
  0x7c   :  { %v13_v62 = vpop.permute.xlu0 %12  }
  0x7d   :  { %v29_v63 = vpop.permute.xlu1 %28   ;;  %516 = vst.msk [vmem:[%s1294_s1 + $0x1] sm:$0x1] %vm7_vm0, %v13_v62   ;;  %517 = vst.msk [vmem:[%s1294_s1 + $0x40] sm:$0x2] %vm7_vm0, %v13_v62  }
  0x7e   :  { %520 = vst.msk [vmem:[%s1294_s1 + $0x3] sm:$0x1] %vm7_vm0, %v29_v63   ;;  %521 = vst.msk [vmem:[%s1294_s1 + $0x42] sm:$0x2] %vm7_vm0, %v29_v63   ;;  %476 = vrot.lane.b32.xlu0 %v475_v60, %s763_s17 }
  0x7f   :  { %484 = vrot.lane.b32.xlu1 %v483_v61, %s764_s18 }
  0x80   :  { %v21_v2 = vpop.permute.xlu0 %20  }
  0x81   :  { %v37_v3 = vpop.permute.xlu1 %36   ;;  %518 = vst.msk [vmem:[%s1294_s1 + $0x2] sm:$0x1] %vm7_vm0, %v21_v2   ;;  %519 = vst.msk [vmem:[%s1294_s1 + $0x41] sm:$0x2] %vm7_vm0, %v21_v2  }
  0x82   :  { %522 = vst.msk [vmem:[%s1294_s1 + $0x4] sm:$0x1] %vm7_vm0, %v37_v3   ;;  %523 = vst.msk [vmem:[%s1294_s1 + $0x43] sm:$0x2] %vm7_vm0, %v37_v3   ;;  %492 = vrot.lane.b32.xlu0 %v491_v0, %s765_s27 }
  0x83   :  { %500 = vrot.lane.b32.xlu1 %v499_v1, %s766_s28 }
  0x84   :  { %v45_v5 = vpop.permute.xlu0 %44  }
  0x85   :  { %v53_v6 = vpop.permute.xlu1 %52   ;;  %524 = vst.msk [vmem:[%s1294_s1 + $0x5] sm:$0x1] %vm7_vm0, %v45_v5   ;;  %525 = vst.msk [vmem:[%s1294_s1 + $0x44] sm:$0x2] %vm7_vm0, %v45_v5  }
  0x86   :  { %526 = vst.msk [vmem:[%s1294_s1 + $0x6] sm:$0x1] %vm7_vm0, %v53_v6   ;;  %527 = vst.msk [vmem:[%s1294_s1 + $0x45] sm:$0x2] %vm7_vm0, %v53_v6   ;;  %508 = vrot.lane.b32.xlu0 %v507_v4, %s767_s0 }
  0x88   :  { %v61_v7 = vpop.permute.xlu0 %60  }
  0x89   :  { %v69_v8 = vpop.permute.xlu1 %68   ;;  %528 = vst.msk [vmem:[%s1294_s1 + $0x7] sm:$0x1] %vm7_vm0, %v61_v7   ;;  %529 = vst.msk [vmem:[%s1294_s1 + $0x46] sm:$0x2] %vm7_vm0, %v61_v7  }
  0x8a   :  { %530 = vst.msk [vmem:[%s1294_s1 + $0x8] sm:$0x1] %vm7_vm0, %v69_v8   ;;  %531 = vst.msk [vmem:[%s1294_s1 + $0x47] sm:$0x2] %vm7_vm0, %v69_v8  }
  0x8c   :  { %v77_v9 = vpop.permute.xlu0 %76  }
  0x8d   :  { %v85_v10 = vpop.permute.xlu1 %84   ;;  %532 = vst.msk [vmem:[%s1294_s1 + $0x9] sm:$0x1] %vm7_vm0, %v77_v9   ;;  %533 = vst.msk [vmem:[%s1294_s1 + $0x48] sm:$0x2] %vm7_vm0, %v77_v9  }
  0x8e   :  { %534 = vst.msk [vmem:[%s1294_s1 + $0xa] sm:$0x1] %vm7_vm0, %v85_v10   ;;  %535 = vst.msk [vmem:[%s1294_s1 + $0x49] sm:$0x2] %vm7_vm0, %v85_v10  }
  0x90   :  { %v93_v11 = vpop.permute.xlu0 %92  }
  0x91   :  { %v101_v12 = vpop.permute.xlu1 %100   ;;  %536 = vst.msk [vmem:[%s1294_s1 + $0xb] sm:$0x1] %vm7_vm0, %v93_v11   ;;  %537 = vst.msk [vmem:[%s1294_s1 + $0x4a] sm:$0x2] %vm7_vm0, %v93_v11  }
  0x92   :  { %538 = vst.msk [vmem:[%s1294_s1 + $0xc] sm:$0x1] %vm7_vm0, %v101_v12   ;;  %539 = vst.msk [vmem:[%s1294_s1 + $0x4b] sm:$0x2] %vm7_vm0, %v101_v12  }
  0x94   :  { %v109_v13 = vpop.permute.xlu0 %108  }
  0x95   :  { %v117_v14 = vpop.permute.xlu1 %116   ;;  %540 = vst.msk [vmem:[%s1294_s1 + $0xd] sm:$0x1] %vm7_vm0, %v109_v13   ;;  %541 = vst.msk [vmem:[%s1294_s1 + $0x4c] sm:$0x2] %vm7_vm0, %v109_v13  }
  0x96   :  { %542 = vst.msk [vmem:[%s1294_s1 + $0xe] sm:$0x1] %vm7_vm0, %v117_v14   ;;  %543 = vst.msk [vmem:[%s1294_s1 + $0x4d] sm:$0x2] %vm7_vm0, %v117_v14  }
  0x98   :  { %v125_v15 = vpop.permute.xlu0 %124  }
  0x99   :  { %v133_v16 = vpop.permute.xlu1 %132   ;;  %544 = vst.msk [vmem:[%s1294_s1 + $0xf] sm:$0x1] %vm7_vm0, %v125_v15   ;;  %545 = vst.msk [vmem:[%s1294_s1 + $0x4e] sm:$0x2] %vm7_vm0, %v125_v15  }
  0x9a   :  { %546 = vst.msk [vmem:[%s1294_s1 + $0x10] sm:$0x1] %vm7_vm0, %v133_v16   ;;  %547 = vst.msk [vmem:[%s1294_s1 + $0x4f] sm:$0x2] %vm7_vm0, %v133_v16  }
  0x9c   :  { %v141_v17 = vpop.permute.xlu0 %140  }
  0x9d   :  { %v149_v18 = vpop.permute.xlu1 %148   ;;  %548 = vst.msk [vmem:[%s1294_s1 + $0x11] sm:$0x1] %vm7_vm0, %v141_v17   ;;  %549 = vst.msk [vmem:[%s1294_s1 + $0x50] sm:$0x2] %vm7_vm0, %v141_v17  }
  0x9e   :  { %550 = vst.msk [vmem:[%s1294_s1 + $0x12] sm:$0x1] %vm7_vm0, %v149_v18   ;;  %551 = vst.msk [vmem:[%s1294_s1 + $0x51] sm:$0x2] %vm7_vm0, %v149_v18  }
  0xa0   :  { %v157_v19 = vpop.permute.xlu0 %156  }
  0xa1   :  { %v165_v20 = vpop.permute.xlu1 %164   ;;  %552 = vst.msk [vmem:[%s1294_s1 + $0x13] sm:$0x1] %vm7_vm0, %v157_v19   ;;  %553 = vst.msk [vmem:[%s1294_s1 + $0x52] sm:$0x2] %vm7_vm0, %v157_v19  }
  0xa2   :  { %554 = vst.msk [vmem:[%s1294_s1 + $0x14] sm:$0x1] %vm7_vm0, %v165_v20   ;;  %555 = vst.msk [vmem:[%s1294_s1 + $0x53] sm:$0x2] %vm7_vm0, %v165_v20  }
  0xa4   :  { %v173_v21 = vpop.permute.xlu0 %172  }
  0xa5   :  { %v181_v22 = vpop.permute.xlu1 %180   ;;  %556 = vst.msk [vmem:[%s1294_s1 + $0x15] sm:$0x1] %vm7_vm0, %v173_v21   ;;  %557 = vst.msk [vmem:[%s1294_s1 + $0x54] sm:$0x2] %vm7_vm0, %v173_v21  }
  0xa6   :  { %558 = vst.msk [vmem:[%s1294_s1 + $0x16] sm:$0x1] %vm7_vm0, %v181_v22   ;;  %559 = vst.msk [vmem:[%s1294_s1 + $0x55] sm:$0x2] %vm7_vm0, %v181_v22  }
  0xa8   :  { %v189_v23 = vpop.permute.xlu0 %188  }
  0xa9   :  { %v197_v24 = vpop.permute.xlu1 %196   ;;  %560 = vst.msk [vmem:[%s1294_s1 + $0x17] sm:$0x1] %vm7_vm0, %v189_v23   ;;  %561 = vst.msk [vmem:[%s1294_s1 + $0x56] sm:$0x2] %vm7_vm0, %v189_v23  }
  0xaa   :  { %562 = vst.msk [vmem:[%s1294_s1 + $0x18] sm:$0x1] %vm7_vm0, %v197_v24   ;;  %563 = vst.msk [vmem:[%s1294_s1 + $0x57] sm:$0x2] %vm7_vm0, %v197_v24  }
  0xac   :  { %v205_v25 = vpop.permute.xlu0 %204  }
  0xad   :  { %v213_v26 = vpop.permute.xlu1 %212   ;;  %564 = vst.msk [vmem:[%s1294_s1 + $0x19] sm:$0x1] %vm7_vm0, %v205_v25   ;;  %565 = vst.msk [vmem:[%s1294_s1 + $0x58] sm:$0x2] %vm7_vm0, %v205_v25  }
  0xae   :  { %566 = vst.msk [vmem:[%s1294_s1 + $0x1a] sm:$0x1] %vm7_vm0, %v213_v26   ;;  %567 = vst.msk [vmem:[%s1294_s1 + $0x59] sm:$0x2] %vm7_vm0, %v213_v26  }
  0xb0   :  { %v221_v27 = vpop.permute.xlu0 %220  }
  0xb1   :  { %v229_v28 = vpop.permute.xlu1 %228   ;;  %568 = vst.msk [vmem:[%s1294_s1 + $0x1b] sm:$0x1] %vm7_vm0, %v221_v27   ;;  %569 = vst.msk [vmem:[%s1294_s1 + $0x5a] sm:$0x2] %vm7_vm0, %v221_v27  }
  0xb2   :  { %570 = vst.msk [vmem:[%s1294_s1 + $0x1c] sm:$0x1] %vm7_vm0, %v229_v28   ;;  %571 = vst.msk [vmem:[%s1294_s1 + $0x5b] sm:$0x2] %vm7_vm0, %v229_v28  }
  0xb4   :  { %v237_v29 = vpop.permute.xlu0 %236  }
  0xb5   :  { %v245_v30 = vpop.permute.xlu1 %244   ;;  %572 = vst.msk [vmem:[%s1294_s1 + $0x1d] sm:$0x1] %vm7_vm0, %v237_v29   ;;  %573 = vst.msk [vmem:[%s1294_s1 + $0x5c] sm:$0x2] %vm7_vm0, %v237_v29  }
  0xb6   :  { %574 = vst.msk [vmem:[%s1294_s1 + $0x1e] sm:$0x1] %vm7_vm0, %v245_v30   ;;  %575 = vst.msk [vmem:[%s1294_s1 + $0x5d] sm:$0x2] %vm7_vm0, %v245_v30  }
  0xb8   :  { %v253_v31 = vpop.permute.xlu0 %252  }
  0xb9   :  { %v261_v32 = vpop.permute.xlu1 %260   ;;  %576 = vst.msk [vmem:[%s1294_s1 + $0x1f] sm:$0x1] %vm7_vm0, %v253_v31   ;;  %577 = vst.msk [vmem:[%s1294_s1 + $0x5e] sm:$0x2] %vm7_vm0, %v253_v31  }
  0xba   :  { %578 = vst.msk [vmem:[%s1294_s1 + $0x20] sm:$0x1] %vm7_vm0, %v261_v32   ;;  %579 = vst.msk [vmem:[%s1294_s1 + $0x5f] sm:$0x2] %vm7_vm0, %v261_v32  }
  0xbc   :  { %v269_v33 = vpop.permute.xlu0 %268  }
  0xbd   :  { %v277_v34 = vpop.permute.xlu1 %276   ;;  %580 = vst.msk [vmem:[%s1294_s1 + $0x21] sm:$0x1] %vm7_vm0, %v269_v33   ;;  %581 = vst.msk [vmem:[%s1294_s1 + $0x60] sm:$0x2] %vm7_vm0, %v269_v33  }
  0xbe   :  { %582 = vst.msk [vmem:[%s1294_s1 + $0x22] sm:$0x1] %vm7_vm0, %v277_v34   ;;  %583 = vst.msk [vmem:[%s1294_s1 + $0x61] sm:$0x2] %vm7_vm0, %v277_v34  }
  0xc0   :  { %v285_v35 = vpop.permute.xlu0 %284  }
  0xc1   :  { %v293_v36 = vpop.permute.xlu1 %292   ;;  %584 = vst.msk [vmem:[%s1294_s1 + $0x23] sm:$0x1] %vm7_vm0, %v285_v35   ;;  %585 = vst.msk [vmem:[%s1294_s1 + $0x62] sm:$0x2] %vm7_vm0, %v285_v35  }
  0xc2   :  { %586 = vst.msk [vmem:[%s1294_s1 + $0x24] sm:$0x1] %vm7_vm0, %v293_v36   ;;  %587 = vst.msk [vmem:[%s1294_s1 + $0x63] sm:$0x2] %vm7_vm0, %v293_v36  }
  0xc4   :  { %v301_v37 = vpop.permute.xlu0 %300  }
  0xc5   :  { %v309_v38 = vpop.permute.xlu1 %308   ;;  %588 = vst.msk [vmem:[%s1294_s1 + $0x25] sm:$0x1] %vm7_vm0, %v301_v37   ;;  %589 = vst.msk [vmem:[%s1294_s1 + $0x64] sm:$0x2] %vm7_vm0, %v301_v37  }
  0xc6   :  { %590 = vst.msk [vmem:[%s1294_s1 + $0x26] sm:$0x1] %vm7_vm0, %v309_v38   ;;  %591 = vst.msk [vmem:[%s1294_s1 + $0x65] sm:$0x2] %vm7_vm0, %v309_v38  }
  0xc8   :  { %v317_v39 = vpop.permute.xlu0 %316  }
  0xc9   :  { %v325_v40 = vpop.permute.xlu1 %324   ;;  %592 = vst.msk [vmem:[%s1294_s1 + $0x27] sm:$0x1] %vm7_vm0, %v317_v39   ;;  %593 = vst.msk [vmem:[%s1294_s1 + $0x66] sm:$0x2] %vm7_vm0, %v317_v39  }
  0xca   :  { %594 = vst.msk [vmem:[%s1294_s1 + $0x28] sm:$0x1] %vm7_vm0, %v325_v40   ;;  %595 = vst.msk [vmem:[%s1294_s1 + $0x67] sm:$0x2] %vm7_vm0, %v325_v40  }
  0xcc   :  { %v333_v41 = vpop.permute.xlu0 %332  }
  0xcd   :  { %v341_v42 = vpop.permute.xlu1 %340   ;;  %596 = vst.msk [vmem:[%s1294_s1 + $0x29] sm:$0x1] %vm7_vm0, %v333_v41   ;;  %597 = vst.msk [vmem:[%s1294_s1 + $0x68] sm:$0x2] %vm7_vm0, %v333_v41  }
  0xce   :  { %598 = vst.msk [vmem:[%s1294_s1 + $0x2a] sm:$0x1] %vm7_vm0, %v341_v42   ;;  %599 = vst.msk [vmem:[%s1294_s1 + $0x69] sm:$0x2] %vm7_vm0, %v341_v42  }
  0xd0   :  { %v349_v43 = vpop.permute.xlu0 %348  }
  0xd1   :  { %v357_v44 = vpop.permute.xlu1 %356   ;;  %600 = vst.msk [vmem:[%s1294_s1 + $0x2b] sm:$0x1] %vm7_vm0, %v349_v43   ;;  %601 = vst.msk [vmem:[%s1294_s1 + $0x6a] sm:$0x2] %vm7_vm0, %v349_v43  }
  0xd2   :  { %602 = vst.msk [vmem:[%s1294_s1 + $0x2c] sm:$0x1] %vm7_vm0, %v357_v44   ;;  %603 = vst.msk [vmem:[%s1294_s1 + $0x6b] sm:$0x2] %vm7_vm0, %v357_v44  }
  0xd4   :  { %v365_v45 = vpop.permute.xlu0 %364  }
  0xd5   :  { %v373_v46 = vpop.permute.xlu1 %372   ;;  %604 = vst.msk [vmem:[%s1294_s1 + $0x2d] sm:$0x1] %vm7_vm0, %v365_v45   ;;  %605 = vst.msk [vmem:[%s1294_s1 + $0x6c] sm:$0x2] %vm7_vm0, %v365_v45  }
  0xd6   :  { %606 = vst.msk [vmem:[%s1294_s1 + $0x2e] sm:$0x1] %vm7_vm0, %v373_v46   ;;  %607 = vst.msk [vmem:[%s1294_s1 + $0x6d] sm:$0x2] %vm7_vm0, %v373_v46  }
  0xd8   :  { %v381_v47 = vpop.permute.xlu0 %380  }
  0xd9   :  { %v389_v48 = vpop.permute.xlu1 %388   ;;  %608 = vst.msk [vmem:[%s1294_s1 + $0x2f] sm:$0x1] %vm7_vm0, %v381_v47   ;;  %609 = vst.msk [vmem:[%s1294_s1 + $0x6e] sm:$0x2] %vm7_vm0, %v381_v47  }
  0xda   :  { %610 = vst.msk [vmem:[%s1294_s1 + $0x30] sm:$0x1] %vm7_vm0, %v389_v48   ;;  %611 = vst.msk [vmem:[%s1294_s1 + $0x6f] sm:$0x2] %vm7_vm0, %v389_v48  }
  0xdc   :  { %v397_v49 = vpop.permute.xlu0 %396  }
  0xdd   :  { %v405_v50 = vpop.permute.xlu1 %404   ;;  %612 = vst.msk [vmem:[%s1294_s1 + $0x31] sm:$0x1] %vm7_vm0, %v397_v49   ;;  %613 = vst.msk [vmem:[%s1294_s1 + $0x70] sm:$0x2] %vm7_vm0, %v397_v49  }
  0xde   :  { %614 = vst.msk [vmem:[%s1294_s1 + $0x32] sm:$0x1] %vm7_vm0, %v405_v50   ;;  %615 = vst.msk [vmem:[%s1294_s1 + $0x71] sm:$0x2] %vm7_vm0, %v405_v50  }
  0xe0   :  { %v413_v51 = vpop.permute.xlu0 %412  }
  0xe1   :  { %v421_v52 = vpop.permute.xlu1 %420   ;;  %616 = vst.msk [vmem:[%s1294_s1 + $0x33] sm:$0x1] %vm7_vm0, %v413_v51   ;;  %617 = vst.msk [vmem:[%s1294_s1 + $0x72] sm:$0x2] %vm7_vm0, %v413_v51  }
  0xe2   :  { %618 = vst.msk [vmem:[%s1294_s1 + $0x34] sm:$0x1] %vm7_vm0, %v421_v52   ;;  %619 = vst.msk [vmem:[%s1294_s1 + $0x73] sm:$0x2] %vm7_vm0, %v421_v52  }
  0xe4   :  { %v429_v53 = vpop.permute.xlu0 %428  }
  0xe5   :  { %v437_v54 = vpop.permute.xlu1 %436   ;;  %620 = vst.msk [vmem:[%s1294_s1 + $0x35] sm:$0x1] %vm7_vm0, %v429_v53   ;;  %621 = vst.msk [vmem:[%s1294_s1 + $0x74] sm:$0x2] %vm7_vm0, %v429_v53  }
  0xe6   :  { %622 = vst.msk [vmem:[%s1294_s1 + $0x36] sm:$0x1] %vm7_vm0, %v437_v54   ;;  %623 = vst.msk [vmem:[%s1294_s1 + $0x75] sm:$0x2] %vm7_vm0, %v437_v54  }
  0xe8   :  { %v445_v55 = vpop.permute.xlu0 %444  }
  0xe9   :  { %v453_v56 = vpop.permute.xlu1 %452   ;;  %624 = vst.msk [vmem:[%s1294_s1 + $0x37] sm:$0x1] %vm7_vm0, %v445_v55   ;;  %625 = vst.msk [vmem:[%s1294_s1 + $0x76] sm:$0x2] %vm7_vm0, %v445_v55  }
  0xea   :  { %626 = vst.msk [vmem:[%s1294_s1 + $0x38] sm:$0x1] %vm7_vm0, %v453_v56   ;;  %627 = vst.msk [vmem:[%s1294_s1 + $0x77] sm:$0x2] %vm7_vm0, %v453_v56  }
  0xec   :  { %v461_v57 = vpop.permute.xlu0 %460  }
  0xed   :  { %v469_v58 = vpop.permute.xlu1 %468   ;;  %628 = vst.msk [vmem:[%s1294_s1 + $0x39] sm:$0x1] %vm7_vm0, %v461_v57   ;;  %629 = vst.msk [vmem:[%s1294_s1 + $0x78] sm:$0x2] %vm7_vm0, %v461_v57  }
  0xee   :  { %630 = vst.msk [vmem:[%s1294_s1 + $0x3a] sm:$0x1] %vm7_vm0, %v469_v58   ;;  %631 = vst.msk [vmem:[%s1294_s1 + $0x79] sm:$0x2] %vm7_vm0, %v469_v58  }
  0xf0   :  { %v477_v59 = vpop.permute.xlu0 %476  }
  0xf1   :  { %v485_v60 = vpop.permute.xlu1 %484   ;;  %632 = vst.msk [vmem:[%s1294_s1 + $0x3b] sm:$0x1] %vm7_vm0, %v477_v59   ;;  %633 = vst.msk [vmem:[%s1294_s1 + $0x7a] sm:$0x2] %vm7_vm0, %v477_v59  }
  0xf2   :  { %634 = vst.msk [vmem:[%s1294_s1 + $0x3c] sm:$0x1] %vm7_vm0, %v485_v60   ;;  %635 = vst.msk [vmem:[%s1294_s1 + $0x7b] sm:$0x2] %vm7_vm0, %v485_v60  }
  0xf4   :  { %v493_v61 = vpop.permute.xlu0 %492  }
  0xf5   :  { %v501_v62 = vpop.permute.xlu1 %500   ;;  %636 = vst.msk [vmem:[%s1294_s1 + $0x3d] sm:$0x1] %vm7_vm0, %v493_v61   ;;  %637 = vst.msk [vmem:[%s1294_s1 + $0x7c] sm:$0x2] %vm7_vm0, %v493_v61  }
  0xf6   :  { %638 = vst.msk [vmem:[%s1294_s1 + $0x3e] sm:$0x1] %vm7_vm0, %v501_v62   ;;  %639 = vst.msk [vmem:[%s1294_s1 + $0x7d] sm:$0x2] %vm7_vm0, %v501_v62  }
  0xf8   :  { %v509_v63 = vpop.permute.xlu0 %508  }
  0xf9   :  { %640 = vst.msk [vmem:[%s1294_s1 + $0x3f] sm:$0x1] %vm7_vm0, %v509_v63   ;;  %641 = vst.msk [vmem:[%s1294_s1 + $0x7e] sm:$0x2] %vm7_vm0, %v509_v63  }

// kernel: forward.1
= control target key start
LH: loop header
LB: loop body
LE: loop exit
PB: predicated region body
PF: predicated region fallthrough
CT: control target
= control target key end

     0   :  { %10 = vsyncpa [#allocation3], 0  ;;  %v8362_v0 = vmov 0   ;;  %vm128_vm0 = vcmask 523264   ;;  %s10589_s0 = inlined_call_operand.vmem [shape: f32[32,192], index: 0, kind: input, shape index: {}]   ;;  %s10590_s1 = inlined_call_operand.vmem [shape: bf16[2624,256], index: 1, kind: input, shape index: {}]   ;;  %s10591_s2 = inlined_call_operand.vmem [shape: f32[728,256], index: 2, kind: input, shape index: {}]   ;;  %s10592_s3 = inlined_call_operand.hbm [shape: f32[32,64], index: 3, kind: output, shape index: {0}]   ;;  %s10593_s4 = inlined_call_operand.hbm [shape: f32[2,64], index: 4, kind: output, shape index: {1}]  }
   0x1   :  { %135 = vmatprep.subr.bf16.mxu0 %v8362_v0  ;;  %v7823_v1 = vld [vmem:[%s10590_s1] ss:$8 sps:$4 sm:$0xff]   ;;  %365 = vmatprep.mubr.bf16.mxu1 %v8362_v0  ;;  %v7824_v2 = vld [vmem:[%s10590_s1 + $0x10] ss:$8 sps:$4 sm:$0xff]  }
   0x2   :  { %7742 = vset.pattern.permute.xlu1 %v8362_v0  ;;  %7741 = vset.pattern.permute.xlu0 %v8362_v0  ;;  %v7825_v3 = vld [vmem:[%s10590_s1 + $0x20] ss:$8 sps:$4 sm:$0xff]   ;;  %v7826_v5 = vld [vmem:[%s10590_s1 + $0x30] ss:$8 sps:$4 sm:$0xff]  }
   0x3   :  { %136 = vmatpush1.bf16.msra.mxu0 %v7823_v1  ;;  %v20_v4 = vld [vmem:[%s10589_s0 + $0x8] sm:$0xff]  ;;  %v22_v6 = vld [vmem:[%s10589_s0 + $0x18] sm:$0xff]  ;;  %v19_v16 = vld [vmem:[%s10589_s0] sm:$0xff] }
   0x4   :  { %137 = vmatprep.subr.bf16.mxu0 %v8362_v0  ;;  %v52_v7 = vpack.c.bf16 %v22_v6, %v20_v4  ;;  %v7827_v8 = vld [vmem:[%s10590_s1 + $0x40] ss:$8 sps:$4 sm:$0xff]   ;;  %v7828_v9 = vld [vmem:[%s10590_s1 + $0x50] ss:$8 sps:$4 sm:$0xff]  }
   0x5   :  { %v7829_v10 = vld [vmem:[%s10590_s1 + $0x60] ss:$8 sps:$4 sm:$0xff]   ;;  %v7830_v11 = vld [vmem:[%s10590_s1 + $0x70] ss:$8 sps:$4 sm:$0xff]  }
   0x6   :  { %6637 = vmatprep.mubr.msk.bf16.mxu0 %vm128_vm0, %v52_v7  ;;  %v7831_v12 = vld [vmem:[%s10590_s1 + $0x80] ss:$8 sps:$4 sm:$0xff]   ;;  %v7832_v13 = vld [vmem:[%s10590_s1 + $0x90] ss:$8 sps:$4 sm:$0xff]  }
   0x7   :  { %138 = vmatpush1.bf16.msra.mxu0 %v7824_v2  ;;  %v7833_v14 = vld [vmem:[%s10590_s1 + $0xa0] ss:$8 sps:$4 sm:$0xff]   ;;  %v7834_v15 = vld [vmem:[%s10590_s1 + $0xb0] ss:$8 sps:$4 sm:$0xff]  }
   0x8   :  { %139 = vmatprep.subr.bf16.mxu0 %v8362_v0  ;;  %v21_v17 = vld [vmem:[%s10589_s0 + $0x10] sm:$0xff]  ;;  %v24_v18 = vld [vmem:[%s10589_s0 + $0x28] sm:$0xff]  ;;  %v26_v19 = vld [vmem:[%s10589_s0 + $0x38] sm:$0xff] }
   0x9   :  { %v51_v20 = vpack.c.bf16 %v21_v17, %v19_v16  ;;  %v54_v21 = vpack.c.bf16 %v26_v19, %v24_v18  ;;  %v23_v22 = vld [vmem:[%s10589_s0 + $0x20] sm:$0xff]  ;;  %v25_v23 = vld [vmem:[%s10589_s0 + $0x30] sm:$0xff] }
   0xa   :  { %v53_v24 = vpack.c.bf16 %v25_v23, %v23_v22 }
   0xb   :  { %140 = vmatpush1.bf16.msra.mxu0 %v7825_v3 }
   0xc   :  { %141 = vmatprep.subr.bf16.mxu0 %v8362_v0 }
   0xf   :  { %142 = vmatpush1.bf16.msra.mxu0 %v7826_v5 }
  0x10   :  { %143 = vmatprep.subr.bf16.mxu0 %v8362_v0 }
  0x13   :  { %144 = vmatpush1.bf16.msra.mxu0 %v7827_v8 }
  0x14   :  { %145 = vmatprep.subr.bf16.mxu0 %v8362_v0 }
  0x17   :  { %146 = vmatpush1.bf16.msra.mxu0 %v7828_v9 }
  0x18   :  { %147 = vmatprep.subr.bf16.mxu0 %v8362_v0 }
  0x1b   :  { %148 = vmatpush1.bf16.msra.mxu0 %v7829_v10 }
  0x1c   :  { %149 = vmatprep.subr.bf16.mxu0 %v8362_v0 }
  0x1f   :  { %150 = vmatpush1.bf16.msra.mxu0 %v7830_v11 }
  0x20   :  { %151 = vmatprep.subr.bf16.mxu0 %v8362_v0 }
  0x23   :  { %152 = vmatpush1.bf16.msra.mxu0 %v7831_v12 }
  0x24   :  { %153 = vmatprep.subr.bf16.mxu0 %v8362_v0 }
  0x27   :  { %154 = vmatpush1.bf16.msra.mxu0 %v7832_v13 }
  0x28   :  { %155 = vmatprep.subr.bf16.mxu0 %v8362_v0 }
  0x2b   :  { %156 = vmatpush1.bf16.msra.mxu0 %v7833_v14 }
  0x2c   :  { %157 = vmatprep.subr.bf16.mxu0 %v8362_v0 }
  0x2f   :  { %158 = vmatpush1.bf16.msra.mxu0 %v7834_v15 }
  0x32   :  { %168 = vmatmul.mubr.bf16.vlgmr.msra.gmra.mrb[0].mxu0 %v51_v20 }
  0x33   :  { %6638 = vmatprep.mubr.msk.bf16.mxu0 %vm128_vm0, %v54_v21 }
  0x3a   :  { %176 = vmatmul.mubr.bf16.gmra.mrb[4].mxu0 %v53_v24 }
  0x3b   :  { %11 = vsyncpa [#allocation5], 0  ;;  %v55_v25 = vld [vmem:[%s10591_s2] ss:$0 sm:$0xff]  ;;  %v184_v27 = vld [vmem:[%s10591_s2 + $0x10] sm:$0xff]  ;;  %s8363_s23 = smov 64  }
  0x3c   :  { %v185_v31 = vld [vmem:[%s10591_s2 + $0x20] sm:$0xff]  ;;  %v186_v38 = vld [vmem:[%s10591_s2 + $0x30] sm:$0xff]  ;;  %vm747_vm1 = vcmask 130048   ;;  %s8365_s26 = smov 96   ;;  %s8366_s14 = smov 112   ;;  %vm8368_vm2 = vmmov 0  }
  0x3d   :  { %v187_v43 = vld [vmem:[%s10591_s2 + $0x40] sm:$0xff]  ;;  %v7838_v9 = vld [vmem:[%s10590_s1 + $0xd4] ss:$8 sps:$4 sm:$0xff]   ;;  %v7840_v10 = vld [vmem:[%s10590_s1 + $0xd0] ss:$8 sps:$4 sm:$0xff]   ;;  %s8367_s17 = smov 80  }
  0x3e   :  { %v7835_v7 = vld [vmem:[%s10590_s1 + $0xc4] ss:$8 sps:$4 sm:$0xff]   ;;  %v7837_v8 = vld [vmem:[%s10590_s1 + $0xc0] ss:$8 sps:$4 sm:$0xff]   ;;  %v7844_v13 = vld [vmem:[%s10590_s1 + $0xf4] ss:$8 sps:$4 sm:$0xff]  }
  0x3f   :  { %333 = vmatprep.subr.bf16.mxu1 %v7835_v7  ;;  %v7841_v11 = vld [vmem:[%s10590_s1 + $0xe4] ss:$8 sps:$4 sm:$0xff]   ;;  %v7843_v12 = vld [vmem:[%s10590_s1 + $0xe0] ss:$8 sps:$4 sm:$0xff]   ;;  %v7846_v14 = vld [vmem:[%s10590_s1 + $0xf0] ss:$8 sps:$4 sm:$0xff]  }
  0x40   :  { %334 = vmatpush1.bf16.msra.mxu1 %v7837_v8  ;;  %v199_v8 = vld [vmem:[%s10591_s2 + $0xc0] sm:$0xff]  ;;  %s8369_s13 = smov 16   ;;  %s8370_s22 = smov 48   ;;  %vm1406_vm3 = vcmask 261120   ;;  %vm1409_vm4 = vcmask 392192   ;;  %vm4156_vm5 = vcmask 517120  }
  0x41   :  { %335 = vmatprep.subr.bf16.mxu1 %v7838_v9  ;;  %v200_v9 = vld [vmem:[%s10591_s2 + $0xd0] sm:$0xff]  ;;  %s8371_s24 = smov 32   ;;  %vm4440_vm6 = vcmask 123904   ;;  %vm4496_vm7 = vcmask 254976   ;;  %s8372_s18 = smov [#allocation2]  }
  0x42   :  { %s6600_s19 = sshll.u32 %s8372_s18, 4  ;;  %s6601_s19 = int_to_ptr.vmem [resolvable:$true] %s6600_s19 }
  0x43   :  { %s8314_s20 = scalar_lea.vmem %s6601_s19, 512  ;;  %p8319_p1 = scmp.lt.s32.totalorder %s6601_s19, %s6601_s19 }
  0x44   :  { %336 = vmatpush1.bf16.msra.mxu1 %v7840_v10  ;;  %p8315_p0 = scmp.ne.s32.totalorder %s6601_s19, %s8314_s20  ;;  %p8320_p2 = scmp.lt.s32.totalorder %s8314_s20, %s8314_s20 }
  0x45   :  { %337 = vmatprep.subr.bf16.mxu1 %v7841_v11 }
  0x46   :  { %p8321_p3 = por %p8320_p2, %p8319_p1 }
  0x48   :  { %338 = vmatpush1.bf16.msra.mxu1 %v7843_v12  ;;  %p8322_p4 = pnand %p8321_p3, %p8315_p0 }
  0x49   :  { %339 = vmatprep.subr.bf16.mxu1 %v7844_v13 }
  0x4c   :  { %340 = vmatpush1.bf16.msra.mxu1 %v7846_v14 }
 0x105   :  { %v169_v26 = vpop.f32.mrb[0].mxu0 }
 0x106   :  { %v170_v28 = vadd.f32 %v169_v26, %v55_v25  ;;  %v171_v29 = vpop.f32.mrb[1].mxu0 }
 0x107   :  { %v172_v30 = vpop.f32.mrb[2].mxu0  ;;  %v201_v29 = vld [vmem:[%s10591_s2 + $0xf0] ss:$0 sm:$0xff] }
 0x108   :  { %v8487_v32 = vadd.f32 %v184_v27, %v170_v28  ;;  %v173_v33 = vadd.f32 %v172_v30, %v55_v25  ;;  %v174_v34 = vpop.f32.mrb[3].mxu0 }
 0x109   :  { %v202_v34 = vld [vmem:[%s10591_s2 + $0x100] ss:$0 sm:$0xff] }
 0x10a   :  { %v8489_v35 = vadd.f32 %v185_v31, %v173_v33  ;;  %v203_v36 = vsel %vm128_vm0, %v8487_v32, 0.0 }
 0x10b   :  { %204 = vadd.xlane.f32.xlu0 %v203_v36 }
 0x10c   :  { %v206_v40 = vsel %vm128_vm0, %v8489_v35, 0.0 }
 0x10d   :  { %v177_v37 = vpop.f32.mrb[4].mxu0 }
 0x10e   :  { %v178_v39 = vadd.f32 %v177_v37, %v55_v25  ;;  %v179_v41 = vpop.f32.mrb[5].mxu0 }
 0x10f   :  { %207 = vadd.xlane.f32.xlu0 %v206_v40  ;;  %v180_v42 = vpop.f32.mrb[6].mxu0 }
 0x110   :  { %v8501_v44 = vadd.f32 %v186_v38, %v178_v39  ;;  %v181_v45 = vadd.f32 %v180_v42, %v55_v25  ;;  %v182_v46 = vpop.f32.mrb[7].mxu0 }
 0x112   :  { %v8503_v47 = vadd.f32 %v187_v43, %v181_v45  ;;  %v209_v48 = vsel %vm128_vm0, %v8501_v44, 0.0 }
 0x113   :  { %210 = vadd.xlane.f32.xlu1 %v209_v48 }
 0x114   :  { %v212_v49 = vsel %vm128_vm0, %v8503_v47, 0.0 }
 0x117   :  { %213 = vadd.xlane.f32.xlu1 %v212_v49 }
 0x198   :  { %v205_v50 = vpop.xlane.xlu0 %204 }
 0x199   :  { %v216_v51 = vmul.f32 0.015625, %v205_v50 }
 0x19b   :  { %v220_v52 = vsub.f32 %v8487_v32, %v216_v51  ;;  %v277_v51 = vlaneseq }
 0x19c   :  { %v208_v53 = vpop.xlane.xlu0 %207 }
 0x19d   :  { %v217_v54 = vmul.f32 0.015625, %v208_v53  ;;  %v224_v55 = vmul.f32 %v220_v52, %v220_v52 }
 0x19f   :  { %v221_v56 = vsub.f32 %v8489_v35, %v217_v54  ;;  %v228_v57 = vsel %vm128_vm0, %v224_v55, 0.0  ;;  %v6639_v54 = vld [vmem:[%s10591_s2 + $0x110] ss:$8 sm:$0x3] }
 0x1a0   :  { %v211_v58 = vpop.xlane.xlu1 %210  ;;  %229 = vadd.xlane.f32.xlu0 %v228_v57 }
 0x1a1   :  { %v218_v59 = vmul.f32 0.015625, %v211_v58  ;;  %v225_v60 = vmul.f32 %v221_v56, %v221_v56 }
 0x1a3   :  { %v222_v61 = vsub.f32 %v8501_v44, %v218_v59  ;;  %v231_v62 = vsel %vm128_vm0, %v225_v60, 0.0  ;;  %v195_v59 = vld [vmem:[%s10591_s2 + $0x80] sm:$0xff] }
 0x1a4   :  { %v214_v63 = vpop.xlane.xlu1 %213  ;;  %232 = vadd.xlane.f32.xlu1 %v231_v62  ;;  %v193_v62 = vld [vmem:[%s10591_s2 + $0x60] sm:$0xff] }
 0x1a5   :  { %v219_v1 = vmul.f32 0.015625, %v214_v63  ;;  %v226_v2 = vmul.f32 %v222_v61, %v222_v61  ;;  %v197_v63 = vld [vmem:[%s10591_s2 + $0xa0] sm:$0xff] }
 0x1a7   :  { %v223_v3 = vsub.f32 %v8503_v47, %v219_v1  ;;  %v234_v4 = vsel %vm128_vm0, %v226_v2, 0.0  ;;  %v196_v1 = vld [vmem:[%s10591_s2 + $0x90] sm:$0xff] }
 0x1a8   :  { %235 = vadd.xlane.f32.xlu0 %v234_v4  ;;  %v198_v4 = vld [vmem:[%s10591_s2 + $0xb0] sm:$0xff] }
 0x1a9   :  { %v227_v5 = vmul.f32 %v223_v3, %v223_v3 }
 0x1ab   :  { %v237_v6 = vsel %vm128_vm0, %v227_v5, 0.0 }
 0x1ac   :  { %238 = vadd.xlane.f32.xlu1 %v237_v6 }
 0x22d   :  { %v230_v15 = vpop.xlane.xlu0 %229 }
 0x22e   :  { %v240_v16 = vmul.f32 0.015625, %v230_v15 }
 0x230   :  { %v244_v17 = vadd.f32 1e-06, %v240_v16 }
 0x231   :  { %v233_v18 = vpop.xlane.xlu1 %232 }
 0x232   :  { %8035 = vrsqrt.f32 %v244_v17  ;;  %v241_v19 = vmul.f32 0.015625, %v233_v18 }
 0x234   :  { %v245_v20 = vadd.f32 1e-06, %v241_v19 }
 0x235   :  { %v236_v21 = vpop.xlane.xlu0 %235 }
 0x236   :  { %8037 = vrsqrt.f32 %v245_v20  ;;  %v242_v22 = vmul.f32 0.015625, %v236_v21 }
 0x238   :  { %v246_v23 = vadd.f32 1e-06, %v242_v22 }
 0x239   :  { %v239_v24 = vpop.xlane.xlu1 %238 }
 0x23a   :  { %8039 = vrsqrt.f32 %v246_v23  ;;  %v243_v25 = vmul.f32 0.015625, %v239_v24 }
 0x23c   :  { %v8036_v26 = vpop.eup %8035  ;;  %v247_v27 = vadd.f32 1e-06, %v243_v25 }
 0x23d   :  { %v252_v28 = vmul.f32 %v8036_v26, %v220_v52  ;;  %v278_v52 = vshrl.u32 %v277_v51, 7 }
 0x23e   :  { %8041 = vrsqrt.f32 %v247_v27 }
 0x23f   :  { %v256_v33 = vmul.f32 %v252_v28, %v201_v29  ;;  %v8550_v53 = vsub.s32 0, %v278_v52  ;;  %v8555_v55 = vsub.s32 1, %v278_v52 }
 0x240   :  { %v8038_v30 = vpop.eup %8037 }
 0x241   :  { %v253_v31 = vmul.f32 %v8038_v30, %v221_v56  ;;  %v260_v38 = vadd.f32 %v256_v33, %v202_v34  ;;  %v280_v56 = vrot.slane %v6639_v54, %v8550_v53  ;;  %v284_v57 = vrot.slane %v6639_v54, %v8555_v55 }
 0x243   :  { %v257_v36 = vmul.f32 %v253_v31, %v201_v29 }
 0x244   :  { %v8040_v37 = vpop.eup %8039 }
 0x245   :  { %v261_v39 = vadd.f32 %v257_v36, %v202_v34  ;;  %v254_v40 = vmul.f32 %v8040_v37, %v222_v61 }
 0x247   :  { %v272_v41 = vpack.c.bf16 %v261_v39, %v260_v38  ;;  %v258_v45 = vmul.f32 %v254_v40, %v201_v29 }
 0x248   :  { %v8042_v42 = vpop.eup %8041 }
 0x249   :  { %6648 = vmatmul.mubr.msk.bf16.vlgmr.msra.gmra.mrb[0].mxu1 %vm128_vm0, %v272_v41  ;;  %v255_v43 = vmul.f32 %v8042_v42, %v223_v3  ;;  %v262_v48 = vadd.f32 %v258_v45, %v202_v34  ;;  %v194_v3 = vld [vmem:[%s10591_s2 + $0x70] sm:$0xff] }
 0x24a   :  { %375 = vmatprep.mubr.bf16.mxu1 %v8362_v0 }
 0x24b   :  { %v259_v46 = vmul.f32 %v255_v43, %v201_v29 }
 0x24d   :  { %v263_v49 = vadd.f32 %v259_v46, %v202_v34 }
 0x24f   :  { %v273_v50 = vpack.c.bf16 %v263_v49, %v262_v48 }
 0x251   :  { %6649 = vmatmul.mubr.msk.bf16.gmra.mrb[4].mxu1 %vm128_vm0, %v273_v50 }
 0x31c   :  { %v367_v58 = vpop.f32.mrb[0].mxu1 }
 0x31d   :  { %v368_v60 = vadd.f32 %v367_v58, %v280_v56  ;;  %v369_v61 = vpop.f32.mrb[1].mxu1 }
 0x31e   :  { %v371_v2 = vpop.f32.mrb[2].mxu1  ;;  %v370_v5 = vadd.f32 %v369_v61, %v284_v57 }
 0x31f   :  { %v372_v6 = vadd.f32 %v371_v2, %v280_v56  ;;  %v373_v7 = vpop.f32.mrb[3].mxu1  ;;  %v388_v10 = vmul.f32 %v368_v60, %v195_v59  ;;  %v386_v12 = vmul.f32 %v368_v60, %v193_v62  ;;  %v390_v13 = vmul.f32 %v368_v60, %v197_v63 }
 0x320   :  { %v374_v11 = vadd.f32 %v373_v7, %v284_v57  ;;  %v392_v19 = vmul.f32 %v368_v60, %v199_v8 }
 0x321   :  { %v389_v14 = vmul.f32 %v372_v6, %v196_v1  ;;  %v398_v15 = vpack.c.bf16 %v372_v6, %v368_v60  ;;  %v387_v16 = vmul.f32 %v372_v6, %v194_v3  ;;  %v391_v17 = vmul.f32 %v372_v6, %v198_v4 }
 0x322   :  { %v8583_v18 = vpack.c.bf16 %v374_v11, %v370_v5  ;;  %v393_v20 = vmul.f32 %v372_v6, %v200_v9 }
 0x323   :  { %v395_v21 = vpack.c.bf16 %v389_v14, %v388_v10  ;;  %400 = vrot.lane.b32.xlu0 %v398_v15, %s8363_s23  ;;  %v394_v22 = vpack.c.bf16 %v387_v16, %v386_v12  ;;  %v396_v23 = vpack.c.bf16 %v391_v17, %v390_v13 }
 0x324   :  { %v377_v24 = vpop.f32.mrb[4].mxu1  ;;  %v397_v25 = vpack.c.bf16 %v393_v20, %v392_v19  ;;  %v7848_v20 = vld [vmem:[%s10590_s1 + $0x110] ss:$8 sps:$4 sm:$0xff]  }
 0x325   :  { %v378_v26 = vadd.f32 %v377_v24, %v280_v56  ;;  %v379_v27 = vpop.f32.mrb[5].mxu1  ;;  %7213 = vmatprep.mubr.msk.bf16.mxu1 %vm128_vm0, %v394_v22  ;;  %v8364_v22 = vmov 0.0   ;;  %v7851_v24 = vld [vmem:[%s10590_s1 + $0x140] ss:$8 sps:$4 sm:$0xff]  }
 0x326   :  { %v380_v28 = vadd.f32 %v379_v27, %v284_v57  ;;  %v381_v29 = vpop.f32.mrb[6].mxu1  ;;  %v7854_v27 = vld [vmem:[%s10590_s1 + $0x170] ss:$8 sps:$4 sm:$0xff]  }
 0x327   :  { %v382_v30 = vadd.f32 %v381_v29, %v280_v56  ;;  %v383_v31 = vpop.f32.mrb[7].mxu1  ;;  %v484_v33 = vmul.f32 %v378_v26, %v195_v59  ;;  %v482_v36 = vmul.f32 %v378_v26, %v193_v62  ;;  %v486_v37 = vmul.f32 %v378_v26, %v197_v63 }
 0x328   :  { %v384_v34 = vadd.f32 %v383_v31, %v284_v57  ;;  %v488_v43 = vmul.f32 %v378_v26, %v199_v8  ;;  %v7847_v57 = vld [vmem:[%s10590_s1 + $0x100] ss:$8 sps:$4 sm:$0xff]  }
 0x329   :  { %v485_v38 = vmul.f32 %v382_v30, %v196_v1  ;;  %v494_v39 = vpack.c.bf16 %v382_v30, %v378_v26  ;;  %v483_v40 = vmul.f32 %v382_v30, %v194_v3  ;;  %v487_v41 = vmul.f32 %v382_v30, %v198_v4  ;;  %7247 = vmatprep.mubr.bf16.mxu0 %v7847_v57  ;;  %v7853_v26 = vld [vmem:[%s10590_s1 + $0x160] ss:$8 sps:$4 sm:$0xff]  }
 0x32a   :  { %v8587_v42 = vpack.c.bf16 %v384_v34, %v380_v28  ;;  %v489_v45 = vmul.f32 %v382_v30, %v200_v9 }
 0x32b   :  { %v491_v46 = vpack.c.bf16 %v485_v38, %v484_v33  ;;  %496 = vrot.lane.b32.xlu1 %v494_v39, %s8363_s23  ;;  %v490_v48 = vpack.c.bf16 %v483_v40, %v482_v36  ;;  %v492_v49 = vpack.c.bf16 %v487_v41, %v486_v37 }
 0x32c   :  { %v493_v50 = vpack.c.bf16 %v489_v45, %v488_v43 }
 0x395   :  { %v401_v51 = vpop.permute.xlu0 %400 }
 0x396   :  { %7723 = vmatprep.subr.msk.bf16.mxu1 %vm128_vm0, %v401_v51  ;;  %v415_v52 = vsel %vm128_vm0, %v401_v51, 0 }
 0x397   :  { %7212 = vmatpush3.bf16.xpose.msra.mxu1 %v415_v52 }
 0x39d   :  { %v497_v54 = vpop.permute.xlu1 %496 }
 0x39e   :  { %7214 = vmatmul.mubr.msk.bf16.vlgmr.msra.gmra.mrb[8].mxu1 %vm128_vm0, %v395_v21  ;;  %7724 = vmatprep.subr.msk.bf16.mxu1 %vm128_vm0, %v497_v54  ;;  %v511_v56 = vsel %vm128_vm0, %v497_v54, 0  ;;  %v7849_v21 = vld [vmem:[%s10590_s1 + $0x120] ss:$8 sps:$4 sm:$0xff]  }
 0x39f   :  { %7217 = vmatprep.mubr.msk.bf16.mxu1 %vm128_vm0, %v396_v23  ;;  %7222 = vmatpush3.bf16.xpose.msra.mxu1 %v511_v56  ;;  %v7850_v23 = vld [vmem:[%s10590_s1 + $0x130] ss:$8 sps:$4 sm:$0xff]  }
 0x3a6   :  { %7218 = vmatmul.mubr.msk.bf16.gmra.mrb[12].mxu1 %vm128_vm0, %v397_v25  ;;  %v7852_v25 = vld [vmem:[%s10590_s1 + $0x150] ss:$8 sps:$4 sm:$0xff]  }
 0x3a7   :  { %7223 = vmatprep.mubr.msk.bf16.mxu1 %vm128_vm0, %v490_v48 }
 0x3ae   :  { %7224 = vmatmul.mubr.msk.bf16.vlgmr.msra.gmra.mrb[16].mxu1 %vm128_vm0, %v491_v46 }
 0x3af   :  { %7227 = vmatprep.mubr.msk.bf16.mxu1 %vm128_vm0, %v492_v49 }
 0x3b6   :  { %7228 = vmatmul.mubr.msk.bf16.gmra.mrb[20].mxu1 %vm128_vm0, %v493_v50 }
 0x471   :  { %v7215_v58 = vpop.f32.mrb[8].mxu1 }
 0x472   :  { %v451_v59 = vpop.f32.mrb[9].mxu1 }
 0x473   :  { %v7216_v60 = vpop.f32.mrb[10].mxu1 }
 0x474   :  { %v595_v61 = vpack.c.bf16 %v7216_v60, %v7215_v58  ;;  %v454_v62 = vpop.f32.mrb[11].mxu1 }
 0x475   :  { %v594_v63 = vpack.c.bf16 %v454_v62, %v451_v59 }
 0x477   :  { %7231 = vmatprep.subr.bf16.mxu0 %v594_v63 }
 0x478   :  { %7232 = vmatpush3.bf16.msra.mxu0 %v594_v63 }
 0x479   :  { %v7219_v1 = vpop.f32.mrb[12].mxu1  ;;  %7233 = vmatprep.subr.bf16.mxu0 %v595_v61 }
 0x47a   :  { %v467_v2 = vpop.f32.mrb[13].mxu1 }
 0x47b   :  { %v7220_v3 = vpop.f32.mrb[14].mxu1 }
 0x47c   :  { %v597_v4 = vpack.c.bf16 %v7220_v3, %v7219_v1  ;;  %v470_v5 = vpop.f32.mrb[15].mxu1  ;;  %7234 = vmatpush3.bf16.msra.mxu0 %v595_v61 }
 0x47d   :  { %v596_v6 = vpack.c.bf16 %v470_v5, %v467_v2 }
 0x47f   :  { %7235 = vmatprep.subr.bf16.mxu0 %v596_v6 }
 0x480   :  { %7236 = vmatpush3.bf16.msra.mxu0 %v596_v6 }
 0x481   :  { %v7225_v7 = vpop.f32.mrb[16].mxu1  ;;  %7237 = vmatprep.subr.bf16.mxu0 %v597_v4 }
 0x482   :  { %v547_v8 = vpop.f32.mrb[17].mxu1 }
 0x483   :  { %v7226_v9 = vpop.f32.mrb[18].mxu1 }
 0x484   :  { %v599_v10 = vpack.c.bf16 %v7226_v9, %v7225_v7  ;;  %v550_v11 = vpop.f32.mrb[19].mxu1  ;;  %7238 = vmatpush3.bf16.msra.mxu0 %v597_v4 }
 0x485   :  { %v598_v12 = vpack.c.bf16 %v550_v11, %v547_v8 }
 0x487   :  { %7239 = vmatprep.subr.bf16.mxu0 %v598_v12 }
 0x488   :  { %7240 = vmatpush3.bf16.msra.mxu0 %v598_v12 }
 0x489   :  { %v7229_v13 = vpop.f32.mrb[20].mxu1  ;;  %7241 = vmatprep.subr.bf16.mxu0 %v599_v10 }
 0x48a   :  { %v563_v14 = vpop.f32.mrb[21].mxu1 }
 0x48b   :  { %v7230_v15 = vpop.f32.mrb[22].mxu1 }
 0x48c   :  { %v601_v16 = vpack.c.bf16 %v7230_v15, %v7229_v13  ;;  %v566_v17 = vpop.f32.mrb[23].mxu1  ;;  %7242 = vmatpush3.bf16.msra.mxu0 %v599_v10 }
 0x48d   :  { %v600_v19 = vpack.c.bf16 %v566_v17, %v563_v14 }
 0x48f   :  { %7243 = vmatprep.subr.bf16.mxu0 %v600_v19 }
 0x490   :  { %7244 = vmatpush3.bf16.msra.mxu0 %v600_v19 }
 0x491   :  { %7245 = vmatprep.subr.bf16.mxu0 %v601_v16 }
 0x494   :  { %7246 = vmatpush3.bf16.msra.mxu0 %v601_v16 }
 0x495   :  { %7295 = vmatprep.subr.bf16.mxu0 %v8364_v22 }
 0x497   :  { %7248 = vmatmul.mubr.bf16.vlgmr.msra.gmra.mrb[8].mxu0 %v7848_v20 }
 0x498   :  { %7296 = vmatpush3.bf16.msra.mxu0 %v8583_v18  ;;  %7251 = vmatprep.mubr.bf16.mxu0 %v7849_v21 }
 0x499   :  { %7307 = vmatprep.subr.bf16.mxu0 %v8364_v22 }
 0x49f   :  { %7252 = vmatmul.mubr.bf16.gmra.mrb[12].mxu0 %v7850_v23 }
 0x4a0   :  { %7255 = vmatprep.mubr.bf16.mxu0 %v7851_v24 }
 0x4a7   :  { %7256 = vmatmul.mubr.bf16.gmra.mrb[16].mxu0 %v7852_v25 }
 0x4a8   :  { %7259 = vmatprep.mubr.bf16.mxu0 %v7853_v26 }
 0x4af   :  { %7260 = vmatmul.mubr.bf16.gmra.mrb[20].mxu0 %v7854_v27 }
 0x4b0   :  { %7297 = vmatprep.mubr.msk.bf16.mxu0 %vm8368_vm2, %v8364_v22 }
 0x56a   :  { %v7249_v28 = vpop.f32.mrb[8].mxu0 }
 0x56b   :  { %v684_v29 = vpop.f32.mrb[9].mxu0  ;;  %v754_v38 = vsel %vm747_vm1, %v7249_v28, -inf }
 0x56c   :  { %v7250_v30 = vpop.f32.mrb[10].mxu0  ;;  %v748_v31 = vsel %vm747_vm1, %v684_v29, -inf }
 0x56d   :  { %749 = vmax.xlane.f32.xlu1 %v748_v31  ;;  %v687_v33 = vpop.f32.mrb[11].mxu0  ;;  %v757_v36 = vsel %vm747_vm1, %v7250_v30, -inf }
 0x56e   :  { %v751_v34 = vsel %vm747_vm1, %v687_v33, -inf }
 0x56f   :  { %752 = vmax.xlane.f32.xlu0 %v751_v34 }
 0x571   :  { %758 = vmax.xlane.f32.xlu1 %v757_v36 }
 0x572   :  { %v8631_v37 = vpop.f32.mrb[12].mxu0 }
 0x573   :  { %755 = vmax.xlane.f32.xlu0 %v754_v38  ;;  %v700_v39 = vpop.f32.mrb[13].mxu0  ;;  %v766_v48 = vsel %vm747_vm1, %v8631_v37, -inf }
 0x574   :  { %v8634_v40 = vpop.f32.mrb[14].mxu0  ;;  %v760_v43 = vsel %vm747_vm1, %v700_v39, -inf }
 0x575   :  { %v703_v41 = vpop.f32.mrb[15].mxu0  ;;  %v769_v49 = vsel %vm747_vm1, %v8634_v40, -inf }
 0x576   :  { %v763_v45 = vsel %vm747_vm1, %v703_v41, -inf }
 0x577   :  { %761 = vmax.xlane.f32.xlu0 %v760_v43  ;;  %764 = vmax.xlane.f32.xlu1 %v763_v45 }
 0x57a   :  { %v8638_v46 = vpop.f32.mrb[16].mxu0 }
 0x57b   :  { %767 = vmax.xlane.f32.xlu0 %v766_v48  ;;  %770 = vmax.xlane.f32.xlu1 %v769_v49  ;;  %v8644_v50 = vpop.f32.mrb[17].mxu0  ;;  %v778_v58 = vsel %vm747_vm1, %v8638_v46, -inf }
 0x57c   :  { %v8646_v51 = vpop.f32.mrb[18].mxu0  ;;  %v772_v54 = vsel %vm747_vm1, %v8644_v50, -inf }
 0x57d   :  { %v8648_v52 = vpop.f32.mrb[19].mxu0  ;;  %v781_v59 = vsel %vm747_vm1, %v8646_v51, -inf }
 0x57e   :  { %v775_v56 = vsel %vm747_vm1, %v8648_v52, -inf }
 0x57f   :  { %773 = vmax.xlane.f32.xlu0 %v772_v54  ;;  %776 = vmax.xlane.f32.xlu1 %v775_v56 }
 0x582   :  { %v8654_v57 = vpop.f32.mrb[20].mxu0 }
 0x583   :  { %779 = vmax.xlane.f32.xlu0 %v778_v58  ;;  %782 = vmax.xlane.f32.xlu1 %v781_v59  ;;  %v8660_v60 = vpop.f32.mrb[21].mxu0  ;;  %v790_v2 = vsel %vm747_vm1, %v8654_v57, -inf }
 0x584   :  { %v8662_v61 = vpop.f32.mrb[22].mxu0  ;;  %v784_v63 = vsel %vm747_vm1, %v8660_v60, -inf }
 0x585   :  { %v8664_v62 = vpop.f32.mrb[23].mxu0  ;;  %v793_v3 = vsel %vm747_vm1, %v8662_v61, -inf }
 0x586   :  { %v787_v1 = vsel %vm747_vm1, %v8664_v62, -inf }
 0x587   :  { %785 = vmax.xlane.f32.xlu0 %v784_v63  ;;  %788 = vmax.xlane.f32.xlu1 %v787_v1 }
 0x58b   :  { %791 = vmax.xlane.f32.xlu0 %v790_v2  ;;  %794 = vmax.xlane.f32.xlu1 %v793_v3 }
 0x5fa   :  { %v750_v4 = vpop.xlane.xlu1 %749 }
 0x5fb   :  { %v796_v5 = vsub.f32 %v684_v29, %v750_v4 }
 0x5fc   :  { %v753_v6 = vpop.xlane.xlu0 %752 }
 0x5fd   :  { %v812_v7 = vmul.f32 1.442695, %v796_v5  ;;  %v797_v8 = vsub.f32 %v687_v33, %v753_v6 }
 0x5fe   :  { %v759_v9 = vpop.xlane.xlu1 %758 }
 0x5ff   :  { %8043 = vpow2.f32 %v812_v7  ;;  %v814_v10 = vmul.f32 1.442695, %v797_v8  ;;  %v799_v11 = vsub.f32 %v7250_v30, %v759_v9 }
 0x600   :  { %v756_v12 = vpop.xlane.xlu0 %755 }
 0x601   :  { %8045 = vpow2.f32 %v814_v10  ;;  %v818_v13 = vmul.f32 1.442695, %v799_v11  ;;  %v798_v14 = vsub.f32 %v7249_v28, %v756_v12 }
 0x603   :  { %8047 = vpow2.f32 %v818_v13  ;;  %v816_v15 = vmul.f32 1.442695, %v798_v14 }
 0x604   :  { %v762_v16 = vpop.xlane.xlu0 %761  ;;  %v765_v17 = vpop.xlane.xlu1 %764 }
 0x605   :  { %8049 = vpow2.f32 %v816_v15  ;;  %v800_v19 = vsub.f32 %v700_v39, %v762_v16  ;;  %v801_v20 = vsub.f32 %v703_v41, %v765_v17 }
 0x607   :  { %v820_v21 = vmul.f32 1.442695, %v800_v19  ;;  %v822_v23 = vmul.f32 1.442695, %v801_v20 }
 0x608   :  { %v768_v24 = vpop.xlane.xlu0 %767  ;;  %v771_v25 = vpop.xlane.xlu1 %770 }
 0x609   :  { %v8674_v26 = vpop.eup %8043  ;;  %8051 = vpow2.f32 %v820_v21  ;;  %v802_v27 = vsub.f32 %v8631_v37, %v768_v24  ;;  %v803_v29 = vsub.f32 %v8634_v40, %v771_v25 }
 0x60a   :  { %8053 = vpow2.f32 %v822_v23  ;;  %v844_v28 = vsel %vm747_vm1, %v8674_v26, 0.0 }
 0x60b   :  { %v8680_v30 = vpop.eup %8045  ;;  %v824_v31 = vmul.f32 1.442695, %v802_v27  ;;  %v826_v33 = vmul.f32 1.442695, %v803_v29  ;;  %845 = vadd.xlane.f32.xlu0 %v844_v28 }
 0x60c   :  { %v774_v34 = vpop.xlane.xlu0 %773  ;;  %v777_v36 = vpop.xlane.xlu1 %776  ;;  %v847_v38 = vsel %vm747_vm1, %v8680_v30, 0.0 }
 0x60d   :  { %v8684_v39 = vpop.eup %8047  ;;  %8055 = vpow2.f32 %v824_v31  ;;  %v804_v37 = vsub.f32 %v8644_v50, %v774_v34  ;;  %v805_v40 = vsub.f32 %v8648_v52, %v777_v36  ;;  %848 = vadd.xlane.f32.xlu1 %v847_v38  ;;  %v949_v36 = vld [vmem:[%s10591_s2 + $0x130] sm:$0xff]  ;;  %v950_v38 = vld [vmem:[%s10591_s2 + $0x140] sm:$0xff] }
 0x60e   :  { %8057 = vpow2.f32 %v826_v33  ;;  %v853_v56 = vsel %vm747_vm1, %v8684_v39, 0.0 }
 0x60f   :  { %v8688_v41 = vpop.eup %8049  ;;  %v828_v43 = vmul.f32 1.442695, %v804_v37  ;;  %v830_v45 = vmul.f32 1.442695, %v805_v40  ;;  %v948_v37 = vld [vmem:[%s10591_s2 + $0x120] sm:$0xff]  ;;  %v951_v40 = vld [vmem:[%s10591_s2 + $0x150] sm:$0xff] }
 0x610   :  { %v780_v48 = vpop.xlane.xlu0 %779  ;;  %v783_v49 = vpop.xlane.xlu1 %782  ;;  %v850_v54 = vsel %vm747_vm1, %v8688_v41, 0.0 }
 0x611   :  { %8059 = vpow2.f32 %v828_v43  ;;  %v806_v58 = vsub.f32 %v8638_v46, %v780_v48  ;;  %v807_v50 = vsub.f32 %v8646_v51, %v783_v49  ;;  %851 = vadd.xlane.f32.xlu0 %v850_v54  ;;  %854 = vadd.xlane.f32.xlu1 %v853_v56  ;;  %v956_v43 = vld [vmem:[%s10591_s2 + $0x1a0] sm:$0xff]  ;;  %v953_v48 = vld [vmem:[%s10591_s2 + $0x170] sm:$0xff] }
 0x612   :  { %8061 = vpow2.f32 %v830_v45  ;;  %v952_v45 = vld [vmem:[%s10591_s2 + $0x160] sm:$0xff]  ;;  %v959_v49 = vld [vmem:[%s10591_s2 + $0x1d0] sm:$0xff] }
 0x613   :  { %v8696_v52 = vpop.eup %8051  ;;  %v832_v59 = vmul.f32 1.442695, %v806_v58  ;;  %v834_v63 = vmul.f32 1.442695, %v807_v50  ;;  %v7855_v54 = vld [vmem:[%s10590_s1 + $0x180] ss:$8 sps:$4 sm:$0xff]  }
 0x614   :  { %v8698_v1 = vpop.eup %8053  ;;  %v786_v2 = vpop.xlane.xlu0 %785  ;;  %v856_v4 = vsel %vm747_vm1, %v8696_v52, 0.0  ;;  %7279 = vmatprep.mubr.bf16.mxu1 %v7855_v54  ;;  %v954_v56 = vld [vmem:[%s10591_s2 + $0x180] sm:$0xff]  ;;  %v955_v50 = vld [vmem:[%s10591_s2 + $0x190] sm:$0xff] }
 0x615   :  { %v789_v3 = vpop.xlane.xlu1 %788  ;;  %8063 = vpow2.f32 %v832_v59  ;;  %v808_v5 = vsub.f32 %v8660_v60, %v786_v2  ;;  %857 = vadd.xlane.f32.xlu0 %v856_v4  ;;  %v859_v51 = vsel %vm747_vm1, %v8698_v1, 0.0  ;;  %v960_v58 = vld [vmem:[%s10591_s2 + $0x1e0] sm:$0xff]  ;;  %v963_v4 = vld [vmem:[%s10591_s2 + $0x210] sm:$0xff] }
 0x616   :  { %v809_v46 = vsub.f32 %v8664_v62, %v789_v3  ;;  %8065 = vpow2.f32 %v834_v63  ;;  %860 = vadd.xlane.f32.xlu1 %v859_v51  ;;  %v962_v59 = vld [vmem:[%s10591_s2 + $0x200] sm:$0xff]  ;;  %v957_v63 = vld [vmem:[%s10591_s2 + $0x1b0] sm:$0xff] }
 0x617   :  { %v8706_v6 = vpop.eup %8055  ;;  %v836_v7 = vmul.f32 1.442695, %v808_v5  ;;  %v958_v2 = vld [vmem:[%s10591_s2 + $0x1c0] sm:$0xff]  ;;  %v961_v3 = vld [vmem:[%s10591_s2 + $0x1f0] sm:$0xff] }
 0x618   :  { %v838_v8 = vmul.f32 1.442695, %v809_v46  ;;  %v8708_v9 = vpop.eup %8057  ;;  %v792_v10 = vpop.xlane.xlu0 %791  ;;  %v862_v12 = vsel %vm747_vm1, %v8706_v6, 0.0 }
 0x619   :  { %v795_v11 = vpop.xlane.xlu1 %794  ;;  %8067 = vpow2.f32 %v836_v7  ;;  %v810_v60 = vsub.f32 %v8654_v57, %v792_v10  ;;  %863 = vadd.xlane.f32.xlu0 %v862_v12  ;;  %v865_v13 = vsel %vm747_vm1, %v8708_v9, 0.0 }
 0x61a   :  { %v811_v62 = vsub.f32 %v8662_v61, %v795_v11  ;;  %8069 = vpow2.f32 %v838_v8  ;;  %866 = vadd.xlane.f32.xlu1 %v865_v13 }
 0x61b   :  { %v8716_v14 = vpop.eup %8059  ;;  %v840_v15 = vmul.f32 1.442695, %v810_v60 }
 0x61c   :  { %v842_v16 = vmul.f32 1.442695, %v811_v62  ;;  %v8718_v17 = vpop.eup %8061  ;;  %v868_v19 = vsel %vm747_vm1, %v8716_v14, 0.0 }
 0x61d   :  { %8071 = vpow2.f32 %v840_v15  ;;  %869 = vadd.xlane.f32.xlu0 %v868_v19  ;;  %v871_v57 = vsel %vm747_vm1, %v8718_v17, 0.0 }
 0x61e   :  { %8073 = vpow2.f32 %v842_v16  ;;  %872 = vadd.xlane.f32.xlu1 %v871_v57 }
 0x61f   :  { %v8724_v61 = vpop.eup %8063 }
 0x620   :  { %v8726_v20 = vpop.eup %8065  ;;  %v874_v21 = vsel %vm747_vm1, %v8724_v61, 0.0 }
 0x621   :  { %875 = vadd.xlane.f32.xlu0 %v874_v21  ;;  %v877_v23 = vsel %vm747_vm1, %v8726_v20, 0.0 }
 0x622   :  { %878 = vadd.xlane.f32.xlu1 %v877_v23 }
 0x623   :  { %v8732_v24 = vpop.eup %8067 }
 0x624   :  { %v8734_v25 = vpop.eup %8069  ;;  %v880_v27 = vsel %vm747_vm1, %v8732_v24, 0.0 }
 0x625   :  { %881 = vadd.xlane.f32.xlu0 %v880_v27  ;;  %v883_v29 = vsel %vm747_vm1, %v8734_v25, 0.0 }
 0x626   :  { %884 = vadd.xlane.f32.xlu1 %v883_v29 }
 0x627   :  { %v8740_v28 = vpop.eup %8071 }
 0x628   :  { %v8742_v31 = vpop.eup %8073  ;;  %v886_v33 = vsel %vm747_vm1, %v8740_v28, 0.0 }
 0x629   :  { %887 = vadd.xlane.f32.xlu0 %v886_v33  ;;  %v889_v34 = vsel %vm747_vm1, %v8742_v31, 0.0 }
 0x62a   :  { %890 = vadd.xlane.f32.xlu1 %v889_v34 }
 0x63b   :  { %971 = vperm.xlu1 %7742, %v949_v36  }
 0x63f   :  { %976 = vperm.xlu1 %7742, %v950_v38   ;;  %966 = vperm.xlu0 %7741, %v948_v37  }
 0x643   :  { %981 = vperm.xlu1 %7742, %v951_v40   ;;  %1006 = vperm.xlu0 %7741, %v956_v43  }
 0x647   :  { %986 = vperm.xlu1 %7742, %v952_v45   ;;  %1285 = vrot.lane.b32.xlu0 %v8583_v18, %s8365_s26 }
 0x64b   :  { %991 = vperm.xlu1 %7742, %v953_v48   ;;  %1021 = vperm.xlu0 %7741, %v959_v49  }
 0x64f   :  { %996 = vperm.xlu1 %7742, %v954_v56   ;;  %1026 = vperm.xlu0 %7741, %v960_v58  }
 0x653   :  { %1001 = vperm.xlu1 %7742, %v955_v50   ;;  %1036 = vperm.xlu0 %7741, %v962_v59  }
 0x657   :  { %1237 = vrot.lane.b32.xlu1 %v8583_v18, %s8366_s14  ;;  %1460 = vrot.lane.b32.xlu0 %v8587_v42, %s8366_s14 }
 0x65b   :  { %1011 = vperm.xlu1 %7742, %v957_v63   ;;  %1556 = vrot.lane.b32.xlu0 %v8587_v42, %s8367_s17 }
 0x65f   :  { %1016 = vperm.xlu1 %7742, %v958_v2  }
 0x663   :  { %1333 = vrot.lane.b32.xlu1 %v8583_v18, %s8367_s17 }
 0x667   :  { %1031 = vperm.xlu1 %7742, %v961_v3  }
 0x66b   :  { %1041 = vperm.xlu1 %7742, %v963_v4  }
 0x66f   :  { %1508 = vrot.lane.b32.xlu1 %v8587_v42, %s8365_s26 }
 0x698   :  { %v846_v5 = vpop.xlane.xlu0 %845 }
 0x699   :  { %8075 = vrcp.f32 %v846_v5 }
 0x69a   :  { %v849_v46 = vpop.xlane.xlu1 %848 }
 0x69b   :  { %8077 = vrcp.f32 %v849_v46 }
 0x69e   :  { %v852_v51 = vpop.xlane.xlu0 %851  ;;  %v855_v7 = vpop.xlane.xlu1 %854 }
 0x69f   :  { %8079 = vrcp.f32 %v852_v51 }
 0x6a0   :  { %8081 = vrcp.f32 %v855_v7 }
 0x6a2   :  { %v858_v18 = vpop.xlane.xlu0 %857 }
 0x6a3   :  { %v8076_v8 = vpop.eup %8075  ;;  %8083 = vrcp.f32 %v858_v18  ;;  %v861_v10 = vpop.xlane.xlu1 %860 }
 0x6a4   :  { %8085 = vrcp.f32 %v861_v10  ;;  %v908_v60 = vmul.f32 %v8076_v8, %v8674_v26 }
 0x6a5   :  { %v8078_v11 = vpop.eup %8077 }
 0x6a6   :  { %v864_v12 = vpop.xlane.xlu0 %863  ;;  %v909_v62 = vmul.f32 %v8078_v11, %v8680_v30 }
 0x6a7   :  { %8087 = vrcp.f32 %v864_v12  ;;  %v867_v13 = vpop.xlane.xlu1 %866 }
 0x6a8   :  { %8089 = vrcp.f32 %v867_v13  ;;  %v940_v15 = vpack.c.bf16 %v909_v62, %v908_v60  ;;  %v7859_v62 = vld [vmem:[%s10590_s1 + $0x1c0] ss:$8 sps:$4 sm:$0xff]  }
 0x6a9   :  { %v8080_v16 = vpop.eup %8079 }
 0x6aa   :  { %v8082_v19 = vpop.eup %8081  ;;  %v870_v57 = vpop.xlane.xlu0 %869  ;;  %7263 = vmatprep.subr.bf16.mxu1 %v940_v15  ;;  %v910_v21 = vmul.f32 %v8080_v16, %v8688_v41  ;;  %v7860_v16 = vld [vmem:[%s10590_s1 + $0x1d0] ss:$8 sps:$4 sm:$0xff]  }
 0x6ab   :  { %8091 = vrcp.f32 %v870_v57  ;;  %v873_v23 = vpop.xlane.xlu1 %872  ;;  %7264 = vmatpush3.bf16.msra.mxu1 %v940_v15  ;;  %v911_v27 = vmul.f32 %v8082_v19, %v8684_v39  ;;  %v7861_v19 = vld [vmem:[%s10590_s1 + $0x1e0] ss:$8 sps:$4 sm:$0xff]   ;;  %v7862_v57 = vld [vmem:[%s10590_s1 + $0x1f0] ss:$8 sps:$4 sm:$0xff]  }
 0x6ac   :  { %8093 = vrcp.f32 %v873_v23 }
 0x6ad   :  { %v8084_v29 = vpop.eup %8083  ;;  %v941_v26 = vpack.c.bf16 %v911_v27, %v910_v21 }
 0x6ae   :  { %v8086_v33 = vpop.eup %8085  ;;  %v876_v30 = vpop.xlane.xlu0 %875  ;;  %v912_v34 = vmul.f32 %v8084_v29, %v8696_v52 }
 0x6af   :  { %8095 = vrcp.f32 %v876_v30  ;;  %7265 = vmatprep.subr.bf16.mxu1 %v941_v26  ;;  %v879_v36 = vpop.xlane.xlu1 %878  ;;  %v913_v38 = vmul.f32 %v8086_v33, %v8698_v1 }
 0x6b0   :  { %8097 = vrcp.f32 %v879_v36  ;;  %7266 = vmatpush3.bf16.msra.mxu1 %v941_v26 }
 0x6b1   :  { %v8088_v41 = vpop.eup %8087  ;;  %v942_v37 = vpack.c.bf16 %v913_v38, %v912_v34 }
 0x6b2   :  { %v8090_v40 = vpop.eup %8089  ;;  %v882_v43 = vpop.xlane.xlu0 %881  ;;  %v914_v39 = vmul.f32 %v8088_v41, %v8706_v6 }
 0x6b3   :  { %8099 = vrcp.f32 %v882_v43  ;;  %7267 = vmatprep.subr.bf16.mxu1 %v942_v37  ;;  %v885_v45 = vpop.xlane.xlu1 %884  ;;  %v915_v48 = vmul.f32 %v8090_v40, %v8708_v9 }
 0x6b4   :  { %8101 = vrcp.f32 %v885_v45  ;;  %7268 = vmatpush3.bf16.msra.mxu1 %v942_v37 }
 0x6b5   :  { %v8092_v52 = vpop.eup %8091  ;;  %v943_v49 = vpack.c.bf16 %v915_v48, %v914_v39 }
 0x6b6   :  { %v8094_v54 = vpop.eup %8093  ;;  %v888_v56 = vpop.xlane.xlu0 %887  ;;  %v916_v1 = vmul.f32 %v8092_v52, %v8716_v14 }
 0x6b7   :  { %8103 = vrcp.f32 %v888_v56  ;;  %7269 = vmatprep.subr.bf16.mxu1 %v943_v49  ;;  %v891_v58 = vpop.xlane.xlu1 %890  ;;  %v917_v50 = vmul.f32 %v8094_v54, %v8718_v17 }
 0x6b8   :  { %8105 = vrcp.f32 %v891_v58  ;;  %7270 = vmatpush3.bf16.msra.mxu1 %v943_v49 }
 0x6b9   :  { %v8096_v6 = vpop.eup %8095  ;;  %v944_v59 = vpack.c.bf16 %v917_v50, %v916_v1 }
 0x6ba   :  { %v8098_v63 = vpop.eup %8097  ;;  %v918_v9 = vmul.f32 %v8096_v6, %v8724_v61 }
 0x6bb   :  { %7271 = vmatprep.subr.bf16.mxu1 %v944_v59  ;;  %v972_v2 = vpop.permute.xlu1 %971  ;;  %v919_v3 = vmul.f32 %v8098_v63, %v8726_v20 }
 0x6bc   :  { %7272 = vmatpush3.bf16.msra.mxu1 %v944_v59 }
 0x6bd   :  { %v8100_v4 = vpop.eup %8099  ;;  %v945_v5 = vpack.c.bf16 %v919_v3, %v918_v9 }
 0x6be   :  { %v8102_v14 = vpop.eup %8101  ;;  %v920_v46 = vmul.f32 %v8100_v4, %v8732_v24  ;;  %v7856_v24 = vld [vmem:[%s10590_s1 + $0x190] ss:$8 sps:$4 sm:$0xff]   ;;  %v967_v21 = vpop.permute.xlu0 %966 }
 0x6bf   :  { %7273 = vmatprep.subr.bf16.mxu1 %v945_v5  ;;  %v977_v51 = vpop.permute.xlu1 %976  ;;  %v921_v17 = vmul.f32 %v8102_v14, %v8734_v25  ;;  %v7857_v25 = vld [vmem:[%s10590_s1 + $0x1a0] ss:$8 sps:$4 sm:$0xff]  }
 0x6c0   :  { %7274 = vmatpush3.bf16.msra.mxu1 %v945_v5 }
 0x6c1   :  { %v8104_v7 = vpop.eup %8103  ;;  %v946_v18 = vpack.c.bf16 %v921_v17, %v920_v46 }
 0x6c2   :  { %v8106_v8 = vpop.eup %8105  ;;  %v922_v61 = vmul.f32 %v8104_v7, %v8740_v28  ;;  %v1007_v23 = vpop.permute.xlu0 %1006 }
 0x6c3   :  { %7275 = vmatprep.subr.bf16.mxu1 %v946_v18  ;;  %v982_v10 = vpop.permute.xlu1 %981  ;;  %v923_v20 = vmul.f32 %v8106_v8, %v8742_v31  ;;  %v7858_v31 = vld [vmem:[%s10590_s1 + $0x1b0] ss:$8 sps:$4 sm:$0xff]  }
 0x6c4   :  { %7276 = vmatpush3.bf16.msra.mxu1 %v946_v18 }
 0x6c5   :  { %v947_v11 = vpack.c.bf16 %v923_v20, %v922_v61 }
 0x6c6   :  { %v1286_v27 = vpop.permute.xlu0 %1285 }
 0x6c7   :  { %7277 = vmatprep.subr.bf16.mxu1 %v947_v11  ;;  %v987_v12 = vpop.permute.xlu1 %986 }
 0x6c8   :  { %7278 = vmatpush3.bf16.msra.mxu1 %v947_v11 }
 0x6c9   :  { %7301 = vmatprep.subr.bf16.mxu1 %v8364_v22 }
 0x6ca   :  { %v1022_v26 = vpop.permute.xlu0 %1021 }
 0x6cb   :  { %7280 = vmatmul.mubr.bf16.vlgmr.msra.gmra.mrb[24].mxu1 %v7856_v24  ;;  %v992_v28 = vpop.permute.xlu1 %991 }
 0x6cc   :  { %7283 = vmatprep.mubr.bf16.mxu1 %v7857_v25 }
 0x6ce   :  { %v8854_v38 = vpop.permute.xlu0 %1026 }
 0x6cf   :  { %v997_v60 = vpop.permute.xlu1 %996 }
 0x6d2   :  { %v1037_v54 = vpop.permute.xlu0 %1036 }
 0x6d3   :  { %7284 = vmatmul.mubr.bf16.gmra.mrb[28].mxu1 %v7858_v31  ;;  %v1002_v13 = vpop.permute.xlu1 %1001 }
 0x6d4   :  { %7287 = vmatprep.mubr.bf16.mxu1 %v7859_v62 }
 0x6d6   :  { %v1461_v4 = vpop.permute.xlu0 %1460 }
 0x6d7   :  { %v1238_v15 = vpop.permute.xlu1 %1237 }
 0x6d8   :  { %7302 = vmatpush3.bf16.msra.mxu1 %v1238_v15 }
 0x6d9   :  { %7313 = vmatprep.subr.bf16.mxu1 %v8364_v22 }
 0x6da   :  { %v1557_v20 = vpop.permute.xlu0 %1556 }
 0x6db   :  { %7288 = vmatmul.mubr.bf16.gmra.mrb[32].mxu1 %v7860_v16  ;;  %v1012_v29 = vpop.permute.xlu1 %1011 }
 0x6dc   :  { %7291 = vmatprep.mubr.bf16.mxu1 %v7861_v19 }
 0x6df   :  { %v1017_v33 = vpop.permute.xlu1 %1016 }
 0x6e3   :  { %7292 = vmatmul.mubr.bf16.gmra.mrb[36].mxu1 %v7862_v57  ;;  %v1334_v48 = vpop.permute.xlu1 %1333 }
 0x6e4   :  { %7303 = vmatprep.mubr.msk.bf16.mxu1 %vm8368_vm2, %v8364_v22 }
 0x6e7   :  { %v1032_v59 = vpop.permute.xlu1 %1031 }
 0x6eb   :  { %v1042_v46 = vpop.permute.xlu1 %1041 }
 0x6ef   :  { %v1509_v11 = vpop.permute.xlu1 %1508 }
 0x79e   :  { %v7281_v30 = vpop.f32.mrb[24].mxu1 }
 0x79f   :  { %v1126_v34 = vpop.f32.mrb[25].mxu1  ;;  %v1135_v41 = vadd.f32 %v7281_v30, %v977_v51 }
 0x7a0   :  { %v7282_v36 = vpop.f32.mrb[26].mxu1  ;;  %v1127_v43 = vadd.f32 %v1126_v34, %v967_v21  ;;  %v7863_v34 = vld [vmem:[%s10590_s1 + $0x200] ss:$8 sps:$4 sm:$0xff]  }
 0x7a1   :  { %v1138_v37 = vadd.f32 %v7282_v36, %v982_v10  ;;  %v1129_v40 = vpop.f32.mrb[27].mxu1 }
 0x7a2   :  { %v1130_v39 = vadd.f32 %v1129_v40, %v972_v2 }
 0x7a3   :  { %v1235_v45 = vpack.c.bf16 %v1138_v37, %v1135_v41 }
 0x7a4   :  { %v1189_v52 = vpack.c.bf16 %v1130_v39, %v1127_v43  ;;  %v7864_v43 = vld [vmem:[%s10590_s1 + $0x210] ss:$8 sps:$4 sm:$0xff]   ;;  %v7865_v39 = vld [vmem:[%s10590_s1 + $0x220] ss:$8 sps:$4 sm:$0xff]  }
 0x7a5   :  { %7304 = vmatmul.mubr.msk.bf16.vlgmr.msra.gmra.mrb[40].mxu1 %vm747_vm1, %v1235_v45 }
 0x7a6   :  { %7314 = vmatpush3.bf16.msra.mxu1 %v1334_v48  ;;  %v7285_v49 = vpop.f32.mrb[28].mxu1  ;;  %7298 = vmatmul.mubr.msk.bf16.vlgmr.msra.gmra.mrb[24].mxu0 %vm747_vm1, %v1189_v52 }
 0x7a7   :  { %7308 = vmatpush3.bf16.msra.mxu0 %v1286_v27  ;;  %v1142_v56 = vpop.f32.mrb[29].mxu1  ;;  %7315 = vmatprep.mubr.msk.bf16.mxu1 %vm8368_vm2, %v8364_v22  ;;  %v1151_v58 = vadd.f32 %v7285_v49, %v997_v60 }
 0x7a8   :  { %v7286_v1 = vpop.f32.mrb[30].mxu1  ;;  %7325 = vmatprep.subr.bf16.mxu1 %v8364_v22  ;;  %7309 = vmatprep.mubr.msk.bf16.mxu0 %vm8368_vm2, %v8364_v22  ;;  %v1143_v63 = vadd.f32 %v1142_v56, %v987_v12 }
 0x7a9   :  { %v1154_v50 = vadd.f32 %v7286_v1, %v1002_v13  ;;  %v1145_v6 = vpop.f32.mrb[31].mxu1  ;;  %7319 = vmatprep.subr.bf16.mxu0 %v8364_v22 }
 0x7aa   :  { %v1146_v9 = vadd.f32 %v1145_v6, %v992_v28 }
 0x7ab   :  { %v1332_v2 = vpack.c.bf16 %v1154_v50, %v1151_v58 }
 0x7ac   :  { %v1284_v3 = vpack.c.bf16 %v1146_v9, %v1143_v63 }
 0x7ad   :  { %7316 = vmatmul.mubr.msk.bf16.vlgmr.msra.gmra.mrb[44].mxu1 %vm747_vm1, %v1332_v2 }
 0x7ae   :  { %7326 = vmatpush3.bf16.msra.mxu1 %v1461_v4  ;;  %v7289_v5 = vpop.f32.mrb[32].mxu1  ;;  %7310 = vmatmul.mubr.msk.bf16.vlgmr.msra.gmra.mrb[28].mxu0 %vm747_vm1, %v1284_v3 }
 0x7af   :  { %7320 = vmatpush3.bf16.msra.mxu0 %v8587_v42  ;;  %v1158_v14 = vpop.f32.mrb[33].mxu1  ;;  %7327 = vmatprep.mubr.msk.bf16.mxu1 %vm8368_vm2, %v8364_v22  ;;  %v1167_v17 = vadd.f32 %v7289_v5, %v1017_v33 }
 0x7b0   :  { %v7290_v51 = vpop.f32.mrb[34].mxu1  ;;  %7337 = vmatprep.subr.bf16.mxu1 %v8364_v22  ;;  %7321 = vmatprep.mubr.msk.bf16.mxu0 %vm8368_vm2, %v8364_v22  ;;  %v1159_v8 = vadd.f32 %v1158_v14, %v1007_v23 }
 0x7b1   :  { %v1170_v7 = vadd.f32 %v7290_v51, %v1022_v26  ;;  %v1161_v18 = vpop.f32.mrb[35].mxu1  ;;  %7331 = vmatprep.subr.bf16.mxu0 %v8364_v22 }
 0x7b2   :  { %v1162_v61 = vadd.f32 %v1161_v18, %v1012_v29 }
 0x7b3   :  { %v1458_v10 = vpack.c.bf16 %v1170_v7, %v1167_v17 }
 0x7b4   :  { %v1412_v42 = vpack.c.bf16 %v1162_v61, %v1159_v8 }
 0x7b5   :  { %7328 = vmatmul.mubr.msk.bf16.vlgmr.msra.gmra.mrb[48].mxu1 %vm747_vm1, %v1458_v10 }
 0x7b6   :  { %7338 = vmatpush3.bf16.msra.mxu1 %v1557_v20  ;;  %v7293_v12 = vpop.f32.mrb[36].mxu1  ;;  %7322 = vmatmul.mubr.msk.bf16.vlgmr.msra.gmra.mrb[32].mxu0 %vm747_vm1, %v1412_v42 }
 0x7b7   :  { %7332 = vmatpush3.bf16.msra.mxu0 %v1509_v11  ;;  %v1174_v24 = vpop.f32.mrb[37].mxu1  ;;  %7339 = vmatprep.mubr.msk.bf16.mxu1 %vm8368_vm2, %v8364_v22  ;;  %v1183_v28 = vadd.f32 %v7293_v12, %v1037_v54 }
 0x7b8   :  { %v7294_v25 = vpop.f32.mrb[38].mxu1  ;;  %7333 = vmatprep.mubr.msk.bf16.mxu0 %vm8368_vm2, %v8364_v22  ;;  %v1175_v62 = vadd.f32 %v1174_v24, %v8854_v38  ;;  %7343 = vmatprep.subr.bf16.mxu1 %v7863_v34 }
 0x7b9   :  { %v1186_v60 = vadd.f32 %v7294_v25, %v1042_v46  ;;  %v1177_v31 = vpop.f32.mrb[39].mxu1 }
 0x7ba   :  { %v1178_v13 = vadd.f32 %v1177_v31, %v1032_v59  ;;  %v7866_v59 = vld [vmem:[%s10590_s1 + $0x230] ss:$8 sps:$4 sm:$0xff]  }
 0x7bb   :  { %v1555_v15 = vpack.c.bf16 %v1186_v60, %v1183_v28 }
 0x7bc   :  { %v1507_v16 = vpack.c.bf16 %v1178_v13, %v1175_v62 }
 0x7bd   :  { %7340 = vmatmul.mubr.msk.bf16.vlgmr.msra.gmra.mrb[52].mxu1 %vm747_vm1, %v1555_v15 }
 0x7be   :  { %7334 = vmatmul.mubr.msk.bf16.vlgmr.msra.gmra.mrb[36].mxu0 %vm747_vm1, %v1507_v16  ;;  %7344 = vmatpush3.bf16.msra.mxu1 %v7863_v34 }
 0x7bf   :  { %7345 = vmatprep.subr.bf16.mxu1 %v7864_v43 }
 0x7c2   :  { %7346 = vmatpush3.bf16.msra.mxu1 %v7864_v43 }
 0x7c3   :  { %7347 = vmatprep.subr.bf16.mxu1 %v7865_v39 }
 0x7c6   :  { %7348 = vmatpush3.bf16.msra.mxu1 %v7865_v39 }
 0x7c7   :  { %7349 = vmatprep.subr.bf16.mxu1 %v7866_v59 }
 0x7ca   :  { %7350 = vmatpush3.bf16.msra.mxu1 %v7866_v59 }
 0x878   :  { %v1277_v19 = vpop.f32.mrb[40].mxu1 }
 0x879   :  { %v8882_v57 = vpop.f32.mrb[24].mxu0  ;;  %v7305_v21 = vpop.f32.mrb[41].mxu1 }
 0x87a   :  { %v7299_v23 = vpop.f32.mrb[25].mxu0  ;;  %v1280_v27 = vpop.f32.mrb[42].mxu1 }
 0x87b   :  { %v7743_v29 = vpack.i.bf16 %v1280_v27, %v1277_v19  ;;  %v8884_v26 = vpop.f32.mrb[26].mxu0  ;;  %v7306_v33 = vpop.f32.mrb[43].mxu1 }
 0x87c   :  { %v7300_v30 = vpop.f32.mrb[27].mxu0 }
 0x87d   :  { %7744 = vrot.lane.b32.xlu1 %v7743_v29, %s8369_s13 }
 0x880   :  { %v1373_v36 = vpop.f32.mrb[44].mxu1 }
 0x881   :  { %v1325_v38 = vpop.f32.mrb[28].mxu0  ;;  %v7317_v41 = vpop.f32.mrb[45].mxu1 }
 0x882   :  { %v7311_v37 = vpop.f32.mrb[29].mxu0  ;;  %v1376_v40 = vpop.f32.mrb[46].mxu1 }
 0x883   :  { %v7748_v45 = vpack.i.bf16 %v1376_v40, %v1373_v36  ;;  %v1328_v48 = vpop.f32.mrb[30].mxu0  ;;  %v7318_v52 = vpop.f32.mrb[47].mxu1 }
 0x884   :  { %v7753_v49 = vpack.i.bf16 %v1328_v48, %v1325_v38  ;;  %v7312_v54 = vpop.f32.mrb[31].mxu0  ;;  %v1644_v48 = vld [vmem:[%s10591_s2 + $0x220] ss:$0 sm:$0xff] }
 0x885   :  { %7749 = vrot.lane.b32.xlu0 %v7748_v45, %s8370_s22 }
 0x888   :  { %v1500_v56 = vpop.f32.mrb[48].mxu1 }
 0x889   :  { %v1451_v1 = vpop.f32.mrb[32].mxu0  ;;  %7754 = vrot.lane.b32.xlu0 %v7753_v49, %s8371_s24  ;;  %v7329_v58 = vpop.f32.mrb[49].mxu1  ;;  %v1633_v49 = vld [vmem:[%s10591_s2 + $0x230] ss:$0 sm:$0xff] }
 0x88a   :  { %v7323_v50 = vpop.f32.mrb[33].mxu0  ;;  %v1503_v6 = vpop.f32.mrb[50].mxu1 }
 0x88b   :  { %v7758_v63 = vpack.i.bf16 %v1503_v6, %v1500_v56  ;;  %v1454_v9 = vpop.f32.mrb[34].mxu0  ;;  %v7330_v2 = vpop.f32.mrb[51].mxu1 }
 0x88c   :  { %v7324_v3 = vpop.f32.mrb[35].mxu0 }
 0x88d   :  { %7759 = vrot.lane.b32.xlu1 %v7758_v63, %s8369_s13 }
 0x890   :  { %v1596_v4 = vpop.f32.mrb[52].mxu1 }
 0x891   :  { %v1548_v5 = vpop.f32.mrb[36].mxu0  ;;  %v7341_v14 = vpop.f32.mrb[53].mxu1 }
 0x892   :  { %v7335_v46 = vpop.f32.mrb[37].mxu0  ;;  %v1599_v51 = vpop.f32.mrb[54].mxu1 }
 0x893   :  { %v7768_v17 = vpack.i.bf16 %v1599_v51, %v1596_v4  ;;  %v1551_v7 = vpop.f32.mrb[38].mxu0  ;;  %v7342_v18 = vpop.f32.mrb[55].mxu1 }
 0x894   :  { %v7763_v8 = vpack.i.bf16 %v1551_v7, %v1548_v5  ;;  %v7336_v61 = vpop.f32.mrb[39].mxu0 }
 0x895   :  { %7769 = vrot.lane.b32.xlu0 %v7768_v17, %s8370_s22 }
 0x896   :  { %7764 = vrot.lane.b32.xlu1 %v7763_v8, %s8371_s24 }
 0x8ef   :  { %v7745_v10 = vpop.permute.xlu1 %7744 }
 0x8f0   :  { %v7747_v20 = vunpack.i.h.bf16 %v7745_v10  ;;  %v7746_v11 = vunpack.i.l.bf16 %v7745_v10 }
 0x8f2   :  { %v1405_v28 = vsel %vm747_vm1, %v8884_v26, %v7747_v20  ;;  %v1404_v60 = vsel %vm747_vm1, %v8882_v57, %v7746_v11 }
 0x8f7   :  { %v7750_v42 = vpop.permute.xlu0 %7749 }
 0x8f8   :  { %v7752_v31 = vunpack.i.h.bf16 %v7750_v42  ;;  %v7751_v62 = vunpack.i.l.bf16 %v7750_v42 }
 0x8fb   :  { %v7755_v12 = vpop.permute.xlu0 %7754 }
 0x8fc   :  { %v7757_v24 = vunpack.i.h.bf16 %v7755_v12  ;;  %v7756_v25 = vunpack.i.l.bf16 %v7755_v12 }
 0x8fe   :  { %v1407_v13 = vsel %vm1406_vm3, %v1404_v60, %v7756_v25  ;;  %v1408_v15 = vsel %vm1406_vm3, %v1405_v28, %v7757_v24 }
 0x8ff   :  { %v1410_v16 = vsel %vm1409_vm4, %v1407_v13, %v7751_v62  ;;  %v1411_v19 = vsel %vm1409_vm4, %v1408_v15, %v7752_v31  ;;  %v7760_v23 = vpop.permute.xlu1 %7759 }
 0x900   :  { %v1642_v21 = vpack.c.bf16 %v1411_v19, %v1410_v16  ;;  %v7762_v27 = vunpack.i.h.bf16 %v7760_v23  ;;  %v7761_v29 = vunpack.i.l.bf16 %v7760_v23  ;;  %v7869_v19 = vld [vmem:[%s10590_s1 + $0x244] ss:$8 sps:$4 sm:$0xff]   ;;  %v7872_v23 = vld [vmem:[%s10590_s1 + $0x254] ss:$8 sps:$4 sm:$0xff]  }
 0x901   :  { %1863 = vmatprep.subr.bf16.mxu1 %v7869_v19  ;;  %v6688_v19 = vld [vmem:[%s10591_s2 + $0x260] ss:$8 sm:$0x3] }
 0x902   :  { %7351 = vmatprep.mubr.msk.bf16.mxu1 %vm128_vm0, %v1642_v21  ;;  %v1628_v34 = vsel %vm747_vm1, %v1454_v9, %v7762_v27  ;;  %v1627_v36 = vsel %vm747_vm1, %v1451_v1, %v7761_v29  ;;  %v7867_v21 = vld [vmem:[%s10590_s1 + $0x240] ss:$8 sps:$4 sm:$0xff]   ;;  %v7870_v27 = vld [vmem:[%s10590_s1 + $0x250] ss:$8 sps:$4 sm:$0xff]   ;;  %v7875_v29 = vld [vmem:[%s10590_s1 + $0x264] ss:$8 sps:$4 sm:$0xff]  }
 0x907   :  { %v7770_v26 = vpop.permute.xlu0 %7769 }
 0x908   :  { %v7765_v33 = vpop.permute.xlu1 %7764  ;;  %v7772_v38 = vunpack.i.h.bf16 %v7770_v26  ;;  %v7771_v41 = vunpack.i.l.bf16 %v7770_v26  ;;  %v7873_v26 = vld [vmem:[%s10590_s1 + $0x260] ss:$8 sps:$4 sm:$0xff]  }
 0x909   :  { %v7767_v30 = vunpack.i.h.bf16 %v7765_v33  ;;  %v7766_v57 = vunpack.i.l.bf16 %v7765_v33  ;;  %v7876_v33 = vld [vmem:[%s10590_s1 + $0x270] ss:$8 sps:$4 sm:$0xff]  }
 0x90b   :  { %v1629_v37 = vsel %vm1406_vm3, %v1627_v36, %v7766_v57  ;;  %v1630_v40 = vsel %vm1406_vm3, %v1628_v34, %v7767_v30  ;;  %v7878_v30 = vld [vmem:[%s10590_s1 + $0x274] ss:$8 sps:$4 sm:$0xff]  }
 0x90c   :  { %v1631_v43 = vsel %vm1409_vm4, %v1629_v37, %v7771_v41  ;;  %v1632_v39 = vsel %vm1409_vm4, %v1630_v40, %v7772_v38 }
 0x90d   :  { %v1643_v45 = vpack.c.bf16 %v1632_v39, %v1631_v43 }
 0x90f   :  { %7352 = vmatmul.mubr.msk.bf16.vlgmr.msra.gmra.mrb[56].mxu1 %vm128_vm0, %v1643_v45 }
 0x910   :  { %1895 = vmatprep.mubr.bf16.mxu1 %v8362_v0  ;;  %1864 = vmatpush1.bf16.msra.mxu1 %v7867_v21  ;;  %v1810_v21 = vrot.slane %v6688_v19, %v8550_v53 }
 0x911   :  { %1865 = vmatprep.subr.bf16.mxu1 %v7872_v23  ;;  %v1814_v23 = vrot.slane %v6688_v19, %v8555_v55 }
 0x914   :  { %1866 = vmatpush1.bf16.msra.mxu1 %v7870_v27 }
 0x915   :  { %1867 = vmatprep.subr.bf16.mxu1 %v7875_v29 }
 0x918   :  { %1868 = vmatpush1.bf16.msra.mxu1 %v7873_v26 }
 0x919   :  { %1869 = vmatprep.subr.bf16.mxu1 %v7878_v30 }
 0x91c   :  { %1870 = vmatpush1.bf16.msra.mxu1 %v7876_v33 }
 0x9e2   :  { %v7353_v52 = vpop.f32.mrb[56].mxu1 }
 0x9e3   :  { %v1709_v54 = vpop.f32.mrb[57].mxu1  ;;  %v1718_v56 = vadd.f32 %v7353_v52, %v1644_v48 }
 0x9e4   :  { %v1710_v1 = vadd.f32 %v1709_v54, %v1644_v48  ;;  %v7354_v58 = vpop.f32.mrb[58].mxu1  ;;  %v1732_v54 = vld [vmem:[%s10591_s2 + $0x240] ss:$0 sm:$0xff] }
 0x9e5   :  { %v1721_v50 = vadd.f32 %v7354_v58, %v1644_v48  ;;  %v1712_v6 = vpop.f32.mrb[59].mxu1  ;;  %v1726_v2 = vmul.f32 %v1718_v56, %v1633_v49 }
 0x9e6   :  { %v1724_v59 = vmul.f32 %v1710_v1, %v1633_v49  ;;  %v1713_v63 = vadd.f32 %v1712_v6, %v1644_v48  ;;  %v1733_v6 = vld [vmem:[%s10591_s2 + $0x250] ss:$0 sm:$0xff] }
 0x9e7   :  { %v1727_v9 = vmul.f32 %v1721_v50, %v1633_v49  ;;  %v8939_v51 = vadd.f32 %v1726_v2, %v8501_v44 }
 0x9e8   :  { %v8928_v3 = vadd.f32 %v1724_v59, %v8487_v32  ;;  %v1725_v4 = vmul.f32 %v1713_v63, %v1633_v49 }
 0x9e9   :  { %v8931_v5 = vadd.f32 %v1727_v9, %v8503_v47  ;;  %v1740_v47 = vsel %vm128_vm0, %v8939_v51, 0.0 }
 0x9ea   :  { %v8934_v14 = vadd.f32 %v1725_v4, %v8489_v35  ;;  %v1734_v46 = vsel %vm128_vm0, %v8928_v3, 0.0 }
 0x9eb   :  { %1735 = vadd.xlane.f32.xlu1 %v1734_v46  ;;  %v1743_v32 = vsel %vm128_vm0, %v8931_v5, 0.0 }
 0x9ec   :  { %v1737_v17 = vsel %vm128_vm0, %v8934_v14, 0.0 }
 0x9ed   :  { %1738 = vadd.xlane.f32.xlu0 %v1737_v17 }
 0x9ef   :  { %1744 = vadd.xlane.f32.xlu1 %v1743_v32 }
 0x9f1   :  { %1741 = vadd.xlane.f32.xlu0 %v1740_v47 }
 0xa78   :  { %v1736_v35 = vpop.xlane.xlu1 %1735 }
 0xa79   :  { %v1746_v7 = vmul.f32 0.015625, %v1736_v35 }
 0xa7a   :  { %v1739_v18 = vpop.xlane.xlu0 %1738 }
 0xa7b   :  { %v1750_v8 = vsub.f32 %v8928_v3, %v1746_v7  ;;  %v1747_v61 = vmul.f32 0.015625, %v1739_v18 }
 0xa7c   :  { %v1745_v44 = vpop.xlane.xlu1 %1744 }
 0xa7d   :  { %v1751_v10 = vsub.f32 %v8934_v14, %v1747_v61  ;;  %v1749_v42 = vmul.f32 0.015625, %v1745_v44  ;;  %v1754_v20 = vmul.f32 %v1750_v8, %v1750_v8  ;;  %v7879_v61 = vld [vmem:[%s10590_s1 + $0x300] ss:$8 sps:$4 sm:$0xff]  }
 0xa7e   :  { %v1742_v11 = vpop.xlane.xlu0 %1741  ;;  %v7880_v44 = vld [vmem:[%s10590_s1 + $0x280] ss:$8 sps:$4 sm:$0xff]   ;;  %6957 = vmatprep.subr.bf16.mxu0 %v7879_v61 }
 0xa7f   :  { %v1753_v12 = vsub.f32 %v8931_v5, %v1749_v42  ;;  %v1748_v24 = vmul.f32 0.015625, %v1742_v11  ;;  %v1758_v25 = vsel %vm128_vm0, %v1754_v20, 0.0  ;;  %v1755_v28 = vmul.f32 %v1751_v10, %v1751_v10  ;;  %6958 = vmatpush3.bf16.msra.mxu0 %v7880_v44  ;;  %v7882_v42 = vld [vmem:[%s10590_s1 + $0x290] ss:$8 sps:$4 sm:$0xff]   ;;  %v7883_v20 = vld [vmem:[%s10590_s1 + $0x320] ss:$8 sps:$4 sm:$0xff]  }
 0xa80   :  { %1759 = vadd.xlane.f32.xlu0 %v1758_v25  ;;  %v7884_v11 = vld [vmem:[%s10590_s1 + $0x2a0] ss:$8 sps:$4 sm:$0xff]  }
 0xa81   :  { %v1752_v60 = vsub.f32 %v8939_v51, %v1748_v24  ;;  %v1761_v31 = vsel %vm128_vm0, %v1755_v28, 0.0  ;;  %v1757_v62 = vmul.f32 %v1753_v12, %v1753_v12  ;;  %v7886_v24 = vld [vmem:[%s10590_s1 + $0x2b0] ss:$8 sps:$4 sm:$0xff]   ;;  %v7887_v25 = vld [vmem:[%s10590_s1 + $0x340] ss:$8 sps:$4 sm:$0xff]  }
 0xa82   :  { %1762 = vadd.xlane.f32.xlu1 %v1761_v31  ;;  %v7888_v28 = vld [vmem:[%s10590_s1 + $0x2c0] ss:$8 sps:$4 sm:$0xff]   ;;  %v7890_v31 = vld [vmem:[%s10590_s1 + $0x2d0] ss:$8 sps:$4 sm:$0xff]  }
 0xa83   :  { %v1756_v13 = vmul.f32 %v1752_v60, %v1752_v60  ;;  %v1767_v16 = vsel %vm128_vm0, %v1757_v62, 0.0  ;;  %v7891_v62 = vld [vmem:[%s10590_s1 + $0x360] ss:$8 sps:$4 sm:$0xff]  }
 0xa85   :  { %v1764_v15 = vsel %vm128_vm0, %v1756_v13, 0.0  ;;  %v7892_v13 = vld [vmem:[%s10590_s1 + $0x2e0] ss:$8 sps:$4 sm:$0xff]  }
 0xa86   :  { %1765 = vadd.xlane.f32.xlu0 %v1764_v15  ;;  %1768 = vadd.xlane.f32.xlu1 %v1767_v16  ;;  %v7893_v15 = vld [vmem:[%s10590_s1 + $0x370] ss:$8 sps:$4 sm:$0xff]  }
 0xa87   :  { %v7894_v16 = vld [vmem:[%s10590_s1 + $0x2f0] ss:$8 sps:$4 sm:$0xff]  }
 0xb0d   :  { %v1760_v57 = vpop.xlane.xlu0 %1759 }
 0xb0e   :  { %v1770_v34 = vmul.f32 0.015625, %v1760_v57 }
 0xb0f   :  { %v1763_v36 = vpop.xlane.xlu1 %1762 }
 0xb10   :  { %v1774_v38 = vadd.f32 1e-06, %v1770_v34  ;;  %v1771_v41 = vmul.f32 0.015625, %v1763_v36 }
 0xb12   :  { %8107 = vrsqrt.f32 %v1774_v38  ;;  %v1775_v37 = vadd.f32 1e-06, %v1771_v41 }
 0xb13   :  { %v1766_v40 = vpop.xlane.xlu0 %1765  ;;  %v1769_v43 = vpop.xlane.xlu1 %1768 }
 0xb14   :  { %8109 = vrsqrt.f32 %v1775_v37  ;;  %v1772_v39 = vmul.f32 0.015625, %v1766_v40  ;;  %v1773_v45 = vmul.f32 0.015625, %v1769_v43 }
 0xb16   :  { %v1776_v48 = vadd.f32 1e-06, %v1772_v39  ;;  %v1777_v52 = vadd.f32 1e-06, %v1773_v45 }
 0xb18   :  { %8111 = vrsqrt.f32 %v1776_v48 }
 0xb19   :  { %8113 = vrsqrt.f32 %v1777_v52 }
 0xb1c   :  { %v8108_v49 = vpop.eup %8107 }
 0xb1d   :  { %v1782_v56 = vmul.f32 %v8108_v49, %v1750_v8 }
 0xb1e   :  { %v8110_v1 = vpop.eup %8109 }
 0xb1f   :  { %v1786_v58 = vmul.f32 %v1782_v56, %v1732_v54  ;;  %v1783_v50 = vmul.f32 %v8110_v1, %v1751_v10  ;;  %v7881_v10 = vld [vmem:[%s10590_s1 + $0x310] ss:$8 sps:$4 sm:$0xff]  }
 0xb20   :  { %6959 = vmatprep.subr.bf16.mxu0 %v7881_v10 }
 0xb21   :  { %v1787_v59 = vmul.f32 %v1783_v50, %v1732_v54  ;;  %v1790_v2 = vadd.f32 %v1786_v58, %v1733_v6  ;;  %6960 = vmatpush3.bf16.msra.mxu0 %v7882_v42 }
 0xb22   :  { %v8112_v63 = vpop.eup %8111  ;;  %6961 = vmatprep.subr.bf16.mxu0 %v7883_v20 }
 0xb23   :  { %v8114_v9 = vpop.eup %8113  ;;  %v1791_v4 = vadd.f32 %v1787_v59, %v1733_v6  ;;  %v1784_v46 = vmul.f32 %v8112_v63, %v1752_v60  ;;  %v7889_v60 = vld [vmem:[%s10590_s1 + $0x350] ss:$8 sps:$4 sm:$0xff]  }
 0xb24   :  { %v1785_v17 = vmul.f32 %v8114_v9, %v1753_v12  ;;  %v7885_v12 = vld [vmem:[%s10590_s1 + $0x330] ss:$8 sps:$4 sm:$0xff]  }
 0xb25   :  { %v1802_v32 = vpack.c.bf16 %v1791_v4, %v1790_v2  ;;  %v1788_v47 = vmul.f32 %v1784_v46, %v1732_v54  ;;  %6962 = vmatpush3.bf16.msra.mxu0 %v7884_v11 }
 0xb26   :  { %v1789_v35 = vmul.f32 %v1785_v17, %v1732_v54  ;;  %6963 = vmatprep.subr.bf16.mxu0 %v7885_v12 }
 0xb27   :  { %6697 = vmatmul.mubr.msk.bf16.vlgmr.msra.gmra.mrb[60].mxu1 %vm128_vm0, %v1802_v32  ;;  %v1792_v7 = vadd.f32 %v1788_v47, %v1733_v6 }
 0xb28   :  { %1905 = vmatprep.mubr.bf16.mxu1 %v8362_v0  ;;  %v1793_v18 = vadd.f32 %v1789_v35, %v1733_v6 }
 0xb29   :  { %6964 = vmatpush3.bf16.msra.mxu0 %v7886_v24 }
 0xb2a   :  { %v1803_v8 = vpack.c.bf16 %v1793_v18, %v1792_v7  ;;  %6965 = vmatprep.subr.bf16.mxu0 %v7887_v25 }
 0xb2d   :  { %6966 = vmatpush3.bf16.msra.mxu0 %v7888_v28 }
 0xb2e   :  { %6967 = vmatprep.subr.bf16.mxu0 %v7889_v60 }
 0xb2f   :  { %6698 = vmatmul.mubr.msk.bf16.gmra.mrb[64].mxu1 %vm128_vm0, %v1803_v8 }
 0xb30   :  { %2342 = vmatprep.mubr.bf16.mxu1 %v8362_v0 }
 0xb31   :  { %6968 = vmatpush3.bf16.msra.mxu0 %v7890_v31 }
 0xb32   :  { %6969 = vmatprep.subr.bf16.mxu0 %v7891_v62 }
 0xb35   :  { %6970 = vmatpush3.bf16.msra.mxu0 %v7892_v13 }
 0xb36   :  { %6971 = vmatprep.subr.bf16.mxu0 %v7893_v15 }
 0xb39   :  { %6972 = vmatpush3.bf16.msra.mxu0 %v7894_v16 }
 0xbfa   :  { %v1897_v27 = vpop.f32.mrb[60].mxu1 }
 0xbfb   :  { %v9042_v29 = vadd.f32 %v1897_v27, %v1810_v21  ;;  %v1899_v26 = vpop.f32.mrb[61].mxu1 }
 0xbfc   :  { %v9044_v33 = vadd.f32 %v1899_v26, %v1814_v23  ;;  %v1901_v30 = vpop.f32.mrb[62].mxu1 }
 0xbfd   :  { %v1916_v57 = vmul.f32 %v9042_v29, %v9042_v29  ;;  %v9048_v34 = vadd.f32 %v1901_v30, %v1810_v21  ;;  %v1903_v36 = vpop.f32.mrb[63].mxu1 }
 0xbfe   :  { %v1917_v38 = vmul.f32 %v9044_v33, %v9044_v33  ;;  %v9052_v41 = vadd.f32 %v1903_v36, %v1814_v23 }
 0xbff   :  { %v1924_v37 = vmul.f32 %v1916_v57, %v9042_v29  ;;  %v1918_v40 = vmul.f32 %v9048_v34, %v9048_v34 }
 0xc00   :  { %v1925_v43 = vmul.f32 %v1917_v38, %v9044_v33  ;;  %v1919_v39 = vmul.f32 %v9052_v41, %v9052_v41 }
 0xc01   :  { %v1932_v45 = vmul.f32 0.044715, %v1924_v37  ;;  %v1926_v48 = vmul.f32 %v1918_v40, %v9048_v34 }
 0xc02   :  { %v1933_v52 = vmul.f32 0.044715, %v1925_v43  ;;  %v1927_v49 = vmul.f32 %v1919_v39, %v9052_v41  ;;  %v1907_v54 = vpop.f32.mrb[64].mxu1 }
 0xc03   :  { %v1940_v56 = vadd.f32 %v1932_v45, %v9042_v29  ;;  %v1934_v1 = vmul.f32 0.044715, %v1926_v48  ;;  %v9063_v58 = vadd.f32 %v1907_v54, %v1810_v21  ;;  %v1909_v50 = vpop.f32.mrb[65].mxu1 }
 0xc04   :  { %v1941_v6 = vadd.f32 %v1933_v52, %v9044_v33  ;;  %v1935_v59 = vmul.f32 0.044715, %v1927_v49  ;;  %v9066_v63 = vadd.f32 %v1909_v50, %v1814_v23  ;;  %v1911_v9 = vpop.f32.mrb[66].mxu1 }
 0xc05   :  { %v1948_v2 = vmul.f32 0.7978846, %v1940_v56  ;;  %v1942_v4 = vadd.f32 %v1934_v1, %v9048_v34  ;;  %v1920_v46 = vmul.f32 %v9063_v58, %v9063_v58  ;;  %v9071_v17 = vadd.f32 %v1911_v9, %v1810_v21  ;;  %v1913_v32 = vpop.f32.mrb[67].mxu1 }
 0xc06   :  { %v1949_v47 = vmul.f32 0.7978846, %v1941_v6  ;;  %v1943_v35 = vadd.f32 %v1935_v59, %v9052_v41  ;;  %v1921_v7 = vmul.f32 %v9066_v63, %v9066_v63  ;;  %v9076_v18 = vadd.f32 %v1913_v32, %v1814_v23 }
 0xc07   :  { %8115 = vtanh.f32 %v1948_v2  ;;  %v1950_v8 = vmul.f32 0.7978846, %v1942_v4  ;;  %v1928_v61 = vmul.f32 %v1920_v46, %v9063_v58  ;;  %v1922_v44 = vmul.f32 %v9071_v17, %v9071_v17 }
 0xc08   :  { %8117 = vtanh.f32 %v1949_v47  ;;  %v1951_v10 = vmul.f32 0.7978846, %v1943_v35  ;;  %v1929_v42 = vmul.f32 %v1921_v7, %v9066_v63  ;;  %v1923_v20 = vmul.f32 %v9076_v18, %v9076_v18 }
 0xc09   :  { %8119 = vtanh.f32 %v1950_v8  ;;  %v1936_v11 = vmul.f32 0.044715, %v1928_v61  ;;  %v1930_v12 = vmul.f32 %v1922_v44, %v9071_v17 }
 0xc0a   :  { %8121 = vtanh.f32 %v1951_v10  ;;  %v1937_v24 = vmul.f32 0.044715, %v1929_v42  ;;  %v1931_v25 = vmul.f32 %v1923_v20, %v9076_v18  ;;  %v2024_v20 = vld [vmem:[%s10591_s2 + $0x270] ss:$0 sm:$0xff] }
 0xc0b   :  { %v1944_v28 = vadd.f32 %v1936_v11, %v9063_v58  ;;  %v1938_v60 = vmul.f32 0.044715, %v1930_v12 }
 0xc0c   :  { %v1945_v31 = vadd.f32 %v1937_v24, %v9066_v63  ;;  %v1939_v62 = vmul.f32 0.044715, %v1931_v25 }
 0xc0d   :  { %v1952_v13 = vmul.f32 0.7978846, %v1944_v28  ;;  %v1946_v15 = vadd.f32 %v1938_v60, %v9071_v17 }
 0xc0e   :  { %v1953_v16 = vmul.f32 0.7978846, %v1945_v31  ;;  %v1947_v19 = vadd.f32 %v1939_v62, %v9076_v18 }
 0xc0f   :  { %8123 = vtanh.f32 %v1952_v13  ;;  %v1954_v21 = vmul.f32 0.7978846, %v1946_v15 }
 0xc10   :  { %8125 = vtanh.f32 %v1953_v16  ;;  %v1955_v23 = vmul.f32 0.7978846, %v1947_v19 }
 0xc11   :  { %v8116_v27 = vpop.eup %8115  ;;  %8127 = vtanh.f32 %v1954_v21 }
 0xc12   :  { %v8118_v26 = vpop.eup %8117  ;;  %v1964_v30 = vadd.f32 1.0, %v8116_v27  ;;  %8129 = vtanh.f32 %v1955_v23 }
 0xc13   :  { %v8120_v57 = vpop.eup %8119  ;;  %v1965_v36 = vadd.f32 1.0, %v8118_v26 }
 0xc14   :  { %v8122_v38 = vpop.eup %8121  ;;  %v1972_v37 = vmul.f32 0.5, %v1964_v30  ;;  %v1966_v40 = vadd.f32 1.0, %v8120_v57 }
 0xc15   :  { %v1967_v43 = vadd.f32 1.0, %v8122_v38  ;;  %v1973_v39 = vmul.f32 0.5, %v1965_v36 }
 0xc16   :  { %v1974_v45 = vmul.f32 0.5, %v1966_v40  ;;  %v1980_v52 = vmul.f32 %v1972_v37, %v9042_v29 }
 0xc17   :  { %v1975_v48 = vmul.f32 0.5, %v1967_v43  ;;  %v1981_v56 = vmul.f32 %v1973_v39, %v9044_v33 }
 0xc18   :  { %v1982_v49 = vmul.f32 %v1974_v45, %v9048_v34 }
 0xc19   :  { %v8124_v54 = vpop.eup %8123  ;;  %v1983_v1 = vmul.f32 %v1975_v48, %v9052_v41 }
 0xc1a   :  { %v8126_v50 = vpop.eup %8125  ;;  %v2020_v6 = vpack.c.bf16 %v1982_v49, %v1980_v52  ;;  %v1968_v59 = vadd.f32 1.0, %v8124_v54 }
 0xc1b   :  { %v8128_v9 = vpop.eup %8127  ;;  %v2021_v2 = vpack.c.bf16 %v1983_v1, %v1981_v56  ;;  %v1969_v4 = vadd.f32 1.0, %v8126_v50 }
 0xc1c   :  { %v8130_v46 = vpop.eup %8129  ;;  %v1970_v32 = vadd.f32 1.0, %v8128_v9  ;;  %v1976_v47 = vmul.f32 0.5, %v1968_v59 }
 0xc1d   :  { %2153 = vmatprep.mubr.bf16.mxu0 %v2021_v2  ;;  %v1971_v35 = vadd.f32 1.0, %v8130_v46  ;;  %v1977_v7 = vmul.f32 0.5, %v1969_v4 }
 0xc1e   :  { %2154 = vmatmul.mubr.bf16.vlgmr.msra.gmra.mrb[40].mxu0 %v2020_v6  ;;  %v1978_v29 = vmul.f32 0.5, %v1970_v32  ;;  %v1984_v8 = vmul.f32 %v1976_v47, %v9063_v58  ;;  %v2170_v58 = vld [vmem:[%s10591_s2 + $0x280] ss:$0 sm:$0xff] }
 0xc1f   :  { %v1979_v34 = vmul.f32 0.5, %v1971_v35  ;;  %v1985_v41 = vmul.f32 %v1977_v7, %v9066_v63  ;;  %v7897_v35 = vld [vmem:[%s10590_s1 + $0x384] ss:$8 sps:$4 sm:$0xff]   ;;  %v7895_v7 = vld [vmem:[%s10590_s1 + $0x380] ss:$8 sps:$4 sm:$0xff]  }
 0xc20   :  { %v1986_v33 = vmul.f32 %v1978_v29, %v9071_v17  ;;  %2310 = vmatprep.subr.bf16.mxu1 %v7897_v35  ;;  %v7900_v29 = vld [vmem:[%s10590_s1 + $0x394] ss:$8 sps:$4 sm:$0xff]  }
 0xc21   :  { %v1987_v61 = vmul.f32 %v1979_v34, %v9076_v18  ;;  %2311 = vmatpush1.bf16.msra.mxu1 %v7895_v7  ;;  %v7898_v34 = vld [vmem:[%s10590_s1 + $0x390] ss:$8 sps:$4 sm:$0xff]  }
 0xc22   :  { %v2022_v44 = vpack.c.bf16 %v1986_v33, %v1984_v8  ;;  %2312 = vmatprep.subr.bf16.mxu1 %v7900_v29  ;;  %v7903_v8 = vld [vmem:[%s10590_s1 + $0x3a4] ss:$8 sps:$4 sm:$0xff]   ;;  %v7901_v33 = vld [vmem:[%s10590_s1 + $0x3a0] ss:$8 sps:$4 sm:$0xff]   ;;  %v8304_v7 = vld [vmem:[%s10591_s2 + $0x90] sm:$0xff] }
 0xc23   :  { %v2023_v10 = vpack.c.bf16 %v1987_v61, %v1985_v41  ;;  %v7906_v41 = vld [vmem:[%s10590_s1 + $0x3b4] ss:$8 sps:$4 sm:$0xff]   ;;  %v7904_v61 = vld [vmem:[%s10590_s1 + $0x3b0] ss:$8 sps:$4 sm:$0xff]  }
 0xc25   :  { %2161 = vmatprep.mubr.bf16.mxu0 %v2023_v10  ;;  %2313 = vmatpush1.bf16.msra.mxu1 %v7898_v34 }
 0xc26   :  { %2162 = vmatmul.mubr.bf16.gmra.mrb[44].mxu0 %v2022_v44  ;;  %2314 = vmatprep.subr.bf16.mxu1 %v7903_v8  ;;  %v8305_v8 = vld [vmem:[%s10591_s2 + $0x70] sm:$0xff] }
 0xc29   :  { %2315 = vmatpush1.bf16.msra.mxu1 %v7901_v33 }
 0xc2a   :  { %2316 = vmatprep.subr.bf16.mxu1 %v7906_v41  ;;  %v8306_v41 = vld [vmem:[%s10591_s2 + $0xb0] sm:$0xff] }
 0xc2d   :  { %2317 = vmatpush1.bf16.msra.mxu1 %v7904_v61 }
 0xcf1   :  { %v6973_v42 = vpop.f32.mrb[40].mxu0 }
 0xcf2   :  { %v6974_v11 = vpop.f32.mrb[41].mxu0 }
 0xcf3   :  { %v6975_v12 = vadd.f32 %v6974_v11, %v6973_v42  ;;  %v6976_v24 = vpop.f32.mrb[42].mxu0 }
 0xcf4   :  { %v6977_v17 = vpop.f32.mrb[43].mxu0 }
 0xcf5   :  { %v2156_v63 = vadd.f32 %v6975_v12, %v2024_v20  ;;  %v6978_v25 = vadd.f32 %v6977_v17, %v6976_v24 }
 0xcf7   :  { %v2171_v18 = vmul.f32 %v2170_v58, %v2156_v63  ;;  %v2159_v28 = vadd.f32 %v6978_v25, %v2024_v20 }
 0xcf9   :  { %v2172_v60 = vmul.f32 %v2170_v58, %v2159_v28  ;;  %v6979_v31 = vpop.f32.mrb[44].mxu0  ;;  %v9105_v62 = vadd.f32 %v2171_v18, %v8928_v3 }
 0xcfa   :  { %v6980_v13 = vpop.f32.mrb[45].mxu0 }
 0xcfb   :  { %v6981_v15 = vadd.f32 %v6980_v13, %v6979_v31  ;;  %v6982_v16 = vpop.f32.mrb[46].mxu0  ;;  %v2181_v19 = vsel %vm128_vm0, %v9105_v62, 0.0  ;;  %v9110_v21 = vadd.f32 %v2172_v60, %v8934_v14  ;;  %v2179_v60 = vld [vmem:[%s10591_s2 + $0x290] ss:$0 sm:$0xff] }
 0xcfc   :  { %2182 = vadd.xlane.f32.xlu0 %v2181_v19  ;;  %v6983_v23 = vpop.f32.mrb[47].mxu0  ;;  %v2180_v19 = vld [vmem:[%s10591_s2 + $0x2a0] ss:$0 sm:$0xff] }
 0xcfd   :  { %v2164_v27 = vadd.f32 %v6981_v15, %v2024_v20  ;;  %v6984_v26 = vadd.f32 %v6983_v23, %v6982_v16  ;;  %v2184_v30 = vsel %vm128_vm0, %v9110_v21, 0.0 }
 0xcfe   :  { %2185 = vadd.xlane.f32.xlu1 %v2184_v30 }
 0xcff   :  { %v2173_v57 = vmul.f32 %v2170_v58, %v2164_v27  ;;  %v2167_v3 = vadd.f32 %v6984_v26, %v2024_v20 }
 0xd01   :  { %v2174_v36 = vmul.f32 %v2170_v58, %v2167_v3  ;;  %v9115_v38 = vadd.f32 %v2173_v57, %v8939_v51 }
 0xd03   :  { %v2187_v37 = vsel %vm128_vm0, %v9115_v38, 0.0  ;;  %v9120_v14 = vadd.f32 %v2174_v36, %v8931_v5 }
 0xd04   :  { %2188 = vadd.xlane.f32.xlu0 %v2187_v37 }
 0xd05   :  { %v2190_v40 = vsel %vm128_vm0, %v9120_v14, 0.0 }
 0xd06   :  { %2191 = vadd.xlane.f32.xlu1 %v2190_v40 }
 0xd89   :  { %v2183_v43 = vpop.xlane.xlu0 %2182 }
 0xd8a   :  { %v2193_v39 = vmul.f32 0.015625, %v2183_v43 }
 0xd8b   :  { %v2186_v45 = vpop.xlane.xlu1 %2185 }
 0xd8c   :  { %v2197_v48 = vsub.f32 %v9105_v62, %v2193_v39  ;;  %v2194_v52 = vmul.f32 0.015625, %v2186_v45 }
 0xd8e   :  { %v2198_v51 = vsub.f32 %v9110_v21, %v2194_v52  ;;  %v2201_v49 = vmul.f32 %v2197_v48, %v2197_v48  ;;  %v6715_v52 = vld [vmem:[%s10591_s2 + $0x2b0] ss:$8 sm:$0x3] }
 0xd90   :  { %v2205_v54 = vsel %vm128_vm0, %v2201_v49, 0.0  ;;  %v2202_v56 = vmul.f32 %v2198_v51, %v2198_v51  ;;  %v2261_v49 = vrot.slane %v6715_v52, %v8555_v55 }
 0xd91   :  { %2206 = vadd.xlane.f32.xlu0 %v2205_v54  ;;  %v2189_v5 = vpop.xlane.xlu0 %2188 }
 0xd92   :  { %v2195_v1 = vmul.f32 0.015625, %v2189_v5  ;;  %v2208_v50 = vsel %vm128_vm0, %v2202_v56, 0.0 }
 0xd93   :  { %2209 = vadd.xlane.f32.xlu1 %v2208_v50  ;;  %v2192_v6 = vpop.xlane.xlu1 %2191 }
 0xd94   :  { %v2199_v59 = vsub.f32 %v9115_v38, %v2195_v1  ;;  %v2196_v9 = vmul.f32 0.015625, %v2192_v6 }
 0xd96   :  { %v2200_v2 = vsub.f32 %v9120_v14, %v2196_v9  ;;  %v2203_v4 = vmul.f32 %v2199_v59, %v2199_v59  ;;  %v8301_v9 = vld [vmem:[%s10591_s2 + $0x80] sm:$0xff] }
 0xd98   :  { %v2211_v46 = vsel %vm128_vm0, %v2203_v4, 0.0  ;;  %v2204_v32 = vmul.f32 %v2200_v2, %v2200_v2 }
 0xd99   :  { %2212 = vadd.xlane.f32.xlu0 %v2211_v46  ;;  %v8302_v46 = vld [vmem:[%s10591_s2 + $0x60] sm:$0xff] }
 0xd9a   :  { %v2214_v47 = vsel %vm128_vm0, %v2204_v32, 0.0 }
 0xd9b   :  { %2215 = vadd.xlane.f32.xlu1 %v2214_v47  ;;  %v8303_v47 = vld [vmem:[%s10591_s2 + $0xa0] sm:$0xff] }
 0xe1e   :  { %v2207_v44 = vpop.xlane.xlu0 %2206 }
 0xe1f   :  { %v2217_v10 = vmul.f32 0.015625, %v2207_v44 }
 0xe20   :  { %v2210_v42 = vpop.xlane.xlu1 %2209 }
 0xe21   :  { %v2221_v20 = vadd.f32 1e-06, %v2217_v10  ;;  %v2218_v11 = vmul.f32 0.015625, %v2210_v42  ;;  %v8307_v10 = vld [vmem:[%s10591_s2 + $0xc0] sm:$0xff] }
 0xe23   :  { %8131 = vrsqrt.f32 %v2221_v20  ;;  %v2222_v12 = vadd.f32 1e-06, %v2218_v11  ;;  %v8308_v20 = vld [vmem:[%s10591_s2 + $0xd0] sm:$0xff] }
 0xe25   :  { %8133 = vrsqrt.f32 %v2222_v12 }
 0xe26   :  { %v2213_v24 = vpop.xlane.xlu0 %2212 }
 0xe27   :  { %v2219_v58 = vmul.f32 0.015625, %v2213_v24 }
 0xe28   :  { %v2216_v17 = vpop.xlane.xlu1 %2215 }
 0xe29   :  { %v2223_v63 = vadd.f32 1e-06, %v2219_v58  ;;  %v2220_v25 = vmul.f32 0.015625, %v2216_v17 }
 0xe2b   :  { %8135 = vrsqrt.f32 %v2223_v63  ;;  %v2224_v18 = vadd.f32 1e-06, %v2220_v25 }
 0xe2d   :  { %v8132_v28 = vpop.eup %8131  ;;  %8137 = vrsqrt.f32 %v2224_v18 }
 0xe2e   :  { %v2229_v31 = vmul.f32 %v8132_v28, %v2197_v48 }
 0xe2f   :  { %v8134_v13 = vpop.eup %8133 }
 0xe30   :  { %v2233_v15 = vmul.f32 %v2229_v31, %v2179_v60  ;;  %v2230_v16 = vmul.f32 %v8134_v13, %v2198_v51  ;;  %v2257_v51 = vrot.slane %v6715_v52, %v8550_v53 }
 0xe32   :  { %v2234_v23 = vmul.f32 %v2230_v16, %v2179_v60  ;;  %v2237_v27 = vadd.f32 %v2233_v15, %v2180_v19 }
 0xe34   :  { %v2238_v26 = vadd.f32 %v2234_v23, %v2180_v19 }
 0xe35   :  { %v8136_v30 = vpop.eup %8135 }
 0xe36   :  { %v2249_v57 = vpack.c.bf16 %v2238_v26, %v2237_v27  ;;  %v2231_v3 = vmul.f32 %v8136_v30, %v2199_v59 }
 0xe37   :  { %v8138_v36 = vpop.eup %8137 }
 0xe38   :  { %6724 = vmatmul.mubr.msk.bf16.vlgmr.msra.gmra.mrb[68].mxu1 %vm128_vm0, %v2249_v57  ;;  %v2232_v37 = vmul.f32 %v8138_v36, %v2200_v2  ;;  %v2235_v40 = vmul.f32 %v2231_v3, %v2179_v60 }
 0xe39   :  { %2352 = vmatprep.mubr.bf16.mxu1 %v8362_v0 }
 0xe3a   :  { %v2236_v43 = vmul.f32 %v2232_v37, %v2179_v60  ;;  %v2239_v39 = vadd.f32 %v2235_v40, %v2180_v19 }
 0xe3c   :  { %v2240_v45 = vadd.f32 %v2236_v43, %v2180_v19 }
 0xe3e   :  { %v2250_v48 = vpack.c.bf16 %v2240_v45, %v2239_v39 }
 0xe40   :  { %6725 = vmatmul.mubr.msk.bf16.gmra.mrb[72].mxu1 %vm128_vm0, %v2250_v48 }
 0xf0b   :  { %v2344_v54 = vpop.f32.mrb[68].mxu1 }
 0xf0c   :  { %v2345_v56 = vadd.f32 %v2344_v54, %v2257_v51  ;;  %v2346_v5 = vpop.f32.mrb[69].mxu1  ;;  %v7907_v54 = vld [vmem:[%s10590_s1 + $0x3c0] ss:$8 sps:$4 sm:$0xff]  }
 0xf0d   :  { %v2348_v1 = vpop.f32.mrb[70].mxu1  ;;  %v2347_v50 = vadd.f32 %v2346_v5, %v2261_v49 }
 0xf0e   :  { %v2349_v6 = vadd.f32 %v2348_v1, %v2257_v51  ;;  %v2350_v59 = vpop.f32.mrb[71].mxu1  ;;  %v2365_v2 = vmul.f32 %v8301_v9, %v2345_v56  ;;  %v2363_v32 = vmul.f32 %v8302_v46, %v2345_v56  ;;  %v2367_v35 = vmul.f32 %v8303_v47, %v2345_v56 }
 0xf0f   :  { %v2351_v4 = vadd.f32 %v2350_v59, %v2261_v49  ;;  %v2369_v42 = vmul.f32 %v8307_v10, %v2345_v56 }
 0xf10   :  { %v2366_v29 = vmul.f32 %v8304_v7, %v2349_v6  ;;  %v2375_v34 = vpack.c.bf16 %v2349_v6, %v2345_v56  ;;  %v2364_v33 = vmul.f32 %v8305_v8, %v2349_v6  ;;  %v2368_v61 = vmul.f32 %v8306_v41, %v2349_v6 }
 0xf11   :  { %v9188_v44 = vpack.c.bf16 %v2351_v4, %v2347_v50  ;;  %v2370_v11 = vmul.f32 %v8308_v20, %v2349_v6 }
 0xf12   :  { %v2372_v12 = vpack.c.bf16 %v2366_v29, %v2365_v2  ;;  %2377 = vrot.lane.b32.xlu0 %v2375_v34, %s8363_s23  ;;  %v2371_v24 = vpack.c.bf16 %v2364_v33, %v2363_v32  ;;  %v2373_v58 = vpack.c.bf16 %v2368_v61, %v2367_v35 }
 0xf13   :  { %v2354_v17 = vpop.f32.mrb[72].mxu1  ;;  %v2374_v63 = vpack.c.bf16 %v2370_v11, %v2369_v42 }
 0xf14   :  { %v2355_v25 = vadd.f32 %v2354_v17, %v2257_v51  ;;  %v2356_v18 = vpop.f32.mrb[73].mxu1  ;;  %7357 = vmatprep.mubr.msk.bf16.mxu1 %vm128_vm0, %v2371_v24  ;;  %v7909_v24 = vld [vmem:[%s10590_s1 + $0x3e0] ss:$8 sps:$4 sm:$0xff]  }
 0xf15   :  { %v2357_v28 = vadd.f32 %v2356_v18, %v2261_v49  ;;  %v2358_v60 = vpop.f32.mrb[74].mxu1  ;;  %v7911_v17 = vld [vmem:[%s10590_s1 + $0x400] ss:$8 sps:$4 sm:$0xff]   ;;  %v7914_v18 = vld [vmem:[%s10590_s1 + $0x430] ss:$8 sps:$4 sm:$0xff]  }
 0xf16   :  { %v2359_v31 = vadd.f32 %v2358_v60, %v2257_v51  ;;  %v2360_v13 = vpop.f32.mrb[75].mxu1  ;;  %v2461_v15 = vmul.f32 %v8301_v9, %v2355_v25  ;;  %v2459_v19 = vmul.f32 %v8302_v46, %v2355_v25  ;;  %v2463_v23 = vmul.f32 %v8303_v47, %v2355_v25 }
 0xf17   :  { %v2361_v16 = vadd.f32 %v2360_v13, %v2261_v49  ;;  %v2465_v36 = vmul.f32 %v8307_v10, %v2355_v25 }
 0xf18   :  { %v2462_v27 = vmul.f32 %v8304_v7, %v2359_v31  ;;  %v2471_v26 = vpack.c.bf16 %v2359_v31, %v2355_v25  ;;  %v2460_v30 = vmul.f32 %v8305_v8, %v2359_v31  ;;  %v2464_v57 = vmul.f32 %v8306_v41, %v2359_v31  ;;  %v7913_v25 = vld [vmem:[%s10590_s1 + $0x420] ss:$8 sps:$4 sm:$0xff]  }
 0xf19   :  { %v9198_v3 = vpack.c.bf16 %v2361_v16, %v2357_v28  ;;  %v2466_v37 = vmul.f32 %v8308_v20, %v2359_v31 }
 0xf1a   :  { %v2468_v40 = vpack.c.bf16 %v2462_v27, %v2461_v15  ;;  %2473 = vrot.lane.b32.xlu1 %v2471_v26, %s8363_s23  ;;  %v2467_v43 = vpack.c.bf16 %v2460_v30, %v2459_v19  ;;  %v2469_v39 = vpack.c.bf16 %v2464_v57, %v2463_v23 }
 0xf1b   :  { %v2470_v45 = vpack.c.bf16 %v2466_v37, %v2465_v36 }
 0xf1c   :  { %7367 = vmatprep.mubr.msk.bf16.mxu0 %vm128_vm0, %v2467_v43 }
 0xf84   :  { %v2378_v48 = vpop.permute.xlu0 %2377 }
 0xf85   :  { %7725 = vmatprep.subr.msk.bf16.mxu1 %vm128_vm0, %v2378_v48  ;;  %v2392_v52 = vsel %vm128_vm0, %v2378_v48, 0 }
 0xf86   :  { %7356 = vmatpush3.bf16.xpose.msra.mxu1 %v2392_v52 }
 0xf8c   :  { %v2474_v51 = vpop.permute.xlu1 %2473 }
 0xf8d   :  { %7358 = vmatmul.mubr.msk.bf16.vlgmr.msra.gmra.mrb[76].mxu1 %vm128_vm0, %v2372_v12  ;;  %7726 = vmatprep.subr.msk.bf16.mxu0 %vm128_vm0, %v2474_v51  ;;  %v2488_v49 = vsel %vm128_vm0, %v2474_v51, 0  ;;  %v7908_v12 = vld [vmem:[%s10590_s1 + $0x3d0] ss:$8 sps:$4 sm:$0xff]  }
 0xf8e   :  { %7361 = vmatprep.mubr.msk.bf16.mxu1 %vm128_vm0, %v2373_v58  ;;  %7366 = vmatpush3.bf16.xpose.msra.mxu0 %v2488_v49  ;;  %v7910_v58 = vld [vmem:[%s10590_s1 + $0x3f0] ss:$8 sps:$4 sm:$0xff]  }
 0xf95   :  { %7362 = vmatmul.mubr.msk.bf16.gmra.mrb[80].mxu1 %vm128_vm0, %v2374_v63  ;;  %7368 = vmatmul.mubr.msk.bf16.vlgmr.msra.gmra.mrb[48].mxu0 %vm128_vm0, %v2468_v40  ;;  %v7912_v63 = vld [vmem:[%s10590_s1 + $0x410] ss:$8 sps:$4 sm:$0xff]  }
 0xf96   :  { %7371 = vmatprep.mubr.msk.bf16.mxu0 %vm128_vm0, %v2469_v39  ;;  %7391 = vmatprep.mubr.bf16.mxu1 %v7907_v54 }
 0xf9d   :  { %7372 = vmatmul.mubr.msk.bf16.gmra.mrb[52].mxu0 %vm128_vm0, %v2470_v45 }
0x1060   :  { %v7359_v56 = vpop.f32.mrb[76].mxu1 }
0x1061   :  { %v2428_v5 = vpop.f32.mrb[77].mxu1 }
0x1062   :  { %v7360_v1 = vpop.f32.mrb[78].mxu1 }
0x1063   :  { %v2572_v50 = vpack.c.bf16 %v7360_v1, %v7359_v56  ;;  %v2431_v6 = vpop.f32.mrb[79].mxu1 }
0x1064   :  { %v2571_v59 = vpack.c.bf16 %v2431_v6, %v2428_v5 }
0x1066   :  { %7375 = vmatprep.subr.bf16.mxu1 %v2571_v59 }
0x1067   :  { %7376 = vmatpush3.bf16.msra.mxu1 %v2571_v59 }
0x1068   :  { %v7363_v9 = vpop.f32.mrb[80].mxu1  ;;  %v7369_v2 = vpop.f32.mrb[48].mxu0  ;;  %7377 = vmatprep.subr.bf16.mxu1 %v2572_v50 }
0x1069   :  { %v2444_v4 = vpop.f32.mrb[81].mxu1  ;;  %v2524_v46 = vpop.f32.mrb[49].mxu0 }
0x106a   :  { %v7364_v32 = vpop.f32.mrb[82].mxu1  ;;  %v7370_v47 = vpop.f32.mrb[50].mxu0 }
0x106b   :  { %v2574_v35 = vpack.c.bf16 %v7364_v32, %v7363_v9  ;;  %v2576_v7 = vpack.c.bf16 %v7370_v47, %v7369_v2  ;;  %v2447_v29 = vpop.f32.mrb[83].mxu1  ;;  %v2527_v34 = vpop.f32.mrb[51].mxu0  ;;  %7378 = vmatpush3.bf16.msra.mxu1 %v2572_v50 }
0x106c   :  { %v2573_v8 = vpack.c.bf16 %v2447_v29, %v2444_v4  ;;  %v2575_v33 = vpack.c.bf16 %v2527_v34, %v2524_v46 }
0x106e   :  { %7379 = vmatprep.subr.bf16.mxu1 %v2573_v8 }
0x106f   :  { %7380 = vmatpush3.bf16.msra.mxu1 %v2573_v8 }
0x1070   :  { %v7373_v41 = vpop.f32.mrb[52].mxu0  ;;  %7381 = vmatprep.subr.bf16.mxu1 %v2574_v35 }
0x1071   :  { %v2540_v61 = vpop.f32.mrb[53].mxu0 }
0x1072   :  { %v7374_v10 = vpop.f32.mrb[54].mxu0 }
0x1073   :  { %v2578_v42 = vpack.c.bf16 %v7374_v10, %v7373_v41  ;;  %v2543_v20 = vpop.f32.mrb[55].mxu0  ;;  %7382 = vmatpush3.bf16.msra.mxu1 %v2574_v35 }
0x1074   :  { %v2577_v11 = vpack.c.bf16 %v2543_v20, %v2540_v61  ;;  %7383 = vmatprep.subr.bf16.mxu1 %v2575_v33 }
0x1077   :  { %7384 = vmatpush3.bf16.msra.mxu1 %v2575_v33 }
0x1078   :  { %7385 = vmatprep.subr.bf16.mxu1 %v2576_v7 }
0x107b   :  { %7386 = vmatpush3.bf16.msra.mxu1 %v2576_v7 }
0x107c   :  { %7387 = vmatprep.subr.bf16.mxu1 %v2577_v11 }
0x107f   :  { %7388 = vmatpush3.bf16.msra.mxu1 %v2577_v11 }
0x1080   :  { %7389 = vmatprep.subr.bf16.mxu1 %v2578_v42 }
0x1083   :  { %7390 = vmatpush3.bf16.msra.mxu1 %v2578_v42 }
0x1084   :  { %7439 = vmatprep.subr.bf16.mxu1 %v8364_v22 }
0x1086   :  { %7392 = vmatmul.mubr.bf16.vlgmr.msra.gmra.mrb[84].mxu1 %v7908_v12 }
0x1087   :  { %7440 = vmatpush3.bf16.msra.mxu1 %v9188_v44  ;;  %7395 = vmatprep.mubr.bf16.mxu1 %v7909_v24 }
0x1088   :  { %7445 = vmatprep.subr.bf16.mxu1 %v8364_v22 }
0x108e   :  { %7396 = vmatmul.mubr.bf16.gmra.mrb[88].mxu1 %v7910_v58 }
0x108f   :  { %7399 = vmatprep.mubr.bf16.mxu1 %v7911_v17 }
0x1096   :  { %7400 = vmatmul.mubr.bf16.gmra.mrb[92].mxu1 %v7912_v63 }
0x1097   :  { %7403 = vmatprep.mubr.bf16.mxu1 %v7913_v25 }
0x109e   :  { %7404 = vmatmul.mubr.bf16.gmra.mrb[96].mxu1 %v7914_v18 }
0x109f   :  { %7441 = vmatprep.mubr.msk.bf16.mxu1 %vm8368_vm2, %v8364_v22 }
0x1159   :  { %v7393_v28 = vpop.f32.mrb[84].mxu1 }
0x115a   :  { %v2661_v60 = vpop.f32.mrb[85].mxu1  ;;  %v2730_v27 = vsel %vm747_vm1, %v7393_v28, -inf }
0x115b   :  { %v7394_v31 = vpop.f32.mrb[86].mxu1  ;;  %v2724_v13 = vsel %vm747_vm1, %v2661_v60, -inf }
0x115c   :  { %2725 = vmax.xlane.f32.xlu1 %v2724_v13  ;;  %v2664_v15 = vpop.f32.mrb[87].mxu1  ;;  %v2733_v19 = vsel %vm747_vm1, %v7394_v31, -inf }
0x115d   :  { %v2727_v16 = vsel %vm747_vm1, %v2664_v15, -inf }
0x115e   :  { %2728 = vmax.xlane.f32.xlu0 %v2727_v16 }
0x1160   :  { %2734 = vmax.xlane.f32.xlu1 %v2733_v19 }
0x1161   :  { %v9244_v23 = vpop.f32.mrb[88].mxu1 }
0x1162   :  { %2731 = vmax.xlane.f32.xlu0 %v2730_v27  ;;  %v2677_v26 = vpop.f32.mrb[89].mxu1  ;;  %v2742_v43 = vsel %vm747_vm1, %v9244_v23, -inf }
0x1163   :  { %v9247_v30 = vpop.f32.mrb[90].mxu1  ;;  %v2736_v36 = vsel %vm747_vm1, %v2677_v26, -inf }
0x1164   :  { %v2680_v57 = vpop.f32.mrb[91].mxu1  ;;  %v2745_v39 = vsel %vm747_vm1, %v9247_v30, -inf }
0x1165   :  { %v2739_v37 = vsel %vm747_vm1, %v2680_v57, -inf }
0x1166   :  { %2737 = vmax.xlane.f32.xlu0 %v2736_v36  ;;  %2740 = vmax.xlane.f32.xlu1 %v2739_v37 }
0x1169   :  { %v9251_v40 = vpop.f32.mrb[92].mxu1 }
0x116a   :  { %2743 = vmax.xlane.f32.xlu0 %v2742_v43  ;;  %2746 = vmax.xlane.f32.xlu1 %v2745_v39  ;;  %v9257_v45 = vpop.f32.mrb[93].mxu1  ;;  %v2754_v56 = vsel %vm747_vm1, %v9251_v40, -inf }
0x116b   :  { %v9259_v48 = vpop.f32.mrb[94].mxu1  ;;  %v2748_v51 = vsel %vm747_vm1, %v9257_v45, -inf }
0x116c   :  { %v9261_v52 = vpop.f32.mrb[95].mxu1  ;;  %v2757_v5 = vsel %vm747_vm1, %v9259_v48, -inf }
0x116d   :  { %v2751_v49 = vsel %vm747_vm1, %v9261_v52, -inf }
0x116e   :  { %2749 = vmax.xlane.f32.xlu0 %v2748_v51  ;;  %2752 = vmax.xlane.f32.xlu1 %v2751_v49 }
0x1171   :  { %v9267_v54 = vpop.f32.mrb[96].mxu1 }
0x1172   :  { %2755 = vmax.xlane.f32.xlu0 %v2754_v56  ;;  %2758 = vmax.xlane.f32.xlu1 %v2757_v5  ;;  %v9273_v1 = vpop.f32.mrb[97].mxu1  ;;  %v2766_v2 = vsel %vm747_vm1, %v9267_v54, -inf }
0x1173   :  { %v9275_v50 = vpop.f32.mrb[98].mxu1  ;;  %v2760_v59 = vsel %vm747_vm1, %v9273_v1, -inf }
0x1174   :  { %v9277_v6 = vpop.f32.mrb[99].mxu1  ;;  %v2769_v4 = vsel %vm747_vm1, %v9275_v50, -inf }
0x1175   :  { %v2763_v9 = vsel %vm747_vm1, %v9277_v6, -inf }
0x1176   :  { %2761 = vmax.xlane.f32.xlu0 %v2760_v59  ;;  %2764 = vmax.xlane.f32.xlu1 %v2763_v9 }
0x117a   :  { %2767 = vmax.xlane.f32.xlu0 %v2766_v2  ;;  %2770 = vmax.xlane.f32.xlu1 %v2769_v4 }
0x11e9   :  { %v2726_v46 = vpop.xlane.xlu1 %2725 }
0x11ea   :  { %v2772_v32 = vsub.f32 %v2661_v60, %v2726_v46 }
0x11eb   :  { %v2729_v47 = vpop.xlane.xlu0 %2728 }
0x11ec   :  { %v2788_v35 = vmul.f32 1.442695, %v2772_v32  ;;  %v2773_v7 = vsub.f32 %v2664_v15, %v2729_v47 }
0x11ed   :  { %v2735_v29 = vpop.xlane.xlu1 %2734 }
0x11ee   :  { %8139 = vpow2.f32 %v2788_v35  ;;  %v2790_v34 = vmul.f32 1.442695, %v2773_v7  ;;  %v2775_v8 = vsub.f32 %v7394_v31, %v2735_v29 }
0x11ef   :  { %v2732_v33 = vpop.xlane.xlu0 %2731 }
0x11f0   :  { %8141 = vpow2.f32 %v2790_v34  ;;  %v2794_v41 = vmul.f32 1.442695, %v2775_v8  ;;  %v2774_v61 = vsub.f32 %v7393_v28, %v2732_v33 }
0x11f2   :  { %8143 = vpow2.f32 %v2794_v41  ;;  %v2792_v10 = vmul.f32 1.442695, %v2774_v61 }
0x11f3   :  { %v2738_v42 = vpop.xlane.xlu0 %2737  ;;  %v2741_v20 = vpop.xlane.xlu1 %2740 }
0x11f4   :  { %8145 = vpow2.f32 %v2792_v10  ;;  %v2776_v11 = vsub.f32 %v2677_v26, %v2738_v42  ;;  %v2777_v12 = vsub.f32 %v2680_v57, %v2741_v20 }
0x11f6   :  { %v2796_v24 = vmul.f32 1.442695, %v2776_v11  ;;  %v2798_v58 = vmul.f32 1.442695, %v2777_v12 }
0x11f7   :  { %v2744_v17 = vpop.xlane.xlu0 %2743  ;;  %v2747_v63 = vpop.xlane.xlu1 %2746 }
0x11f8   :  { %v9287_v25 = vpop.eup %8139  ;;  %8147 = vpow2.f32 %v2796_v24  ;;  %v2778_v18 = vsub.f32 %v9244_v23, %v2744_v17  ;;  %v2779_v60 = vsub.f32 %v9247_v30, %v2747_v63 }
0x11f9   :  { %8149 = vpow2.f32 %v2798_v58  ;;  %v2820_v28 = vsel %vm747_vm1, %v9287_v25, 0.0 }
0x11fa   :  { %v9293_v31 = vpop.eup %8141  ;;  %v2800_v13 = vmul.f32 1.442695, %v2778_v18  ;;  %v2802_v15 = vmul.f32 1.442695, %v2779_v60  ;;  %2821 = vadd.xlane.f32.xlu0 %v2820_v28 }
0x11fb   :  { %v2750_v16 = vpop.xlane.xlu0 %2749  ;;  %v2753_v19 = vpop.xlane.xlu1 %2752  ;;  %v2823_v27 = vsel %vm747_vm1, %v9293_v31, 0.0 }
0x11fc   :  { %v9297_v26 = vpop.eup %8143  ;;  %8151 = vpow2.f32 %v2800_v13  ;;  %v2780_v23 = vsub.f32 %v9257_v45, %v2750_v16  ;;  %v2781_v30 = vsub.f32 %v9261_v52, %v2753_v19  ;;  %2824 = vadd.xlane.f32.xlu1 %v2823_v27  ;;  %v2925_v19 = vld [vmem:[%s10591_s2 + $0x2d0] sm:$0xff]  ;;  %v2926_v27 = vld [vmem:[%s10591_s2 + $0x2e0] sm:$0xff] }
0x11fd   :  { %8153 = vpow2.f32 %v2802_v15  ;;  %v2829_v49 = vsel %vm747_vm1, %v9297_v26, 0.0 }
0x11fe   :  { %v9301_v57 = vpop.eup %8145  ;;  %v2804_v36 = vmul.f32 1.442695, %v2780_v23  ;;  %v2806_v37 = vmul.f32 1.442695, %v2781_v30  ;;  %v2924_v23 = vld [vmem:[%s10591_s2 + $0x2c0] sm:$0xff] }
0x11ff   :  { %v2756_v43 = vpop.xlane.xlu0 %2755  ;;  %v2759_v39 = vpop.xlane.xlu1 %2758  ;;  %v2826_v51 = vsel %vm747_vm1, %v9301_v57, 0.0  ;;  %v2928_v30 = vld [vmem:[%s10591_s2 + $0x300] sm:$0xff] }
0x1200   :  { %8155 = vpow2.f32 %v2804_v36  ;;  %v2782_v56 = vsub.f32 %v9251_v40, %v2756_v43  ;;  %v2783_v45 = vsub.f32 %v9259_v48, %v2759_v39  ;;  %2827 = vadd.xlane.f32.xlu0 %v2826_v51  ;;  %2830 = vadd.xlane.f32.xlu1 %v2829_v49  ;;  %v2927_v36 = vld [vmem:[%s10591_s2 + $0x2f0] sm:$0xff]  ;;  %v7915_v51 = vld [vmem:[%s10590_s1 + $0x440] ss:$8 sps:$4 sm:$0xff]  }
0x1201   :  { %8157 = vpow2.f32 %v2806_v37  ;;  %v2930_v37 = vld [vmem:[%s10591_s2 + $0x320] sm:$0xff]  ;;  %v2929_v43 = vld [vmem:[%s10591_s2 + $0x310] sm:$0xff]  ;;  %7423 = vmatprep.mubr.bf16.mxu0 %v7915_v51 }
0x1202   :  { %v9309_v52 = vpop.eup %8147  ;;  %v2808_v5 = vmul.f32 1.442695, %v2782_v56  ;;  %v2810_v59 = vmul.f32 1.442695, %v2783_v45  ;;  %v2931_v39 = vld [vmem:[%s10591_s2 + $0x330] sm:$0xff]  ;;  %v2932_v56 = vld [vmem:[%s10591_s2 + $0x340] sm:$0xff] }
0x1203   :  { %v9311_v9 = vpop.eup %8149  ;;  %v2762_v2 = vpop.xlane.xlu0 %2761  ;;  %v2832_v46 = vsel %vm747_vm1, %v9309_v52, 0.0  ;;  %v2933_v49 = vld [vmem:[%s10591_s2 + $0x350] sm:$0xff]  ;;  %v2934_v45 = vld [vmem:[%s10591_s2 + $0x360] sm:$0xff] }
0x1204   :  { %v2765_v4 = vpop.xlane.xlu1 %2764  ;;  %8159 = vpow2.f32 %v2808_v5  ;;  %v2784_v32 = vsub.f32 %v9273_v1, %v2762_v2  ;;  %2833 = vadd.xlane.f32.xlu0 %v2832_v46  ;;  %v2835_v48 = vsel %vm747_vm1, %v9311_v9, 0.0  ;;  %v2935_v5 = vld [vmem:[%s10591_s2 + $0x370] sm:$0xff]  ;;  %v2936_v2 = vld [vmem:[%s10591_s2 + $0x380] sm:$0xff] }
0x1205   :  { %v2785_v40 = vsub.f32 %v9277_v6, %v2765_v4  ;;  %8161 = vpow2.f32 %v2810_v59  ;;  %2836 = vadd.xlane.f32.xlu1 %v2835_v48  ;;  %v2937_v59 = vld [vmem:[%s10591_s2 + $0x390] sm:$0xff]  ;;  %v2938_v46 = vld [vmem:[%s10591_s2 + $0x3a0] sm:$0xff] }
0x1206   :  { %v9319_v47 = vpop.eup %8151  ;;  %v2812_v35 = vmul.f32 1.442695, %v2784_v32  ;;  %v2939_v4 = vld [vmem:[%s10591_s2 + $0x3b0] sm:$0xff] }
0x1207   :  { %v2814_v7 = vmul.f32 1.442695, %v2785_v40  ;;  %v9321_v29 = vpop.eup %8153  ;;  %v2768_v34 = vpop.xlane.xlu0 %2767  ;;  %v2838_v33 = vsel %vm747_vm1, %v9319_v47, 0.0 }
0x1208   :  { %v2771_v8 = vpop.xlane.xlu1 %2770  ;;  %8163 = vpow2.f32 %v2812_v35  ;;  %v2786_v1 = vsub.f32 %v9267_v54, %v2768_v34  ;;  %2839 = vadd.xlane.f32.xlu0 %v2838_v33  ;;  %v2841_v41 = vsel %vm747_vm1, %v9321_v29, 0.0 }
0x1209   :  { %v2787_v6 = vsub.f32 %v9275_v50, %v2771_v8  ;;  %8165 = vpow2.f32 %v2814_v7  ;;  %2842 = vadd.xlane.f32.xlu1 %v2841_v41 }
0x120a   :  { %v9329_v61 = vpop.eup %8155  ;;  %v2816_v10 = vmul.f32 1.442695, %v2786_v1 }
0x120b   :  { %v2818_v42 = vmul.f32 1.442695, %v2787_v6  ;;  %v9331_v20 = vpop.eup %8157  ;;  %v2844_v11 = vsel %vm747_vm1, %v9329_v61, 0.0 }
0x120c   :  { %8167 = vpow2.f32 %v2816_v10  ;;  %2845 = vadd.xlane.f32.xlu0 %v2844_v11  ;;  %v2847_v54 = vsel %vm747_vm1, %v9331_v20, 0.0 }
0x120d   :  { %8169 = vpow2.f32 %v2818_v42  ;;  %2848 = vadd.xlane.f32.xlu1 %v2847_v54 }
0x120e   :  { %v9337_v50 = vpop.eup %8159 }
0x120f   :  { %v9339_v12 = vpop.eup %8161  ;;  %v2850_v24 = vsel %vm747_vm1, %v9337_v50, 0.0 }
0x1210   :  { %2851 = vadd.xlane.f32.xlu0 %v2850_v24  ;;  %v2853_v58 = vsel %vm747_vm1, %v9339_v12, 0.0 }
0x1211   :  { %2854 = vadd.xlane.f32.xlu1 %v2853_v58 }
0x1212   :  { %v9345_v17 = vpop.eup %8163 }
0x1213   :  { %v9347_v63 = vpop.eup %8165  ;;  %v2856_v18 = vsel %vm747_vm1, %v9345_v17, 0.0 }
0x1214   :  { %2857 = vadd.xlane.f32.xlu0 %v2856_v18  ;;  %v2859_v60 = vsel %vm747_vm1, %v9347_v63, 0.0 }
0x1215   :  { %2860 = vadd.xlane.f32.xlu1 %v2859_v60 }
0x1216   :  { %v9353_v28 = vpop.eup %8167 }
0x1217   :  { %v9355_v13 = vpop.eup %8169  ;;  %v2862_v15 = vsel %vm747_vm1, %v9353_v28, 0.0 }
0x1218   :  { %2863 = vadd.xlane.f32.xlu0 %v2862_v15  ;;  %v2865_v16 = vsel %vm747_vm1, %v9355_v13, 0.0 }
0x1219   :  { %2866 = vadd.xlane.f32.xlu1 %v2865_v16 }
0x122a   :  { %2947 = vperm.xlu1 %7742, %v2925_v19  }
0x122e   :  { %2952 = vperm.xlu1 %7742, %v2926_v27   ;;  %2942 = vperm.xlu0 %7741, %v2924_v23  }
0x1232   :  { %2962 = vperm.xlu1 %7742, %v2928_v30   ;;  %2957 = vperm.xlu0 %7741, %v2927_v36  }
0x1236   :  { %2972 = vperm.xlu1 %7742, %v2930_v37   ;;  %2967 = vperm.xlu0 %7741, %v2929_v43  }
0x123a   :  { %3213 = vrot.lane.b32.xlu1 %v9188_v44, %s8366_s14  ;;  %2977 = vperm.xlu0 %7741, %v2931_v39  }
0x123e   :  { %2987 = vperm.xlu1 %7742, %v2933_v49   ;;  %2982 = vperm.xlu0 %7741, %v2932_v56  }
0x1242   :  { %2992 = vperm.xlu1 %7742, %v2934_v45   ;;  %3261 = vrot.lane.b32.xlu0 %v9188_v44, %s8365_s26 }
0x1246   :  { %3309 = vrot.lane.b32.xlu1 %v9188_v44, %s8367_s17  ;;  %2997 = vperm.xlu0 %7741, %v2935_v5  }
0x124a   :  { %3007 = vperm.xlu1 %7742, %v2937_v59   ;;  %3002 = vperm.xlu0 %7741, %v2936_v2  }
0x124e   :  { %3017 = vperm.xlu1 %7742, %v2939_v4   ;;  %3012 = vperm.xlu0 %7741, %v2938_v46  }
0x1252   :  { %3482 = vrot.lane.b32.xlu1 %v9198_v3, %s8365_s26  ;;  %3434 = vrot.lane.b32.xlu0 %v9198_v3, %s8366_s14 }
0x1256   :  { %3530 = vrot.lane.b32.xlu0 %v9198_v3, %s8367_s17 }
0x1287   :  { %v2822_v44 = vpop.xlane.xlu0 %2821 }
0x1288   :  { %8171 = vrcp.f32 %v2822_v44 }
0x1289   :  { %v2825_v32 = vpop.xlane.xlu1 %2824 }
0x128a   :  { %8173 = vrcp.f32 %v2825_v32 }
0x128d   :  { %v2828_v40 = vpop.xlane.xlu0 %2827  ;;  %v2831_v48 = vpop.xlane.xlu1 %2830 }
0x128e   :  { %8175 = vrcp.f32 %v2828_v40 }
0x128f   :  { %8177 = vrcp.f32 %v2831_v48 }
0x1291   :  { %v2834_v35 = vpop.xlane.xlu0 %2833 }
0x1292   :  { %v8172_v7 = vpop.eup %8171  ;;  %8179 = vrcp.f32 %v2834_v35  ;;  %v2837_v34 = vpop.xlane.xlu1 %2836 }
0x1293   :  { %8181 = vrcp.f32 %v2837_v34  ;;  %v2884_v1 = vmul.f32 %v8172_v7, %v9287_v25 }
0x1294   :  { %v8174_v8 = vpop.eup %8173 }
0x1295   :  { %v2840_v33 = vpop.xlane.xlu0 %2839  ;;  %v2885_v6 = vmul.f32 %v8174_v8, %v9293_v31 }
0x1296   :  { %8183 = vrcp.f32 %v2840_v33  ;;  %v2843_v41 = vpop.xlane.xlu1 %2842 }
0x1297   :  { %8185 = vrcp.f32 %v2843_v41  ;;  %v2916_v10 = vpack.c.bf16 %v2885_v6, %v2884_v1  ;;  %v7919_v1 = vld [vmem:[%s10590_s1 + $0x480] ss:$8 sps:$4 sm:$0xff]   ;;  %v7920_v41 = vld [vmem:[%s10590_s1 + $0x490] ss:$8 sps:$4 sm:$0xff]  }
0x1298   :  { %v8176_v42 = vpop.eup %8175 }
0x1299   :  { %v8178_v11 = vpop.eup %8177  ;;  %v2846_v54 = vpop.xlane.xlu0 %2845  ;;  %7407 = vmatprep.subr.bf16.mxu0 %v2916_v10  ;;  %v2886_v24 = vmul.f32 %v8176_v42, %v9301_v57  ;;  %v7922_v42 = vld [vmem:[%s10590_s1 + $0x4b0] ss:$8 sps:$4 sm:$0xff]  }
0x129a   :  { %8187 = vrcp.f32 %v2846_v54  ;;  %v2849_v58 = vpop.xlane.xlu1 %2848  ;;  %7408 = vmatpush3.bf16.msra.mxu0 %v2916_v10  ;;  %v2887_v18 = vmul.f32 %v8178_v11, %v9297_v26  ;;  %v7921_v10 = vld [vmem:[%s10590_s1 + $0x4a0] ss:$8 sps:$4 sm:$0xff]  }
0x129b   :  { %8189 = vrcp.f32 %v2849_v58 }
0x129c   :  { %v8180_v60 = vpop.eup %8179  ;;  %v2917_v25 = vpack.c.bf16 %v2887_v18, %v2886_v24 }
0x129d   :  { %v8182_v15 = vpop.eup %8181  ;;  %v2852_v31 = vpop.xlane.xlu0 %2851  ;;  %v2888_v16 = vmul.f32 %v8180_v60, %v9309_v52 }
0x129e   :  { %8191 = vrcp.f32 %v2852_v31  ;;  %7409 = vmatprep.subr.bf16.mxu0 %v2917_v25  ;;  %v2855_v19 = vpop.xlane.xlu1 %2854  ;;  %v2889_v27 = vmul.f32 %v8182_v15, %v9311_v9 }
0x129f   :  { %8193 = vrcp.f32 %v2855_v19  ;;  %7410 = vmatpush3.bf16.msra.mxu0 %v2917_v25 }
0x12a0   :  { %v8184_v57 = vpop.eup %8183  ;;  %v2918_v23 = vpack.c.bf16 %v2889_v27, %v2888_v16 }
0x12a1   :  { %v8186_v30 = vpop.eup %8185  ;;  %v2858_v36 = vpop.xlane.xlu0 %2857  ;;  %v2890_v26 = vmul.f32 %v8184_v57, %v9319_v47 }
0x12a2   :  { %8195 = vrcp.f32 %v2858_v36  ;;  %7411 = vmatprep.subr.bf16.mxu0 %v2918_v23  ;;  %v2861_v37 = vpop.xlane.xlu1 %2860  ;;  %v2891_v43 = vmul.f32 %v8186_v30, %v9321_v29 }
0x12a3   :  { %8197 = vrcp.f32 %v2861_v37  ;;  %7412 = vmatpush3.bf16.msra.mxu0 %v2918_v23 }
0x12a4   :  { %v8188_v52 = vpop.eup %8187  ;;  %v2919_v39 = vpack.c.bf16 %v2891_v43, %v2890_v26 }
0x12a5   :  { %v8190_v51 = vpop.eup %8189  ;;  %v2864_v49 = vpop.xlane.xlu0 %2863  ;;  %v2892_v9 = vmul.f32 %v8188_v52, %v9329_v61 }
0x12a6   :  { %8199 = vrcp.f32 %v2864_v49  ;;  %7413 = vmatprep.subr.bf16.mxu0 %v2919_v39  ;;  %v2867_v56 = vpop.xlane.xlu1 %2866  ;;  %v2893_v45 = vmul.f32 %v8190_v51, %v9331_v20 }
0x12a7   :  { %8201 = vrcp.f32 %v2867_v56  ;;  %7414 = vmatpush3.bf16.msra.mxu0 %v2919_v39 }
0x12a8   :  { %v8192_v47 = vpop.eup %8191  ;;  %v2920_v5 = vpack.c.bf16 %v2893_v45, %v2892_v9 }
0x12a9   :  { %v8194_v59 = vpop.eup %8193  ;;  %v2894_v29 = vmul.f32 %v8192_v47, %v9337_v50 }
0x12aa   :  { %7415 = vmatprep.subr.bf16.mxu0 %v2920_v5  ;;  %v2895_v2 = vmul.f32 %v8194_v59, %v9339_v12  ;;  %v2948_v11 = vpop.permute.xlu1 %2947 }
0x12ab   :  { %7416 = vmatpush3.bf16.msra.mxu0 %v2920_v5 }
0x12ac   :  { %v8196_v4 = vpop.eup %8195  ;;  %v2921_v46 = vpack.c.bf16 %v2895_v2, %v2894_v29 }
0x12ad   :  { %v8198_v44 = vpop.eup %8197  ;;  %v2943_v61 = vpop.permute.xlu0 %2942  ;;  %v2896_v32 = vmul.f32 %v8196_v4, %v9345_v17  ;;  %v7916_v17 = vld [vmem:[%s10590_s1 + $0x450] ss:$8 sps:$4 sm:$0xff]  }
0x12ae   :  { %7417 = vmatprep.subr.bf16.mxu0 %v2921_v46  ;;  %v2897_v20 = vmul.f32 %v8198_v44, %v9347_v63  ;;  %v7917_v63 = vld [vmem:[%s10590_s1 + $0x460] ss:$8 sps:$4 sm:$0xff]   ;;  %v2953_v54 = vpop.permute.xlu1 %2952 }
0x12af   :  { %7418 = vmatpush3.bf16.msra.mxu0 %v2921_v46 }
0x12b0   :  { %v8200_v40 = vpop.eup %8199  ;;  %v2922_v48 = vpack.c.bf16 %v2897_v20, %v2896_v32 }
0x12b1   :  { %v8202_v35 = vpop.eup %8201  ;;  %v2958_v7 = vpop.permute.xlu0 %2957  ;;  %v2898_v50 = vmul.f32 %v8200_v40, %v9353_v28 }
0x12b2   :  { %7419 = vmatprep.subr.bf16.mxu0 %v2922_v48  ;;  %v2899_v12 = vmul.f32 %v8202_v35, %v9355_v13  ;;  %v7918_v13 = vld [vmem:[%s10590_s1 + $0x470] ss:$8 sps:$4 sm:$0xff]   ;;  %v2963_v24 = vpop.permute.xlu1 %2962 }
0x12b3   :  { %7420 = vmatpush3.bf16.msra.mxu0 %v2922_v48 }
0x12b4   :  { %v2923_v34 = vpack.c.bf16 %v2899_v12, %v2898_v50 }
0x12b5   :  { %v2968_v8 = vpop.permute.xlu0 %2967 }
0x12b6   :  { %7421 = vmatprep.subr.bf16.mxu0 %v2923_v34  ;;  %v2973_v58 = vpop.permute.xlu1 %2972 }
0x12b7   :  { %7422 = vmatpush3.bf16.msra.mxu0 %v2923_v34 }
0x12b8   :  { %7451 = vmatprep.subr.bf16.mxu0 %v8364_v22 }
0x12b9   :  { %v2978_v33 = vpop.permute.xlu0 %2977 }
0x12ba   :  { %7424 = vmatmul.mubr.bf16.vlgmr.msra.gmra.mrb[56].mxu0 %v7916_v17  ;;  %v3214_v18 = vpop.permute.xlu1 %3213 }
0x12bb   :  { %7427 = vmatprep.mubr.bf16.mxu0 %v7917_v63 }
0x12bd   :  { %v9447_v28 = vpop.permute.xlu0 %2982 }
0x12be   :  { %v2988_v60 = vpop.permute.xlu1 %2987 }
0x12c1   :  { %v3262_v6 = vpop.permute.xlu0 %3261 }
0x12c2   :  { %7428 = vmatmul.mubr.bf16.gmra.mrb[60].mxu0 %v7918_v13  ;;  %v2993_v25 = vpop.permute.xlu1 %2992 }
0x12c3   :  { %7452 = vmatpush3.bf16.msra.mxu0 %v3262_v6  ;;  %7431 = vmatprep.mubr.bf16.mxu0 %v7919_v1 }
0x12c4   :  { %7463 = vmatprep.subr.bf16.mxu0 %v8364_v22 }
0x12c5   :  { %v2998_v36 = vpop.permute.xlu0 %2997 }
0x12c6   :  { %v3310_v37 = vpop.permute.xlu1 %3309 }
0x12c9   :  { %v3003_v49 = vpop.permute.xlu0 %3002 }
0x12ca   :  { %7432 = vmatmul.mubr.bf16.gmra.mrb[64].mxu0 %v7920_v41  ;;  %v3008_v47 = vpop.permute.xlu1 %3007 }
0x12cb   :  { %7435 = vmatprep.mubr.bf16.mxu0 %v7921_v10 }
0x12cd   :  { %v3013_v46 = vpop.permute.xlu0 %3012 }
0x12d1   :  { %v3435_v12 = vpop.permute.xlu0 %3434 }
0x12d2   :  { %7436 = vmatmul.mubr.bf16.gmra.mrb[68].mxu0 %v7922_v42 }
0x12d3   :  { %7453 = vmatprep.mubr.msk.bf16.mxu0 %vm8368_vm2, %v8364_v22 }
0x12d5   :  { %v3531_v42 = vpop.permute.xlu0 %3530 }
0x138d   :  { %v7425_v15 = vpop.f32.mrb[56].mxu0 }
0x138e   :  { %v3102_v31 = vpop.f32.mrb[57].mxu0  ;;  %v3111_v19 = vadd.f32 %v7425_v15, %v2953_v54 }
0x138f   :  { %v7426_v16 = vpop.f32.mrb[58].mxu0  ;;  %v3103_v23 = vadd.f32 %v3102_v31, %v2943_v61  ;;  %v3018_v61 = vpop.permute.xlu1 %3017 }
0x1390   :  { %v3114_v27 = vadd.f32 %v7426_v16, %v2958_v7  ;;  %v3105_v57 = vpop.f32.mrb[59].mxu0 }
0x1391   :  { %v3106_v30 = vadd.f32 %v3105_v57, %v2948_v11 }
0x1392   :  { %v3211_v26 = vpack.c.bf16 %v3114_v27, %v3111_v19  ;;  %v7923_v19 = vld [vmem:[%s10590_s1 + $0x4c0] ss:$8 sps:$4 sm:$0xff]  }
0x1393   :  { %v3165_v43 = vpack.c.bf16 %v3106_v30, %v3103_v23  ;;  %v3483_v34 = vpop.permute.xlu1 %3482 }
0x1395   :  { %v7429_v52 = vpop.f32.mrb[60].mxu0  ;;  %7442 = vmatmul.mubr.msk.bf16.vlgmr.msra.gmra.mrb[100].mxu1 %vm747_vm1, %v3165_v43 }
0x1396   :  { %7446 = vmatpush3.bf16.msra.mxu1 %v3214_v18  ;;  %v3118_v39 = vpop.f32.mrb[61].mxu0  ;;  %7447 = vmatprep.mubr.msk.bf16.mxu1 %vm8368_vm2, %v8364_v22  ;;  %v3127_v9 = vadd.f32 %v7429_v52, %v2973_v58 }
0x1397   :  { %v7430_v51 = vpop.f32.mrb[62].mxu0  ;;  %7457 = vmatprep.subr.bf16.mxu1 %v8364_v22  ;;  %v3119_v5 = vadd.f32 %v3118_v39, %v2963_v24 }
0x1398   :  { %v3130_v56 = vadd.f32 %v7430_v51, %v2978_v33  ;;  %v3121_v45 = vpop.f32.mrb[63].mxu0 }
0x1399   :  { %v3122_v59 = vadd.f32 %v3121_v45, %v2968_v8  ;;  %v7925_v45 = vld [vmem:[%s10590_s1 + $0x4e0] ss:$8 sps:$4 sm:$0xff]  }
0x139a   :  { %v3308_v29 = vpack.c.bf16 %v3130_v56, %v3127_v9 }
0x139b   :  { %v3260_v2 = vpack.c.bf16 %v3122_v59, %v3119_v5  ;;  %v7926_v59 = vld [vmem:[%s10590_s1 + $0x4f0] ss:$8 sps:$4 sm:$0xff]  }
0x139d   :  { %v7433_v4 = vpop.f32.mrb[64].mxu0  ;;  %7448 = vmatmul.mubr.msk.bf16.vlgmr.msra.gmra.mrb[104].mxu1 %vm747_vm1, %v3211_v26  ;;  %7454 = vmatmul.mubr.msk.bf16.vlgmr.msra.gmra.mrb[72].mxu0 %vm747_vm1, %v3260_v2 }
0x139e   :  { %7458 = vmatpush3.bf16.msra.mxu1 %v3310_v37  ;;  %7464 = vmatpush3.bf16.msra.mxu0 %v9198_v3  ;;  %v3134_v44 = vpop.f32.mrb[65].mxu0  ;;  %v3143_v20 = vadd.f32 %v7433_v4, %v2993_v25  ;;  %v7924_v37 = vld [vmem:[%s10590_s1 + $0x4d0] ss:$8 sps:$4 sm:$0xff]  }
0x139f   :  { %v7434_v32 = vpop.f32.mrb[66].mxu0  ;;  %7459 = vmatprep.mubr.msk.bf16.mxu1 %vm8368_vm2, %v8364_v22  ;;  %7465 = vmatprep.mubr.msk.bf16.mxu0 %vm8368_vm2, %v8364_v22  ;;  %v3135_v35 = vadd.f32 %v3134_v44, %v9447_v28 }
0x13a0   :  { %v3146_v40 = vadd.f32 %v7434_v32, %v2998_v36  ;;  %v3137_v48 = vpop.f32.mrb[67].mxu0  ;;  %7469 = vmatprep.subr.bf16.mxu1 %v8364_v22  ;;  %7475 = vmatprep.subr.bf16.mxu0 %v8364_v22 }
0x13a1   :  { %v3138_v7 = vadd.f32 %v3137_v48, %v2988_v60 }
0x13a2   :  { %v3432_v3 = vpack.c.bf16 %v3146_v40, %v3143_v20 }
0x13a3   :  { %v3386_v50 = vpack.c.bf16 %v3138_v7, %v3135_v35 }
0x13a5   :  { %v7437_v8 = vpop.f32.mrb[68].mxu0  ;;  %7460 = vmatmul.mubr.msk.bf16.vlgmr.msra.gmra.mrb[108].mxu1 %vm747_vm1, %v3308_v29  ;;  %7466 = vmatmul.mubr.msk.bf16.vlgmr.msra.gmra.mrb[76].mxu0 %vm747_vm1, %v3386_v50 }
0x13a6   :  { %7470 = vmatpush3.bf16.msra.mxu1 %v3435_v12  ;;  %7476 = vmatpush3.bf16.msra.mxu0 %v3483_v34  ;;  %v3150_v17 = vpop.f32.mrb[69].mxu0  ;;  %v3159_v33 = vadd.f32 %v7437_v8, %v3013_v46 }
0x13a7   :  { %v7438_v63 = vpop.f32.mrb[70].mxu0  ;;  %7471 = vmatprep.mubr.msk.bf16.mxu1 %vm8368_vm2, %v8364_v22  ;;  %7477 = vmatprep.mubr.msk.bf16.mxu0 %vm8368_vm2, %v8364_v22  ;;  %v3151_v1 = vadd.f32 %v3150_v17, %v3003_v49 }
0x13a8   :  { %v3162_v28 = vadd.f32 %v7438_v63, %v3018_v61  ;;  %v3153_v13 = vpop.f32.mrb[71].mxu0  ;;  %7481 = vmatprep.subr.bf16.mxu1 %v8364_v22  ;;  %7487 = vmatprep.subr.bf16.mxu0 %v7923_v19 }
0x13a9   :  { %v3154_v6 = vadd.f32 %v3153_v13, %v3008_v47 }
0x13aa   :  { %v3529_v41 = vpack.c.bf16 %v3162_v28, %v3159_v33 }
0x13ab   :  { %v3481_v10 = vpack.c.bf16 %v3154_v6, %v3151_v1 }
0x13ad   :  { %7472 = vmatmul.mubr.msk.bf16.vlgmr.msra.gmra.mrb[112].mxu1 %vm747_vm1, %v3432_v3  ;;  %7478 = vmatmul.mubr.msk.bf16.vlgmr.msra.gmra.mrb[80].mxu0 %vm747_vm1, %v3481_v10 }
0x13ae   :  { %7482 = vmatpush3.bf16.msra.mxu1 %v3531_v42  ;;  %7483 = vmatprep.mubr.msk.bf16.mxu1 %vm8368_vm2, %v8364_v22 }
0x13af   :  { %7488 = vmatpush3.bf16.msra.mxu0 %v7923_v19 }
0x13b0   :  { %7489 = vmatprep.subr.bf16.mxu0 %v7924_v37 }
0x13b3   :  { %7490 = vmatpush3.bf16.msra.mxu0 %v7924_v37 }
0x13b4   :  { %7491 = vmatprep.subr.bf16.mxu0 %v7925_v45 }
0x13b5   :  { %7484 = vmatmul.mubr.msk.bf16.vlgmr.msra.gmra.mrb[116].mxu1 %vm747_vm1, %v3529_v41 }
0x13b6   :  { %3869 = vmatprep.mubr.bf16.mxu1 %v8362_v0 }
0x13b7   :  { %7492 = vmatpush3.bf16.msra.mxu0 %v7925_v45 }
0x13b8   :  { %7493 = vmatprep.subr.bf16.mxu0 %v7926_v59 }
0x13bb   :  { %7494 = vmatpush3.bf16.msra.mxu0 %v7926_v59 }
0x1468   :  { %v9494_v11 = vpop.f32.mrb[100].mxu1 }
0x1469   :  { %v7443_v54 = vpop.f32.mrb[101].mxu1 }
0x146a   :  { %v3207_v24 = vpop.f32.mrb[102].mxu1 }
0x146b   :  { %v7444_v58 = vpop.f32.mrb[103].mxu1 }
0x1470   :  { %v3253_v18 = vpop.f32.mrb[104].mxu1  ;;  %v3301_v60 = vpop.f32.mrb[72].mxu0 }
0x1471   :  { %v7449_v25 = vpop.f32.mrb[105].mxu1  ;;  %v7455_v15 = vpop.f32.mrb[73].mxu0 }
0x1472   :  { %v3256_v31 = vpop.f32.mrb[106].mxu1  ;;  %v3304_v16 = vpop.f32.mrb[74].mxu0 }
0x1473   :  { %v7773_v27 = vpack.i.bf16 %v3256_v31, %v3253_v18  ;;  %v7778_v57 = vpack.i.bf16 %v3304_v16, %v3301_v60  ;;  %v7450_v23 = vpop.f32.mrb[107].mxu1  ;;  %v7456_v30 = vpop.f32.mrb[75].mxu0 }
0x1475   :  { %7779 = vrot.lane.b32.xlu0 %v7778_v57, %s8371_s24  ;;  %7774 = vrot.lane.b32.xlu1 %v7773_v27, %s8369_s13 }
0x1478   :  { %v3349_v36 = vpop.f32.mrb[108].mxu1  ;;  %v3425_v26 = vpop.f32.mrb[76].mxu0 }
0x1479   :  { %v7461_v43 = vpop.f32.mrb[109].mxu1  ;;  %v7467_v52 = vpop.f32.mrb[77].mxu0 }
0x147a   :  { %v3352_v39 = vpop.f32.mrb[110].mxu1  ;;  %v3428_v51 = vpop.f32.mrb[78].mxu0  ;;  %v3618_v52 = vld [vmem:[%s10591_s2 + $0x3c0] ss:$0 sm:$0xff] }
0x147b   :  { %v7783_v49 = vpack.i.bf16 %v3352_v39, %v3349_v36  ;;  %v7462_v9 = vpop.f32.mrb[111].mxu1  ;;  %v7468_v56 = vpop.f32.mrb[79].mxu0 }
0x147d   :  { %7784 = vrot.lane.b32.xlu0 %v7783_v49, %s8370_s22 }
0x1480   :  { %v3474_v47 = vpop.f32.mrb[112].mxu1  ;;  %v3522_v5 = vpop.f32.mrb[80].mxu0 }
0x1481   :  { %v7473_v29 = vpop.f32.mrb[113].mxu1  ;;  %v7479_v2 = vpop.f32.mrb[81].mxu0 }
0x1482   :  { %v3477_v4 = vpop.f32.mrb[114].mxu1  ;;  %v3525_v46 = vpop.f32.mrb[82].mxu0 }
0x1483   :  { %v7788_v44 = vpack.i.bf16 %v3477_v4, %v3474_v47  ;;  %v7793_v61 = vpack.i.bf16 %v3525_v46, %v3522_v5  ;;  %v7474_v32 = vpop.f32.mrb[115].mxu1  ;;  %v7480_v20 = vpop.f32.mrb[83].mxu0 }
0x1485   :  { %7789 = vrot.lane.b32.xlu1 %v7788_v44, %s8369_s13 }
0x1488   :  { %v3570_v40 = vpop.f32.mrb[116].mxu1 }
0x1489   :  { %v7485_v48 = vpop.f32.mrb[117].mxu1  ;;  %7794 = vrot.lane.b32.xlu1 %v7793_v61, %s8371_s24 }
0x148a   :  { %v3573_v35 = vpop.f32.mrb[118].mxu1 }
0x148b   :  { %v7798_v7 = vpack.i.bf16 %v3573_v35, %v3570_v40  ;;  %v7486_v3 = vpop.f32.mrb[119].mxu1 }
0x148d   :  { %7799 = vrot.lane.b32.xlu0 %v7798_v7, %s8370_s22 }
0x14e7   :  { %v7775_v50 = vpop.permute.xlu1 %7774  ;;  %v7780_v12 = vpop.permute.xlu0 %7779 }
0x14e8   :  { %v7777_v34 = vunpack.i.h.bf16 %v7775_v50  ;;  %v7776_v8 = vunpack.i.l.bf16 %v7775_v50  ;;  %v7782_v17 = vunpack.i.h.bf16 %v7780_v12  ;;  %v7781_v63 = vunpack.i.l.bf16 %v7780_v12 }
0x14ea   :  { %v3381_v33 = vsel %vm747_vm1, %v3207_v24, %v7777_v34  ;;  %v3380_v28 = vsel %vm747_vm1, %v9494_v11, %v7776_v8 }
0x14eb   :  { %v3382_v41 = vsel %vm1406_vm3, %v3380_v28, %v7781_v63  ;;  %v3383_v10 = vsel %vm1406_vm3, %v3381_v33, %v7782_v17 }
0x14ef   :  { %v7785_v13 = vpop.permute.xlu0 %7784 }
0x14f0   :  { %v7787_v1 = vunpack.i.h.bf16 %v7785_v13  ;;  %v7786_v6 = vunpack.i.l.bf16 %v7785_v13 }
0x14f2   :  { %v3384_v42 = vsel %vm1409_vm4, %v3382_v41, %v7786_v6  ;;  %v3385_v54 = vsel %vm1409_vm4, %v3383_v10, %v7787_v1 }
0x14f3   :  { %v3616_v58 = vpack.c.bf16 %v3385_v54, %v3384_v42  ;;  %v7929_v54 = vld [vmem:[%s10590_s1 + $0x504] ss:$8 sps:$4 sm:$0xff]  }
0x14f4   :  { %3837 = vmatprep.subr.bf16.mxu1 %v7929_v54  ;;  %v6764_v54 = vld [vmem:[%s10591_s2 + $0x400] ss:$8 sm:$0x3] }
0x14f5   :  { %7495 = vmatprep.mubr.msk.bf16.mxu0 %vm128_vm0, %v3616_v58  ;;  %v7927_v58 = vld [vmem:[%s10590_s1 + $0x500] ss:$8 sps:$4 sm:$0xff]  }
0x14f6   :  { %3838 = vmatpush1.bf16.msra.mxu1 %v7927_v58  ;;  %v3784_v58 = vrot.slane %v6764_v54, %v8550_v53 }
0x14f7   :  { %v7790_v18 = vpop.permute.xlu1 %7789 }
0x14f8   :  { %v7792_v24 = vunpack.i.h.bf16 %v7790_v18  ;;  %v7791_v25 = vunpack.i.l.bf16 %v7790_v18  ;;  %v7932_v18 = vld [vmem:[%s10590_s1 + $0x514] ss:$8 sps:$4 sm:$0xff]  }
0x14f9   :  { %3839 = vmatprep.subr.bf16.mxu1 %v7932_v18  ;;  %v3788_v18 = vrot.slane %v6764_v54, %v8555_v55 }
0x14fa   :  { %v3602_v16 = vsel %vm747_vm1, %v3428_v51, %v7792_v24  ;;  %v3601_v19 = vsel %vm747_vm1, %v3425_v26, %v7791_v25  ;;  %v3607_v26 = vld [vmem:[%s10591_s2 + $0x3d0] ss:$0 sm:$0xff]  ;;  %v7935_v24 = vld [vmem:[%s10590_s1 + $0x524] ss:$8 sps:$4 sm:$0xff]   ;;  %v7933_v25 = vld [vmem:[%s10590_s1 + $0x520] ss:$8 sps:$4 sm:$0xff]  }
0x14fb   :  { %v7795_v60 = vpop.permute.xlu1 %7794 }
0x14fc   :  { %v7797_v15 = vunpack.i.h.bf16 %v7795_v60  ;;  %v7796_v11 = vunpack.i.l.bf16 %v7795_v60  ;;  %v7930_v60 = vld [vmem:[%s10590_s1 + $0x510] ss:$8 sps:$4 sm:$0xff]  }
0x14fd   :  { %3840 = vmatpush1.bf16.msra.mxu1 %v7930_v60 }
0x14fe   :  { %v3603_v23 = vsel %vm1406_vm3, %v3601_v19, %v7796_v11  ;;  %v3604_v30 = vsel %vm1406_vm3, %v3602_v16, %v7797_v15  ;;  %3841 = vmatprep.subr.bf16.mxu1 %v7935_v24  ;;  %v7938_v15 = vld [vmem:[%s10590_s1 + $0x534] ss:$8 sps:$4 sm:$0xff]   ;;  %v7936_v11 = vld [vmem:[%s10590_s1 + $0x530] ss:$8 sps:$4 sm:$0xff]  }
0x14ff   :  { %v7800_v31 = vpop.permute.xlu0 %7799 }
0x1500   :  { %v7802_v27 = vunpack.i.h.bf16 %v7800_v31  ;;  %v7801_v57 = vunpack.i.l.bf16 %v7800_v31 }
0x1501   :  { %3842 = vmatpush1.bf16.msra.mxu1 %v7933_v25 }
0x1502   :  { %v3605_v36 = vsel %vm1409_vm4, %v3603_v23, %v7801_v57  ;;  %v3606_v37 = vsel %vm1409_vm4, %v3604_v30, %v7802_v27  ;;  %3843 = vmatprep.subr.bf16.mxu1 %v7938_v15 }
0x1503   :  { %v3617_v43 = vpack.c.bf16 %v3606_v37, %v3605_v36 }
0x1505   :  { %7496 = vmatmul.mubr.msk.bf16.vlgmr.msra.gmra.mrb[84].mxu0 %vm128_vm0, %v3617_v43  ;;  %3844 = vmatpush1.bf16.msra.mxu1 %v7936_v11 }
0x1506   :  { %7499 = vmatprep.subr.bf16.mxu1 %v8364_v22 }
0x15d8   :  { %v7497_v39 = vpop.f32.mrb[84].mxu0 }
0x15d9   :  { %v3683_v51 = vpop.f32.mrb[85].mxu0  ;;  %v3692_v49 = vadd.f32 %v7497_v39, %v3618_v52 }
0x15da   :  { %v3684_v9 = vadd.f32 %v3683_v51, %v3618_v52  ;;  %v7498_v56 = vpop.f32.mrb[86].mxu0  ;;  %v3706_v51 = vld [vmem:[%s10591_s2 + $0x3e0] ss:$0 sm:$0xff] }
0x15db   :  { %v3695_v45 = vadd.f32 %v7498_v56, %v3618_v52  ;;  %v3686_v47 = vpop.f32.mrb[87].mxu0  ;;  %v3700_v2 = vmul.f32 %v3692_v49, %v3607_v26 }
0x15dc   :  { %v3698_v5 = vmul.f32 %v3684_v9, %v3607_v26  ;;  %v3687_v59 = vadd.f32 %v3686_v47, %v3618_v52  ;;  %v3707_v47 = vld [vmem:[%s10591_s2 + $0x3f0] ss:$0 sm:$0xff] }
0x15dd   :  { %v3701_v29 = vmul.f32 %v3695_v45, %v3607_v26  ;;  %v9547_v20 = vadd.f32 %v3700_v2, %v9115_v38 }
0x15de   :  { %v9536_v4 = vadd.f32 %v3698_v5, %v9105_v62  ;;  %v3699_v46 = vmul.f32 %v3687_v59, %v3607_v26 }
0x15df   :  { %v9539_v44 = vadd.f32 %v3701_v29, %v9120_v14  ;;  %v3714_v14 = vsel %vm128_vm0, %v9547_v20, 0.0 }
0x15e0   :  { %v9542_v61 = vadd.f32 %v3699_v46, %v9110_v21  ;;  %v3708_v32 = vsel %vm128_vm0, %v9536_v4, 0.0 }
0x15e1   :  { %3709 = vadd.xlane.f32.xlu1 %v3708_v32  ;;  %v3717_v62 = vsel %vm128_vm0, %v9539_v44, 0.0 }
0x15e2   :  { %v3711_v40 = vsel %vm128_vm0, %v9542_v61, 0.0 }
0x15e3   :  { %3712 = vadd.xlane.f32.xlu0 %v3711_v40 }
0x15e5   :  { %3718 = vadd.xlane.f32.xlu1 %v3717_v62 }
0x15e7   :  { %3715 = vadd.xlane.f32.xlu0 %v3714_v14 }
0x166e   :  { %v3710_v21 = vpop.xlane.xlu1 %3709 }
0x166f   :  { %v3720_v48 = vmul.f32 0.015625, %v3710_v21 }
0x1670   :  { %v3713_v35 = vpop.xlane.xlu0 %3712 }
0x1671   :  { %v3724_v7 = vsub.f32 %v9536_v4, %v3720_v48  ;;  %v3721_v3 = vmul.f32 0.015625, %v3713_v35 }
0x1672   :  { %v3719_v38 = vpop.xlane.xlu1 %3718 }
0x1673   :  { %v3725_v50 = vsub.f32 %v9542_v61, %v3721_v3  ;;  %v3723_v12 = vmul.f32 0.015625, %v3719_v38  ;;  %v3728_v34 = vmul.f32 %v3724_v7, %v3724_v7  ;;  %v7939_v3 = vld [vmem:[%s10590_s1 + $0x5c0] ss:$8 sps:$4 sm:$0xff]  }
0x1674   :  { %v3716_v8 = vpop.xlane.xlu0 %3715  ;;  %v7940_v38 = vld [vmem:[%s10590_s1 + $0x540] ss:$8 sps:$4 sm:$0xff]   ;;  %7049 = vmatprep.subr.bf16.mxu0 %v7939_v3 }
0x1675   :  { %v3727_v17 = vsub.f32 %v9539_v44, %v3723_v12  ;;  %v3722_v63 = vmul.f32 0.015625, %v3716_v8  ;;  %v3732_v33 = vsel %vm128_vm0, %v3728_v34, 0.0  ;;  %v3729_v28 = vmul.f32 %v3725_v50, %v3725_v50  ;;  %7050 = vmatpush3.bf16.msra.mxu0 %v7940_v38  ;;  %v7942_v12 = vld [vmem:[%s10590_s1 + $0x550] ss:$8 sps:$4 sm:$0xff]   ;;  %v7943_v34 = vld [vmem:[%s10590_s1 + $0x5e0] ss:$8 sps:$4 sm:$0xff]  }
0x1676   :  { %3733 = vadd.xlane.f32.xlu0 %v3732_v33  ;;  %v7944_v8 = vld [vmem:[%s10590_s1 + $0x560] ss:$8 sps:$4 sm:$0xff]  }
0x1677   :  { %v3726_v13 = vsub.f32 %v9547_v20, %v3722_v63  ;;  %v3735_v1 = vsel %vm128_vm0, %v3729_v28, 0.0  ;;  %v3731_v6 = vmul.f32 %v3727_v17, %v3727_v17  ;;  %v7946_v63 = vld [vmem:[%s10590_s1 + $0x570] ss:$8 sps:$4 sm:$0xff]   ;;  %v7947_v33 = vld [vmem:[%s10590_s1 + $0x600] ss:$8 sps:$4 sm:$0xff]  }
0x1678   :  { %3736 = vadd.xlane.f32.xlu1 %v3735_v1  ;;  %v7948_v28 = vld [vmem:[%s10590_s1 + $0x580] ss:$8 sps:$4 sm:$0xff]   ;;  %v7950_v1 = vld [vmem:[%s10590_s1 + $0x590] ss:$8 sps:$4 sm:$0xff]  }
0x1679   :  { %v3730_v41 = vmul.f32 %v3726_v13, %v3726_v13  ;;  %v3741_v42 = vsel %vm128_vm0, %v3731_v6, 0.0  ;;  %v7951_v6 = vld [vmem:[%s10590_s1 + $0x620] ss:$8 sps:$4 sm:$0xff]  }
0x167b   :  { %v3738_v10 = vsel %vm128_vm0, %v3730_v41, 0.0  ;;  %v7952_v41 = vld [vmem:[%s10590_s1 + $0x5a0] ss:$8 sps:$4 sm:$0xff]  }
0x167c   :  { %3739 = vadd.xlane.f32.xlu0 %v3738_v10  ;;  %3742 = vadd.xlane.f32.xlu1 %v3741_v42  ;;  %v7953_v10 = vld [vmem:[%s10590_s1 + $0x630] ss:$8 sps:$4 sm:$0xff]  }
0x167d   :  { %v7954_v42 = vld [vmem:[%s10590_s1 + $0x5b0] ss:$8 sps:$4 sm:$0xff]  }
0x1703   :  { %v3734_v31 = vpop.xlane.xlu0 %3733 }
0x1704   :  { %v3744_v16 = vmul.f32 0.015625, %v3734_v31 }
0x1705   :  { %v3737_v19 = vpop.xlane.xlu1 %3736 }
0x1706   :  { %v3748_v27 = vadd.f32 1e-06, %v3744_v16  ;;  %v3745_v57 = vmul.f32 0.015625, %v3737_v19 }
0x1708   :  { %8203 = vrsqrt.f32 %v3748_v27  ;;  %v3749_v23 = vadd.f32 1e-06, %v3745_v57 }
0x1709   :  { %v3740_v30 = vpop.xlane.xlu0 %3739  ;;  %v3743_v36 = vpop.xlane.xlu1 %3742 }
0x170a   :  { %8205 = vrsqrt.f32 %v3749_v23  ;;  %v3746_v37 = vmul.f32 0.015625, %v3740_v30  ;;  %v3747_v43 = vmul.f32 0.015625, %v3743_v36 }
0x170c   :  { %v3750_v52 = vadd.f32 1e-06, %v3746_v37  ;;  %v3751_v39 = vadd.f32 1e-06, %v3747_v43 }
0x170e   :  { %8207 = vrsqrt.f32 %v3750_v52 }
0x170f   :  { %8209 = vrsqrt.f32 %v3751_v39 }
0x1712   :  { %v8204_v26 = vpop.eup %8203 }
0x1713   :  { %v3756_v49 = vmul.f32 %v8204_v26, %v3724_v7 }
0x1714   :  { %v8206_v9 = vpop.eup %8205 }
0x1715   :  { %v3760_v56 = vmul.f32 %v3756_v49, %v3706_v51  ;;  %v3757_v45 = vmul.f32 %v8206_v9, %v3725_v50  ;;  %v7941_v50 = vld [vmem:[%s10590_s1 + $0x5d0] ss:$8 sps:$4 sm:$0xff]  }
0x1716   :  { %7051 = vmatprep.subr.bf16.mxu0 %v7941_v50 }
0x1717   :  { %v3761_v5 = vmul.f32 %v3757_v45, %v3706_v51  ;;  %v3764_v46 = vadd.f32 %v3760_v56, %v3707_v47  ;;  %7052 = vmatpush3.bf16.msra.mxu0 %v7942_v12 }
0x1718   :  { %v8208_v59 = vpop.eup %8207  ;;  %7053 = vmatprep.subr.bf16.mxu0 %v7943_v34 }
0x1719   :  { %v8210_v29 = vpop.eup %8209  ;;  %v3758_v2 = vmul.f32 %v8208_v59, %v3726_v13  ;;  %v3765_v32 = vadd.f32 %v3761_v5, %v3707_v47  ;;  %v7949_v13 = vld [vmem:[%s10590_s1 + $0x610] ss:$8 sps:$4 sm:$0xff]  }
0x171a   :  { %v3759_v40 = vmul.f32 %v8210_v29, %v3727_v17  ;;  %v7945_v17 = vld [vmem:[%s10590_s1 + $0x5f0] ss:$8 sps:$4 sm:$0xff]  }
0x171b   :  { %v3776_v62 = vpack.c.bf16 %v3765_v32, %v3764_v46  ;;  %v3762_v14 = vmul.f32 %v3758_v2, %v3706_v51  ;;  %7054 = vmatpush3.bf16.msra.mxu0 %v7944_v8 }
0x171c   :  { %v3763_v21 = vmul.f32 %v3759_v40, %v3706_v51  ;;  %7055 = vmatprep.subr.bf16.mxu0 %v7945_v17 }
0x171d   :  { %6773 = vmatmul.mubr.msk.bf16.vlgmr.msra.gmra.mrb[120].mxu1 %vm128_vm0, %v3776_v62  ;;  %v3766_v48 = vadd.f32 %v3762_v14, %v3707_v47 }
0x171e   :  { %3879 = vmatprep.mubr.bf16.mxu1 %v8362_v0  ;;  %v3767_v35 = vadd.f32 %v3763_v21, %v3707_v47 }
0x171f   :  { %7056 = vmatpush3.bf16.msra.mxu0 %v7946_v63 }
0x1720   :  { %v3777_v7 = vpack.c.bf16 %v3767_v35, %v3766_v48  ;;  %7057 = vmatprep.subr.bf16.mxu0 %v7947_v33 }
0x1723   :  { %7058 = vmatpush3.bf16.msra.mxu0 %v7948_v28 }
0x1724   :  { %7059 = vmatprep.subr.bf16.mxu0 %v7949_v13 }
0x1725   :  { %6774 = vmatmul.mubr.msk.bf16.gmra.mrb[124].mxu1 %vm128_vm0, %v3777_v7 }
0x1726   :  { %7507 = vmatprep.mubr.msk.bf16.mxu1 %vm8368_vm2, %v8364_v22 }
0x1727   :  { %7060 = vmatpush3.bf16.msra.mxu0 %v7950_v1 }
0x1728   :  { %7061 = vmatprep.subr.bf16.mxu0 %v7951_v6 }
0x172b   :  { %7062 = vmatpush3.bf16.msra.mxu0 %v7952_v41 }
0x172c   :  { %7063 = vmatprep.subr.bf16.mxu0 %v7953_v10 }
0x172f   :  { %7064 = vmatpush3.bf16.msra.mxu0 %v7954_v42 }
0x17f0   :  { %v3871_v60 = vpop.f32.mrb[120].mxu1 }
0x17f1   :  { %v9652_v24 = vadd.f32 %v3871_v60, %v3784_v58  ;;  %v3873_v25 = vpop.f32.mrb[121].mxu1 }
0x17f2   :  { %v9654_v15 = vadd.f32 %v3873_v25, %v3788_v18  ;;  %v3875_v11 = vpop.f32.mrb[122].mxu1 }
0x17f3   :  { %v3890_v31 = vmul.f32 %v9652_v24, %v9652_v24  ;;  %v9658_v16 = vadd.f32 %v3875_v11, %v3784_v58  ;;  %v3877_v19 = vpop.f32.mrb[123].mxu1 }
0x17f4   :  { %v3891_v27 = vmul.f32 %v9654_v15, %v9654_v15  ;;  %v9662_v57 = vadd.f32 %v3877_v19, %v3788_v18 }
0x17f5   :  { %v3898_v23 = vmul.f32 %v3890_v31, %v9652_v24  ;;  %v3892_v30 = vmul.f32 %v9658_v16, %v9658_v16 }
0x17f6   :  { %v3899_v36 = vmul.f32 %v3891_v27, %v9654_v15  ;;  %v3893_v37 = vmul.f32 %v9662_v57, %v9662_v57 }
0x17f7   :  { %v3906_v43 = vmul.f32 0.044715, %v3898_v23  ;;  %v3900_v52 = vmul.f32 %v3892_v30, %v9658_v16 }
0x17f8   :  { %v3907_v39 = vmul.f32 0.044715, %v3899_v36  ;;  %v3901_v26 = vmul.f32 %v3893_v37, %v9662_v57  ;;  %v3881_v51 = vpop.f32.mrb[124].mxu1 }
0x17f9   :  { %v3914_v49 = vadd.f32 %v3906_v43, %v9652_v24  ;;  %v3908_v9 = vmul.f32 0.044715, %v3900_v52  ;;  %v9673_v56 = vadd.f32 %v3881_v51, %v3784_v58  ;;  %v3883_v45 = vpop.f32.mrb[125].mxu1 }
0x17fa   :  { %v3915_v47 = vadd.f32 %v3907_v39, %v9654_v15  ;;  %v3909_v5 = vmul.f32 0.044715, %v3901_v26  ;;  %v9676_v59 = vadd.f32 %v3883_v45, %v3788_v18  ;;  %v3885_v29 = vpop.f32.mrb[126].mxu1 }
0x17fb   :  { %v3922_v2 = vmul.f32 0.7978846, %v3914_v49  ;;  %v3916_v46 = vadd.f32 %v3908_v9, %v9658_v16  ;;  %v3894_v32 = vmul.f32 %v9673_v56, %v9673_v56  ;;  %v9681_v40 = vadd.f32 %v3885_v29, %v3784_v58  ;;  %v3887_v62 = vpop.f32.mrb[127].mxu1 }
0x17fc   :  { %v3923_v14 = vmul.f32 0.7978846, %v3915_v47  ;;  %v3917_v21 = vadd.f32 %v3909_v5, %v9662_v57  ;;  %v3895_v48 = vmul.f32 %v9676_v59, %v9676_v59  ;;  %v9686_v35 = vadd.f32 %v3887_v62, %v3788_v18 }
0x17fd   :  { %8211 = vtanh.f32 %v3922_v2  ;;  %v3924_v7 = vmul.f32 0.7978846, %v3916_v46  ;;  %v3902_v3 = vmul.f32 %v3894_v32, %v9673_v56  ;;  %v3896_v38 = vmul.f32 %v9681_v40, %v9681_v40 }
0x17fe   :  { %8213 = vtanh.f32 %v3923_v14  ;;  %v3925_v50 = vmul.f32 0.7978846, %v3917_v21  ;;  %v3903_v12 = vmul.f32 %v3895_v48, %v9676_v59  ;;  %v3897_v34 = vmul.f32 %v9686_v35, %v9686_v35 }
0x17ff   :  { %8215 = vtanh.f32 %v3924_v7  ;;  %v3910_v8 = vmul.f32 0.044715, %v3902_v3  ;;  %v3904_v17 = vmul.f32 %v3896_v38, %v9681_v40 }
0x1800   :  { %8217 = vtanh.f32 %v3925_v50  ;;  %v3911_v63 = vmul.f32 0.044715, %v3903_v12  ;;  %v3905_v33 = vmul.f32 %v3897_v34, %v9686_v35  ;;  %v3998_v34 = vld [vmem:[%s10591_s2 + $0x410] ss:$0 sm:$0xff] }
0x1801   :  { %v3918_v28 = vadd.f32 %v3910_v8, %v9673_v56  ;;  %v3912_v13 = vmul.f32 0.044715, %v3904_v17 }
0x1802   :  { %v3919_v1 = vadd.f32 %v3911_v63, %v9676_v59  ;;  %v3913_v6 = vmul.f32 0.044715, %v3905_v33 }
0x1803   :  { %v3926_v41 = vmul.f32 0.7978846, %v3918_v28  ;;  %v3920_v10 = vadd.f32 %v3912_v13, %v9681_v40 }
0x1804   :  { %v3927_v42 = vmul.f32 0.7978846, %v3919_v1  ;;  %v3921_v54 = vadd.f32 %v3913_v6, %v9686_v35 }
0x1805   :  { %8219 = vtanh.f32 %v3926_v41  ;;  %v3928_v58 = vmul.f32 0.7978846, %v3920_v10 }
0x1806   :  { %8221 = vtanh.f32 %v3927_v42  ;;  %v3929_v18 = vmul.f32 0.7978846, %v3921_v54 }
0x1807   :  { %v8212_v60 = vpop.eup %8211  ;;  %8223 = vtanh.f32 %v3928_v58 }
0x1808   :  { %v8214_v25 = vpop.eup %8213  ;;  %v3938_v11 = vadd.f32 1.0, %v8212_v60  ;;  %8225 = vtanh.f32 %v3929_v18 }
0x1809   :  { %v8216_v31 = vpop.eup %8215  ;;  %v3939_v19 = vadd.f32 1.0, %v8214_v25 }
0x180a   :  { %v8218_v27 = vpop.eup %8217  ;;  %v3946_v23 = vmul.f32 0.5, %v3938_v11  ;;  %v3940_v30 = vadd.f32 1.0, %v8216_v31 }
0x180b   :  { %v3941_v36 = vadd.f32 1.0, %v8218_v27  ;;  %v3947_v37 = vmul.f32 0.5, %v3939_v19 }
0x180c   :  { %v3948_v43 = vmul.f32 0.5, %v3940_v30  ;;  %v3954_v39 = vmul.f32 %v3946_v23, %v9652_v24 }
0x180d   :  { %v3949_v52 = vmul.f32 0.5, %v3941_v36  ;;  %v3955_v49 = vmul.f32 %v3947_v37, %v9654_v15 }
0x180e   :  { %v3956_v26 = vmul.f32 %v3948_v43, %v9658_v16 }
0x180f   :  { %v8220_v51 = vpop.eup %8219  ;;  %v3957_v9 = vmul.f32 %v3949_v52, %v9662_v57 }
0x1810   :  { %v8222_v45 = vpop.eup %8221  ;;  %v3994_v47 = vpack.c.bf16 %v3956_v26, %v3954_v39  ;;  %v3942_v5 = vadd.f32 1.0, %v8220_v51 }
0x1811   :  { %v8224_v29 = vpop.eup %8223  ;;  %v3995_v2 = vpack.c.bf16 %v3957_v9, %v3955_v49  ;;  %v3943_v46 = vadd.f32 1.0, %v8222_v45 }
0x1812   :  { %v8226_v32 = vpop.eup %8225  ;;  %v3944_v62 = vadd.f32 1.0, %v8224_v29  ;;  %v3950_v14 = vmul.f32 0.5, %v3942_v5 }
0x1813   :  { %4127 = vmatprep.mubr.bf16.mxu0 %v3995_v2  ;;  %v3945_v21 = vadd.f32 1.0, %v8226_v32  ;;  %v3951_v48 = vmul.f32 0.5, %v3943_v46 }
0x1814   :  { %4128 = vmatmul.mubr.bf16.vlgmr.msra.gmra.mrb[88].mxu0 %v3994_v47  ;;  %v3952_v24 = vmul.f32 0.5, %v3944_v62  ;;  %v3958_v7 = vmul.f32 %v3950_v14, %v9673_v56  ;;  %v4144_v56 = vld [vmem:[%s10591_s2 + $0x420] ss:$0 sm:$0xff] }
0x1815   :  { %v3953_v16 = vmul.f32 0.5, %v3945_v21  ;;  %v3959_v57 = vmul.f32 %v3951_v48, %v9676_v59 }
0x1816   :  { %v3960_v15 = vmul.f32 %v3952_v24, %v9681_v40 }
0x1817   :  { %v3961_v3 = vmul.f32 %v3953_v16, %v9686_v35 }
0x1818   :  { %v3996_v38 = vpack.c.bf16 %v3960_v15, %v3958_v7 }
0x1819   :  { %v3997_v50 = vpack.c.bf16 %v3961_v3, %v3959_v57  ;;  %v9758_v3 = vld [vmem:[%s10590_s1 + $0x680] ss:$8 sps:$4 sm:$0xff]  }
0x181a   :  { %7523 = vmatprep.subr.bf16.mxu0 %v9758_v3 }
0x181b   :  { %4135 = vmatprep.mubr.bf16.mxu0 %v3997_v50  ;;  %7524 = vmatpush3.bf16.msra.mxu0 %v9758_v3  ;;  %v9768_v50 = vld [vmem:[%s10590_s1 + $0x690] ss:$8 sps:$4 sm:$0xff]  }
0x181c   :  { %4136 = vmatmul.mubr.bf16.gmra.mrb[92].mxu0 %v3996_v38  ;;  %v7956_v38 = vld [vmem:[%s10590_s1 + $0x640] ss:$8 sps:$4 sm:$0xff]   ;;  %7525 = vmatprep.subr.bf16.mxu0 %v9768_v50 }
0x181d   :  { %7500 = vmatpush3.bf16.msra.mxu1 %v7956_v38 }
0x181e   :  { %7501 = vmatprep.subr.bf16.mxu1 %v8364_v22 }
0x181f   :  { %7526 = vmatpush3.bf16.msra.mxu0 %v9768_v50 }
0x18e7   :  { %v7065_v12 = vpop.f32.mrb[88].mxu0 }
0x18e8   :  { %v7066_v8 = vpop.f32.mrb[89].mxu0 }
0x18e9   :  { %v7067_v17 = vadd.f32 %v7066_v8, %v7065_v12  ;;  %v7068_v63 = vpop.f32.mrb[90].mxu0  ;;  %v7958_v12 = vld [vmem:[%s10590_s1 + $0x650] ss:$8 sps:$4 sm:$0xff]   ;;  %v7960_v8 = vld [vmem:[%s10590_s1 + $0x660] ss:$8 sps:$4 sm:$0xff]  }
0x18ea   :  { %v7069_v40 = vpop.f32.mrb[91].mxu0  ;;  %7502 = vmatpush3.bf16.msra.mxu1 %v7958_v12 }
0x18eb   :  { %v4130_v59 = vadd.f32 %v7067_v17, %v3998_v34  ;;  %v7070_v33 = vadd.f32 %v7069_v40, %v7068_v63  ;;  %7503 = vmatprep.subr.bf16.mxu1 %v8364_v22  ;;  %v9790_v17 = vld [vmem:[%s10590_s1 + $0x6b0] ss:$8 sps:$4 sm:$0xff]  }
0x18ec   :  { %v7962_v63 = vld [vmem:[%s10590_s1 + $0x670] ss:$8 sps:$4 sm:$0xff]  }
0x18ed   :  { %v4145_v35 = vmul.f32 %v4144_v56, %v4130_v59  ;;  %v4133_v28 = vadd.f32 %v7070_v33, %v3998_v34 }
0x18ee   :  { %7504 = vmatpush3.bf16.msra.mxu1 %v7960_v8 }
0x18ef   :  { %v4146_v13 = vmul.f32 %v4144_v56, %v4133_v28  ;;  %v7071_v1 = vpop.f32.mrb[92].mxu0  ;;  %v4149_v6 = vadd.f32 %v4145_v35, %v9536_v4  ;;  %v9722_v4 = vld [vmem:[%s10591_s2 + $0x50] sm:$0x3]  ;;  %7505 = vmatprep.subr.bf16.mxu1 %v8364_v22 }
0x18f0   :  { %v7072_v41 = vpop.f32.mrb[93].mxu0  ;;  %v4157_v37 = vsel %vm4156_vm5, %v9722_v4, 0.0 }
0x18f1   :  { %v7073_v10 = vadd.f32 %v7072_v41, %v7071_v1  ;;  %v7074_v42 = vpop.f32.mrb[94].mxu0  ;;  %v4172_v54 = vsel %vm128_vm0, %v4149_v6, 0.0  ;;  %v4150_v58 = vadd.f32 %v4146_v13, %v9542_v61 }
0x18f2   :  { %4173 = vadd.xlane.f32.xlu0 %v4172_v54  ;;  %v7075_v18 = vpop.f32.mrb[95].mxu0  ;;  %7506 = vmatpush3.bf16.msra.mxu1 %v7962_v63 }
0x18f3   :  { %v4138_v60 = vadd.f32 %v7073_v10, %v3998_v34  ;;  %v7076_v25 = vadd.f32 %v7075_v18, %v7074_v42  ;;  %v4175_v11 = vsel %vm128_vm0, %v4150_v58, 0.0  ;;  %7511 = vmatprep.subr.bf16.mxu1 %v8364_v22  ;;  %v4154_v18 = vld [vmem:[%s10591_s2 + $0x430] ss:$0 sm:$0xff] }
0x18f4   :  { %4176 = vadd.xlane.f32.xlu1 %v4175_v11  ;;  %v5386_v11 = vld [vmem:[%s10591_s2 + $0x4e0] ss:$0 sm:$0xff] }
0x18f5   :  { %v4147_v31 = vmul.f32 %v4144_v56, %v4138_v60  ;;  %v4141_v19 = vadd.f32 %v7076_v25, %v3998_v34  ;;  %v9779_v34 = vld [vmem:[%s10590_s1 + $0x6a0] ss:$8 sps:$4 sm:$0xff]  }
0x18f6   :  { %7527 = vmatprep.subr.bf16.mxu0 %v9779_v34 }
0x18f7   :  { %v4148_v27 = vmul.f32 %v4144_v56, %v4141_v19  ;;  %v4151_v23 = vadd.f32 %v4147_v31, %v9547_v20  ;;  %7528 = vmatpush3.bf16.msra.mxu0 %v9779_v34  ;;  %v6563_v31 = vld [vmem:[%s10591_s2 + $0x590] ss:$0 sm:$0xff] }
0x18f8   :  { %7529 = vmatprep.subr.bf16.mxu0 %v9790_v17 }
0x18f9   :  { %v4178_v61 = vsel %vm128_vm0, %v4151_v23, 0.0  ;;  %v4152_v30 = vadd.f32 %v4148_v27, %v9539_v44 }
0x18fa   :  { %4179 = vadd.xlane.f32.xlu0 %v4178_v61 }
0x18fb   :  { %v4181_v36 = vsel %vm128_vm0, %v4152_v30, 0.0  ;;  %7530 = vmatpush3.bf16.msra.mxu0 %v9790_v17 }
0x18fc   :  { %4182 = vadd.xlane.f32.xlu1 %v4181_v36  ;;  %7543 = vmatprep.subr.bf16.mxu0 %v8364_v22  ;;  %v6564_v36 = vld [vmem:[%s10591_s2 + $0x5a0] ss:$0 sm:$0xff] }
0x18fe   :  { %4158 = vadd.xlane.f32.xlu0 %v4157_v37 }
0x197f   :  { %v4174_v43 = vpop.xlane.xlu0 %4173 }
0x1980   :  { %v4184_v20 = vmul.f32 0.015625, %v4174_v43  ;;  %v4155_v43 = vld [vmem:[%s10591_s2 + $0x440] ss:$0 sm:$0xff] }
0x1981   :  { %v4177_v52 = vpop.xlane.xlu1 %4176 }
0x1982   :  { %v9729_v39 = vsub.f32 %v4149_v6, %v4184_v20  ;;  %v4185_v26 = vmul.f32 0.015625, %v4177_v52  ;;  %v5387_v20 = vld [vmem:[%s10591_s2 + $0x4f0] ss:$0 sm:$0xff] }
0x1984   :  { %v9731_v51 = vsub.f32 %v4150_v58, %v4185_v26  ;;  %v4192_v49 = vmul.f32 %v9729_v39, %v9729_v39 }
0x1986   :  { %v4196_v44 = vsel %vm128_vm0, %v4192_v49, 0.0  ;;  %v4193_v9 = vmul.f32 %v9731_v51, %v9731_v51 }
0x1987   :  { %4197 = vadd.xlane.f32.xlu1 %v4196_v44  ;;  %v4180_v45 = vpop.xlane.xlu0 %4179 }
0x1988   :  { %v4186_v47 = vmul.f32 0.015625, %v4180_v45  ;;  %v4199_v5 = vsel %vm128_vm0, %v4193_v9, 0.0 }
0x1989   :  { %4200 = vadd.xlane.f32.xlu0 %v4199_v5  ;;  %v4183_v29 = vpop.xlane.xlu1 %4182 }
0x198a   :  { %v9739_v2 = vsub.f32 %v4151_v23, %v4186_v47  ;;  %v4187_v46 = vmul.f32 0.015625, %v4183_v29 }
0x198b   :  { %v4159_v32 = vpop.xlane.xlu0 %4158 }
0x198c   :  { %v9741_v62 = vsub.f32 %v4152_v30, %v4187_v46  ;;  %v4160_v14 = vmul.f32 0.015625, %v4159_v32  ;;  %v4194_v21 = vmul.f32 %v9739_v2, %v9739_v2 }
0x198e   :  { %v9746_v48 = vsub.f32 %v9722_v4, %v4160_v14  ;;  %v4202_v24 = vsel %vm128_vm0, %v4194_v21, 0.0  ;;  %v4195_v16 = vmul.f32 %v9741_v62, %v9741_v62 }
0x198f   :  { %4203 = vadd.xlane.f32.xlu1 %v4202_v24 }
0x1990   :  { %v4205_v7 = vsel %vm128_vm0, %v4195_v16, 0.0  ;;  %v4162_v15 = vmul.f32 %v9746_v48, %v9746_v48 }
0x1991   :  { %4206 = vadd.xlane.f32.xlu0 %v4205_v7 }
0x1992   :  { %v4163_v57 = vsel %vm4156_vm5, %v4162_v15, 0.0 }
0x1993   :  { %4164 = vadd.xlane.f32.xlu1 %v4163_v57 }
0x1a14   :  { %v4198_v56 = vpop.xlane.xlu1 %4197 }
0x1a15   :  { %v4208_v40 = vmul.f32 0.015625, %v4198_v56 }
0x1a16   :  { %v4201_v59 = vpop.xlane.xlu0 %4200 }
0x1a17   :  { %v4212_v33 = vadd.f32 1e-06, %v4208_v40  ;;  %v4209_v35 = vmul.f32 0.015625, %v4201_v59 }
0x1a19   :  { %8227 = vrsqrt.f32 %v4212_v33  ;;  %v4213_v28 = vadd.f32 1e-06, %v4209_v35 }
0x1a1b   :  { %8229 = vrsqrt.f32 %v4213_v28 }
0x1a1c   :  { %v4204_v13 = vpop.xlane.xlu1 %4203 }
0x1a1d   :  { %v4210_v1 = vmul.f32 0.015625, %v4204_v13 }
0x1a1e   :  { %v4207_v6 = vpop.xlane.xlu0 %4206 }
0x1a1f   :  { %v4214_v41 = vadd.f32 1e-06, %v4210_v1  ;;  %v4211_v10 = vmul.f32 0.015625, %v4207_v6 }
0x1a20   :  { %v4165_v42 = vpop.xlane.xlu1 %4164 }
0x1a21   :  { %8231 = vrsqrt.f32 %v4214_v41  ;;  %v4215_v54 = vadd.f32 1e-06, %v4211_v10  ;;  %v4166_v58 = vmul.f32 0.015625, %v4165_v42 }
0x1a23   :  { %v8228_v60 = vpop.eup %8227  ;;  %8233 = vrsqrt.f32 %v4215_v54  ;;  %v4167_v25 = vadd.f32 1e-06, %v4166_v58 }
0x1a24   :  { %v4220_v19 = vmul.f32 %v8228_v60, %v9729_v39 }
0x1a25   :  { %v8230_v27 = vpop.eup %8229  ;;  %8235 = vrsqrt.f32 %v4167_v25 }
0x1a26   :  { %v4221_v23 = vmul.f32 %v8230_v27, %v9731_v51  ;;  %v4224_v61 = vmul.f32 %v4220_v19, %v4154_v18  ;;  %v5403_v30 = vmul.f32 %v5386_v11, %v4220_v19  ;;  %v6565_v37 = vmul.f32 %v6563_v31, %v4220_v19 }
0x1a28   :  { %v4225_v52 = vmul.f32 %v4221_v23, %v4154_v18  ;;  %v5404_v39 = vmul.f32 %v5386_v11, %v4221_v23  ;;  %v6566_v26 = vmul.f32 %v6563_v31, %v4221_v23  ;;  %v6569_v49 = vadd.f32 %v6565_v37, %v6564_v36 }
0x1a29   :  { %v4228_v51 = vadd.f32 %v4224_v61, %v4155_v43  ;;  %v9820_v9 = vadd.f32 %v5403_v30, %v5387_v20 }
0x1a2a   :  { %v4229_v44 = vadd.f32 %v4225_v52, %v4155_v43  ;;  %v9822_v45 = vadd.f32 %v5404_v39, %v5387_v20  ;;  %v6570_v5 = vadd.f32 %v6566_v26, %v6564_v36  ;;  %6573 = vst.msk [vmem:[#allocation2] sm:$0xff] %vm128_vm0, %v6569_v49 }
0x1a2b   :  { %v8232_v47 = vpop.eup %8231 }
0x1a2c   :  { %v4222_v29 = vmul.f32 %v8232_v47, %v9739_v2  ;;  %v4382_v46 = vpack.c.bf16 %v4229_v44, %v4228_v51  ;;  %v5561_v32 = vpack.c.bf16 %v9822_v45, %v9820_v9  ;;  %6574 = vst.msk [vmem:[#allocation2 + $0x8] sm:$0xff] %vm128_vm0, %v6570_v5  ;;  %v5246_v45 = vld [vmem:[%s10591_s2 + $0x4c0] ss:$0 sm:$0xff] }
0x1a2d   :  { %v8234_v14 = vpop.eup %8233 }
0x1a2e   :  { %v4226_v21 = vmul.f32 %v4222_v29, %v4154_v18  ;;  %v4223_v24 = vmul.f32 %v8234_v14, %v9741_v62  ;;  %7531 = vmatprep.mubr.msk.bf16.mxu0 %vm128_vm0, %v4382_v46  ;;  %v5405_v16 = vmul.f32 %v5386_v11, %v4222_v29  ;;  %v6567_v7 = vmul.f32 %v6563_v31, %v4222_v29  ;;  %v9909_v46 = vld [vmem:[%s10591_s2 + $0xe0] sm:$0x3] }
0x1a2f   :  { %v8236_v15 = vpop.eup %8235 }
0x1a30   :  { %v4227_v57 = vmul.f32 %v4223_v24, %v4154_v18  ;;  %v4169_v38 = vmul.f32 %v8236_v15, %v9746_v48  ;;  %v5406_v12 = vmul.f32 %v5386_v11, %v4223_v24  ;;  %v4230_v2 = vadd.f32 %v4226_v21, %v4155_v43 }
0x1a31   :  { %v6568_v8 = vmul.f32 %v6563_v31, %v4223_v24  ;;  %v6571_v63 = vadd.f32 %v6567_v7, %v6564_v36  ;;  %v9832_v59 = vadd.f32 %v5405_v16, %v5387_v20 }
0x1a32   :  { %v4170_v56 = vmul.f32 %v4169_v38, %v4154_v18  ;;  %v4231_v40 = vadd.f32 %v4227_v57, %v4155_v43  ;;  %v9834_v33 = vadd.f32 %v5406_v12, %v5387_v20 }
0x1a33   :  { %v6572_v35 = vadd.f32 %v6568_v8, %v6564_v36  ;;  %6575 = vst.msk [vmem:[#allocation2 + $0x10] sm:$0xff] %vm128_vm0, %v6571_v63 }
0x1a34   :  { %v4383_v62 = vpack.c.bf16 %v4231_v40, %v4230_v2  ;;  %v4171_v28 = vadd.f32 %v4170_v56, %v4155_v43  ;;  %v5562_v13 = vpack.c.bf16 %v9834_v33, %v9832_v59 }
0x1a35   :  { %6576 = vst.msk [vmem:[#allocation2 + $0x18] sm:$0xff] %vm128_vm0, %v6572_v35 }
0x1a36   :  { %7532 = vmatmul.mubr.msk.bf16.vlgmr.msra.gmra.mrb[96].mxu0 %vm128_vm0, %v4383_v62  ;;  %v4240_v48 = vpack.c.bf16 %v4171_v28, %v4171_v28 }
0x1a37   :  { %7547 = vmatprep.mubr.msk.bf16.mxu0 %vm8368_vm2, %v8364_v22 }
0x1a38   :  { %7508 = vmatmul.mubr.msk.bf16.vlgmr.msra.gmra.mrb[128].mxu1 %vm128_vm0, %v4240_v48 }
0x1a39   :  { %7512 = vmatpush3.bf16.msra.mxu1 %v9758_v3  ;;  %7519 = vmatprep.mubr.msk.bf16.mxu1 %vm8368_vm2, %v8364_v22 }
0x1a3a   :  { %7513 = vmatprep.subr.bf16.mxu1 %v8364_v22 }
0x1a3d   :  { %7514 = vmatpush3.bf16.msra.mxu1 %v9768_v50  ;;  %v4317_v50 = vld [vmem:[%s10591_s2 + $0x460] ss:$0 sm:$0xff] }
0x1a3e   :  { %7515 = vmatprep.subr.bf16.mxu1 %v8364_v22 }
0x1a41   :  { %7516 = vmatpush3.bf16.msra.mxu1 %v9779_v34  ;;  %v4241_v34 = vld [vmem:[%s10591_s2 + $0x450] ss:$0 sm:$0xff] }
0x1a42   :  { %7517 = vmatprep.subr.bf16.mxu1 %v8364_v22 }
0x1a45   :  { %7518 = vmatpush3.bf16.msra.mxu1 %v9790_v17 }
0x1a46   :  { %7535 = vmatprep.subr.bf16.mxu1 %v8364_v22 }
0x1a48   :  { %7520 = vmatmul.mubr.msk.bf16.vlgmr.msra.gmra.mrb[132].mxu1 %vm128_vm0, %v4240_v48 }
0x1a49   :  { %7539 = vmatprep.mubr.msk.bf16.mxu1 %vm8368_vm2, %v8364_v22 }
0x1b09   :  { %v7533_v3 = vpop.f32.mrb[96].mxu0 }
0x1b0a   :  { %v4424_v1 = vpop.f32.mrb[97].mxu0  ;;  %v4433_v17 = vadd.f32 %v7533_v3, %v4317_v50 }
0x1b0b   :  { %v4303_v6 = vpop.f32.mrb[128].mxu1  ;;  %v7534_v41 = vpop.f32.mrb[98].mxu0  ;;  %v4425_v58 = vadd.f32 %v4424_v1, %v4317_v50 }
0x1b0c   :  { %v4436_v10 = vadd.f32 %v7534_v41, %v4317_v50  ;;  %v7509_v42 = vpop.f32.mrb[129].mxu1  ;;  %v4427_v54 = vpop.f32.mrb[99].mxu0  ;;  %v4304_v25 = vadd.f32 %v4303_v6, %v4241_v34 }
0x1b0d   :  { %v4428_v18 = vadd.f32 %v4427_v54, %v4317_v50  ;;  %v4306_v60 = vpop.f32.mrb[130].mxu1 }
0x1b0e   :  { %v9863_v11 = vpack.c.bf16 %v4436_v10, %v4433_v17  ;;  %v7510_v31 = vpop.f32.mrb[131].mxu1  ;;  %v9873_v23 = vpack.c.bf16 %v4304_v25, %v4304_v25 }
0x1b0f   :  { %v9865_v19 = vpack.c.bf16 %v4428_v18, %v4425_v58 }
0x1b10   :  { %4583 = vrot.lane.b32.xlu1 %v9863_v11, %s8366_s14  ;;  %v4454_v61 = vsel %vm747_vm1, %v9863_v11, 0 }
0x1b11   :  { %4581 = vrot.lane.b32.xlu0 %v9865_v19, %s8366_s14  ;;  %v4451_v27 = vsel %vm747_vm1, %v9865_v19, 0 }
0x1b12   :  { %7536 = vmatpush3.bf16.xpose.msra.mxu1 %v4451_v27 }
0x1b13   :  { %7537 = vmatprep.subr.bf16.mxu1 %v8364_v22 }
0x1b14   :  { %4579 = vrot.lane.b32.xlu1 %v9873_v23, %s8366_s14 }
0x1b1a   :  { %7538 = vmatpush3.bf16.xpose.msra.mxu1 %v4454_v61 }
0x1b1b   :  { %v4376_v30 = vpop.f32.mrb[132].mxu1  ;;  %7551 = vmatprep.subr.bf16.mxu1 %v8364_v22 }
0x1b1c   :  { %v9881_v36 = vadd.f32 %v4376_v30, %v4317_v50  ;;  %v7521_v37 = vpop.f32.mrb[133].mxu1 }
0x1b1d   :  { %v4379_v43 = vpop.f32.mrb[134].mxu1 }
0x1b1e   :  { %v7522_v20 = vpop.f32.mrb[135].mxu1  ;;  %v9884_v52 = vmul.f32 %v9881_v36, %v4304_v25 }
0x1b20   :  { %4572 = vrot.lane.b32.xlu0 %v9884_v52, %s8366_s14  ;;  %v4441_v39 = vsel %vm4440_vm6, %v9884_v52, 0.0 }
0x1b21   :  { %7540 = vmatmul.mubr.msk.bf16.vlgmr.msra.gmra.mrb[136].mxu1 %vm747_vm1, %v9873_v23 }
0x1b22   :  { %7555 = vmatprep.mubr.msk.bf16.mxu1 %vm8368_vm2, %v8364_v22 }
0x1b38   :  { %4442 = vadd.xlane.f32.xlu1 %v4441_v39 }
0x1b49   :  { %4518 = vrot.lane.b32.xlu1 %v9863_v11, %s8363_s23 }
0x1b4d   :  { %4651 = vrot.lane.b32.xlu1 %v9865_v19, %s8370_s22 }
0x1b82   :  { %v4584_v51 = vpop.permute.xlu1 %4583 }
0x1b83   :  { %v4582_v26 = vpop.permute.xlu0 %4581  ;;  %v4592_v44 = vsel %vm747_vm1, %v4584_v51, 0 }
0x1b84   :  { %v4589_v49 = vsel %vm747_vm1, %v4582_v26, 0 }
0x1b85   :  { %7552 = vmatpush3.bf16.xpose.msra.mxu1 %v4589_v49 }
0x1b86   :  { %7553 = vmatprep.subr.bf16.mxu1 %v8364_v22  ;;  %v4580_v5 = vpop.permute.xlu1 %4579 }
0x1b8d   :  { %7554 = vmatpush3.bf16.xpose.msra.mxu1 %v4592_v44 }
0x1b8e   :  { %7575 = vmatprep.subr.bf16.mxu1 %v8364_v22 }
0x1b92   :  { %v4573_v47 = vpop.permute.xlu0 %4572 }
0x1b93   :  { %v4575_v29 = vsel %vm4440_vm6, %v4573_v47, 0.0 }
0x1b94   :  { %4576 = vadd.xlane.f32.xlu0 %v4575_v29  ;;  %7556 = vmatmul.mubr.msk.bf16.vlgmr.msra.gmra.mrb[140].mxu1 %vm747_vm1, %v4580_v5 }
0x1b95   :  { %7579 = vmatprep.mubr.msk.bf16.mxu1 %vm8368_vm2, %v8364_v22 }
0x1bc5   :  { %v9929_v40 = vpop.xlane.xlu1 %4442 }
0x1bc9   :  { %v4519_v50 = vpop.permute.xlu1 %4518 }
0x1bcd   :  { %v4652_v41 = vpop.permute.xlu1 %4651 }
0x1bf4   :  { %v4490_v14 = vpop.f32.mrb[136].mxu1 }
0x1bf5   :  { %v4491_v21 = vadd.f32 %v4490_v14, %v9909_v46  ;;  %v7541_v24 = vpop.f32.mrb[137].mxu1 }
0x1bf6   :  { %v4493_v16 = vpop.f32.mrb[138].mxu1 }
0x1bf7   :  { %v7542_v7 = vpop.f32.mrb[139].mxu1  ;;  %v4497_v15 = vsel %vm4496_vm7, %v4491_v21, -inf }
0x1bf8   :  { %4498 = vmax.xlane.f32.xlu0 %v4497_v15 }
0x1c0e   :  { %4516 = vrot.lane.b32.xlu0 %v9865_v19, %s8363_s23 }
0x1c12   :  { %4653 = vrot.lane.b32.xlu0 %v9863_v11, %s8370_s22 }
0x1c16   :  { %4716 = vrot.lane.b32.xlu0 %v9863_v11, %s8365_s26 }
0x1c1a   :  { %4706 = vrot.lane.b32.xlu0 %v9884_v52, %s8365_s26 }
0x1c21   :  { %v9927_v56 = vpop.xlane.xlu0 %4576 }
0x1c67   :  { %v4628_v57 = vpop.f32.mrb[140].mxu1 }
0x1c68   :  { %v4629_v38 = vadd.f32 %v4628_v57, %v9909_v46  ;;  %v7557_v12 = vpop.f32.mrb[141].mxu1 }
0x1c69   :  { %v4631_v2 = vpop.f32.mrb[142].mxu1 }
0x1c6a   :  { %v7558_v8 = vpop.f32.mrb[143].mxu1  ;;  %v4634_v63 = vsel %vm4496_vm7, %v4629_v38, -inf }
0x1c6b   :  { %4635 = vmax.xlane.f32.xlu1 %v4634_v63 }
0x1c7c   :  { %4714 = vrot.lane.b32.xlu1 %v9865_v19, %s8365_s26 }
0x1c80   :  { %4712 = vrot.lane.b32.xlu1 %v9873_v23, %s8365_s26 }
0x1c85   :  { %v4499_v35 = vpop.xlane.xlu0 %4498 }
0x1c86   :  { %v9932_v62 = vmax.f32 %v9929_v40, %v4499_v35 }
0x1c88   :  { %v4504_v28 = vsub.f32 %v4491_v21, %v9932_v62 }
0x1c89   :  { %v4517_v48 = vpop.permute.xlu0 %4516 }
0x1c8a   :  { %v4505_v3 = vmul.f32 1.442695, %v4504_v28  ;;  %7544 = vmatpush3.bf16.msra.mxu0 %v4517_v48 }
0x1c8b   :  { %7545 = vmatprep.subr.bf16.mxu0 %v8364_v22 }
0x1c8c   :  { %8237 = vpow2.f32 %v4505_v3 }
0x1c8d   :  { %v4654_v1 = vpop.permute.xlu0 %4653 }
0x1c8e   :  { %7546 = vmatpush3.bf16.msra.mxu0 %v4519_v50 }
0x1c8f   :  { %7559 = vmatprep.subr.bf16.mxu0 %v8364_v22 }
0x1c91   :  { %v4717_v17 = vpop.permute.xlu0 %4716 }
0x1c95   :  { %v4707_v10 = vpop.permute.xlu0 %4706 }
0x1c96   :  { %v9937_v34 = vpop.eup %8237  ;;  %v4709_v42 = vsel %vm4440_vm6, %v4707_v10, 0.0 }
0x1c97   :  { %v4513_v6 = vpack.c.bf16 %v9937_v34, %v9937_v34 }
0x1c99   :  { %7548 = vmatmul.mubr.msk.bf16.vlgmr.msra.gmra.mrb[100].mxu0 %vm1406_vm3, %v4513_v6  ;;  %v4507_v6 = vsel %vm4496_vm7, %v9937_v34, 0.0 }
0x1c9a   :  { %7560 = vmatpush3.bf16.msra.mxu0 %v4652_v41  ;;  %7563 = vmatprep.mubr.msk.bf16.mxu0 %vm8368_vm2, %v8364_v22 }
0x1c9b   :  { %7561 = vmatprep.subr.bf16.mxu0 %v8364_v22 }
0x1c9e   :  { %7562 = vmatpush3.bf16.msra.mxu0 %v4654_v1 }
0x1c9f   :  { %7567 = vmatprep.subr.bf16.mxu0 %v8364_v22 }
0x1ca4   :  { %4710 = vadd.xlane.f32.xlu1 %v4709_v42 }
0x1cb5   :  { %4786 = vrot.lane.b32.xlu1 %v9863_v11, %s8371_s24 }
0x1cb9   :  { %4847 = vrot.lane.b32.xlu1 %v9865_v19, %s8367_s17 }
0x1cbd   :  { %4845 = vrot.lane.b32.xlu1 %v9873_v23, %s8367_s17  ;;  %v4725_v23 = vsel %vm747_vm1, %v4717_v17, 0 }
0x1cf8   :  { %v4636_v54 = vpop.xlane.xlu1 %4635 }
0x1cf9   :  { %v9954_v58 = vmax.f32 %v9927_v56, %v4636_v54 }
0x1cfb   :  { %v4641_v18 = vsub.f32 %v4629_v38, %v9954_v58 }
0x1cfc   :  { %v4715_v31 = vpop.permute.xlu1 %4714 }
0x1cfd   :  { %v4642_v60 = vmul.f32 1.442695, %v4641_v18  ;;  %v4722_v61 = vsel %vm747_vm1, %v4715_v31, 0 }
0x1cff   :  { %8239 = vpow2.f32 %v4642_v60 }
0x1d00   :  { %v4713_v30 = vpop.permute.xlu1 %4712 }
0x1d09   :  { %v9957_v25 = vpop.eup %8239 }
0x1d0a   :  { %v4650_v27 = vpack.c.bf16 %v9957_v25, %v9957_v25  ;;  %v4644_v34 = vsel %vm4496_vm7, %v9957_v25, 0.0 }
0x1d0c   :  { %7564 = vmatmul.mubr.msk.bf16.vlgmr.msra.gmra.mrb[104].mxu0 %vm1406_vm3, %v4650_v27 }
0x1d0d   :  { %7568 = vmatpush3.bf16.xpose.msra.mxu0 %v4722_v61  ;;  %7571 = vmatprep.mubr.msk.bf16.mxu0 %vm8368_vm2, %v8364_v22 }
0x1d0e   :  { %7569 = vmatprep.subr.bf16.mxu0 %v8364_v22 }
0x1d15   :  { %7570 = vmatpush3.bf16.xpose.msra.mxu0 %v4725_v23 }
0x1d16   :  { %7591 = vmatprep.subr.bf16.mxu0 %v8364_v22 }
0x1d1c   :  { %7572 = vmatmul.mubr.msk.bf16.vlgmr.msra.gmra.mrb[108].mxu0 %vm747_vm1, %v4713_v30 }
0x1d1d   :  { %7595 = vmatprep.mubr.msk.bf16.mxu0 %vm8368_vm2, %v8364_v22 }
0x1d31   :  { %v9981_v16 = vpop.xlane.xlu1 %4710 }
0x1d35   :  { %v4787_v2 = vpop.permute.xlu1 %4786 }
0x1d39   :  { %v4848_v28 = vpop.permute.xlu1 %4847 }
0x1d3a   :  { %v4855_v3 = vsel %vm747_vm1, %v4848_v28, 0 }
0x1d3d   :  { %v4846_v1 = vpop.permute.xlu1 %4845 }
0x1d6c   :  { %v9971_v37 = vpop.f32.mrb[100].mxu0 }
0x1d6d   :  { %v7549_v43 = vpop.f32.mrb[101].mxu0 }
0x1d6e   :  { %v4562_v20 = vpop.f32.mrb[102].mxu0 }
0x1d6f   :  { %v7550_v39 = vpop.f32.mrb[103].mxu0 }
0x1ddf   :  { %v4694_v26 = vpop.f32.mrb[104].mxu0 }
0x1de0   :  { %v7565_v49 = vpop.f32.mrb[105].mxu0 }
0x1de1   :  { %v4697_v51 = vpop.f32.mrb[106].mxu0 }
0x1de2   :  { %v7566_v44 = vpop.f32.mrb[107].mxu0  ;;  %v4501_v51 = vsub.f32 %v9929_v40, %v9932_v62 }
0x1de3   :  { %v4638_v44 = vsub.f32 %v9927_v56, %v9954_v58 }
0x1def   :  { %v4761_v47 = vpop.f32.mrb[108].mxu0 }
0x1df0   :  { %v4762_v5 = vadd.f32 %v4761_v47, %v9909_v46  ;;  %v7573_v29 = vpop.f32.mrb[109].mxu0  ;;  %v4502_v47 = vmul.f32 1.442695, %v4501_v51 }
0x1df1   :  { %v4764_v14 = vpop.f32.mrb[110].mxu0 }
0x1df2   :  { %v7574_v21 = vpop.f32.mrb[111].mxu0  ;;  %v4767_v24 = vsel %vm4496_vm7, %v4762_v5, -inf }
0x1df3   :  { %4768 = vmax.xlane.f32.xlu0 %v4767_v24 }
0x1e09   :  { %4784 = vrot.lane.b32.xlu0 %v9865_v19, %s8371_s24 }
0x1e0d   :  { %4849 = vrot.lane.b32.xlu0 %v9863_v11, %s8367_s17 }
0x1e11   :  { %4839 = vrot.lane.b32.xlu0 %v9884_v52, %s8367_s17 }
0x1e80   :  { %v4769_v7 = vpop.xlane.xlu0 %4768 }
0x1e81   :  { %v9984_v15 = vmax.f32 %v9981_v16, %v4769_v7 }
0x1e83   :  { %v4774_v57 = vsub.f32 %v4762_v5, %v9984_v15  ;;  %v4639_v5 = vmul.f32 1.442695, %v4638_v44  ;;  %v4771_v29 = vsub.f32 %v9981_v16, %v9984_v15 }
0x1e84   :  { %v4785_v38 = vpop.permute.xlu0 %4784 }
0x1e85   :  { %v4775_v12 = vmul.f32 1.442695, %v4774_v57  ;;  %7576 = vmatpush3.bf16.msra.mxu1 %v4785_v38  ;;  %v4772_v14 = vmul.f32 1.442695, %v4771_v29 }
0x1e86   :  { %7577 = vmatprep.subr.bf16.mxu1 %v8364_v22 }
0x1e87   :  { %8241 = vpow2.f32 %v4775_v12 }
0x1e88   :  { %v4850_v8 = vpop.permute.xlu0 %4849 }
0x1e89   :  { %7578 = vmatpush3.bf16.msra.mxu1 %v4787_v2  ;;  %v4858_v50 = vsel %vm747_vm1, %v4850_v8, 0 }
0x1e8a   :  { %7583 = vmatprep.subr.bf16.mxu1 %v8364_v22 }
0x1e8c   :  { %v4840_v52 = vpop.permute.xlu0 %4839 }
0x1e8d   :  { %v4842_v63 = vsel %vm4440_vm6, %v4840_v52, 0.0 }
0x1e8e   :  { %4843 = vadd.xlane.f32.xlu1 %v4842_v63 }
0x1e91   :  { %v8242_v35 = vpop.eup %8241 }
0x1e92   :  { %v4783_v48 = vpack.c.bf16 %v8242_v35, %v8242_v35  ;;  %v4777_v61 = vsel %vm4496_vm7, %v8242_v35, 0.0 }
0x1e94   :  { %7580 = vmatmul.mubr.msk.bf16.vlgmr.msra.gmra.mrb[144].mxu1 %vm1406_vm3, %v4783_v48 }
0x1e95   :  { %7584 = vmatpush3.bf16.xpose.msra.mxu1 %v4855_v3  ;;  %7587 = vmatprep.mubr.msk.bf16.mxu1 %vm8368_vm2, %v8364_v22 }
0x1e96   :  { %7585 = vmatprep.subr.bf16.mxu1 %v8364_v22 }
0x1e9d   :  { %7586 = vmatpush3.bf16.xpose.msra.mxu1 %v4858_v50 }
0x1e9f   :  { %4919 = vrot.lane.b32.xlu1 %v9863_v11, %s8369_s13 }
0x1ea4   :  { %7588 = vmatmul.mubr.msk.bf16.vlgmr.msra.gmra.mrb[148].mxu1 %vm747_vm1, %v4846_v1 }
0x1ea5   :  { %5185 = vmatprep.mubr.bf16.mxu1 %v8362_v0 }
0x1ec3   :  { %4508 = vadd.xlane.f32.xlu1 %v4507_v6 }
0x1ed4   :  { %4701 = vrot.lane.b32.xlu1 %v4694_v26, %s8367_s17 }
0x1f1b   :  { %v10012_v23 = vpop.xlane.xlu1 %4843 }
0x1f1f   :  { %v4920_v25 = vpop.permute.xlu1 %4919 }
0x1f50   :  { %v4509_v21 = vpop.xlane.xlu1 %4508 }
0x1f54   :  { %v4702_v8 = vpop.permute.xlu1 %4701 }
0x1f67   :  { %v4827_v41 = vpop.f32.mrb[144].mxu1 }
0x1f68   :  { %v7581_v17 = vpop.f32.mrb[145].mxu1 }
0x1f69   :  { %v4830_v10 = vpop.f32.mrb[146].mxu1 }
0x1f6a   :  { %v7582_v42 = vpop.f32.mrb[147].mxu1 }
0x1f6b   :  { %v7963_v42 = vld [vmem:[%s10590_s1 + $0x6c0] ss:$8 sps:$4 sm:$0xff]  }
0x1f77   :  { %v4894_v54 = vpop.f32.mrb[148].mxu1 }
0x1f78   :  { %v4895_v18 = vadd.f32 %v4894_v54, %v9909_v46  ;;  %v7589_v60 = vpop.f32.mrb[149].mxu1  ;;  %v7964_v54 = vld [vmem:[%s10590_s1 + $0x6d0] ss:$8 sps:$4 sm:$0xff]  }
0x1f79   :  { %v4897_v11 = vpop.f32.mrb[150].mxu1  ;;  %v7965_v60 = vld [vmem:[%s10590_s1 + $0x6e0] ss:$8 sps:$4 sm:$0xff]  }
0x1f7a   :  { %v7590_v31 = vpop.f32.mrb[151].mxu1  ;;  %v4900_v27 = vsel %vm4496_vm7, %v4895_v18, -inf }
0x1f7b   :  { %4901 = vmax.xlane.f32.xlu0 %v4900_v27 }
0x1f91   :  { %4917 = vrot.lane.b32.xlu0 %v9865_v19, %s8369_s13 }
0x1fb0   :  { %4645 = vadd.xlane.f32.xlu0 %v4644_v34 }
0x1fb4   :  { %4778 = vadd.xlane.f32.xlu0 %v4777_v61 }
0x1fca   :  { %4566 = vrot.lane.b32.xlu0 %v9971_v37, %s8363_s23 }
0x2008   :  { %v4902_v30 = vpop.xlane.xlu0 %4901 }
0x2009   :  { %v10015_v43 = vmax.f32 %v10012_v23, %v4902_v30 }
0x200b   :  { %v4907_v20 = vsub.f32 %v4895_v18, %v10015_v43  ;;  %v4904_v34 = vsub.f32 %v10012_v23, %v10015_v43 }
0x200c   :  { %v4918_v39 = vpop.permute.xlu0 %4917 }
0x200d   :  { %v4908_v19 = vmul.f32 1.442695, %v4907_v20  ;;  %7592 = vmatpush3.bf16.msra.mxu0 %v4918_v39  ;;  %v4905_v61 = vmul.f32 1.442695, %v4904_v34  ;;  %v7966_v39 = vld [vmem:[%s10590_s1 + $0x6f0] ss:$8 sps:$4 sm:$0xff]  }
0x200e   :  { %7593 = vmatprep.subr.bf16.mxu0 %v8364_v22 }
0x200f   :  { %8243 = vpow2.f32 %v4908_v19 }
0x2010   :  { %8245 = vpow2.f32 %v4502_v47 }
0x2011   :  { %7594 = vmatpush3.bf16.msra.mxu0 %v4920_v25  ;;  %8247 = vpow2.f32 %v4639_v5 }
0x2012   :  { %7599 = vmatprep.subr.bf16.mxu0 %v8364_v22  ;;  %8249 = vpow2.f32 %v4772_v14 }
0x2019   :  { %v8244_v26 = vpop.eup %8243 }
0x201a   :  { %v4910_v37 = vsel %vm4496_vm7, %v8244_v26, 0.0  ;;  %v4916_v49 = vpack.c.bf16 %v8244_v26, %v8244_v26  ;;  %v8246_v24 = vpop.eup %8245 }
0x201b   :  { %4911 = vadd.xlane.f32.xlu1 %v4910_v37  ;;  %v4510_v7 = vadd.f32 %v8246_v24, %v4509_v21  ;;  %v8248_v57 = vpop.eup %8247  ;;  %v4512_v12 = vmul.f32 %v8246_v24, %v9881_v36 }
0x201c   :  { %7596 = vmatmul.mubr.msk.bf16.vlgmr.msra.gmra.mrb[112].mxu0 %vm1406_vm3, %v4916_v49  ;;  %v8250_v56 = vpop.eup %8249  ;;  %v4649_v16 = vmul.f32 %v8248_v57, %v9881_v36 }
0x201d   :  { %7607 = vmatprep.mubr.msk.bf16.mxu0 %vm8368_vm2, %v8364_v22  ;;  %8251 = vrcp.f32 %v4510_v7  ;;  %v4782_v1 = vmul.f32 %v8250_v56, %v9881_v36  ;;  %7600 = vmatpush3.bf16.msra.mxu0 %v7963_v42  ;;  %v5001_v7 = vld [vmem:[%s10591_s2 + $0x470] ss:$0 sm:$0xff] }
0x201e   :  { %v4704_v63 = vadd.f32 %v4702_v8, %v4649_v16  ;;  %7601 = vmatprep.subr.bf16.mxu0 %v8364_v22 }
0x2021   :  { %7602 = vmatpush3.bf16.msra.mxu0 %v7964_v54 }
0x2022   :  { %7603 = vmatprep.subr.bf16.mxu0 %v8364_v22 }
0x2025   :  { %7604 = vmatpush3.bf16.msra.mxu0 %v7965_v60 }
0x2026   :  { %7605 = vmatprep.subr.bf16.mxu0 %v8364_v22 }
0x2027   :  { %v8252_v52 = vpop.eup %8251 }
0x2029   :  { %7606 = vmatpush3.bf16.msra.mxu0 %v7966_v39  ;;  %v7982_v39 = vld [vmem:[%s10590_s1 + $0x750] ss:$8 sps:$4 sm:$0xff]  }
0x202c   :  { %4834 = vrot.lane.b32.xlu1 %v4827_v41, %s8365_s26 }
0x203d   :  { %v4646_v38 = vpop.xlane.xlu0 %4645 }
0x203e   :  { %v4647_v40 = vadd.f32 %v8248_v57, %v4646_v38  ;;  %v4991_v57 = vld [vmem:[%s10591_s2 + $0x480] ss:$0 sm:$0xff] }
0x2040   :  { %8253 = vrcp.f32 %v4647_v40 }
0x2041   :  { %v4779_v62 = vpop.xlane.xlu0 %4778 }
0x2042   :  { %v4780_v58 = vadd.f32 %v8250_v56, %v4779_v62 }
0x2044   :  { %8255 = vrcp.f32 %v4780_v58 }
0x2045   :  { %v4567_v2 = vpop.permute.xlu0 %4566  ;;  %8257 = vpow2.f32 %v4905_v61  ;;  %v7979_v61 = vld [vmem:[%s10590_s1 + $0x7c0] ss:$8 sps:$4 sm:$0xff]  }
0x2046   :  { %v4569_v15 = vadd.f32 %v4567_v2, %v4512_v12  ;;  %7122 = vmatprep.subr.bf16.mxu0 %v7979_v61 }
0x2048   :  { %v4570_v28 = vmul.f32 %v8252_v52, %v4569_v15 }
0x204a   :  { %v8254_v35 = vpop.eup %8253 }
0x204b   :  { %v4705_v48 = vmul.f32 %v8254_v35, %v4704_v63 }
0x204d   :  { %v7803_v3 = vpack.i.bf16 %v4705_v48, %v4570_v28  ;;  %v7969_v28 = vld [vmem:[%s10590_s1 + $0x704] ss:$8 sps:$4 sm:$0xff]   ;;  %v7972_v48 = vld [vmem:[%s10590_s1 + $0x714] ss:$8 sps:$4 sm:$0xff]  }
0x204e   :  { %v8256_v17 = vpop.eup %8255  ;;  %5153 = vmatprep.subr.bf16.mxu1 %v7969_v28 }
0x204f   :  { %7804 = vrot.lane.b32.xlu1 %v7803_v3, %s8363_s23  ;;  %v8258_v30 = vpop.eup %8257  ;;  %v7970_v3 = vld [vmem:[%s10590_s1 + $0x710] ss:$8 sps:$4 sm:$0xff]  }
0x2050   :  { %v4915_v19 = vmul.f32 %v8258_v30, %v9881_v36 }
0x20a8   :  { %v4912_v50 = vpop.xlane.xlu1 %4911 }
0x20a9   :  { %v4913_v20 = vadd.f32 %v8258_v30, %v4912_v50  ;;  %v7975_v50 = vld [vmem:[%s10590_s1 + $0x724] ss:$8 sps:$4 sm:$0xff]   ;;  %v7980_v30 = vld [vmem:[%s10590_s1 + $0x740] ss:$8 sps:$4 sm:$0xff]  }
0x20ab   :  { %8259 = vrcp.f32 %v4913_v20  ;;  %v7981_v20 = vld [vmem:[%s10590_s1 + $0x7d0] ss:$8 sps:$4 sm:$0xff]  }
0x20ac   :  { %v4835_v6 = vpop.permute.xlu1 %4834 }
0x20ad   :  { %v4837_v41 = vadd.f32 %v4835_v6, %v4782_v1  ;;  %v7973_v1 = vld [vmem:[%s10590_s1 + $0x720] ss:$8 sps:$4 sm:$0xff]   ;;  %v7978_v6 = vld [vmem:[%s10590_s1 + $0x734] ss:$8 sps:$4 sm:$0xff]  }
0x20af   :  { %v4838_v10 = vmul.f32 %v8256_v17, %v4837_v41  ;;  %v7976_v41 = vld [vmem:[%s10590_s1 + $0x730] ss:$8 sps:$4 sm:$0xff]  }
0x20b5   :  { %v8260_v37 = vpop.eup %8259 }
0x20c1   :  { %v7805_v23 = vpop.permute.xlu1 %7804 }
0x20c2   :  { %v7807_v43 = vunpack.i.h.bf16 %v7805_v23  ;;  %v7806_v44 = vunpack.i.l.bf16 %v7805_v23  ;;  %v7989_v23 = vld [vmem:[%s10590_s1 + $0x810] ss:$8 sps:$4 sm:$0xff]  }
0x20c4   :  { %v4988_v14 = vsel %vm747_vm1, %v7806_v44, %v7807_v43  ;;  %v7990_v43 = vld [vmem:[%s10590_s1 + $0x790] ss:$8 sps:$4 sm:$0xff]   ;;  %v7991_v44 = vld [vmem:[%s10590_s1 + $0x820] ss:$8 sps:$4 sm:$0xff]  }
0x20ef   :  { %v4960_v18 = vpop.f32.mrb[112].mxu0 }
0x20f0   :  { %4967 = vrot.lane.b32.xlu0 %v4960_v18, %s8366_s14  ;;  %v7597_v11 = vpop.f32.mrb[113].mxu0  ;;  %v5071_v18 = vld [vmem:[%s10591_s2 + $0x490] ss:$0 sm:$0xff] }
0x20f1   :  { %v4963_v31 = vpop.f32.mrb[114].mxu0  ;;  %v5072_v11 = vld [vmem:[%s10591_s2 + $0x4a0] ss:$0 sm:$0xff] }
0x20f2   :  { %v7598_v27 = vpop.f32.mrb[115].mxu0 }
0x2162   :  { %v4968_v25 = vpop.permute.xlu0 %4967 }
0x2163   :  { %v4970_v26 = vadd.f32 %v4968_v25, %v4915_v19  ;;  %v7983_v19 = vld [vmem:[%s10590_s1 + $0x7e0] ss:$8 sps:$4 sm:$0xff]  }
0x2164   :  { %v7984_v25 = vld [vmem:[%s10590_s1 + $0x760] ss:$8 sps:$4 sm:$0xff]  }
0x2165   :  { %v4971_v49 = vmul.f32 %v8260_v37, %v4970_v26  ;;  %v7985_v26 = vld [vmem:[%s10590_s1 + $0x7f0] ss:$8 sps:$4 sm:$0xff]  }
0x2166   :  { %v7986_v37 = vld [vmem:[%s10590_s1 + $0x770] ss:$8 sps:$4 sm:$0xff]  }
0x2167   :  { %v7808_v51 = vpack.i.bf16 %v4971_v49, %v4838_v10  ;;  %v7987_v49 = vld [vmem:[%s10590_s1 + $0x800] ss:$8 sps:$4 sm:$0xff]  }
0x2169   :  { %7809 = vrot.lane.b32.xlu0 %v7808_v51, %s8363_s23  ;;  %v7988_v51 = vld [vmem:[%s10590_s1 + $0x780] ss:$8 sps:$4 sm:$0xff]  }
0x21db   :  { %v7810_v47 = vpop.permute.xlu0 %7809 }
0x21dc   :  { %v7812_v5 = vunpack.i.h.bf16 %v7810_v47  ;;  %v7811_v29 = vunpack.i.l.bf16 %v7810_v47  ;;  %v7992_v47 = vld [vmem:[%s10590_s1 + $0x7a0] ss:$8 sps:$4 sm:$0xff]  }
0x21de   :  { %v4989_v21 = vsel %vm1406_vm3, %v4988_v14, %v7811_v29  ;;  %v7994_v29 = vld [vmem:[%s10590_s1 + $0x7b0] ss:$8 sps:$4 sm:$0xff]   ;;  %v10157_v14 = vld [vmem:[%s10590_s1 + $0x880] ss:$8 sps:$4 sm:$0xff]  }
0x21df   :  { %v4990_v24 = vsel %vm1409_vm4, %v4989_v21, %v7812_v5  ;;  %v7993_v5 = vld [vmem:[%s10590_s1 + $0x830] ss:$8 sps:$4 sm:$0xff]  }
0x21e0   :  { %v5000_v36 = vpack.c.bf16 %v4990_v24, %v4990_v24  ;;  %v6816_v21 = vld [vmem:[%s10591_s2 + $0x4b0] ss:$8 sm:$0x3] }
0x21e1   :  { %v5103_v24 = vrot.slane %v6816_v21, %v8550_v53 }
0x21e2   :  { %7608 = vmatmul.mubr.msk.bf16.vlgmr.msra.gmra.mrb[116].mxu0 %vm128_vm0, %v5000_v36  ;;  %v5107_v36 = vrot.slane %v6816_v21, %v8555_v55 }
0x21e3   :  { %7123 = vmatpush3.bf16.msra.mxu0 %v7980_v30 }
0x21e4   :  { %7124 = vmatprep.subr.bf16.mxu0 %v7981_v20 }
0x21e7   :  { %7125 = vmatpush3.bf16.msra.mxu0 %v7982_v39  ;;  %v10212_v39 = vld [vmem:[%s10591_s2 + $0x510] ss:$0 sm:$0xff] }
0x21e8   :  { %7126 = vmatprep.subr.bf16.mxu0 %v7983_v19 }
0x21eb   :  { %7127 = vmatpush3.bf16.msra.mxu0 %v7984_v25 }
0x21ec   :  { %7128 = vmatprep.subr.bf16.mxu0 %v7985_v26 }
0x21ef   :  { %7129 = vmatpush3.bf16.msra.mxu0 %v7986_v37 }
0x21f0   :  { %7130 = vmatprep.subr.bf16.mxu0 %v7987_v49 }
0x21f3   :  { %7131 = vmatpush3.bf16.msra.mxu0 %v7988_v51 }
0x21f4   :  { %7132 = vmatprep.subr.bf16.mxu0 %v7989_v23 }
0x21f7   :  { %7133 = vmatpush3.bf16.msra.mxu0 %v7990_v43 }
0x21f8   :  { %7134 = vmatprep.subr.bf16.mxu0 %v7991_v44 }
0x21fb   :  { %7135 = vmatpush3.bf16.msra.mxu0 %v7992_v47 }
0x21fc   :  { %7136 = vmatprep.subr.bf16.mxu0 %v7993_v5 }
0x21ff   :  { %7137 = vmatpush3.bf16.msra.mxu0 %v7994_v29 }
0x2200   :  { %7635 = vmatprep.subr.bf16.mxu0 %v10157_v14 }
0x22b5   :  { %v5063_v38 = vpop.f32.mrb[116].mxu0 }
0x22b6   :  { %v5064_v40 = vadd.f32 %v5063_v38, %v5001_v7  ;;  %v7609_v56 = vpop.f32.mrb[117].mxu0 }
0x22b7   :  { %v5066_v62 = vpop.f32.mrb[118].mxu0 }
0x22b8   :  { %v5069_v58 = vmul.f32 %v5064_v40, %v4991_v57  ;;  %v7610_v12 = vpop.f32.mrb[119].mxu0 }
0x22ba   :  { %v10066_v2 = vadd.f32 %v5069_v58, %v9722_v4  ;;  %v7967_v4 = vld [vmem:[%s10590_s1 + $0x700] ss:$8 sps:$4 sm:$0xff]  }
0x22bb   :  { %5154 = vmatpush1.bf16.msra.mxu1 %v7967_v4 }
0x22bc   :  { %v5073_v8 = vsel %vm4156_vm5, %v10066_v2, 0.0  ;;  %5155 = vmatprep.subr.bf16.mxu1 %v7972_v48 }
0x22bd   :  { %5074 = vadd.xlane.f32.xlu1 %v5073_v8 }
0x22bf   :  { %5156 = vmatpush1.bf16.msra.mxu1 %v7970_v3 }
0x22c0   :  { %5157 = vmatprep.subr.bf16.mxu1 %v7975_v50 }
0x22c3   :  { %5158 = vmatpush1.bf16.msra.mxu1 %v7973_v1 }
0x22c4   :  { %5159 = vmatprep.subr.bf16.mxu1 %v7978_v6 }
0x22c7   :  { %5160 = vmatpush1.bf16.msra.mxu1 %v7976_v41 }
0x22c8   :  { %7611 = vmatprep.subr.bf16.mxu1 %v8364_v22 }
0x234a   :  { %v5075_v16 = vpop.xlane.xlu1 %5074 }
0x234b   :  { %v5076_v15 = vmul.f32 0.015625, %v5075_v16 }
0x234d   :  { %v5077_v52 = vsub.f32 %v10066_v2, %v5076_v15 }
0x234f   :  { %v5078_v63 = vmul.f32 %v5077_v52, %v5077_v52 }
0x2351   :  { %v5079_v35 = vsel %vm4156_vm5, %v5078_v63, 0.0 }
0x2352   :  { %5080 = vadd.xlane.f32.xlu0 %v5079_v35 }
0x23df   :  { %v5081_v17 = vpop.xlane.xlu0 %5080 }
0x23e0   :  { %v5082_v10 = vmul.f32 0.015625, %v5081_v17 }
0x23e2   :  { %v5083_v42 = vadd.f32 1e-06, %v5082_v10 }
0x23e4   :  { %8261 = vrsqrt.f32 %v5083_v42 }
0x23ee   :  { %v8262_v54 = vpop.eup %8261 }
0x23ef   :  { %v5085_v60 = vmul.f32 %v8262_v54, %v5077_v52 }
0x23f1   :  { %v5086_v31 = vmul.f32 %v5085_v60, %v5071_v18  ;;  %v10168_v18 = vld [vmem:[%s10590_s1 + $0x890] ss:$8 sps:$4 sm:$0xff]   ;;  %v10179_v60 = vld [vmem:[%s10590_s1 + $0x8a0] ss:$8 sps:$4 sm:$0xff]  }
0x23f3   :  { %v5087_v27 = vadd.f32 %v5086_v31, %v5072_v11  ;;  %v10186_v11 = vld [vmem:[%s10590_s1 + $0x8b0] ss:$8 sps:$4 sm:$0xff]  }
0x23f5   :  { %v5096_v34 = vpack.c.bf16 %v5087_v27, %v5087_v27 }
0x23f7   :  { %6825 = vmatmul.mubr.msk.bf16.vlgmr.msra.gmra.mrb[152].mxu1 %vm128_vm0, %v5096_v34  ;;  %v5383_v34 = vld [vmem:[%s10591_s2 + $0x4d0] ss:$0 sm:$0xff] }
0x23f8   :  { %7619 = vmatprep.mubr.msk.bf16.mxu1 %vm8368_vm2, %v8364_v22 }
0x24ca   :  { %v5187_v7 = vpop.f32.mrb[152].mxu1 }
0x24cb   :  { %v5188_v57 = vadd.f32 %v5187_v7, %v5103_v24  ;;  %v5189_v38 = vpop.f32.mrb[153].mxu1  ;;  %v7999_v24 = vld [vmem:[%s10590_s1 + $0x840] ss:$8 sps:$4 sm:$0xff]  }
0x24cc   :  { %v5190_v40 = vadd.f32 %v5189_v38, %v5107_v36  ;;  %v5191_v56 = vpop.f32.mrb[154].mxu1  ;;  %7612 = vmatpush3.bf16.msra.mxu1 %v7999_v24  ;;  %v8000_v36 = vld [vmem:[%s10590_s1 + $0x850] ss:$8 sps:$4 sm:$0xff]   ;;  %v8001_v7 = vld [vmem:[%s10590_s1 + $0x860] ss:$8 sps:$4 sm:$0xff]  }
0x24cd   :  { %v5194_v62 = vmul.f32 %v5188_v57, %v5188_v57  ;;  %v5192_v58 = vpop.f32.mrb[155].mxu1  ;;  %7613 = vmatprep.subr.bf16.mxu1 %v8364_v22 }
0x24ce   :  { %v5195_v12 = vmul.f32 %v5190_v40, %v5190_v40 }
0x24cf   :  { %v5196_v8 = vmul.f32 %v5194_v62, %v5188_v57 }
0x24d0   :  { %v5197_v16 = vmul.f32 %v5195_v12, %v5190_v40  ;;  %7614 = vmatpush3.bf16.msra.mxu1 %v8000_v36  ;;  %v8309_v12 = vld [vmem:[%s10591_s2 + $0x4e0] ss:$0 sm:$0xff] }
0x24d1   :  { %v5198_v15 = vmul.f32 0.044715, %v5196_v8  ;;  %7615 = vmatprep.subr.bf16.mxu1 %v8364_v22 }
0x24d2   :  { %v5199_v52 = vmul.f32 0.044715, %v5197_v16  ;;  %v8310_v16 = vld [vmem:[%s10591_s2 + $0x4f0] ss:$0 sm:$0xff] }
0x24d3   :  { %v5200_v63 = vadd.f32 %v5198_v15, %v5188_v57 }
0x24d4   :  { %v5201_v35 = vadd.f32 %v5199_v52, %v5190_v40  ;;  %7616 = vmatpush3.bf16.msra.mxu1 %v8001_v7 }
0x24d5   :  { %v5202_v28 = vmul.f32 0.7978846, %v5200_v63  ;;  %7617 = vmatprep.subr.bf16.mxu1 %v8364_v22 }
0x24d6   :  { %v5203_v4 = vmul.f32 0.7978846, %v5201_v35  ;;  %v5420_v35 = vld [vmem:[%s10591_s2 + $0x500] ss:$0 sm:$0xff] }
0x24d7   :  { %8263 = vtanh.f32 %v5202_v28 }
0x24d8   :  { %8265 = vtanh.f32 %v5203_v4 }
0x24e1   :  { %v8264_v48 = vpop.eup %8263 }
0x24e2   :  { %v8266_v3 = vpop.eup %8265  ;;  %v5206_v50 = vadd.f32 1.0, %v8264_v48 }
0x24e3   :  { %v5207_v1 = vadd.f32 1.0, %v8266_v3 }
0x24e4   :  { %v5208_v6 = vmul.f32 0.5, %v5206_v50 }
0x24e5   :  { %v5209_v41 = vmul.f32 0.5, %v5207_v1 }
0x24e6   :  { %v5210_v17 = vmul.f32 %v5208_v6, %v5188_v57  ;;  %v8002_v57 = vld [vmem:[%s10590_s1 + $0x870] ss:$8 sps:$4 sm:$0xff]  }
0x24e7   :  { %v5211_v10 = vmul.f32 %v5209_v41, %v5190_v40  ;;  %7618 = vmatpush3.bf16.msra.mxu1 %v8002_v57 }
0x24e8   :  { %v5244_v54 = vpack.c.bf16 %v5210_v17, %v5210_v17  ;;  %7623 = vmatprep.subr.bf16.mxu1 %v8364_v22 }
0x24e9   :  { %v5245_v42 = vpack.c.bf16 %v5211_v10, %v5211_v10 }
0x24eb   :  { %5375 = vmatprep.mubr.bf16.mxu0 %v5245_v42 }
0x24ec   :  { %5376 = vmatmul.mubr.bf16.vlgmr.msra.gmra.mrb[120].mxu0 %v5244_v54 }
0x24ed   :  { %7636 = vmatpush3.bf16.msra.mxu0 %v10157_v14  ;;  %7643 = vmatprep.mubr.msk.bf16.mxu0 %vm128_vm0, %v5561_v32 }
0x24ee   :  { %7637 = vmatprep.subr.bf16.mxu0 %v10168_v18 }
0x24f1   :  { %7638 = vmatpush3.bf16.msra.mxu0 %v10168_v18 }
0x24f2   :  { %7639 = vmatprep.subr.bf16.mxu0 %v10179_v60 }
0x24f5   :  { %7640 = vmatpush3.bf16.msra.mxu0 %v10179_v60 }
0x24f6   :  { %7641 = vmatprep.subr.bf16.mxu0 %v10186_v11 }
0x24f9   :  { %7642 = vmatpush3.bf16.msra.mxu0 %v10186_v11 }
0x24fa   :  { %7655 = vmatprep.subr.bf16.mxu0 %v8364_v22 }
0x24fc   :  { %7644 = vmatmul.mubr.msk.bf16.vlgmr.msra.gmra.mrb[124].mxu0 %vm128_vm0, %v5562_v13 }
0x24fd   :  { %7659 = vmatprep.mubr.msk.bf16.mxu0 %vm8368_vm2, %v8364_v22 }
0x25bf   :  { %v7138_v9 = vpop.f32.mrb[120].mxu0 }
0x25c0   :  { %v7139_v32 = vpop.f32.mrb[121].mxu0 }
0x25c1   :  { %v7140_v31 = vadd.f32 %v7139_v32, %v7138_v9  ;;  %v7141_v27 = vpop.f32.mrb[122].mxu0 }
0x25c2   :  { %v7142_v61 = vpop.f32.mrb[123].mxu0 }
0x25c3   :  { %v5378_v30 = vadd.f32 %v7140_v31, %v5246_v45 }
0x25c5   :  { %v5384_v59 = vmul.f32 %v5383_v34, %v5378_v30 }
0x25c7   :  { %v10205_v33 = vadd.f32 %v5384_v59, %v10066_v2 }
0x25c9   :  { %v5388_v13 = vsel %vm4156_vm5, %v10205_v33, 0.0 }
0x25ca   :  { %5389 = vadd.xlane.f32.xlu0 %v5388_v13 }
0x25cf   :  { %v7645_v20 = vpop.f32.mrb[124].mxu0 }
0x25d0   :  { %v5603_v19 = vpop.f32.mrb[125].mxu0  ;;  %v5612_v26 = vadd.f32 %v7645_v20, %v10212_v39 }
0x25d1   :  { %v7646_v25 = vpop.f32.mrb[126].mxu0  ;;  %v5604_v2 = vadd.f32 %v5603_v19, %v10212_v39 }
0x25d2   :  { %v5615_v37 = vadd.f32 %v7646_v25, %v10212_v39  ;;  %v5606_v49 = vpop.f32.mrb[127].mxu0 }
0x25d3   :  { %v5607_v51 = vadd.f32 %v5606_v49, %v10212_v39 }
0x25d4   :  { %v10218_v23 = vpack.c.bf16 %v5615_v37, %v5612_v26 }
0x25d5   :  { %v10220_v43 = vpack.c.bf16 %v5607_v51, %v5604_v2 }
0x25d6   :  { %v5632_v63 = vsel %vm747_vm1, %v10218_v23, 0 }
0x25e0   :  { %5758 = vrot.lane.b32.xlu0 %v10220_v43, %s8366_s14 }
0x2657   :  { %v5390_v44 = vpop.xlane.xlu0 %5389 }
0x2658   :  { %v5391_v47 = vmul.f32 0.015625, %v5390_v44 }
0x265a   :  { %v5392_v5 = vsub.f32 %v10205_v33, %v5391_v47 }
0x265b   :  { %v5759_v3 = vpop.permute.xlu0 %5758 }
0x265c   :  { %v5393_v29 = vmul.f32 %v5392_v5, %v5392_v5  ;;  %v5766_v41 = vsel %vm747_vm1, %v5759_v3, 0 }
0x265e   :  { %v5394_v21 = vsel %vm4156_vm5, %v5393_v29, 0.0 }
0x265f   :  { %5395 = vadd.xlane.f32.xlu1 %v5394_v21 }
0x2670   :  { %5760 = vrot.lane.b32.xlu1 %v10218_v23, %s8366_s14 }
0x26ec   :  { %v5396_v38 = vpop.xlane.xlu1 %5395 }
0x26ed   :  { %v5397_v40 = vmul.f32 0.015625, %v5396_v38 }
0x26ef   :  { %v5398_v56 = vadd.f32 1e-06, %v5397_v40 }
0x26f0   :  { %v5761_v17 = vpop.permute.xlu1 %5760 }
0x26f1   :  { %8267 = vrsqrt.f32 %v5398_v56  ;;  %v5769_v10 = vsel %vm747_vm1, %v5761_v17, 0 }
0x26fb   :  { %v8268_v62 = vpop.eup %8267 }
0x26fc   :  { %v5400_v58 = vmul.f32 %v8268_v62, %v5392_v5 }
0x26fe   :  { %v5401_v8 = vmul.f32 %v8309_v12, %v5400_v58 }
0x2700   :  { %v5402_v15 = vadd.f32 %v8310_v16, %v5401_v8 }
0x2702   :  { %v5419_v52 = vpack.c.bf16 %v5402_v15, %v5402_v15 }
0x2704   :  { %7620 = vmatmul.mubr.msk.bf16.vlgmr.msra.gmra.mrb[156].mxu1 %vm128_vm0, %v5419_v52 }
0x2705   :  { %7624 = vmatpush3.bf16.msra.mxu1 %v10157_v14  ;;  %7631 = vmatprep.mubr.msk.bf16.mxu1 %vm8368_vm2, %v8364_v22  ;;  %v5629_v14 = vsel %vm747_vm1, %v10220_v43, 0 }
0x2706   :  { %7625 = vmatprep.subr.bf16.mxu1 %v8364_v22 }
0x2709   :  { %7626 = vmatpush3.bf16.msra.mxu1 %v10168_v18 }
0x270a   :  { %7627 = vmatprep.subr.bf16.mxu1 %v8364_v22 }
0x270d   :  { %7628 = vmatpush3.bf16.msra.mxu1 %v10179_v60 }
0x270e   :  { %7629 = vmatprep.subr.bf16.mxu1 %v8364_v22 }
0x2711   :  { %7630 = vmatpush3.bf16.msra.mxu1 %v10186_v11 }
0x2712   :  { %7647 = vmatprep.subr.bf16.mxu1 %v8364_v22 }
0x2714   :  { %7632 = vmatmul.mubr.msk.bf16.vlgmr.msra.gmra.mrb[160].mxu1 %vm128_vm0, %v5419_v52 }
0x2715   :  { %7651 = vmatprep.mubr.msk.bf16.mxu1 %vm8368_vm2, %v8364_v22 }
0x271a   :  { %7648 = vmatpush3.bf16.xpose.msra.mxu1 %v5629_v14 }
0x271b   :  { %7649 = vmatprep.subr.bf16.mxu1 %v8364_v22 }
0x2722   :  { %7650 = vmatpush3.bf16.xpose.msra.mxu1 %v5632_v63 }
0x2723   :  { %7663 = vmatprep.subr.bf16.mxu1 %v8364_v22 }
0x27d7   :  { %v5482_v28 = vpop.f32.mrb[156].mxu1 }
0x27d8   :  { %v5483_v4 = vadd.f32 %v5482_v28, %v5420_v35  ;;  %v7621_v48 = vpop.f32.mrb[157].mxu1 }
0x27d9   :  { %v5485_v50 = vpop.f32.mrb[158].mxu1 }
0x27da   :  { %v10273_v1 = vpack.c.bf16 %v5483_v4, %v5483_v4  ;;  %v7622_v6 = vpop.f32.mrb[159].mxu1 }
0x27dc   :  { %5756 = vrot.lane.b32.xlu1 %v10273_v1, %s8366_s14  ;;  %7652 = vmatmul.mubr.msk.bf16.vlgmr.msra.gmra.mrb[164].mxu1 %vm747_vm1, %v10273_v1 }
0x27dd   :  { %7664 = vmatpush3.bf16.xpose.msra.mxu1 %v5766_v41  ;;  %7667 = vmatprep.mubr.msk.bf16.mxu1 %vm8368_vm2, %v8364_v22 }
0x27de   :  { %7665 = vmatprep.subr.bf16.mxu1 %v8364_v22 }
0x27e5   :  { %7666 = vmatpush3.bf16.xpose.msra.mxu1 %v5769_v10  ;;  %v8311_v10 = vld [vmem:[%s10591_s2 + $0xe0] sm:$0x3] }
0x27e6   :  { %7687 = vmatprep.subr.bf16.mxu1 %v8364_v22 }
0x27e7   :  { %v5555_v42 = vpop.f32.mrb[160].mxu1 }
0x27e8   :  { %v10286_v54 = vadd.f32 %v5555_v42, %v10212_v39  ;;  %v7633_v18 = vpop.f32.mrb[161].mxu1 }
0x27e9   :  { %v5558_v60 = vpop.f32.mrb[162].mxu1 }
0x27ea   :  { %v7634_v11 = vpop.f32.mrb[163].mxu1  ;;  %v10289_v9 = vmul.f32 %v10286_v54, %v5483_v4 }
0x27ec   :  { %5749 = vrot.lane.b32.xlu0 %v10289_v9, %s8366_s14  ;;  %v5619_v45 = vsel %vm4440_vm6, %v10289_v9, 0.0 }
0x2800   :  { %5620 = vadd.xlane.f32.xlu1 %v5619_v45 }
0x2811   :  { %5695 = vrot.lane.b32.xlu1 %v10218_v23, %s8363_s23 }
0x2815   :  { %5828 = vrot.lane.b32.xlu1 %v10220_v43, %s8370_s22 }
0x284e   :  { %v5757_v32 = vpop.permute.xlu1 %5756 }
0x284f   :  { %7668 = vmatmul.mubr.msk.bf16.vlgmr.msra.gmra.mrb[168].mxu1 %vm747_vm1, %v5757_v32 }
0x2850   :  { %7691 = vmatprep.mubr.msk.bf16.mxu1 %vm8368_vm2, %v8364_v22 }
0x285e   :  { %v5750_v31 = vpop.permute.xlu0 %5749 }
0x285f   :  { %v5752_v27 = vsel %vm4440_vm6, %v5750_v31, 0.0 }
0x2860   :  { %5753 = vadd.xlane.f32.xlu0 %v5752_v27 }
0x288d   :  { %v10321_v51 = vpop.xlane.xlu1 %5620 }
0x2891   :  { %v5696_v21 = vpop.permute.xlu1 %5695 }
0x2895   :  { %v5829_v57 = vpop.permute.xlu1 %5828 }
0x28af   :  { %v5668_v34 = vpop.f32.mrb[164].mxu1 }
0x28b0   :  { %v5669_v61 = vadd.f32 %v5668_v34, %v9909_v46  ;;  %v7653_v30 = vpop.f32.mrb[165].mxu1 }
0x28b1   :  { %v5671_v59 = vpop.f32.mrb[166].mxu1 }
0x28b2   :  { %v7654_v13 = vpop.f32.mrb[167].mxu1  ;;  %v5674_v20 = vsel %vm4496_vm7, %v5669_v61, -inf }
0x28b3   :  { %5675 = vmax.xlane.f32.xlu0 %v5674_v20 }
0x28c9   :  { %5693 = vrot.lane.b32.xlu0 %v10220_v43, %s8363_s23 }
0x28cd   :  { %5830 = vrot.lane.b32.xlu0 %v10218_v23, %s8370_s22 }
0x28d1   :  { %5893 = vrot.lane.b32.xlu0 %v10218_v23, %s8365_s26 }
0x28d5   :  { %5883 = vrot.lane.b32.xlu0 %v10289_v9, %s8365_s26 }
0x28ed   :  { %v10319_v2 = vpop.xlane.xlu0 %5753 }
0x2922   :  { %v5805_v39 = vpop.f32.mrb[168].mxu1 }
0x2923   :  { %v5806_v19 = vadd.f32 %v5805_v39, %v9909_v46  ;;  %v7669_v25 = vpop.f32.mrb[169].mxu1 }
0x2924   :  { %v5808_v26 = vpop.f32.mrb[170].mxu1 }
0x2925   :  { %v7670_v37 = vpop.f32.mrb[171].mxu1  ;;  %v5811_v49 = vsel %vm4496_vm7, %v5806_v19, -inf }
0x2926   :  { %5812 = vmax.xlane.f32.xlu1 %v5811_v49 }
0x2937   :  { %5891 = vrot.lane.b32.xlu1 %v10220_v43, %s8365_s26 }
0x293b   :  { %5889 = vrot.lane.b32.xlu1 %v10273_v1, %s8365_s26 }
0x2940   :  { %v5676_v44 = vpop.xlane.xlu0 %5675 }
0x2941   :  { %v10324_v47 = vmax.f32 %v10321_v51, %v5676_v44 }
0x2943   :  { %v5681_v46 = vsub.f32 %v5669_v61, %v10324_v47 }
0x2944   :  { %v5694_v5 = vpop.permute.xlu0 %5693 }
0x2945   :  { %v5682_v29 = vmul.f32 1.442695, %v5681_v46  ;;  %7656 = vmatpush3.bf16.msra.mxu0 %v5694_v5 }
0x2946   :  { %7657 = vmatprep.subr.bf16.mxu0 %v8364_v22 }
0x2947   :  { %8269 = vpow2.f32 %v5682_v29 }
0x2948   :  { %v5831_v24 = vpop.permute.xlu0 %5830 }
0x2949   :  { %7658 = vmatpush3.bf16.msra.mxu0 %v5696_v21 }
0x294a   :  { %7671 = vmatprep.subr.bf16.mxu0 %v8364_v22 }
0x294c   :  { %v5894_v38 = vpop.permute.xlu0 %5893 }
0x294d   :  { %v5902_v63 = vsel %vm747_vm1, %v5894_v38, 0 }
0x2950   :  { %v5884_v40 = vpop.permute.xlu0 %5883 }
0x2951   :  { %v10329_v36 = vpop.eup %8269  ;;  %v5886_v56 = vsel %vm4440_vm6, %v5884_v40, 0.0 }
0x2952   :  { %v5690_v7 = vpack.c.bf16 %v10329_v36, %v10329_v36  ;;  %v5684_v44 = vsel %vm4496_vm7, %v10329_v36, 0.0 }
0x2954   :  { %7660 = vmatmul.mubr.msk.bf16.vlgmr.msra.gmra.mrb[128].mxu0 %vm1406_vm3, %v5690_v7 }
0x2955   :  { %7672 = vmatpush3.bf16.msra.mxu0 %v5829_v57  ;;  %7675 = vmatprep.mubr.msk.bf16.mxu0 %vm8368_vm2, %v8364_v22 }
0x2956   :  { %7673 = vmatprep.subr.bf16.mxu0 %v8364_v22 }
0x2959   :  { %7674 = vmatpush3.bf16.msra.mxu0 %v5831_v24 }
0x295a   :  { %7679 = vmatprep.subr.bf16.mxu0 %v8364_v22 }
0x295f   :  { %5887 = vadd.xlane.f32.xlu1 %v5886_v56 }
0x2970   :  { %5963 = vrot.lane.b32.xlu1 %v10218_v23, %s8371_s24 }
0x2974   :  { %6024 = vrot.lane.b32.xlu1 %v10220_v43, %s8367_s17 }
0x2978   :  { %6022 = vrot.lane.b32.xlu1 %v10273_v1, %s8367_s17 }
0x29b3   :  { %v5813_v62 = vpop.xlane.xlu1 %5812 }
0x29b4   :  { %v10346_v58 = vmax.f32 %v10319_v2, %v5813_v62 }
0x29b6   :  { %v5818_v12 = vsub.f32 %v5806_v19, %v10346_v58 }
0x29b7   :  { %v5892_v15 = vpop.permute.xlu1 %5891 }
0x29b8   :  { %v5819_v8 = vmul.f32 1.442695, %v5818_v12  ;;  %v5899_v14 = vsel %vm747_vm1, %v5892_v15, 0 }
0x29ba   :  { %8271 = vpow2.f32 %v5819_v8 }
0x29bb   :  { %v5890_v35 = vpop.permute.xlu1 %5889 }
0x29c4   :  { %v10349_v16 = vpop.eup %8271 }
0x29c5   :  { %v5827_v52 = vpack.c.bf16 %v10349_v16, %v10349_v16 }
0x29c7   :  { %7676 = vmatmul.mubr.msk.bf16.vlgmr.msra.gmra.mrb[132].mxu0 %vm1406_vm3, %v5827_v52 }
0x29c8   :  { %7680 = vmatpush3.bf16.xpose.msra.mxu0 %v5899_v14  ;;  %7683 = vmatprep.mubr.msk.bf16.mxu0 %vm8368_vm2, %v8364_v22 }
0x29c9   :  { %7681 = vmatprep.subr.bf16.mxu0 %v8364_v22 }
0x29d0   :  { %7682 = vmatpush3.bf16.xpose.msra.mxu0 %v5902_v63 }
0x29d1   :  { %7703 = vmatprep.subr.bf16.mxu0 %v8364_v22 }
0x29d7   :  { %7684 = vmatmul.mubr.msk.bf16.vlgmr.msra.gmra.mrb[136].mxu0 %vm747_vm1, %v5890_v35  ;;  %v5678_v35 = vsub.f32 %v10321_v51, %v10324_v47 }
0x29d8   :  { %7707 = vmatprep.mubr.msk.bf16.mxu0 %vm8368_vm2, %v8364_v22 }
0x29ec   :  { %v10375_v32 = vpop.xlane.xlu1 %5887 }
0x29f0   :  { %v5964_v59 = vpop.permute.xlu1 %5963 }
0x29f4   :  { %v6025_v19 = vpop.permute.xlu1 %6024 }
0x29f5   :  { %v6032_v26 = vsel %vm747_vm1, %v6025_v19, 0 }
0x29f8   :  { %v6023_v49 = vpop.permute.xlu1 %6022 }
0x2a27   :  { %v10363_v28 = vpop.f32.mrb[128].mxu0 }
0x2a28   :  { %v7661_v4 = vpop.f32.mrb[129].mxu0 }
0x2a29   :  { %v5739_v48 = vpop.f32.mrb[130].mxu0  ;;  %v5679_v4 = vmul.f32 1.442695, %v5678_v35  ;;  %v6168_v35 = vld [vmem:[%s10591_s2 + $0x530] ss:$0 sm:$0xff] }
0x2a2a   :  { %v7662_v3 = vpop.f32.mrb[131].mxu0 }
0x2a9a   :  { %v5871_v50 = vpop.f32.mrb[132].mxu0 }
0x2a9b   :  { %v7677_v1 = vpop.f32.mrb[133].mxu0 }
0x2a9c   :  { %v5874_v6 = vpop.f32.mrb[134].mxu0 }
0x2a9d   :  { %v7678_v41 = vpop.f32.mrb[135].mxu0 }
0x2aaa   :  { %v5938_v17 = vpop.f32.mrb[136].mxu0 }
0x2aab   :  { %v5939_v42 = vadd.f32 %v8311_v10, %v5938_v17  ;;  %v7685_v18 = vpop.f32.mrb[137].mxu0 }
0x2aac   :  { %v5941_v60 = vpop.f32.mrb[138].mxu0 }
0x2aad   :  { %v7686_v11 = vpop.f32.mrb[139].mxu0  ;;  %v5944_v45 = vsel %vm4496_vm7, %v5939_v42, -inf }
0x2aae   :  { %5945 = vmax.xlane.f32.xlu0 %v5944_v45 }
0x2ac4   :  { %5961 = vrot.lane.b32.xlu0 %v10220_v43, %s8371_s24 }
0x2ac8   :  { %6026 = vrot.lane.b32.xlu0 %v10218_v23, %s8367_s17 }
0x2acc   :  { %6016 = vrot.lane.b32.xlu0 %v10289_v9, %s8367_s17 }
0x2b3b   :  { %v5946_v31 = vpop.xlane.xlu0 %5945 }
0x2b3c   :  { %v10378_v27 = vmax.f32 %v10375_v32, %v5946_v31 }
0x2b3e   :  { %v5951_v34 = vsub.f32 %v5939_v42, %v10378_v27  ;;  %v5948_v3 = vsub.f32 %v10375_v32, %v10378_v27 }
0x2b3f   :  { %v5962_v61 = vpop.permute.xlu0 %5961 }
0x2b40   :  { %v5952_v30 = vmul.f32 1.442695, %v5951_v34  ;;  %7688 = vmatpush3.bf16.msra.mxu1 %v5962_v61 }
0x2b41   :  { %7689 = vmatprep.subr.bf16.mxu1 %v8364_v22 }
0x2b42   :  { %8273 = vpow2.f32 %v5952_v30 }
0x2b43   :  { %v6027_v13 = vpop.permute.xlu0 %6026 }
0x2b44   :  { %7690 = vmatpush3.bf16.msra.mxu1 %v5964_v59  ;;  %v6035_v37 = vsel %vm747_vm1, %v6027_v13, 0 }
0x2b45   :  { %7695 = vmatprep.subr.bf16.mxu1 %v8364_v22 }
0x2b47   :  { %v6017_v9 = vpop.permute.xlu0 %6016 }
0x2b48   :  { %v6019_v20 = vsel %vm4440_vm6, %v6017_v9, 0.0 }
0x2b49   :  { %6020 = vadd.xlane.f32.xlu1 %v6019_v20 }
0x2b4c   :  { %v8274_v39 = vpop.eup %8273 }
0x2b4d   :  { %v5960_v25 = vpack.c.bf16 %v8274_v39, %v8274_v39  ;;  %v5954_v36 = vsel %vm4496_vm7, %v8274_v39, 0.0 }
0x2b4f   :  { %7692 = vmatmul.mubr.msk.bf16.vlgmr.msra.gmra.mrb[172].mxu1 %vm1406_vm3, %v5960_v25  ;;  %v8003_v25 = vld [vmem:[%s10590_s1 + $0x8c0] ss:$8 sps:$4 sm:$0xff]  }
0x2b50   :  { %7696 = vmatpush3.bf16.xpose.msra.mxu1 %v6032_v26  ;;  %7699 = vmatprep.mubr.msk.bf16.mxu1 %vm8368_vm2, %v8364_v22  ;;  %v8004_v26 = vld [vmem:[%s10590_s1 + $0x8d0] ss:$8 sps:$4 sm:$0xff]  }
0x2b51   :  { %7697 = vmatprep.subr.bf16.mxu1 %v8364_v22 }
0x2b58   :  { %7698 = vmatpush3.bf16.xpose.msra.mxu1 %v6035_v37 }
0x2b5a   :  { %6096 = vrot.lane.b32.xlu1 %v10218_v23, %s8369_s13 }
0x2b5f   :  { %7700 = vmatmul.mubr.msk.bf16.vlgmr.msra.gmra.mrb[176].mxu1 %vm747_vm1, %v6023_v49  ;;  %v8005_v49 = vld [vmem:[%s10590_s1 + $0x8e0] ss:$8 sps:$4 sm:$0xff]  }
0x2b60   :  { %6362 = vmatprep.mubr.bf16.mxu1 %v8362_v0  ;;  %v5821_v0 = vsel %vm4496_vm7, %v10349_v16, 0.0 }
0x2b7e   :  { %5685 = vadd.xlane.f32.xlu1 %v5684_v44 }
0x2b8f   :  { %5878 = vrot.lane.b32.xlu1 %v5871_v50, %s8367_s17  ;;  %v5949_v50 = vmul.f32 1.442695, %v5948_v3 }
0x2bd6   :  { %v10405_v56 = vpop.xlane.xlu1 %6020 }
0x2bda   :  { %v6097_v16 = vpop.permute.xlu1 %6096 }
0x2c0b   :  { %v5686_v1 = vpop.xlane.xlu1 %5685 }
0x2c0f   :  { %v5879_v60 = vpop.permute.xlu1 %5878 }
0x2c22   :  { %v6004_v46 = vpop.f32.mrb[172].mxu1 }
0x2c23   :  { %v7693_v5 = vpop.f32.mrb[173].mxu1 }
0x2c24   :  { %v6007_v29 = vpop.f32.mrb[174].mxu1 }
0x2c25   :  { %v7694_v21 = vpop.f32.mrb[175].mxu1 }
0x2c32   :  { %v6071_v24 = vpop.f32.mrb[176].mxu1 }
0x2c33   :  { %v6072_v7 = vadd.f32 %v8311_v10, %v6071_v24  ;;  %v7701_v57 = vpop.f32.mrb[177].mxu1 }
0x2c34   :  { %v6074_v38 = vpop.f32.mrb[178].mxu1  ;;  %v8006_v57 = vld [vmem:[%s10590_s1 + $0x8f0] ss:$8 sps:$4 sm:$0xff]  }
0x2c35   :  { %v7702_v23 = vpop.f32.mrb[179].mxu1  ;;  %v6077_v40 = vsel %vm4496_vm7, %v6072_v7, -inf }
0x2c36   :  { %6078 = vmax.xlane.f32.xlu0 %v6077_v40 }
0x2c4c   :  { %6094 = vrot.lane.b32.xlu0 %v10220_v43, %s8369_s13 }
0x2c6b   :  { %5822 = vadd.xlane.f32.xlu0 %v5821_v0 }
0x2c6f   :  { %5955 = vadd.xlane.f32.xlu0 %v5954_v36 }
0x2c85   :  { %5743 = vrot.lane.b32.xlu0 %v10363_v28, %s8363_s23  ;;  %v5815_v28 = vsub.f32 %v10319_v2, %v10346_v58 }
0x2c87   :  { %v5816_v48 = vmul.f32 1.442695, %v5815_v28 }
0x2cc3   :  { %v6079_v62 = vpop.xlane.xlu0 %6078 }
0x2cc4   :  { %v10408_v12 = vmax.f32 %v10405_v56, %v6079_v62 }
0x2cc6   :  { %v6084_v8 = vsub.f32 %v6072_v7, %v10408_v12  ;;  %v6081_v29 = vsub.f32 %v10405_v56, %v10408_v12 }
0x2cc7   :  { %v6095_v15 = vpop.permute.xlu0 %6094 }
0x2cc8   :  { %v6085_v43 = vmul.f32 1.442695, %v6084_v8  ;;  %7704 = vmatpush3.bf16.msra.mxu0 %v6095_v15  ;;  %v6082_v21 = vmul.f32 1.442695, %v6081_v29  ;;  %v8027_v29 = vld [vmem:[%s10590_s1 + $0xa00] ss:$8 sps:$4 sm:$0xff]  }
0x2cc9   :  { %7705 = vmatprep.subr.bf16.mxu0 %v8364_v22 }
0x2cca   :  { %8275 = vpow2.f32 %v6085_v43 }
0x2ccb   :  { %8277 = vpow2.f32 %v5679_v4 }
0x2ccc   :  { %7706 = vmatpush3.bf16.msra.mxu0 %v6097_v16  ;;  %8279 = vpow2.f32 %v5816_v48 }
0x2ccd   :  { %7711 = vmatprep.subr.bf16.mxu0 %v8364_v22  ;;  %8281 = vpow2.f32 %v5949_v50 }
0x2cd4   :  { %v8276_v52 = vpop.eup %8275 }
0x2cd5   :  { %v6087_v14 = vsel %vm4496_vm7, %v8276_v52, 0.0  ;;  %v6093_v63 = vpack.c.bf16 %v8276_v52, %v8276_v52  ;;  %v8278_v6 = vpop.eup %8277 }
0x2cd6   :  { %6088 = vadd.xlane.f32.xlu1 %v6087_v14  ;;  %v5687_v41 = vadd.f32 %v8278_v6, %v5686_v1  ;;  %v8280_v17 = vpop.eup %8279  ;;  %v5689_v42 = vmul.f32 %v8278_v6, %v10286_v54 }
0x2cd7   :  { %7708 = vmatmul.mubr.msk.bf16.vlgmr.msra.gmra.mrb[140].mxu0 %vm1406_vm3, %v6093_v63  ;;  %v8282_v2 = vpop.eup %8281  ;;  %v5826_v11 = vmul.f32 %v8280_v17, %v10286_v54  ;;  %v6178_v63 = vld [vmem:[%s10591_s2 + $0x520] ss:$0 sm:$0xff] }
0x2cd8   :  { %7719 = vmatprep.mubr.msk.bf16.mxu0 %vm8368_vm2, %v8364_v22  ;;  %8283 = vrcp.f32 %v5687_v41  ;;  %v5959_v13 = vmul.f32 %v8282_v2, %v10286_v54  ;;  %7712 = vmatpush3.bf16.msra.mxu0 %v8003_v25  ;;  %v8020_v25 = vld [vmem:[%s10590_s1 + $0x940] ss:$8 sps:$4 sm:$0xff]  }
0x2cd9   :  { %v5881_v31 = vadd.f32 %v5879_v60, %v5826_v11  ;;  %7713 = vmatprep.subr.bf16.mxu0 %v8364_v22  ;;  %v8015_v60 = vld [vmem:[%s10590_s1 + $0x924] ss:$8 sps:$4 sm:$0xff]   ;;  %v8013_v11 = vld [vmem:[%s10590_s1 + $0x920] ss:$8 sps:$4 sm:$0xff]  }
0x2cdc   :  { %7714 = vmatpush3.bf16.msra.mxu0 %v8004_v26  ;;  %v8021_v26 = vld [vmem:[%s10590_s1 + $0x9d0] ss:$8 sps:$4 sm:$0xff]  }
0x2cdd   :  { %7715 = vmatprep.subr.bf16.mxu0 %v8364_v22 }
0x2ce0   :  { %7716 = vmatpush3.bf16.msra.mxu0 %v8005_v49  ;;  %v8023_v49 = vld [vmem:[%s10590_s1 + $0x9e0] ss:$8 sps:$4 sm:$0xff]  }
0x2ce1   :  { %7717 = vmatprep.subr.bf16.mxu0 %v8364_v22 }
0x2ce2   :  { %v8284_v32 = vpop.eup %8283 }
0x2ce4   :  { %7718 = vmatpush3.bf16.msra.mxu0 %v8006_v57  ;;  %v8031_v57 = vld [vmem:[%s10590_s1 + $0xa20] ss:$8 sps:$4 sm:$0xff]  }
0x2ce7   :  { %6011 = vrot.lane.b32.xlu1 %v6004_v46, %s8365_s26 }
0x2cf8   :  { %v5823_v10 = vpop.xlane.xlu0 %5822 }
0x2cf9   :  { %v5824_v51 = vadd.f32 %v8280_v17, %v5823_v10 }
0x2cfb   :  { %8285 = vrcp.f32 %v5824_v51 }
0x2cfc   :  { %v5956_v47 = vpop.xlane.xlu0 %5955 }
0x2cfd   :  { %v5957_v58 = vadd.f32 %v8282_v2, %v5956_v47 }
0x2cff   :  { %8287 = vrcp.f32 %v5957_v58  ;;  %v8009_v58 = vld [vmem:[%s10590_s1 + $0x904] ss:$8 sps:$4 sm:$0xff]  }
0x2d00   :  { %v5744_v18 = vpop.permute.xlu0 %5743  ;;  %8289 = vpow2.f32 %v6082_v21  ;;  %6330 = vmatprep.subr.bf16.mxu1 %v8009_v58  ;;  %v8028_v21 = vld [vmem:[%s10590_s1 + $0x980] ss:$8 sps:$4 sm:$0xff]  }
0x2d01   :  { %v5746_v45 = vadd.f32 %v5744_v18, %v5689_v42  ;;  %v8012_v42 = vld [vmem:[%s10590_s1 + $0x914] ss:$8 sps:$4 sm:$0xff]   ;;  %v8010_v18 = vld [vmem:[%s10590_s1 + $0x910] ss:$8 sps:$4 sm:$0xff]  }
0x2d03   :  { %v5747_v61 = vmul.f32 %v8284_v32, %v5746_v45  ;;  %v8018_v45 = vld [vmem:[%s10590_s1 + $0x934] ss:$8 sps:$4 sm:$0xff]   ;;  %v8016_v32 = vld [vmem:[%s10590_s1 + $0x930] ss:$8 sps:$4 sm:$0xff]  }
0x2d05   :  { %v8286_v27 = vpop.eup %8285 }
0x2d06   :  { %v5882_v34 = vmul.f32 %v8286_v27, %v5881_v31 }
0x2d08   :  { %v7813_v30 = vpack.i.bf16 %v5882_v34, %v5747_v61 }
0x2d09   :  { %v8288_v39 = vpop.eup %8287 }
0x2d0a   :  { %7814 = vrot.lane.b32.xlu1 %v7813_v30, %s8363_s23  ;;  %v8290_v24 = vpop.eup %8289  ;;  %v6248_v30 = vld [vmem:[%s10591_s2 + $0x540] ss:$0 sm:$0xff] }
0x2d0b   :  { %v6092_v38 = vmul.f32 %v8290_v24, %v10286_v54 }
0x2d63   :  { %v6089_v59 = vpop.xlane.xlu1 %6088 }
0x2d64   :  { %v6090_v7 = vadd.f32 %v8290_v24, %v6089_v59  ;;  %v8029_v24 = vld [vmem:[%s10590_s1 + $0xa10] ss:$8 sps:$4 sm:$0xff]  }
0x2d66   :  { %8291 = vrcp.f32 %v6090_v7  ;;  %v8030_v7 = vld [vmem:[%s10590_s1 + $0x990] ss:$8 sps:$4 sm:$0xff]  }
0x2d67   :  { %v6012_v9 = vpop.permute.xlu1 %6011 }
0x2d68   :  { %v6014_v20 = vadd.f32 %v6012_v9, %v5959_v13  ;;  %v6249_v13 = vld [vmem:[%s10591_s2 + $0x550] ss:$0 sm:$0xff] }
0x2d6a   :  { %v6015_v19 = vmul.f32 %v8288_v39, %v6014_v20 }
0x2d70   :  { %v8292_v0 = vpop.eup %8291 }
0x2d7c   :  { %v7815_v56 = vpop.permute.xlu1 %7814 }
0x2d7d   :  { %v7817_v62 = vunpack.i.h.bf16 %v7815_v56  ;;  %v7816_v12 = vunpack.i.l.bf16 %v7815_v56 }
0x2d7f   :  { %v6165_v16 = vsel %vm747_vm1, %v7816_v12, %v7817_v62 }
0x2daa   :  { %v6137_v37 = vpop.f32.mrb[140].mxu0 }
0x2dab   :  { %6144 = vrot.lane.b32.xlu0 %v6137_v37, %s8366_s14  ;;  %v7709_v44 = vpop.f32.mrb[141].mxu0  ;;  %v8022_v37 = vld [vmem:[%s10590_s1 + $0x950] ss:$8 sps:$4 sm:$0xff]  }
0x2dac   :  { %v6140_v46 = vpop.f32.mrb[142].mxu0  ;;  %v8024_v44 = vld [vmem:[%s10590_s1 + $0x960] ss:$8 sps:$4 sm:$0xff]  }
0x2dad   :  { %v7710_v5 = vpop.f32.mrb[143].mxu0  ;;  %v8025_v46 = vld [vmem:[%s10590_s1 + $0x9f0] ss:$8 sps:$4 sm:$0xff]  }
0x2dae   :  { %v8026_v5 = vld [vmem:[%s10590_s1 + $0x970] ss:$8 sps:$4 sm:$0xff]  }
0x2e1d   :  { %v6145_v23 = vpop.permute.xlu0 %6144 }
0x2e1e   :  { %v6147_v40 = vadd.f32 %v6145_v23, %v6092_v38  ;;  %v8032_v38 = vld [vmem:[%s10590_s1 + $0x9a0] ss:$8 sps:$4 sm:$0xff]   ;;  %v8033_v23 = vld [vmem:[%s10590_s1 + $0xa30] ss:$8 sps:$4 sm:$0xff]  }
0x2e20   :  { %v6148_v36 = vmul.f32 %v8292_v0, %v6147_v40  ;;  %v8034_v40 = vld [vmem:[%s10590_s1 + $0x9b0] ss:$8 sps:$4 sm:$0xff]   ;;  %v6867_v0 = vld [vmem:[%s10591_s2 + $0x560] ss:$8 sm:$0x3] }
0x2e22   :  { %v7818_v22 = vpack.i.bf16 %v6148_v36, %v6015_v19  ;;  %v8019_v19 = vld [vmem:[%s10590_s1 + $0x9c0] ss:$8 sps:$4 sm:$0xff]   ;;  %v6280_v36 = vrot.slane %v6867_v0, %v8550_v53 }
0x2e23   :  { %7189 = vmatprep.subr.bf16.mxu0 %v8019_v19 }
0x2e24   :  { %7819 = vrot.lane.b32.xlu0 %v7818_v22, %s8363_s23  ;;  %v6284_v22 = vrot.slane %v6867_v0, %v8555_v55 }
0x2e96   :  { %v7820_v8 = vpop.permute.xlu0 %7819 }
0x2e97   :  { %v7822_v15 = vunpack.i.h.bf16 %v7820_v8  ;;  %v7821_v43 = vunpack.i.l.bf16 %v7820_v8 }
0x2e99   :  { %v6166_v52 = vsel %vm1406_vm3, %v6165_v16, %v7821_v43 }
0x2e9a   :  { %v6167_v14 = vsel %vm1409_vm4, %v6166_v52, %v7822_v15 }
0x2e9b   :  { %v6177_v54 = vpack.c.bf16 %v6167_v14, %v6167_v14 }
0x2e9d   :  { %7720 = vmatmul.mubr.msk.bf16.vlgmr.msra.gmra.mrb[144].mxu0 %vm128_vm0, %v6177_v54 }
0x2e9e   :  { %7190 = vmatpush3.bf16.msra.mxu0 %v8020_v25 }
0x2e9f   :  { %7191 = vmatprep.subr.bf16.mxu0 %v8021_v26 }
0x2ea2   :  { %7192 = vmatpush3.bf16.msra.mxu0 %v8022_v37 }
0x2ea3   :  { %7193 = vmatprep.subr.bf16.mxu0 %v8023_v49 }
0x2ea6   :  { %7194 = vmatpush3.bf16.msra.mxu0 %v8024_v44 }
0x2ea7   :  { %7195 = vmatprep.subr.bf16.mxu0 %v8025_v46 }
0x2eaa   :  { %7196 = vmatpush3.bf16.msra.mxu0 %v8026_v5 }
0x2eab   :  { %7197 = vmatprep.subr.bf16.mxu0 %v8027_v29 }
0x2eae   :  { %7198 = vmatpush3.bf16.msra.mxu0 %v8028_v21 }
0x2eaf   :  { %7199 = vmatprep.subr.bf16.mxu0 %v8029_v24 }
0x2eb2   :  { %7200 = vmatpush3.bf16.msra.mxu0 %v8030_v7 }
0x2eb3   :  { %7201 = vmatprep.subr.bf16.mxu0 %v8031_v57 }
0x2eb6   :  { %7202 = vmatpush3.bf16.msra.mxu0 %v8032_v38 }
0x2eb7   :  { %7203 = vmatprep.subr.bf16.mxu0 %v8033_v23 }
0x2eba   :  { %7204 = vmatpush3.bf16.msra.mxu0 %v8034_v40 }
0x2f70   :  { %v6240_v28 = vpop.f32.mrb[144].mxu0 }
0x2f71   :  { %v6241_v4 = vadd.f32 %v6240_v28, %v6178_v63  ;;  %v7721_v48 = vpop.f32.mrb[145].mxu0 }
0x2f72   :  { %v6243_v3 = vpop.f32.mrb[146].mxu0 }
0x2f73   :  { %v6246_v50 = vmul.f32 %v6241_v4, %v6168_v35  ;;  %v7722_v1 = vpop.f32.mrb[147].mxu0 }
0x2f75   :  { %v10459_v6 = vadd.f32 %v6246_v50, %v10205_v33  ;;  %v8007_v33 = vld [vmem:[%s10590_s1 + $0x900] ss:$8 sps:$4 sm:$0xff]  }
0x2f76   :  { %6331 = vmatpush1.bf16.msra.mxu1 %v8007_v33  ;;  %v6423_v33 = vld [vmem:[%s10591_s2 + $0x570] ss:$0 sm:$0xff] }
0x2f77   :  { %v6250_v41 = vsel %vm4156_vm5, %v10459_v6, 0.0  ;;  %6332 = vmatprep.subr.bf16.mxu1 %v8012_v42 }
0x2f78   :  { %6251 = vadd.xlane.f32.xlu1 %v6250_v41 }
0x2f7a   :  { %6333 = vmatpush1.bf16.msra.mxu1 %v8010_v18 }
0x2f7b   :  { %6334 = vmatprep.subr.bf16.mxu1 %v8015_v60 }
0x2f7e   :  { %6335 = vmatpush1.bf16.msra.mxu1 %v8013_v11  ;;  %v6560_v11 = vld [vmem:[%s10591_s2 + $0x580] ss:$0 sm:$0xff] }
0x2f7f   :  { %6336 = vmatprep.subr.bf16.mxu1 %v8018_v45 }
0x2f82   :  { %6337 = vmatpush1.bf16.msra.mxu1 %v8016_v32 }
0x3005   :  { %v6252_v17 = vpop.xlane.xlu1 %6251 }
0x3006   :  { %v6253_v10 = vmul.f32 0.015625, %v6252_v17 }
0x3008   :  { %v6254_v51 = vsub.f32 %v10459_v6, %v6253_v10 }
0x300a   :  { %v6255_v2 = vmul.f32 %v6254_v51, %v6254_v51 }
0x300c   :  { %v6256_v47 = vsel %vm4156_vm5, %v6255_v2, 0.0 }
0x300d   :  { %6257 = vadd.xlane.f32.xlu0 %v6256_v47 }
0x309a   :  { %v6258_v31 = vpop.xlane.xlu0 %6257 }
0x309b   :  { %v6259_v27 = vmul.f32 0.015625, %v6258_v31 }
0x309d   :  { %v6260_v34 = vadd.f32 1e-06, %v6259_v27 }
0x309f   :  { %8293 = vrsqrt.f32 %v6260_v34 }
0x30a9   :  { %v8294_v61 = vpop.eup %8293 }
0x30aa   :  { %v6262_v59 = vmul.f32 %v8294_v61, %v6254_v51 }
0x30ac   :  { %v6263_v9 = vmul.f32 %v6262_v59, %v6248_v30 }
0x30ae   :  { %v6264_v20 = vadd.f32 %v6263_v9, %v6249_v13 }
0x30b0   :  { %v6273_v39 = vpack.c.bf16 %v6264_v20, %v6264_v20 }
0x30b2   :  { %6876 = vmatmul.mubr.msk.bf16.vlgmr.msra.gmra.mrb[180].mxu1 %vm128_vm0, %v6273_v39 }
0x3185   :  { %v6364_v56 = vpop.f32.mrb[180].mxu1 }
0x3186   :  { %v6365_v62 = vadd.f32 %v6364_v56, %v6280_v36  ;;  %v6366_v12 = vpop.f32.mrb[181].mxu1 }
0x3187   :  { %v6367_v8 = vadd.f32 %v6366_v12, %v6284_v22  ;;  %v6368_v15 = vpop.f32.mrb[182].mxu1 }
0x3188   :  { %v6371_v43 = vmul.f32 %v6365_v62, %v6365_v62  ;;  %v6369_v16 = vpop.f32.mrb[183].mxu1 }
0x3189   :  { %v6372_v52 = vmul.f32 %v6367_v8, %v6367_v8 }
0x318a   :  { %v6373_v14 = vmul.f32 %v6371_v43, %v6365_v62 }
0x318b   :  { %v6374_v54 = vmul.f32 %v6372_v52, %v6367_v8 }
0x318c   :  { %v6375_v63 = vmul.f32 0.044715, %v6373_v14 }
0x318d   :  { %v6376_v35 = vmul.f32 0.044715, %v6374_v54 }
0x318e   :  { %v6377_v28 = vadd.f32 %v6375_v63, %v6365_v62 }
0x318f   :  { %v6378_v4 = vadd.f32 %v6376_v35, %v6367_v8 }
0x3190   :  { %v6379_v48 = vmul.f32 0.7978846, %v6377_v28 }
0x3191   :  { %v6380_v3 = vmul.f32 0.7978846, %v6378_v4 }
0x3192   :  { %8295 = vtanh.f32 %v6379_v48 }
0x3193   :  { %8297 = vtanh.f32 %v6380_v3 }
0x319c   :  { %v8296_v53 = vpop.eup %8295 }
0x319d   :  { %v8298_v55 = vpop.eup %8297  ;;  %v6383_v50 = vadd.f32 1.0, %v8296_v53 }
0x319e   :  { %v6384_v1 = vadd.f32 1.0, %v8298_v55 }
0x319f   :  { %v6385_v41 = vmul.f32 0.5, %v6383_v50 }
0x31a0   :  { %v6386_v17 = vmul.f32 0.5, %v6384_v1 }
0x31a1   :  { %v6387_v10 = vmul.f32 %v6385_v41, %v6365_v62 }
0x31a2   :  { %v6388_v51 = vmul.f32 %v6386_v17, %v6367_v8 }
0x31a3   :  { %v6421_v47 = vpack.c.bf16 %v6387_v10, %v6387_v10 }
0x31a4   :  { %v6422_v2 = vpack.c.bf16 %v6388_v51, %v6388_v51 }
0x31a6   :  { %6552 = vmatprep.mubr.bf16.mxu0 %v6422_v2 }
0x31a7   :  { %6553 = vmatmul.mubr.bf16.vlgmr.msra.gmra.mrb[148].mxu0 %v6421_v47 }
0x327a   :  { %v7205_v58 = vpop.f32.mrb[148].mxu0 }
0x327b   :  { %v7206_v42 = vpop.f32.mrb[149].mxu0 }
0x327c   :  { %v7207_v18 = vadd.f32 %v7206_v42, %v7205_v58  ;;  %v7208_v60 = vpop.f32.mrb[150].mxu0 }
0x327d   :  { %v7209_v45 = vpop.f32.mrb[151].mxu0 }
0x327e   :  { %v6555_v32 = vadd.f32 %v7207_v18, %v6423_v33 }
0x3280   :  { %v6561_v31 = vmul.f32 %v6560_v11, %v6555_v32 }
0x3282   :  { %v6562_v27 = vadd.f32 %v6561_v31, %v10459_v6 }
0x3284   :  { %v6579_v34 = vsel %vm4156_vm5, %v6562_v27, 0.0 }
0x3285   :  { %6580 = vadd.xlane.f32.xlu0 %v6579_v34 }
0x3312   :  { %v6581_v61 = vpop.xlane.xlu0 %6580 }
0x3313   :  { %v6582_v30 = vmul.f32 0.015625, %v6581_v61 }
0x3315   :  { %v6583_v59 = vsub.f32 %v6562_v27, %v6582_v30 }
0x3317   :  { %v6584_v13 = vmul.f32 %v6583_v59, %v6583_v59 }
0x3319   :  { %v6585_v9 = vsel %vm4156_vm5, %v6584_v13, 0.0 }
0x331a   :  { %6586 = vadd.xlane.f32.xlu1 %v6585_v9 }
0x331b   :  { %8325 = shalt.err (!%p8322_p4)
}
0x331c   :  { %s8326_s27 = scalar_lea.hbm %s10592_s3, 512 }
0x331d   :  { %p8327_p5 = scmp.ne.s32.totalorder %s10592_s3, %s8326_s27  ;;  %p8330_p6 = scmp.lt.u32.totalorder %s8326_s27, %s10592_s3 }
0x331f   :  { %p8332_p7 = pnand %p8330_p6, %p8327_p5 }
0x3321   :  { %8335 = shalt.err (!%p8332_p7)
}
0x3322   :  { %s8373_s22 = smov 128   ;;  %s8374_s6 = smov 8   ;;  %v8312_v26 = vld [vmem:[%s10591_s2 + $0x590] ss:$0 sm:$0xff]  ;;  %v8313_v49 = vld [vmem:[%s10591_s2 + $0x5a0] ss:$0 sm:$0xff] }
0x3323   :  { %6606 = dma.vmem_to_hbm [thread:$0]  %s6601_s19, 512, %s10592_s3, [#allocation3], %s8373_s22, %s8373_s22, %s8374_s6  }
0x3324   :  { %s8375_s13 = smov [#allocation4]  }
0x3325   :  { %s6613_s24 = sshll.u32 %s8375_s13, 4  ;;  %s6614_s24 = int_to_ptr.vmem [resolvable:$true] %s6613_s24 }
0x3326   :  { %s8336_s3 = scalar_lea.vmem %s6614_s24, 32  ;;  %p8341_p9 = scmp.lt.s32.totalorder %s6614_s24, %s6614_s24 }
0x3327   :  { %p8337_p8 = scmp.ne.s32.totalorder %s6614_s24, %s8336_s3  ;;  %p8342_p10 = scmp.lt.s32.totalorder %s8336_s3, %s8336_s3 }
0x3329   :  { %p8343_p11 = por %p8342_p10, %p8341_p9 }
0x332b   :  { %p8344_p12 = pnand %p8343_p11, %p8337_p8 }
0x33a7   :  { %v6587_v6 = vpop.xlane.xlu1 %6586 }
0x33a8   :  { %v6588_v20 = vmul.f32 0.015625, %v6587_v6 }
0x33aa   :  { %v6589_v39 = vadd.f32 1e-06, %v6588_v20 }
0x33ac   :  { %8299 = vrsqrt.f32 %v6589_v39 }
0x33b6   :  { %v8300_v19 = vpop.eup %8299 }
0x33b7   :  { %v6591_v25 = vmul.f32 %v8300_v19, %v6583_v59 }
0x33b9   :  { %v6592_v37 = vmul.f32 %v8312_v26, %v6591_v25 }
0x33bb   :  { %v6593_v44 = vadd.f32 %v8313_v49, %v6592_v37 }
0x33bd   :  { %6594 = vst.msk [vmem:[#allocation4] sm:$0x3] %vm4156_vm5, %v6593_v44 }
0x33be   :  { %8347 = shalt.err (!%p8344_p12)
}
0x33bf   :  { %s8348_s23 = scalar_lea.hbm %s10593_s4, 32 }
0x33c0   :  { %p8349_p13 = scmp.ne.s32.totalorder %s10593_s4, %s8348_s23  ;;  %p8352_p0 = scmp.lt.u32.totalorder %s8348_s23, %s10593_s4 }
0x33c2   :  { %p8354_p1 = pnand %p8352_p0, %p8349_p13 }
0x33c4   :  { %8357 = shalt.err (!%p8354_p1)
}
0x33c5   :  { %6616 = dma.vmem_to_hbm [thread:$0]  %s6614_s24, 32, %s10593_s4, [#allocation5]  }
0x33c6   :  { %8358 = dma.done.wait [#allocation3], 512  }
0x33c7   :  { %8359 = vsyncadd [#allocation3], 4294966784 }
0x33c8   :  { %8360 = dma.done.wait [#allocation5], 32  }
0x33c9   :  { %8361 = vsyncadd [#allocation5], 4294967264 }
0x33ca   :  { %6623 = vsyncpa [#allocation3], 1 }
0x33cb   :  { %6624 = vsyncpa [#allocation5], 1 }

</bundles_post_ra>
